<compile_context>
chip_gen: v7x
topology: tpu7x:2x2x1
jax: 0.10.0
libtpu: 0.0.40
codegen_flags: <defaults>
</compile_context>

<pallas_src>
import functools

import jax
import jax.numpy as jnp
from jax import lax
from jax.experimental import pallas as pl
from jax.experimental.pallas import tpu as pltpu


# ----------------------------- Pallas kernels ------------------------------ #

def _fused_linear_kernel(*refs, ln, gelu, residual, eps=1e-5):
    """[optional LN] -> x @ W + b -> [optional GELU] -> [optional +residual]."""
    idx = 0
    x_ref = refs[idx]; idx += 1
    if ln:
        g_ref, b_ref = refs[idx], refs[idx + 1]; idx += 2
    w_ref, bias_ref = refs[idx], refs[idx + 1]; idx += 2
    if residual:
        res_ref = refs[idx]; idx += 1
    o_ref = refs[idx]

    if ln:
        x = x_ref[...].astype(jnp.float32)
        mu = jnp.mean(x, axis=-1, keepdims=True)
        var = jnp.mean(jnp.square(x - mu), axis=-1, keepdims=True)
        x = (x - mu) * lax.rsqrt(var + eps)
        x = x * g_ref[...] + b_ref[...]
        x_mm = x.astype(jnp.bfloat16)
    else:
        x_mm = x_ref[...].astype(jnp.bfloat16)

    # bf16 MXU inputs, f32 accumulation.
    y = jnp.dot(x_mm, w_ref[...].astype(jnp.bfloat16),
                preferred_element_type=jnp.float32)
    y = y + bias_ref[...]
    if gelu:  # exact (erf) GELU, matching nn.GELU()
        y = 0.5 * y * (1.0 + lax.erf(y * 0.7071067811865476))
    if residual:
        y = y + res_ref[...].astype(jnp.float32)
    o_ref[...] = y.astype(o_ref.dtype)


def _attention_kernel(qkv_ref, wo_ref, bo_ref, res_ref, o_ref, *,
                      scale, heads, dh):
    """One batch element, all heads: causal softmax(q k^T) v, then the fused
    output projection and residual add (ctx @ W_out + b_out + residual)."""
    d = heads * dh
    qkv = qkv_ref[0]                                        # [S, 3D] bf16
    ctx_parts = []
    for h in range(heads):                                  # static, unrolled
        qh = qkv[:, h * dh:(h + 1) * dh].astype(jnp.bfloat16)
        kh = qkv[:, d + h * dh: d + (h + 1) * dh].astype(jnp.bfloat16)
        vh = qkv[:, 2 * d + h * dh: 2 * d + (h + 1) * dh].astype(jnp.bfloat16)
        s = lax.dot_general(qh, kh, (((1,), (1,)), ((), ())),
                            preferred_element_type=jnp.float32) * scale  # [S,S]
        row = lax.broadcasted_iota(jnp.int32, s.shape, 0)
        col = lax.broadcasted_iota(jnp.int32, s.shape, 1)
        s = jnp.where(col > row, jnp.float32(-1e30), s)     # causal mask, finite
        s = s - jnp.max(s, axis=-1, keepdims=True)
        p = jnp.exp(s)                                      # f32 softmax (v5e-safe)
        p = p * pl.reciprocal(jnp.sum(p, axis=-1, keepdims=True), approx=True)
        ctx_parts.append(jnp.dot(p.astype(jnp.bfloat16), vh,
                                 preferred_element_type=jnp.float32))  # [S, dh]
    ctx = jnp.concatenate(ctx_parts, axis=-1)               # [S, D] f32
    y = jnp.dot(ctx.astype(jnp.bfloat16), wo_ref[...].astype(jnp.bfloat16),
                preferred_element_type=jnp.float32)
    y = y + bo_ref[...] + res_ref[0].astype(jnp.float32)
    o_ref[0] = y.astype(o_ref.dtype)


def _layernorm_kernel(x_ref, g_ref, b_ref, o_ref, *, eps=1e-5):
    x = x_ref[...].astype(jnp.float32)
    mu = jnp.mean(x, axis=-1, keepdims=True)
    var = jnp.mean(jnp.square(x - mu), axis=-1, keepdims=True)
    y = (x - mu) * lax.rsqrt(var + eps)
    o_ref[...] = (y * g_ref[...] + b_ref[...]).astype(o_ref.dtype)


# ------------------------------ helpers ------------------------------------ #

def _pick_tile(dim, pref, min_blocks=1):
    """Largest tile that divides `dim` (<= pref unless the whole dim is taken),
    preferring one that leaves >= min_blocks blocks (keeps both v7x TCs busy)."""
    cands = [dim] + [t for t in (1024, 512, 256, 128) if t < dim and dim % t == 0]
    for t in cands:
        if t <= pref and dim // t >= min_blocks:
            return t
    for t in cands:
        if t <= pref:
            return t
    return dim


def _vmem_limit_bytes(*part_bytes):
    """Double-buffered block footprint + headroom, clamped to a v7x-safe 32 MiB."""
    total = 2 * sum(int(p) for p in part_bytes)
    return int(min(max(total + (4 << 20), 12 << 20), 32 << 20))


# ------------------------------ kernel wrappers ----------------------------- #

def fused_linear(x, w, bias, *, gamma=None, beta=None, residual=None,
                 gelu=False, out_dtype=None, tm_pref=512, tn_pref=1024):
    m, k = x.shape
    k2, n = w.shape
    assert k == k2
    out_dtype = out_dtype or x.dtype
    # >=2 M tiles where possible (megacore); few/large N tiles (avoid LN recompute).
    tm = _pick_tile(m, tm_pref, min_blocks=2)
    tn = _pick_tile(n, tn_pref, min_blocks=1)
    ln = gamma is not None

    in_specs = [pl.BlockSpec((tm, k), lambda i, j: (i, 0))]
    args = [x]
    if ln:
        in_specs += [pl.BlockSpec((1, k), lambda i, j: (0, 0)),
                     pl.BlockSpec((1, k), lambda i, j: (0, 0))]
        args += [gamma.reshape(1, k), beta.reshape(1, k)]
    in_specs += [pl.BlockSpec((k, tn), lambda i, j: (0, j)),
                 pl.BlockSpec((1, tn), lambda i, j: (0, j))]
    args += [w, bias.reshape(1, n)]
    if residual is not None:
        in_specs.append(pl.BlockSpec((tm, tn), lambda i, j: (i, j)))
        args.append(residual)

    out_itemsize = jnp.dtype(out_dtype).itemsize
    vmem = _vmem_limit_bytes(
        tm * k * x.dtype.itemsize,
        k * tn * w.dtype.itemsize,
        tm * tn * out_itemsize,
        (2 * k * 4 if ln else 0) + tn * 4
        + (tm * tn * residual.dtype.itemsize if residual is not None else 0))

    cost = pl.CostEstimate(
        flops=2 * m * k * n,
        transcendentals=m * n if gelu else 0,
        bytes_accessed=int(x.size * x.dtype.itemsize
                           + w.size * w.dtype.itemsize
                           + (residual.size * residual.dtype.itemsize
                              if residual is not None else 0)
                           + (2 * k * 4 if ln else 0) + n * 4
                           + m * n * out_itemsize))

    return pl.pallas_call(
        functools.partial(_fused_linear_kernel, ln=ln, gelu=gelu,
                          residual=residual is not None),
        out_shape=jax.ShapeDtypeStruct((m, n), out_dtype),
        grid=(m // tm, n // tn),
        in_specs=in_specs,
        out_specs=pl.BlockSpec((tm, tn), lambda i, j: (i, j)),
        compiler_params=pltpu.CompilerParams(
            dimension_semantics=("parallel", "parallel"),
            vmem_limit_bytes=vmem),
        cost_estimate=cost,
    )(*args)


def attention_block(qkv, x2, w_out, b_out, b, s_pad, heads, dh):
    """qkv: [B*S_pad, 3D] (bf16) -> attention + out_proj + residual, f32 [B*S_pad, D]."""
    d = heads * dh
    scale = float(dh) ** -0.5
    qkv3 = qkv.reshape(b, s_pad, 3 * d)
    res3 = x2.reshape(b, s_pad, d)
    out = pl.pallas_call(
        functools.partial(_attention_kernel, scale=scale, heads=heads, dh=dh),
        out_shape=jax.ShapeDtypeStruct((b, s_pad, d), jnp.float32),
        grid=(b,),
        in_specs=[pl.BlockSpec((1, s_pad, 3 * d), lambda bi: (bi, 0, 0)),
                  pl.BlockSpec((d, d), lambda bi: (0, 0)),
                  pl.BlockSpec((1, d), lambda bi: (0, 0)),
                  pl.BlockSpec((1, s_pad, d), lambda bi: (bi, 0, 0))],
        out_specs=pl.BlockSpec((1, s_pad, d), lambda bi: (bi, 0, 0)),
        compiler_params=pltpu.CompilerParams(
            dimension_semantics=("parallel",),
            vmem_limit_bytes=_vmem_limit_bytes(
                s_pad * 3 * d * qkv.dtype.itemsize,
                d * d * w_out.dtype.itemsize,
                2 * s_pad * d * 4)),
    )(qkv3, w_out, b_out.reshape(1, d), res3)
    return out.reshape(b * s_pad, d)


def layer_norm(x, gamma, beta, *, tm_pref=256):
    m, d = x.shape
    tm = _pick_tile(m, tm_pref, min_blocks=2)
    return pl.pallas_call(
        functools.partial(_layernorm_kernel, eps=1e-5),
        out_shape=jax.ShapeDtypeStruct((m, d), x.dtype),
        grid=(m // tm,),
        in_specs=[pl.BlockSpec((tm, d), lambda i: (i, 0)),
                  pl.BlockSpec((1, d), lambda i: (0, 0)),
                  pl.BlockSpec((1, d), lambda i: (0, 0))],
        out_specs=pl.BlockSpec((tm, d), lambda i: (i, 0)),
        compiler_params=pltpu.CompilerParams(dimension_semantics=("parallel",)),
    )(x, gamma.reshape(1, d), beta.reshape(1, d))


# ----------------------------- model forward ------------------------------- #

def resblock(x2, p, b, s_pad, heads, dh):
    """OpenCLIP ResidualAttentionBlock: x += attn(ln1(x)); x += mlp(ln2(x))."""
    qkv = fused_linear(x2, p["in_proj_w"], p["in_proj_b"],
                       gamma=p["ln1_g"], beta=p["ln1_b"],
                       out_dtype=jnp.bfloat16)                    # [M, 3D] bf16
    # attention + out_proj + first residual, all in one kernel.
    x2 = attention_block(qkv, x2, p["out_proj_w"], p["out_proj_b"],
                         b, s_pad, heads, dh)                     # [M, D] f32
    h = fused_linear(x2, p["fc_w"], p["fc_b"],
                     gamma=p["ln2_g"], beta=p["ln2_b"], gelu=True,
                     out_dtype=jnp.bfloat16)                      # [M, 4D] bf16
    x2 = fused_linear(h, p["proj_w"], p["proj_b"], residual=x2,
                      out_dtype=jnp.float32)                      # [M, D] f32
    return x2


def clip_text_forward(tokens, params, heads, layer_idx=0):
    """encode_with_transformer: embed + pos, resblocks (minus layer_idx), ln_final."""
    b, ctx = tokens.shape
    d = params["token_embedding"].shape[1]
    dh = d // heads
    s_pad = pl.cdiv(ctx, 128) * 128      # pad sequence to lane-dense multiple

    tok = jnp.pad(tokens, ((0, 0), (0, s_pad - ctx)))
    x = jnp.take(params["token_embedding"], tok, axis=0)         # [B, S_pad, D]
    pos = jnp.pad(params["positional_embedding"], ((0, s_pad - ctx), (0, 0)))
    x = x + pos[None]
    x2 = x.reshape(b * s_pad, d).astype(jnp.float32)

    n_blocks = len(params["resblocks"]) - layer_idx   # layer='last' -> layer_idx=0
    for p in params["resblocks"][:n_blocks]:
        x2 = resblock(x2, p, b, s_pad, heads, dh)

    x2 = layer_norm(x2, params["ln_final_g"], params["ln_final_b"])
    return x2.reshape(b, s_pad, d)[:, :ctx, :]


# ----------------------------- param init ---------------------------------- #

def init_params(key, vocab_size, ctx, width, layers):
    def nrm(k, shape, scale=0.02, dtype=jnp.float32):
        return (jax.random.normal(k, shape, jnp.float32) * scale).astype(dtype)

    keys = iter(jax.random.split(key, 4 + layers * 8))
    params = {
        "token_embedding": nrm(next(keys), (vocab_size, width)),
        "positional_embedding": nrm(next(keys), (ctx, width), 0.01),
        "ln_final_g": jnp.ones((width,), jnp.float32),
        "ln_final_b": jnp.zeros((width,), jnp.float32),
        "resblocks": [],
    }
    for _ in range(layers):
        params["resblocks"].append({
            "ln1_g": jnp.ones((width,), jnp.float32),
            "ln1_b": jnp.zeros((width,), jnp.float32),
            # matmul weights stored [in, out] in bf16 (MXU inputs);
            # a PyTorch checkpoint ([out, in]) must be transposed on load.
            "in_proj_w": nrm(next(keys), (width, 3 * width), dtype=jnp.bfloat16),
            "in_proj_b": jnp.zeros((3 * width,), jnp.float32),
            "out_proj_w": nrm(next(keys), (width, width), dtype=jnp.bfloat16),
            "out_proj_b": jnp.zeros((width,), jnp.float32),
            "ln2_g": jnp.ones((width,), jnp.float32),
            "ln2_b": jnp.zeros((width,), jnp.float32),
            "fc_w": nrm(next(keys), (width, 4 * width), dtype=jnp.bfloat16),
            "fc_b": jnp.zeros((4 * width,), jnp.float32),
            "proj_w": nrm(next(keys), (4 * width, width), dtype=jnp.bfloat16),
            "proj_b": jnp.zeros((width,), jnp.float32),
        })
    return params


# --------------------------------- main ------------------------------------ #

if __name__ == "__main__":
    # Small synthetic text_cfg: vocab=1000, context_length=77 (real CLIP ctx),
    # width=256, heads=2 (head_dim=128, lane-aligned), layers=2, batch=2.
    VOCAB, CTX, WIDTH, HEADS, LAYERS = 1000, 77, 256, 2, 2
    BATCH = 2

    key = jax.random.PRNGKey(0)
    params = init_params(key, VOCAB, CTX, WIDTH, LAYERS)
    tokens = jax.random.randint(jax.random.fold_in(key, 999), (BATCH, CTX), 0, VOCAB,
                                dtype=jnp.int32)

    fwd = jax.jit(lambda t, p: clip_text_forward(t, p, HEADS, layer_idx=0))  # layer='last'
    out = fwd(tokens, params)
    jax.block_until_ready(out)

    assert out.shape == (BATCH, CTX, WIDTH) and out.dtype == jnp.float32
    print("KERNEL_OK")
</pallas_src>

<mosaic_0001>
module attributes {stable_mosaic.version = 11 : i64} {
  func.func @_fused_linear_kernel(%arg0: i32, %arg1: i32, %arg2: memref<128x256xf32, #tpu.memory_space<vmem>>, %arg3: memref<1x256xf32, #tpu.memory_space<vmem>>, %arg4: memref<1x256xf32, #tpu.memory_space<vmem>>, %arg5: memref<256x768xbf16, #tpu.memory_space<vmem>>, %arg6: memref<1x768xf32, #tpu.memory_space<vmem>>, %arg7: memref<128x768xbf16, #tpu.memory_space<vmem>>) attributes {dimension_semantics = [#tpu.dimension_semantics<parallel>, #tpu.dimension_semantics<parallel>], iteration_bounds = array<i64: 2, 1>, scalar_prefetch = 0 : i64, scratch_operands = 0 : i64, tpu.core_type = #tpu.core_type<tc>, window_params = [{transform_indices = @transform_0, window_bounds = array<i64: 128, 256>}, {pipeline_mode = #tpu.pipeline_mode<synchronous>, transform_indices = @transform_1, window_bounds = array<i64: 1, 256>}, {pipeline_mode = #tpu.pipeline_mode<synchronous>, transform_indices = @transform_2, window_bounds = array<i64: 1, 256>}, {transform_indices = @transform_3, window_bounds = array<i64: 256, 768>}, {transform_indices = @transform_4, window_bounds = array<i64: 1, 768>}, {transform_indices = @transform_5, window_bounds = array<i64: 128, 768>}]} {
    %c0 = arith.constant 0 : index
    %c0_0 = arith.constant 0 : index
    %0 = vector.load %arg2[%c0, %c0_0] : memref<128x256xf32, #tpu.memory_space<vmem>>, vector<128x256xf32>
    %cst = arith.constant dense<0.000000e+00> : vector<128xf32>
    %1 = vector.multi_reduction <add>, %0, %cst [1] : vector<128x256xf32> to vector<128xf32>
    %2 = vector.shape_cast %1 : vector<128xf32> to vector<128x1xf32>
    %cst_1 = arith.constant 2.560000e+02 : f32
    %3 = vector.broadcast %cst_1 : f32 to vector<128x1xf32>
    %4 = arith.divf %2, %3 : vector<128x1xf32>
    %5 = vector.broadcast %4 : vector<128x1xf32> to vector<128x256xf32>
    %6 = arith.subf %0, %5 : vector<128x256xf32>
    %7 = arith.mulf %6, %6 : vector<128x256xf32>
    %cst_2 = arith.constant dense<0.000000e+00> : vector<128xf32>
    %8 = vector.multi_reduction <add>, %7, %cst_2 [1] : vector<128x256xf32> to vector<128xf32>
    %9 = vector.shape_cast %8 : vector<128xf32> to vector<128x1xf32>
    %cst_3 = arith.constant 2.560000e+02 : f32
    %10 = vector.broadcast %cst_3 : f32 to vector<128x1xf32>
    %11 = arith.divf %9, %10 : vector<128x1xf32>
    %12 = vector.broadcast %4 : vector<128x1xf32> to vector<128x256xf32>
    %13 = arith.subf %0, %12 : vector<128x256xf32>
    %cst_4 = arith.constant 9.99999974E-6 : f32
    %14 = vector.broadcast %cst_4 : f32 to vector<128x1xf32>
    %15 = arith.addf %11, %14 : vector<128x1xf32>
    %16 = math.rsqrt %15 : vector<128x1xf32>
    %17 = vector.broadcast %16 : vector<128x1xf32> to vector<128x256xf32>
    %18 = arith.mulf %13, %17 : vector<128x256xf32>
    %c0_5 = arith.constant 0 : index
    %c0_6 = arith.constant 0 : index
    %19 = vector.load %arg3[%c0_5, %c0_6] : memref<1x256xf32, #tpu.memory_space<vmem>>, vector<1x256xf32>
    %20 = vector.broadcast %19 : vector<1x256xf32> to vector<128x256xf32>
    %21 = arith.mulf %18, %20 : vector<128x256xf32>
    %c0_7 = arith.constant 0 : index
    %c0_8 = arith.constant 0 : index
    %22 = vector.load %arg4[%c0_7, %c0_8] : memref<1x256xf32, #tpu.memory_space<vmem>>, vector<1x256xf32>
    %23 = vector.broadcast %22 : vector<1x256xf32> to vector<128x256xf32>
    %24 = arith.addf %21, %23 : vector<128x256xf32>
    %25 = arith.truncf %24 : vector<128x256xf32> to vector<128x256xbf16>
    %c0_9 = arith.constant 0 : index
    %c0_10 = arith.constant 0 : index
    %26 = vector.load %arg5[%c0_9, %c0_10] : memref<256x768xbf16, #tpu.memory_space<vmem>>, vector<256x768xbf16>
    %cst_11 = arith.constant dense<0.000000e+00> : vector<128x768xf32>
    %27 = tpu.matmul %25, %26, %cst_11 {dimension_numbers = #tpu.dot_dimension_numbers<[1], [0], [0], [1], [0, 0, 1, 1], [], []>} : vector<128x256xbf16>, vector<256x768xbf16>, vector<128x768xf32> -> vector<128x768xf32>
    %c0_12 = arith.constant 0 : index
    %c0_13 = arith.constant 0 : index
    %28 = vector.load %arg6[%c0_12, %c0_13] : memref<1x768xf32, #tpu.memory_space<vmem>>, vector<1x768xf32>
    %29 = vector.broadcast %28 : vector<1x768xf32> to vector<128x768xf32>
    %30 = arith.addf %27, %29 : vector<128x768xf32>
    %31 = arith.truncf %30 : vector<128x768xf32> to vector<128x768xbf16>
    %c0_14 = arith.constant 0 : index
    %c0_15 = arith.constant 0 : index
    %32 = vector.load %arg7[%c0_14, %c0_15] : memref<128x768xbf16, #tpu.memory_space<vmem>>, vector<128x768xbf16>
    tpu.vector_store %arg7[%c0_14, %c0_15], %31 {strides = array<i32>} : memref<128x768xbf16, #tpu.memory_space<vmem>>, vector<128x768xbf16>,
    return
  }
  func.func @transform_0(%arg0: i32, %arg1: i32) -> (i32, i32) {
    %c0_i32 = arith.constant 0 : i32
    %c0_i32_0 = arith.constant 0 : i32
    return %arg0, %c0_i32 : i32, i32
  }
  func.func @transform_1(%arg0: i32, %arg1: i32) -> (i32, i32) {
    %c0_i32 = arith.constant 0 : i32
    %c0_i32_0 = arith.constant 0 : i32
    %c0_i32_1 = arith.constant 0 : i32
    return %c0_i32, %c0_i32_0 : i32, i32
  }
  func.func @transform_2(%arg0: i32, %arg1: i32) -> (i32, i32) {
    %c0_i32 = arith.constant 0 : i32
    %c0_i32_0 = arith.constant 0 : i32
    %c0_i32_1 = arith.constant 0 : i32
    return %c0_i32, %c0_i32_0 : i32, i32
  }
  func.func @transform_3(%arg0: i32, %arg1: i32) -> (i32, i32) {
    %c0_i32 = arith.constant 0 : i32
    %c0_i32_0 = arith.constant 0 : i32
    return %c0_i32, %arg1 : i32, i32
  }
  func.func @transform_4(%arg0: i32, %arg1: i32) -> (i32, i32) {
    %c0_i32 = arith.constant 0 : i32
    %c0_i32_0 = arith.constant 0 : i32
    return %c0_i32, %arg1 : i32, i32
  }
  func.func @transform_5(%arg0: i32, %arg1: i32) -> (i32, i32) {
    %c0_i32 = arith.constant 0 : i32
    return %arg0, %arg1 : i32, i32
  }
}

module attributes {stable_mosaic.version = 11 : i64} {
  func.func @_attention_kernel(%arg0: i32, %arg1: memref<1x128x768xbf16, #tpu.memory_space<vmem>>, %arg2: memref<256x256xbf16, #tpu.memory_space<vmem>>, %arg3: memref<1x256xf32, #tpu.memory_space<vmem>>, %arg4: memref<1x128x256xf32, #tpu.memory_space<vmem>>, %arg5: memref<1x128x256xf32, #tpu.memory_space<vmem>>) attributes {dimension_semantics = [#tpu.dimension_semantics<parallel>], iteration_bounds = array<i64: 2>, scalar_prefetch = 0 : i64, scratch_operands = 0 : i64, tpu.core_type = #tpu.core_type<tc>, window_params = [{transform_indices = @transform_0, window_bounds = array<i64: 1, 128, 768>}, {pipeline_mode = #tpu.pipeline_mode<synchronous>, transform_indices = @transform_1, window_bounds = array<i64: 256, 256>}, {pipeline_mode = #tpu.pipeline_mode<synchronous>, transform_indices = @transform_2, window_bounds = array<i64: 1, 256>}, {transform_indices = @transform_3, window_bounds = array<i64: 1, 128, 256>}, {transform_indices = @transform_4, window_bounds = array<i64: 1, 128, 256>}]} {
    %c0 = arith.constant 0 : index
    %c0_0 = arith.constant 0 : index
    %c0_1 = arith.constant 0 : index
    %0 = vector.load %arg1[%c0, %c0_0, %c0_1] : memref<1x128x768xbf16, #tpu.memory_space<vmem>>, vector<1x128x768xbf16>
    %1 = vector.shape_cast %0 : vector<1x128x768xbf16> to vector<128x768xbf16>
    %2 = vector.extract_strided_slice %1 {offsets = [0, 0], sizes = [128, 128], strides = [1, 1]} : vector<128x768xbf16> to vector<128x128xbf16>
    %3 = vector.extract_strided_slice %1 {offsets = [0, 256], sizes = [128, 128], strides = [1, 1]} : vector<128x768xbf16> to vector<128x128xbf16>
    %4 = vector.extract_strided_slice %1 {offsets = [0, 512], sizes = [128, 128], strides = [1, 1]} : vector<128x768xbf16> to vector<128x128xbf16>
    %cst = arith.constant dense<0.000000e+00> : vector<128x128xf32>
    %5 = tpu.matmul %2, %3, %cst {dimension_numbers = #tpu.dot_dimension_numbers<[1], [1], [0], [0], [0, 0, 1, 0], [], []>} : vector<128x128xbf16>, vector<128x128xbf16>, vector<128x128xf32> -> vector<128x128xf32>
    %cst_2 = arith.constant 0.0883883461 : f32
    %6 = vector.broadcast %cst_2 : f32 to vector<128x128xf32>
    %7 = arith.mulf %5, %6 : vector<128x128xf32>
    %8 = tpu.iota {dimensions = array<i32: 0>} : vector<128x128xi32>
    %9 = tpu.iota {dimensions = array<i32: 1>} : vector<128x128xi32>
    %10 = arith.cmpi sgt, %9, %8 : vector<128x128xi32>
    %cst_3 = arith.constant -1.000000e+30 : f32
    %11 = vector.broadcast %cst_3 : f32 to vector<128x128xf32>
    %12 = arith.select %10, %11, %7 : vector<128x128xi1>, vector<128x128xf32>
    %cst_4 = arith.constant dense<0xFF800000> : vector<128xf32>
    %13 = vector.multi_reduction <maximumf>, %12, %cst_4 [1] : vector<128x128xf32> to vector<128xf32>
    %14 = vector.shape_cast %13 : vector<128xf32> to vector<128x1xf32>
    %15 = vector.broadcast %14 : vector<128x1xf32> to vector<128x128xf32>
    %16 = arith.subf %12, %15 : vector<128x128xf32>
    %17 = math.exp %16 : vector<128x128xf32>
    %cst_5 = arith.constant dense<0.000000e+00> : vector<128xf32>
    %18 = vector.multi_reduction <add>, %17, %cst_5 [1] : vector<128x128xf32> to vector<128xf32>
    %19 = vector.shape_cast %18 : vector<128xf32> to vector<128x1xf32>
    %20 = tpu.reciprocal %19 {approx = true} : vector<128x1xf32> -> vector<128x1xf32>
    %21 = vector.broadcast %20 : vector<128x1xf32> to vector<128x128xf32>
    %22 = arith.mulf %17, %21 : vector<128x128xf32>
    %23 = arith.truncf %22 : vector<128x128xf32> to vector<128x128xbf16>
    %cst_6 = arith.constant dense<0.000000e+00> : vector<128x128xf32>
    %24 = tpu.matmul %23, %4, %cst_6 {dimension_numbers = #tpu.dot_dimension_numbers<[1], [0], [0], [1], [0, 0, 1, 1], [], []>} : vector<128x128xbf16>, vector<128x128xbf16>, vector<128x128xf32> -> vector<128x128xf32>
    %25 = vector.extract_strided_slice %1 {offsets = [0, 128], sizes = [128, 128], strides = [1, 1]} : vector<128x768xbf16> to vector<128x128xbf16>
    %26 = vector.extract_strided_slice %1 {offsets = [0, 384], sizes = [128, 128], strides = [1, 1]} : vector<128x768xbf16> to vector<128x128xbf16>
    %27 = vector.extract_strided_slice %1 {offsets = [0, 640], sizes = [128, 128], strides = [1, 1]} : vector<128x768xbf16> to vector<128x128xbf16>
    %cst_7 = arith.constant dense<0.000000e+00> : vector<128x128xf32>
    %28 = tpu.matmul %25, %26, %cst_7 {dimension_numbers = #tpu.dot_dimension_numbers<[1], [1], [0], [0], [0, 0, 1, 0], [], []>} : vector<128x128xbf16>, vector<128x128xbf16>, vector<128x128xf32> -> vector<128x128xf32>
    %cst_8 = arith.constant 0.0883883461 : f32
    %29 = vector.broadcast %cst_8 : f32 to vector<128x128xf32>
    %30 = arith.mulf %28, %29 : vector<128x128xf32>
    %31 = tpu.iota {dimensions = array<i32: 0>} : vector<128x128xi32>
    %32 = tpu.iota {dimensions = array<i32: 1>} : vector<128x128xi32>
    %33 = arith.cmpi sgt, %32, %31 : vector<128x128xi32>
    %cst_9 = arith.constant -1.000000e+30 : f32
    %34 = vector.broadcast %cst_9 : f32 to vector<128x128xf32>
    %35 = arith.select %33, %34, %30 : vector<128x128xi1>, vector<128x128xf32>
    %cst_10 = arith.constant dense<0xFF800000> : vector<128xf32>
    %36 = vector.multi_reduction <maximumf>, %35, %cst_10 [1] : vector<128x128xf32> to vector<128xf32>
    %37 = vector.shape_cast %36 : vector<128xf32> to vector<128x1xf32>
    %38 = vector.broadcast %37 : vector<128x1xf32> to vector<128x128xf32>
    %39 = arith.subf %35, %38 : vector<128x128xf32>
    %40 = math.exp %39 : vector<128x128xf32>
    %cst_11 = arith.constant dense<0.000000e+00> : vector<128xf32>
    %41 = vector.multi_reduction <add>, %40, %cst_11 [1] : vector<128x128xf32> to vector<128xf32>
    %42 = vector.shape_cast %41 : vector<128xf32> to vector<128x1xf32>
    %43 = tpu.reciprocal %42 {approx = true} : vector<128x1xf32> -> vector<128x1xf32>
    %44 = vector.broadcast %43 : vector<128x1xf32> to vector<128x128xf32>
    %45 = arith.mulf %40, %44 : vector<128x128xf32>
    %46 = arith.truncf %45 : vector<128x128xf32> to vector<128x128xbf16>
    %cst_12 = arith.constant dense<0.000000e+00> : vector<128x128xf32>
    %47 = tpu.matmul %46, %27, %cst_12 {dimension_numbers = #tpu.dot_dimension_numbers<[1], [0], [0], [1], [0, 0, 1, 1], [], []>} : vector<128x128xbf16>, vector<128x128xbf16>, vector<128x128xf32> -> vector<128x128xf32>
    %48 = tpu.concatenate %24, %47 in 1 : vector<128x128xf32>, vector<128x128xf32> -> vector<128x256xf32>
    %49 = arith.truncf %48 : vector<128x256xf32> to vector<128x256xbf16>
    %c0_13 = arith.constant 0 : index
    %c0_14 = arith.constant 0 : index
    %50 = vector.load %arg2[%c0_13, %c0_14] : memref<256x256xbf16, #tpu.memory_space<vmem>>, vector<256x256xbf16>
    %cst_15 = arith.constant dense<0.000000e+00> : vector<128x256xf32>
    %51 = tpu.matmul %49, %50, %cst_15 {dimension_numbers = #tpu.dot_dimension_numbers<[1], [0], [0], [1], [0, 0, 1, 1], [], []>} : vector<128x256xbf16>, vector<256x256xbf16>, vector<128x256xf32> -> vector<128x256xf32>
    %c0_16 = arith.constant 0 : index
    %c0_17 = arith.constant 0 : index
    %52 = vector.load %arg3[%c0_16, %c0_17] : memref<1x256xf32, #tpu.memory_space<vmem>>, vector<1x256xf32>
    %53 = vector.broadcast %52 : vector<1x256xf32> to vector<128x256xf32>
    %54 = arith.addf %51, %53 : vector<128x256xf32>
    %c0_18 = arith.constant 0 : index
    %c0_19 = arith.constant 0 : index
    %c0_20 = arith.constant 0 : index
    %55 = vector.load %arg4[%c0_18, %c0_19, %c0_20] : memref<1x128x256xf32, #tpu.memory_space<vmem>>, vector<1x128x256xf32>
    %56 = vector.shape_cast %55 : vector<1x128x256xf32> to vector<128x256xf32>
    %57 = arith.addf %54, %56 : vector<128x256xf32>
    %c0_21 = arith.constant 0 : index
    %c0_22 = arith.constant 0 : index
    %c0_23 = arith.constant 0 : index
    %58 = vector.load %arg5[%c0_21, %c0_22, %c0_23] : memref<1x128x256xf32, #tpu.memory_space<vmem>>, vector<1x128x256xf32>
    %59 = vector.shape_cast %58 : vector<1x128x256xf32> to vector<128x256xf32>
    %60 = vector.shape_cast %57 : vector<128x256xf32> to vector<1x128x256xf32>
    tpu.vector_store %arg5[%c0_21, %c0_22, %c0_23], %60 {strides = array<i32>} : memref<1x128x256xf32, #tpu.memory_space<vmem>>, vector<1x128x256xf32>,
    return
  }
  func.func @transform_0(%arg0: i32) -> (i32, i32, i32) {
    %c0_i32 = arith.constant 0 : i32
    %c0_i32_0 = arith.constant 0 : i32
    %c0_i32_1 = arith.constant 0 : i32
    return %arg0, %c0_i32, %c0_i32_0 : i32, i32, i32
  }
  func.func @transform_1(%arg0: i32) -> (i32, i32) {
    %c0_i32 = arith.constant 0 : i32
    %c0_i32_0 = arith.constant 0 : i32
    %c0_i32_1 = arith.constant 0 : i32
    return %c0_i32, %c0_i32_0 : i32, i32
  }
  func.func @transform_2(%arg0: i32) -> (i32, i32) {
    %c0_i32 = arith.constant 0 : i32
    %c0_i32_0 = arith.constant 0 : i32
    %c0_i32_1 = arith.constant 0 : i32
    return %c0_i32, %c0_i32_0 : i32, i32
  }
  func.func @transform_3(%arg0: i32) -> (i32, i32, i32) {
    %c0_i32 = arith.constant 0 : i32
    %c0_i32_0 = arith.constant 0 : i32
    %c0_i32_1 = arith.constant 0 : i32
    return %arg0, %c0_i32, %c0_i32_0 : i32, i32, i32
  }
  func.func @transform_4(%arg0: i32) -> (i32, i32, i32) {
    %c0_i32 = arith.constant 0 : i32
    %c0_i32_0 = arith.constant 0 : i32
    %c0_i32_1 = arith.constant 0 : i32
    return %arg0, %c0_i32, %c0_i32_0 : i32, i32, i32
  }
}

module attributes {stable_mosaic.version = 11 : i64} {
  func.func @_fused_linear_kernel(%arg0: i32, %arg1: i32, %arg2: memref<128x256xf32, #tpu.memory_space<vmem>>, %arg3: memref<1x256xf32, #tpu.memory_space<vmem>>, %arg4: memref<1x256xf32, #tpu.memory_space<vmem>>, %arg5: memref<256x1024xbf16, #tpu.memory_space<vmem>>, %arg6: memref<1x1024xf32, #tpu.memory_space<vmem>>, %arg7: memref<128x1024xbf16, #tpu.memory_space<vmem>>) attributes {dimension_semantics = [#tpu.dimension_semantics<parallel>, #tpu.dimension_semantics<parallel>], iteration_bounds = array<i64: 2, 1>, scalar_prefetch = 0 : i64, scratch_operands = 0 : i64, tpu.core_type = #tpu.core_type<tc>, window_params = [{transform_indices = @transform_0, window_bounds = array<i64: 128, 256>}, {pipeline_mode = #tpu.pipeline_mode<synchronous>, transform_indices = @transform_1, window_bounds = array<i64: 1, 256>}, {pipeline_mode = #tpu.pipeline_mode<synchronous>, transform_indices = @transform_2, window_bounds = array<i64: 1, 256>}, {transform_indices = @transform_3, window_bounds = array<i64: 256, 1024>}, {transform_indices = @transform_4, window_bounds = array<i64: 1, 1024>}, {transform_indices = @transform_5, window_bounds = array<i64: 128, 1024>}]} {
    %c0 = arith.constant 0 : index
    %c0_0 = arith.constant 0 : index
    %0 = vector.load %arg2[%c0, %c0_0] : memref<128x256xf32, #tpu.memory_space<vmem>>, vector<128x256xf32>
    %cst = arith.constant dense<0.000000e+00> : vector<128xf32>
    %1 = vector.multi_reduction <add>, %0, %cst [1] : vector<128x256xf32> to vector<128xf32>
    %2 = vector.shape_cast %1 : vector<128xf32> to vector<128x1xf32>
    %cst_1 = arith.constant 2.560000e+02 : f32
    %3 = vector.broadcast %cst_1 : f32 to vector<128x1xf32>
    %4 = arith.divf %2, %3 : vector<128x1xf32>
    %5 = vector.broadcast %4 : vector<128x1xf32> to vector<128x256xf32>
    %6 = arith.subf %0, %5 : vector<128x256xf32>
    %7 = arith.mulf %6, %6 : vector<128x256xf32>
    %cst_2 = arith.constant dense<0.000000e+00> : vector<128xf32>
    %8 = vector.multi_reduction <add>, %7, %cst_2 [1] : vector<128x256xf32> to vector<128xf32>
    %9 = vector.shape_cast %8 : vector<128xf32> to vector<128x1xf32>
    %cst_3 = arith.constant 2.560000e+02 : f32
    %10 = vector.broadcast %cst_3 : f32 to vector<128x1xf32>
    %11 = arith.divf %9, %10 : vector<128x1xf32>
    %12 = vector.broadcast %4 : vector<128x1xf32> to vector<128x256xf32>
    %13 = arith.subf %0, %12 : vector<128x256xf32>
    %cst_4 = arith.constant 9.99999974E-6 : f32
    %14 = vector.broadcast %cst_4 : f32 to vector<128x1xf32>
    %15 = arith.addf %11, %14 : vector<128x1xf32>
    %16 = math.rsqrt %15 : vector<128x1xf32>
    %17 = vector.broadcast %16 : vector<128x1xf32> to vector<128x256xf32>
    %18 = arith.mulf %13, %17 : vector<128x256xf32>
    %c0_5 = arith.constant 0 : index
    %c0_6 = arith.constant 0 : index
    %19 = vector.load %arg3[%c0_5, %c0_6] : memref<1x256xf32, #tpu.memory_space<vmem>>, vector<1x256xf32>
    %20 = vector.broadcast %19 : vector<1x256xf32> to vector<128x256xf32>
    %21 = arith.mulf %18, %20 : vector<128x256xf32>
    %c0_7 = arith.constant 0 : index
    %c0_8 = arith.constant 0 : index
    %22 = vector.load %arg4[%c0_7, %c0_8] : memref<1x256xf32, #tpu.memory_space<vmem>>, vector<1x256xf32>
    %23 = vector.broadcast %22 : vector<1x256xf32> to vector<128x256xf32>
    %24 = arith.addf %21, %23 : vector<128x256xf32>
    %25 = arith.truncf %24 : vector<128x256xf32> to vector<128x256xbf16>
    %c0_9 = arith.constant 0 : index
    %c0_10 = arith.constant 0 : index
    %26 = vector.load %arg5[%c0_9, %c0_10] : memref<256x1024xbf16, #tpu.memory_space<vmem>>, vector<256x1024xbf16>
    %cst_11 = arith.constant dense<0.000000e+00> : vector<128x1024xf32>
    %27 = tpu.matmul %25, %26, %cst_11 {dimension_numbers = #tpu.dot_dimension_numbers<[1], [0], [0], [1], [0, 0, 1, 1], [], []>} : vector<128x256xbf16>, vector<256x1024xbf16>, vector<128x1024xf32> -> vector<128x1024xf32>
    %c0_12 = arith.constant 0 : index
    %c0_13 = arith.constant 0 : index
    %28 = vector.load %arg6[%c0_12, %c0_13] : memref<1x1024xf32, #tpu.memory_space<vmem>>, vector<1x1024xf32>
    %29 = vector.broadcast %28 : vector<1x1024xf32> to vector<128x1024xf32>
    %30 = arith.addf %27, %29 : vector<128x1024xf32>
    %cst_14 = arith.constant 5.000000e-01 : f32
    %31 = vector.broadcast %cst_14 : f32 to vector<128x1024xf32>
    %32 = arith.mulf %31, %30 : vector<128x1024xf32>
    %cst_15 = arith.constant 0.707106769 : f32
    %33 = vector.broadcast %cst_15 : f32 to vector<128x1024xf32>
    %34 = arith.mulf %30, %33 : vector<128x1024xf32>
    %35 = math.erf %34 : vector<128x1024xf32>
    %cst_16 = arith.constant 1.000000e+00 : f32
    %36 = vector.broadcast %cst_16 : f32 to vector<128x1024xf32>
    %37 = arith.addf %36, %35 : vector<128x1024xf32>
    %38 = arith.mulf %32, %37 : vector<128x1024xf32>
    %39 = arith.truncf %38 : vector<128x1024xf32> to vector<128x1024xbf16>
    %c0_17 = arith.constant 0 : index
    %c0_18 = arith.constant 0 : index
    %40 = vector.load %arg7[%c0_17, %c0_18] : memref<128x1024xbf16, #tpu.memory_space<vmem>>, vector<128x1024xbf16>
    tpu.vector_store %arg7[%c0_17, %c0_18], %39 {strides = array<i32>} : memref<128x1024xbf16, #tpu.memory_space<vmem>>, vector<128x1024xbf16>,
    return
  }
  func.func @transform_0(%arg0: i32, %arg1: i32) -> (i32, i32) {
    %c0_i32 = arith.constant 0 : i32
    %c0_i32_0 = arith.constant 0 : i32
    return %arg0, %c0_i32 : i32, i32
  }
  func.func @transform_1(%arg0: i32, %arg1: i32) -> (i32, i32) {
    %c0_i32 = arith.constant 0 : i32
    %c0_i32_0 = arith.constant 0 : i32
    %c0_i32_1 = arith.constant 0 : i32
    return %c0_i32, %c0_i32_0 : i32, i32
  }
  func.func @transform_2(%arg0: i32, %arg1: i32) -> (i32, i32) {
    %c0_i32 = arith.constant 0 : i32
    %c0_i32_0 = arith.constant 0 : i32
    %c0_i32_1 = arith.constant 0 : i32
    return %c0_i32, %c0_i32_0 : i32, i32
  }
  func.func @transform_3(%arg0: i32, %arg1: i32) -> (i32, i32) {
    %c0_i32 = arith.constant 0 : i32
    %c0_i32_0 = arith.constant 0 : i32
    return %c0_i32, %arg1 : i32, i32
  }
  func.func @transform_4(%arg0: i32, %arg1: i32) -> (i32, i32) {
    %c0_i32 = arith.constant 0 : i32
    %c0_i32_0 = arith.constant 0 : i32
    return %c0_i32, %arg1 : i32, i32
  }
  func.func @transform_5(%arg0: i32, %arg1: i32) -> (i32, i32) {
    %c0_i32 = arith.constant 0 : i32
    return %arg0, %arg1 : i32, i32
  }
}

module attributes {stable_mosaic.version = 11 : i64} {
  func.func @_fused_linear_kernel(%arg0: i32, %arg1: i32, %arg2: memref<128x1024xbf16, #tpu.memory_space<vmem>>, %arg3: memref<1024x256xbf16, #tpu.memory_space<vmem>>, %arg4: memref<1x256xf32, #tpu.memory_space<vmem>>, %arg5: memref<128x256xf32, #tpu.memory_space<vmem>>, %arg6: memref<128x256xf32, #tpu.memory_space<vmem>>) attributes {dimension_semantics = [#tpu.dimension_semantics<parallel>, #tpu.dimension_semantics<parallel>], iteration_bounds = array<i64: 2, 1>, scalar_prefetch = 0 : i64, scratch_operands = 0 : i64, tpu.core_type = #tpu.core_type<tc>, window_params = [{transform_indices = @transform_0, window_bounds = array<i64: 128, 1024>}, {transform_indices = @transform_1, window_bounds = array<i64: 1024, 256>}, {transform_indices = @transform_2, window_bounds = array<i64: 1, 256>}, {transform_indices = @transform_3, window_bounds = array<i64: 128, 256>}, {transform_indices = @transform_4, window_bounds = array<i64: 128, 256>}]} {
    %c0 = arith.constant 0 : index
    %c0_0 = arith.constant 0 : index
    %0 = vector.load %arg2[%c0, %c0_0] : memref<128x1024xbf16, #tpu.memory_space<vmem>>, vector<128x1024xbf16>
    %c0_1 = arith.constant 0 : index
    %c0_2 = arith.constant 0 : index
    %1 = vector.load %arg3[%c0_1, %c0_2] : memref<1024x256xbf16, #tpu.memory_space<vmem>>, vector<1024x256xbf16>
    %cst = arith.constant dense<0.000000e+00> : vector<128x256xf32>
    %2 = tpu.matmul %0, %1, %cst {dimension_numbers = #tpu.dot_dimension_numbers<[1], [0], [0], [1], [0, 0, 1, 1], [], []>} : vector<128x1024xbf16>, vector<1024x256xbf16>, vector<128x256xf32> -> vector<128x256xf32>
    %c0_3 = arith.constant 0 : index
    %c0_4 = arith.constant 0 : index
    %3 = vector.load %arg4[%c0_3, %c0_4] : memref<1x256xf32, #tpu.memory_space<vmem>>, vector<1x256xf32>
    %4 = vector.broadcast %3 : vector<1x256xf32> to vector<128x256xf32>
    %5 = arith.addf %2, %4 : vector<128x256xf32>
    %c0_5 = arith.constant 0 : index
    %c0_6 = arith.constant 0 : index
    %6 = vector.load %arg5[%c0_5, %c0_6] : memref<128x256xf32, #tpu.memory_space<vmem>>, vector<128x256xf32>
    %7 = arith.addf %5, %6 : vector<128x256xf32>
    %c0_7 = arith.constant 0 : index
    %c0_8 = arith.constant 0 : index
    %8 = vector.load %arg6[%c0_7, %c0_8] : memref<128x256xf32, #tpu.memory_space<vmem>>, vector<128x256xf32>
    tpu.vector_store %arg6[%c0_7, %c0_8], %7 {strides = array<i32>} : memref<128x256xf32, #tpu.memory_space<vmem>>, vector<128x256xf32>,
    return
  }
  func.func @transform_0(%arg0: i32, %arg1: i32) -> (i32, i32) {
    %c0_i32 = arith.constant 0 : i32
    %c0_i32_0 = arith.constant 0 : i32
    return %arg0, %c0_i32 : i32, i32
  }
  func.func @transform_1(%arg0: i32, %arg1: i32) -> (i32, i32) {
    %c0_i32 = arith.constant 0 : i32
    %c0_i32_0 = arith.constant 0 : i32
    return %c0_i32, %arg1 : i32, i32
  }
  func.func @transform_2(%arg0: i32, %arg1: i32) -> (i32, i32) {
    %c0_i32 = arith.constant 0 : i32
    %c0_i32_0 = arith.constant 0 : i32
    return %c0_i32, %arg1 : i32, i32
  }
  func.func @transform_3(%arg0: i32, %arg1: i32) -> (i32, i32) {
    %c0_i32 = arith.constant 0 : i32
    return %arg0, %arg1 : i32, i32
  }
  func.func @transform_4(%arg0: i32, %arg1: i32) -> (i32, i32) {
    %c0_i32 = arith.constant 0 : i32
    return %arg0, %arg1 : i32, i32
  }
}

module attributes {stable_mosaic.version = 11 : i64} {
  func.func @_layernorm_kernel(%arg0: i32, %arg1: memref<128x256xf32, #tpu.memory_space<vmem>>, %arg2: memref<1x256xf32, #tpu.memory_space<vmem>>, %arg3: memref<1x256xf32, #tpu.memory_space<vmem>>, %arg4: memref<128x256xf32, #tpu.memory_space<vmem>>) attributes {dimension_semantics = [#tpu.dimension_semantics<parallel>], iteration_bounds = array<i64: 2>, scalar_prefetch = 0 : i64, scratch_operands = 0 : i64, tpu.core_type = #tpu.core_type<tc>, window_params = [{transform_indices = @transform_0, window_bounds = array<i64: 128, 256>}, {pipeline_mode = #tpu.pipeline_mode<synchronous>, transform_indices = @transform_1, window_bounds = array<i64: 1, 256>}, {pipeline_mode = #tpu.pipeline_mode<synchronous>, transform_indices = @transform_2, window_bounds = array<i64: 1, 256>}, {transform_indices = @transform_3, window_bounds = array<i64: 128, 256>}]} {
    %c0 = arith.constant 0 : index
    %c0_0 = arith.constant 0 : index
    %0 = vector.load %arg1[%c0, %c0_0] : memref<128x256xf32, #tpu.memory_space<vmem>>, vector<128x256xf32>
    %cst = arith.constant dense<0.000000e+00> : vector<128xf32>
    %1 = vector.multi_reduction <add>, %0, %cst [1] : vector<128x256xf32> to vector<128xf32>
    %2 = vector.shape_cast %1 : vector<128xf32> to vector<128x1xf32>
    %cst_1 = arith.constant 2.560000e+02 : f32
    %3 = vector.broadcast %cst_1 : f32 to vector<128x1xf32>
    %4 = arith.divf %2, %3 : vector<128x1xf32>
    %5 = vector.broadcast %4 : vector<128x1xf32> to vector<128x256xf32>
    %6 = arith.subf %0, %5 : vector<128x256xf32>
    %7 = arith.mulf %6, %6 : vector<128x256xf32>
    %cst_2 = arith.constant dense<0.000000e+00> : vector<128xf32>
    %8 = vector.multi_reduction <add>, %7, %cst_2 [1] : vector<128x256xf32> to vector<128xf32>
    %9 = vector.shape_cast %8 : vector<128xf32> to vector<128x1xf32>
    %cst_3 = arith.constant 2.560000e+02 : f32
    %10 = vector.broadcast %cst_3 : f32 to vector<128x1xf32>
    %11 = arith.divf %9, %10 : vector<128x1xf32>
    %12 = vector.broadcast %4 : vector<128x1xf32> to vector<128x256xf32>
    %13 = arith.subf %0, %12 : vector<128x256xf32>
    %cst_4 = arith.constant 9.99999974E-6 : f32
    %14 = vector.broadcast %cst_4 : f32 to vector<128x1xf32>
    %15 = arith.addf %11, %14 : vector<128x1xf32>
    %16 = math.rsqrt %15 : vector<128x1xf32>
    %17 = vector.broadcast %16 : vector<128x1xf32> to vector<128x256xf32>
    %18 = arith.mulf %13, %17 : vector<128x256xf32>
    %c0_5 = arith.constant 0 : index
    %c0_6 = arith.constant 0 : index
    %19 = vector.load %arg2[%c0_5, %c0_6] : memref<1x256xf32, #tpu.memory_space<vmem>>, vector<1x256xf32>
    %20 = vector.broadcast %19 : vector<1x256xf32> to vector<128x256xf32>
    %21 = arith.mulf %18, %20 : vector<128x256xf32>
    %c0_7 = arith.constant 0 : index
    %c0_8 = arith.constant 0 : index
    %22 = vector.load %arg3[%c0_7, %c0_8] : memref<1x256xf32, #tpu.memory_space<vmem>>, vector<1x256xf32>
    %23 = vector.broadcast %22 : vector<1x256xf32> to vector<128x256xf32>
    %24 = arith.addf %21, %23 : vector<128x256xf32>
    %c0_9 = arith.constant 0 : index
    %c0_10 = arith.constant 0 : index
    %25 = vector.load %arg4[%c0_9, %c0_10] : memref<128x256xf32, #tpu.memory_space<vmem>>, vector<128x256xf32>
    tpu.vector_store %arg4[%c0_9, %c0_10], %24 {strides = array<i32>} : memref<128x256xf32, #tpu.memory_space<vmem>>, vector<128x256xf32>,
    return
  }
  func.func @transform_0(%arg0: i32) -> (i32, i32) {
    %c0_i32 = arith.constant 0 : i32
    %c0_i32_0 = arith.constant 0 : i32
    return %arg0, %c0_i32 : i32, i32
  }
  func.func @transform_1(%arg0: i32) -> (i32, i32) {
    %c0_i32 = arith.constant 0 : i32
    %c0_i32_0 = arith.constant 0 : i32
    %c0_i32_1 = arith.constant 0 : i32
    return %c0_i32, %c0_i32_0 : i32, i32
  }
  func.func @transform_2(%arg0: i32) -> (i32, i32) {
    %c0_i32 = arith.constant 0 : i32
    %c0_i32_0 = arith.constant 0 : i32
    %c0_i32_1 = arith.constant 0 : i32
    return %c0_i32, %c0_i32_0 : i32, i32
  }
  func.func @transform_3(%arg0: i32) -> (i32, i32) {
    %c0_i32 = arith.constant 0 : i32
    %c0_i32_0 = arith.constant 0 : i32
    return %arg0, %c0_i32 : i32, i32
  }
}

</mosaic_0001>

<bundles_post_ra>
// kernel: _lambda_.10
= control target key start
LH: loop header
LB: loop body
LE: loop exit
PB: predicated region body
PF: predicated region fallthrough
CT: control target
= control target key end

     0   :  { %s2370_s15 = smov 0   ;;  %s3154_s0 = inlined_call_operand.vmem [shape: bf16[2,128,768], index: 0, kind: input, shape index: {}]   ;;  %s3155_s1 = inlined_call_operand.vmem [shape: bf16[256,256], index: 1, kind: input, shape index: {}]   ;;  %s3156_s2 = inlined_call_operand.vmem [shape: f32[1,256], index: 2, kind: input, shape index: {}]   ;;  %s3157_s3 = inlined_call_operand.vmem [shape: f32[2,128,256], index: 3, kind: input, shape index: {}]   ;;  %s3158_s4 = inlined_call_operand.vmem [shape: f32[2,128,256], index: 4, kind: output, shape index: {}]  }
   0x1 LB: > { %s1794_s16 = sadd.s32 4294967295, %s2343_s15   ;;  %p1798_p0 = scmp.ge.s32.totalorder %s2343_s15, 1  ;;  %s2343_s15 = sphi %s2370_s15, %s14_s15  }
   0x2   : > { %p172_p1 = scmp.lt.s32.totalorder %s2343_s15, 3 }
   0x4   : > { %p173_p2 = pnand %p1798_p0, %p172_p1 }
   0x5   : > { %p203_p3 = scmp.lt.s32.totalorder (!%p173_p2), %s1794_s16, 1  ;;  %v476_v16 = vlaneseq (!%p173_p2) }
   0x6   : > { %176 = sbr.rel (%p173_p2) target bundleno = 1714 (0x6b2), region = 36 }
   0x7   : > { %v2402_v17 = vshrl.u32 (!%p173_p2), %v476_v16, 7  ;;  %v2407_v19 = vand.u32 (!%p173_p2), 127, %v476_v16 }
   0x9   : > { %v2405_v18 = vadd.s32 (!%p173_p2), 16, %v2402_v17  ;;  %v2412_v21 = vadd.s32 (!%p173_p2), 24, %v2402_v17  ;;  %vm495_vm1 = vcmp.gt.s32.totalorder (!%p173_p2), %v2407_v19, %v2402_v17  ;;  %v2417_v24 = vadd.s32 (!%p173_p2), 8, %v2402_v17 }
   0xa   : > { %v2436_v32 = vadd.s32 (!%p173_p2), 32, %v2402_v17  ;;  %v2444_v34 = vadd.s32 (!%p173_p2), 40, %v2402_v17  ;;  %v2447_v35 = vadd.s32 (!%p173_p2), 48, %v2402_v17  ;;  %v2459_v39 = vadd.s32 (!%p173_p2), 56, %v2402_v17 }
   0xb   : > { %vm497_vm0 = vcmp.gt.s32.totalorder (!%p173_p2), %v2407_v19, %v2405_v18  ;;  %vm498_vm2 = vcmp.gt.s32.totalorder (!%p173_p2), %v2407_v19, %v2412_v21  ;;  %vm496_vm3 = vcmp.gt.s32.totalorder (!%p173_p2), %v2407_v19, %v2417_v24  ;;  %v2474_v47 = vadd.s32 (!%p173_p2), 64, %v2402_v17 }
   0xc   : > { %vm499_vm4 = vcmp.gt.s32.totalorder (!%p173_p2), %v2407_v19, %v2436_v32  ;;  %vm500_vm5 = vcmp.gt.s32.totalorder (!%p173_p2), %v2407_v19, %v2444_v34  ;;  %vm501_vm6 = vcmp.gt.s32.totalorder (!%p173_p2), %v2407_v19, %v2447_v35  ;;  %vm502_vm7 = vcmp.gt.s32.totalorder (!%p173_p2), %v2407_v19, %v2459_v39 }
   0xd   : > { %s3160_s16 = smov (!%p203_p3, %s1794_s16), 1  ;;  %v2488_v50 = vadd.s32 72, %v2402_v17  ;;  %v2491_v51 = vadd.s32 80, %v2402_v17  ;;  %vm503_vm8 = vcmp.gt.s32.totalorder %v2407_v19, %v2474_v47  ;;  %v2502_v55 = vadd.s32 88, %v2402_v17 }
   0xe   : > { %s2080_s17 = smul.u32 384, %s3160_s16  ;;  %v2518_v63 = vadd.s32 96, %v2402_v17  ;;  %s1886_s11 = sshll.u32 %s3160_s16, 8 }
   0xf   : > { %vm504_vm9 = vcmp.gt.s32.totalorder %v2407_v19, %v2488_v50  ;;  %vm505_vm10 = vcmp.gt.s32.totalorder %v2407_v19, %v2491_v51  ;;  %vm506_vm11 = vcmp.gt.s32.totalorder %v2407_v19, %v2502_v55  ;;  %s3044_s18 = scalar_lea.vmem %s3157_s3, %s1886_s11 }
  0x10   : > { %s2384_s20 = scalar_lea.vmem %s3154_s0, %s2080_s17  ;;  %vm507_vm12 = vcmp.gt.s32.totalorder %v2407_v19, %v2518_v63 }
  0x11   : > { %v2089_v0 = vld [vmem:[%s2384_s20 + $0x8] ss:$24 sps:$4 sm:$0xff]   ;;  %v2092_v1 = vld [vmem:[%s2384_s20 + $0x38] ss:$24 sps:$4 sm:$0xff]  }
  0x12   : > { %1952 = vmatprep.subr.bf16.mxu1 %v2089_v0  ;;  %v2094_v2 = vld [vmem:[%s2384_s20 + $0x68] ss:$24 sps:$4 sm:$0xff]   ;;  %v2096_v4 = vld [vmem:[%s2384_s20 + $0x98] ss:$24 sps:$4 sm:$0xff]  }
  0x13   : > { %1953 = vmatpush3.bf16.xpose.msra.mxu1 %v2089_v0  ;;  %v2106_v3 = vld [vmem:[%s2384_s20] ss:$24 sps:$4 sm:$0xff]   ;;  %v2109_v9 = vld [vmem:[%s2384_s20 + $0x30] ss:$24 sps:$4 sm:$0xff]  }
  0x14   : > { %1954 = vmatprep.subr.bf16.mxu1 %v2092_v1  ;;  %1968 = vmatprep.mubr.bf16.mxu1 %v2106_v3  ;;  %v2098_v5 = vld [vmem:[%s2384_s20 + $0xc8] ss:$24 sps:$4 sm:$0xff]   ;;  %v2100_v6 = vld [vmem:[%s2384_s20 + $0xf8] ss:$24 sps:$4 sm:$0xff]   ;;  %v2535_v3 = vadd.s32 112, %v2402_v17 }
  0x15   : > { %v2102_v7 = vld [vmem:[%s2384_s20 + $0x128] ss:$24 sps:$4 sm:$0xff]   ;;  %v2104_v8 = vld [vmem:[%s2384_s20 + $0x158] ss:$24 sps:$4 sm:$0xff]  }
  0x16   : > { %v2112_v10 = vld [vmem:[%s2384_s20 + $0x60] ss:$24 sps:$4 sm:$0xff]   ;;  %v2114_v11 = vld [vmem:[%s2384_s20 + $0x90] ss:$24 sps:$4 sm:$0xff]   ;;  %vm509_vm14 = vcmp.gt.s32.totalorder %v2407_v19, %v2535_v3 }
  0x17   : > { %v2116_v12 = vld [vmem:[%s2384_s20 + $0xc0] ss:$24 sps:$4 sm:$0xff]   ;;  %v2118_v13 = vld [vmem:[%s2384_s20 + $0xf0] ss:$24 sps:$4 sm:$0xff]  }
  0x18   : > { %v2120_v14 = vld [vmem:[%s2384_s20 + $0x120] ss:$24 sps:$4 sm:$0xff]   ;;  %v2122_v15 = vld [vmem:[%s2384_s20 + $0x150] ss:$24 sps:$4 sm:$0xff]  }
  0x1b   : > { %1955 = vmatpush3.bf16.xpose.msra.mxu1 %v2092_v1 }
  0x1c   : > { %1956 = vmatprep.subr.bf16.mxu1 %v2094_v2 }
  0x23   : > { %1957 = vmatpush3.bf16.xpose.msra.mxu1 %v2094_v2  ;;  %v2532_v2 = vadd.s32 104, %v2402_v17 }
  0x24   : > { %1958 = vmatprep.subr.bf16.mxu1 %v2096_v4 }
  0x25   : > { %vm508_vm13 = vcmp.gt.s32.totalorder %v2407_v19, %v2532_v2  ;;  %v2154_v2 = vld [vmem:[%s2384_s20 + $0x44] ss:$24 sps:$4 sm:$0xff]  }
  0x2b   : > { %1959 = vmatpush3.bf16.xpose.msra.mxu1 %v2096_v4 }
  0x2c   : > { %1960 = vmatprep.subr.bf16.mxu1 %v2098_v5 }
  0x33   : > { %1961 = vmatpush3.bf16.xpose.msra.mxu1 %v2098_v5 }
  0x34   : > { %1962 = vmatprep.subr.bf16.mxu1 %v2100_v6 }
  0x3b   : > { %1963 = vmatpush3.bf16.xpose.msra.mxu1 %v2100_v6 }
  0x3c   : > { %1964 = vmatprep.subr.bf16.mxu1 %v2102_v7 }
  0x43   : > { %1965 = vmatpush3.bf16.xpose.msra.mxu1 %v2102_v7  ;;  %v2546_v7 = vadd.s32 120, %v2402_v17 }
  0x44   : > { %1966 = vmatprep.subr.bf16.mxu1 %v2104_v8 }
  0x45   : > { %vm510_vm15 = vcmp.gt.s32.totalorder %v2407_v19, %v2546_v7 }
  0x4b   : > { %1967 = vmatpush3.bf16.xpose.msra.mxu1 %v2104_v8 }
  0x52   : > { %1969 = vmatmul.mubr.bf16.vlgmr.msra.gmra.mrb[0].mxu1 %v2109_v9 }
  0x53   : > { %1972 = vmatprep.mubr.bf16.mxu1 %v2112_v10 }
  0x5a   : > { %1973 = vmatmul.mubr.bf16.gmra.mrb[4].mxu1 %v2114_v11 }
  0x5b   : > { %1976 = vmatprep.mubr.bf16.mxu1 %v2116_v12 }
  0x62   : > { %1977 = vmatmul.mubr.bf16.gmra.mrb[8].mxu1 %v2118_v13 }
  0x63   : > { %1980 = vmatprep.mubr.bf16.mxu1 %v2120_v14 }
  0x6a   : > { %1981 = vmatmul.mubr.bf16.gmra.mrb[12].mxu1 %v2122_v15 }
 0x125   : > { %v1970_v20 = vpop.f32.mrb[0].mxu1 }
 0x126   : > { %v462_v22 = vmul.f32 0.088388346, %v1970_v20  ;;  %v397_v23 = vpop.f32.mrb[1].mxu1 }
 0x127   : > { %v460_v25 = vmul.f32 0.088388346, %v397_v23  ;;  %v1971_v26 = vpop.f32.mrb[2].mxu1  ;;  %v2126_v23 = vld [vmem:[%s2384_s20 + $0x40] ss:$24 sps:$4 sm:$0xff]  }
 0x128   : > { %v463_v27 = vmul.f32 0.088388346, %v1971_v26  ;;  %v400_v28 = vpop.f32.mrb[3].mxu1  ;;  %v2422_v29 = vsel %vm497_vm0, -1e+30, %v462_v22 }
 0x129   : > { %v461_v30 = vmul.f32 0.088388346, %v400_v28  ;;  %531 = vmax.xlane.f32.xlu1 %v2422_v29  ;;  %v2428_v31 = vsel %vm495_vm1, -1e+30, %v460_v25  ;;  %v2124_v22 = vld [vmem:[%s2384_s20 + $0x10] ss:$24 sps:$4 sm:$0xff]  }
 0x12a   : > { %527 = vmax.xlane.f32.xlu0 %v2428_v31  ;;  %v2441_v33 = vsel %vm498_vm2, -1e+30, %v463_v27  ;;  %1984 = vmatprep.subr.bf16.mxu1 %v2124_v22  ;;  %v2128_v25 = vld [vmem:[%s2384_s20 + $0x70] ss:$24 sps:$4 sm:$0xff]   ;;  %v2130_v26 = vld [vmem:[%s2384_s20 + $0xa0] ss:$24 sps:$4 sm:$0xff]  }
 0x12b   : > { %v2453_v37 = vsel %vm496_vm3, -1e+30, %v461_v30  ;;  %1985 = vmatpush3.bf16.msra.mxu1 %v2124_v22 }
 0x12c   : > { %1986 = vmatprep.subr.bf16.mxu1 %v2126_v23 }
 0x12d   : > { %533 = vmax.xlane.f32.xlu1 %v2441_v33  ;;  %v1974_v36 = vpop.f32.mrb[4].mxu1 }
 0x12e   : > { %529 = vmax.xlane.f32.xlu0 %v2453_v37  ;;  %v413_v38 = vpop.f32.mrb[5].mxu1  ;;  %v466_v40 = vmul.f32 0.088388346, %v1974_v36 }
 0x12f   : > { %v464_v41 = vmul.f32 0.088388346, %v413_v38  ;;  %v1975_v42 = vpop.f32.mrb[6].mxu1  ;;  %1987 = vmatpush3.bf16.msra.mxu1 %v2126_v23 }
 0x130   : > { %v416_v43 = vpop.f32.mrb[7].mxu1  ;;  %v467_v44 = vmul.f32 0.088388346, %v1975_v42  ;;  %v2484_v49 = vsel %vm501_vm6, -1e+30, %v466_v40  ;;  %1988 = vmatprep.subr.bf16.mxu1 %v2128_v25 }
 0x131   : > { %v465_v45 = vmul.f32 0.088388346, %v416_v43  ;;  %v2468_v46 = vsel %vm499_vm4, -1e+30, %v464_v41 }
 0x132   : > { %535 = vmax.xlane.f32.xlu0 %v2468_v46  ;;  %v2496_v53 = vsel %vm502_vm7, -1e+30, %v467_v44 }
 0x133   : > { %v2479_v48 = vsel %vm500_vm5, -1e+30, %v465_v45  ;;  %1989 = vmatpush3.bf16.msra.mxu1 %v2128_v25 }
 0x134   : > { %537 = vmax.xlane.f32.xlu1 %v2479_v48  ;;  %1990 = vmatprep.subr.bf16.mxu1 %v2130_v26 }
 0x135   : > { %v1978_v52 = vpop.f32.mrb[8].mxu1 }
 0x136   : > { %539 = vmax.xlane.f32.xlu0 %v2484_v49  ;;  %v429_v54 = vpop.f32.mrb[9].mxu1  ;;  %v470_v56 = vmul.f32 0.088388346, %v1978_v52 }
 0x137   : > { %v468_v57 = vmul.f32 0.088388346, %v429_v54  ;;  %v1979_v58 = vpop.f32.mrb[10].mxu1  ;;  %1991 = vmatpush3.bf16.msra.mxu1 %v2130_v26 }
 0x138   : > { %541 = vmax.xlane.f32.xlu1 %v2496_v53  ;;  %v432_v59 = vpop.f32.mrb[11].mxu1  ;;  %v471_v60 = vmul.f32 0.088388346, %v1979_v58  ;;  %v2528_v1 = vsel %vm505_vm10, -1e+30, %v470_v56 }
 0x139   : > { %v469_v61 = vmul.f32 0.088388346, %v432_v59  ;;  %v2512_v62 = vsel %vm503_vm8, -1e+30, %v468_v57 }
 0x13a   : > { %543 = vmax.xlane.f32.xlu0 %v2512_v62  ;;  %v2540_v5 = vsel %vm506_vm11, -1e+30, %v471_v60 }
 0x13b   : > { %v2523_v0 = vsel %vm504_vm9, -1e+30, %v469_v61 }
 0x13c   : > { %545 = vmax.xlane.f32.xlu1 %v2523_v0 }
 0x13d   : > { %v1982_v4 = vpop.f32.mrb[12].mxu1 }
 0x13e   : > { %547 = vmax.xlane.f32.xlu0 %v2528_v1  ;;  %v445_v6 = vpop.f32.mrb[13].mxu1  ;;  %v474_v8 = vmul.f32 0.088388346, %v1982_v4 }
 0x13f   : > { %v472_v9 = vmul.f32 0.088388346, %v445_v6  ;;  %v1983_v10 = vpop.f32.mrb[14].mxu1 }
 0x140   : > { %549 = vmax.xlane.f32.xlu1 %v2540_v5  ;;  %v448_v11 = vpop.f32.mrb[15].mxu1  ;;  %v475_v12 = vmul.f32 0.088388346, %v1983_v10  ;;  %v2569_v16 = vsel %vm509_vm14, -1e+30, %v474_v8 }
 0x141   : > { %v473_v13 = vmul.f32 0.088388346, %v448_v11  ;;  %v2556_v14 = vsel %vm507_vm12, -1e+30, %v472_v9 }
 0x142   : > { %551 = vmax.xlane.f32.xlu0 %v2556_v14  ;;  %v2575_v20 = vsel %vm510_vm15, -1e+30, %v475_v12 }
 0x143   : > { %v2564_v15 = vsel %vm508_vm13, -1e+30, %v473_v13 }
 0x144   : > { %553 = vmax.xlane.f32.xlu1 %v2564_v15 }
 0x146   : > { %555 = vmax.xlane.f32.xlu0 %v2569_v16 }
 0x148   : > { %557 = vmax.xlane.f32.xlu1 %v2575_v20 }
 0x1b6   : > { %v532_v27 = vpop.xlane.xlu1 %531 }
 0x1b7   : > { %v561_v28 = vsub.f32 %v2422_v29, %v532_v27  ;;  %v528_v30 = vpop.xlane.xlu0 %527 }
 0x1b8   : > { %v559_v36 = vsub.f32 %v2428_v31, %v528_v30 }
 0x1b9   : > { %v579_v41 = vmul.f32 1.442695, %v561_v28 }
 0x1ba   : > { %v575_v38 = vmul.f32 1.442695, %v559_v36  ;;  %v534_v40 = vpop.xlane.xlu1 %533 }
 0x1bb   : > { %v562_v42 = vsub.f32 %v2441_v33, %v534_v40  ;;  %v530_v43 = vpop.xlane.xlu0 %529 }
 0x1bc   : > { %2209 = vpow2.f32 %v575_v38  ;;  %v560_v44 = vsub.f32 %v2453_v37, %v530_v43 }
 0x1bd   : > { %2211 = vpow2.f32 %v579_v41  ;;  %v581_v52 = vmul.f32 1.442695, %v562_v42 }
 0x1be   : > { %v577_v45 = vmul.f32 1.442695, %v560_v44 }
 0x1bf   : > { %v536_v54 = vpop.xlane.xlu0 %535 }
 0x1c0   : > { %2213 = vpow2.f32 %v577_v45  ;;  %v563_v56 = vsub.f32 %v2468_v46, %v536_v54 }
 0x1c1   : > { %v538_v29 = vpop.xlane.xlu1 %537  ;;  %2215 = vpow2.f32 %v581_v52 }
 0x1c2   : > { %v583_v57 = vmul.f32 1.442695, %v563_v56  ;;  %v564_v31 = vsub.f32 %v2479_v48, %v538_v29  ;;  %v2134_v56 = vld [vmem:[%s2384_s20 + $0x100] ss:$24 sps:$4 sm:$0xff]  }
 0x1c3   : > { %v540_v58 = vpop.xlane.xlu0 %539 }
 0x1c4   : > { %2217 = vpow2.f32 %v583_v57  ;;  %v585_v59 = vmul.f32 1.442695, %v564_v31  ;;  %v565_v33 = vsub.f32 %v2484_v49, %v540_v58  ;;  %v2136_v57 = vld [vmem:[%s2384_s20 + $0x130] ss:$24 sps:$4 sm:$0xff]  }
 0x1c5   : > { %v542_v60 = vpop.xlane.xlu1 %541 }
 0x1c6   : > { %v2590_v61 = vpop.eup %2209  ;;  %v587_v37 = vmul.f32 1.442695, %v565_v33  ;;  %v566_v4 = vsub.f32 %v2496_v53, %v542_v60  ;;  %2219 = vpow2.f32 %v585_v59  ;;  %v2138_v59 = vld [vmem:[%s2384_s20 + $0x160] ss:$24 sps:$4 sm:$0xff]   ;;  %v2091_v60 = vld [vmem:[%s2384_s20 + $0xc] ss:$24 sps:$4 sm:$0xff]  }
 0x1c7   : > { %v544_v6 = vpop.xlane.xlu0 %543  ;;  %607 = vadd.xlane.f32.xlu0 %v2590_v61  ;;  %v2595_v8 = vpop.eup %2211 }
 0x1c8   : > { %2221 = vpow2.f32 %v587_v37  ;;  %v589_v46 = vmul.f32 1.442695, %v566_v4  ;;  %v567_v48 = vsub.f32 %v2512_v62, %v544_v6 }
 0x1c9   : > { %v546_v9 = vpop.xlane.xlu1 %545 }
 0x1ca   : > { %v2597_v10 = vpop.eup %2213  ;;  %v591_v49 = vmul.f32 1.442695, %v567_v48  ;;  %v568_v11 = vsub.f32 %v2523_v0, %v546_v9  ;;  %2223 = vpow2.f32 %v589_v46 }
 0x1cb   : > { %v548_v12 = vpop.xlane.xlu0 %547  ;;  %611 = vadd.xlane.f32.xlu0 %v2595_v8  ;;  %609 = vadd.xlane.f32.xlu1 %v2597_v10  ;;  %v2603_v22 = vpop.eup %2215 }
 0x1cc   : > { %2225 = vpow2.f32 %v591_v49  ;;  %v593_v53 = vmul.f32 1.442695, %v568_v11  ;;  %v569_v13 = vsub.f32 %v2528_v1, %v548_v12 }
 0x1cd   : > { %v550_v62 = vpop.xlane.xlu1 %549 }
 0x1ce   : > { %v2605_v23 = vpop.eup %2217  ;;  %v595_v25 = vmul.f32 1.442695, %v569_v13  ;;  %v570_v26 = vsub.f32 %v2540_v5, %v550_v62  ;;  %2227 = vpow2.f32 %v593_v53 }
 0x1cf   : > { %615 = vadd.xlane.f32.xlu0 %v2605_v23  ;;  %v552_v0 = vpop.xlane.xlu0 %551  ;;  %613 = vadd.xlane.f32.xlu1 %v2603_v22 }
 0x1d0   : > { %2229 = vpow2.f32 %v595_v25  ;;  %v597_v27 = vmul.f32 1.442695, %v570_v26  ;;  %v571_v28 = vsub.f32 %v2556_v14, %v552_v0  ;;  %v2611_v1 = vpop.eup %2219  ;;  %v2132_v14 = vld [vmem:[%s2384_s20 + $0xd0] ss:$24 sps:$4 sm:$0xff]  }
 0x1d1   : > { %v554_v30 = vpop.xlane.xlu1 %553  ;;  %1992 = vmatprep.subr.bf16.mxu1 %v2132_v14 }
 0x1d2   : > { %v2613_v36 = vpop.eup %2221  ;;  %v599_v38 = vmul.f32 1.442695, %v571_v28  ;;  %v572_v40 = vsub.f32 %v2564_v15, %v554_v30  ;;  %2231 = vpow2.f32 %v597_v27  ;;  %1993 = vmatpush3.bf16.msra.mxu1 %v2132_v14  ;;  %v2140_v14 = vld [vmem:[%s2384_s20 + $0x3c] ss:$24 sps:$4 sm:$0xff]  }
 0x1d3   : > { %619 = vadd.xlane.f32.xlu0 %v2613_v36  ;;  %v556_v5 = vpop.xlane.xlu0 %555  ;;  %617 = vadd.xlane.f32.xlu1 %v2611_v1 }
 0x1d4   : > { %2233 = vpow2.f32 %v599_v38  ;;  %v601_v41 = vmul.f32 1.442695, %v572_v40  ;;  %v573_v42 = vsub.f32 %v2569_v16, %v556_v5  ;;  %v2620_v43 = vpop.eup %2223  ;;  %1994 = vmatprep.subr.bf16.mxu1 %v2134_v56 }
 0x1d5   : > { %v558_v44 = vpop.xlane.xlu1 %557 }
 0x1d6   : > { %v2622_v45 = vpop.eup %2225  ;;  %v603_v52 = vmul.f32 1.442695, %v573_v42  ;;  %v574_v15 = vsub.f32 %v2575_v20, %v558_v44  ;;  %2235 = vpow2.f32 %v601_v41  ;;  %1995 = vmatpush3.bf16.msra.mxu1 %v2134_v56 }
 0x1d7   : > { %623 = vadd.xlane.f32.xlu0 %v2622_v45  ;;  %621 = vadd.xlane.f32.xlu1 %v2620_v43 }
 0x1d8   : > { %2237 = vpow2.f32 %v603_v52  ;;  %v605_v54 = vmul.f32 1.442695, %v574_v15  ;;  %v2627_v16 = vpop.eup %2227  ;;  %1996 = vmatprep.subr.bf16.mxu1 %v2136_v57 }
 0x1da   : > { %v2630_v29 = vpop.eup %2229  ;;  %2239 = vpow2.f32 %v605_v54  ;;  %1997 = vmatpush3.bf16.msra.mxu1 %v2136_v57 }
 0x1db   : > { %627 = vadd.xlane.f32.xlu0 %v2630_v29  ;;  %625 = vadd.xlane.f32.xlu1 %v2627_v16 }
 0x1dc   : > { %v2634_v20 = vpop.eup %2231  ;;  %1998 = vmatprep.subr.bf16.mxu1 %v2138_v59 }
 0x1de   : > { %v2637_v31 = vpop.eup %2233  ;;  %1999 = vmatpush3.bf16.msra.mxu1 %v2138_v59 }
 0x1df   : > { %631 = vadd.xlane.f32.xlu0 %v2637_v31  ;;  %629 = vadd.xlane.f32.xlu1 %v2634_v20 }
 0x1e0   : > { %v2641_v58 = vpop.eup %2235  ;;  %2016 = vmatprep.subr.bf16.mxu1 %v2091_v60 }
 0x1e2   : > { %v2644_v33 = vpop.eup %2237 }
 0x1e3   : > { %635 = vadd.xlane.f32.xlu0 %v2644_v33  ;;  %633 = vadd.xlane.f32.xlu1 %v2641_v58 }
 0x1e4   : > { %v2649_v37 = vpop.eup %2239 }
 0x1e7   : > { %637 = vadd.xlane.f32.xlu1 %v2649_v37 }
 0x254   : > { %v608_v4 = vpop.xlane.xlu0 %607 }
 0x255   : > { %2241 = vrcp.f32 %v608_v4 }
 0x258   : > { %v612_v6 = vpop.xlane.xlu0 %611  ;;  %v610_v46 = vpop.xlane.xlu1 %609 }
 0x259   : > { %2243 = vrcp.f32 %v610_v46 }
 0x25a   : > { %2245 = vrcp.f32 %v612_v6 }
 0x25c   : > { %v616_v48 = vpop.xlane.xlu0 %615  ;;  %v614_v9 = vpop.xlane.xlu1 %613 }
 0x25d   : > { %2247 = vrcp.f32 %v614_v9 }
 0x25e   : > { %2249 = vrcp.f32 %v616_v48 }
 0x25f   : > { %v2242_v12 = vpop.eup %2241 }
 0x260   : > { %v620_v49 = vpop.xlane.xlu0 %619  ;;  %v618_v11 = vpop.xlane.xlu1 %617  ;;  %v655_v25 = vmul.f32 %v2242_v12, %v2590_v61 }
 0x261   : > { %2251 = vrcp.f32 %v618_v11 }
 0x262   : > { %2253 = vrcp.f32 %v620_v49 }
 0x263   : > { %v2244_v53 = vpop.eup %2243 }
 0x264   : > { %v624_v13 = vpop.xlane.xlu0 %623  ;;  %v622_v62 = vpop.xlane.xlu1 %621  ;;  %v656_v26 = vmul.f32 %v2244_v53, %v2597_v10 }
 0x265   : > { %v2246_v0 = vpop.eup %2245  ;;  %2255 = vrcp.f32 %v622_v62  ;;  %v2142_v62 = vld [vmem:[%s2384_s20 + $0x9c] ss:$24 sps:$4 sm:$0xff]  }
 0x266   : > { %v671_v27 = vpack.c.bf16 %v656_v26, %v655_v25  ;;  %2257 = vrcp.f32 %v624_v13  ;;  %v657_v40 = vmul.f32 %v2246_v0, %v2595_v8 }
 0x267   : > { %v2248_v28 = vpop.eup %2247 }
 0x268   : > { %v628_v30 = vpop.xlane.xlu0 %627  ;;  %v626_v38 = vpop.xlane.xlu1 %625  ;;  %v658_v5 = vmul.f32 %v2248_v28, %v2603_v22  ;;  %2000 = vmatprep.mubr.bf16.mxu1 %v671_v27  ;;  %v2108_v28 = vld [vmem:[%s2384_s20 + $0x4] ss:$24 sps:$4 sm:$0xff]  }
 0x269   : > { %v2250_v41 = vpop.eup %2249  ;;  %2259 = vrcp.f32 %v626_v38  ;;  %v2143_v38 = vld [vmem:[%s2384_s20 + $0xcc] ss:$24 sps:$4 sm:$0xff]  }
 0x26a   : > { %v672_v42 = vpack.c.bf16 %v658_v5, %v657_v40  ;;  %2261 = vrcp.f32 %v628_v30  ;;  %v659_v52 = vmul.f32 %v2250_v41, %v2605_v23  ;;  %v2147_v40 = vld [vmem:[%s2384_s20 + $0x64] ss:$24 sps:$4 sm:$0xff]   ;;  %v2148_v5 = vld [vmem:[%s2384_s20 + $0x94] ss:$24 sps:$4 sm:$0xff]  }
 0x26b   : > { %v2252_v44 = vpop.eup %2251  ;;  %v2149_v41 = vld [vmem:[%s2384_s20 + $0xc4] ss:$24 sps:$4 sm:$0xff]  }
 0x26c   : > { %v632_v61 = vpop.xlane.xlu0 %631  ;;  %v630_v10 = vpop.xlane.xlu1 %629  ;;  %2001 = vmatmul.mubr.bf16.vlgmr.msra.gmra.mrb[16].mxu1 %v672_v42  ;;  %v660_v15 = vmul.f32 %v2252_v44, %v2611_v1  ;;  %v2141_v1 = vld [vmem:[%s2384_s20 + $0x6c] ss:$24 sps:$4 sm:$0xff]  }
 0x26d   : > { %v2254_v54 = vpop.eup %2253  ;;  %2017 = vmatpush3.bf16.xpose.msra.mxu1 %v2091_v60  ;;  %2263 = vrcp.f32 %v630_v10  ;;  %v2150_v42 = vld [vmem:[%s2384_s20 + $0xf4] ss:$24 sps:$4 sm:$0xff]  }
 0x26e   : > { %v673_v8 = vpack.c.bf16 %v660_v15, %v659_v52  ;;  %2018 = vmatprep.subr.bf16.mxu1 %v2140_v14  ;;  %2265 = vrcp.f32 %v632_v61  ;;  %v661_v59 = vmul.f32 %v2254_v54, %v2613_v36  ;;  %v2152_v44 = vld [vmem:[%s2384_s20 + $0x154] ss:$24 sps:$4 sm:$0xff]  }
 0x26f   : > { %v2256_v22 = vpop.eup %2255 }
 0x270   : > { %v636_v56 = vpop.xlane.xlu0 %635  ;;  %v634_v57 = vpop.xlane.xlu1 %633  ;;  %2004 = vmatprep.mubr.bf16.mxu1 %v673_v8  ;;  %v662_v4 = vmul.f32 %v2256_v22, %v2620_v43 }
 0x271   : > { %v2258_v6 = vpop.eup %2257  ;;  %2267 = vrcp.f32 %v634_v57 }
 0x272   : > { %2269 = vrcp.f32 %v636_v56  ;;  %v674_v23 = vpack.c.bf16 %v662_v4, %v661_v59  ;;  %v663_v48 = vmul.f32 %v2258_v6, %v2622_v45 }
 0x273   : > { %v2260_v46 = vpop.eup %2259 }
 0x274   : > { %v638_v60 = vpop.xlane.xlu1 %637  ;;  %2005 = vmatmul.mubr.bf16.gmra.mrb[20].mxu1 %v674_v23  ;;  %v664_v9 = vmul.f32 %v2260_v46, %v2627_v16  ;;  %v2262_v49 = vpop.eup %2261 }
 0x275   : > { %2271 = vrcp.f32 %v638_v60  ;;  %2019 = vmatpush3.bf16.xpose.msra.mxu1 %v2140_v14  ;;  %v665_v43 = vmul.f32 %v2262_v49, %v2630_v29  ;;  %v2151_v14 = vld [vmem:[%s2384_s20 + $0x124] ss:$24 sps:$4 sm:$0xff]  }
 0x276   : > { %v675_v11 = vpack.c.bf16 %v664_v9, %v663_v48  ;;  %2020 = vmatprep.subr.bf16.mxu1 %v2141_v1 }
 0x277   : > { %v2264_v36 = vpop.eup %2263 }
 0x278   : > { %2008 = vmatprep.mubr.bf16.mxu1 %v675_v11  ;;  %v666_v12 = vmul.f32 %v2264_v36, %v2634_v20  ;;  %v2266_v53 = vpop.eup %2265 }
 0x279   : > { %v667_v45 = vmul.f32 %v2266_v53, %v2637_v31  ;;  %v2144_v31 = vld [vmem:[%s2384_s20 + $0xfc] ss:$24 sps:$4 sm:$0xff]  }
 0x27a   : > { %v676_v13 = vpack.c.bf16 %v666_v12, %v665_v43 }
 0x27b   : > { %v2268_v25 = vpop.eup %2267 }
 0x27c   : > { %v2270_v26 = vpop.eup %2269  ;;  %2009 = vmatmul.mubr.bf16.gmra.mrb[24].mxu1 %v676_v13  ;;  %v668_v16 = vmul.f32 %v2268_v25, %v2641_v58  ;;  %v2145_v58 = vld [vmem:[%s2384_s20 + $0x12c] ss:$24 sps:$4 sm:$0xff]  }
 0x27d   : > { %2021 = vmatpush3.bf16.xpose.msra.mxu1 %v2141_v1  ;;  %v669_v29 = vmul.f32 %v2270_v26, %v2644_v33  ;;  %v2146_v33 = vld [vmem:[%s2384_s20 + $0x15c] ss:$24 sps:$4 sm:$0xff]  }
 0x27e   : > { %v677_v27 = vpack.c.bf16 %v668_v16, %v667_v45  ;;  %2022 = vmatprep.subr.bf16.mxu1 %v2142_v62 }
 0x27f   : > { %v2272_v0 = vpop.eup %2271 }
 0x280   : > { %v670_v20 = vmul.f32 %v2272_v0, %v2649_v37  ;;  %2012 = vmatprep.mubr.bf16.mxu1 %v677_v27  ;;  %v2111_v37 = vld [vmem:[%s2384_s20 + $0x34] ss:$24 sps:$4 sm:$0xff]  }
 0x282   : > { %v678_v30 = vpack.c.bf16 %v670_v20, %v669_v29 }
 0x284   : > { %2013 = vmatmul.mubr.bf16.gmra.mrb[28].mxu1 %v678_v30 }
 0x285   : > { %2023 = vmatpush3.bf16.xpose.msra.mxu1 %v2142_v62  ;;  %2032 = vmatprep.mubr.bf16.mxu1 %v2108_v28 }
 0x286   : > { %2024 = vmatprep.subr.bf16.mxu1 %v2143_v38 }
 0x28d   : > { %2025 = vmatpush3.bf16.xpose.msra.mxu1 %v2143_v38 }
 0x28e   : > { %2026 = vmatprep.subr.bf16.mxu1 %v2144_v31 }
 0x295   : > { %2027 = vmatpush3.bf16.xpose.msra.mxu1 %v2144_v31 }
 0x296   : > { %2028 = vmatprep.subr.bf16.mxu1 %v2145_v58 }
 0x29d   : > { %2029 = vmatpush3.bf16.xpose.msra.mxu1 %v2145_v58 }
 0x29e   : > { %2030 = vmatprep.subr.bf16.mxu1 %v2146_v33 }
 0x2a5   : > { %2031 = vmatpush3.bf16.xpose.msra.mxu1 %v2146_v33 }
 0x2ac   : > { %2033 = vmatmul.mubr.bf16.vlgmr.msra.gmra.mrb[32].mxu1 %v2111_v37 }
 0x2ad   : > { %2036 = vmatprep.mubr.bf16.mxu1 %v2147_v40 }
 0x2b4   : > { %2037 = vmatmul.mubr.bf16.gmra.mrb[36].mxu1 %v2148_v5 }
 0x2b5   : > { %2040 = vmatprep.mubr.bf16.mxu1 %v2149_v41 }
 0x2bc   : > { %2041 = vmatmul.mubr.bf16.gmra.mrb[40].mxu1 %v2150_v42 }
 0x2bd   : > { %2044 = vmatprep.mubr.bf16.mxu1 %v2151_v14 }
 0x2c4   : > { %2045 = vmatmul.mubr.bf16.gmra.mrb[44].mxu1 %v2152_v44 }
 0x33f   : > { %v2683_v61 = vpop.f32.mrb[16].mxu1 }
 0x340   : > { %v2685_v10 = vpop.f32.mrb[17].mxu1 }
 0x341   : > { %v2687_v52 = vpop.f32.mrb[18].mxu1 }
 0x342   : > { %v1300_v15 = vpack.c.bf16 %v2687_v52, %v2683_v61  ;;  %v2691_v54 = vpop.f32.mrb[19].mxu1  ;;  %v1350_v52 = vsub.s32 0, %v2402_v17 }
 0x343   : > { %v1298_v8 = vpack.c.bf16 %v2691_v54, %v2685_v10 }
 0x347   : > { %v2695_v22 = vpop.f32.mrb[20].mxu1 }
 0x348   : > { %v2697_v56 = vpop.f32.mrb[21].mxu1 }
 0x349   : > { %v2699_v57 = vpop.f32.mrb[22].mxu1 }
 0x34a   : > { %v1304_v59 = vpack.c.bf16 %v2699_v57, %v2695_v22  ;;  %v2703_v4 = vpop.f32.mrb[23].mxu1  ;;  %v1354_v22 = vsub.s32 1, %v2402_v17 }
 0x34b   : > { %v1302_v6 = vpack.c.bf16 %v2703_v4, %v2697_v56  ;;  %v1631_v4 = vld [vmem:[%s3044_s18] sm:$0xff] }
 0x34f   : > { %v2707_v23 = vpop.f32.mrb[24].mxu1 }
 0x350   : > { %v2709_v1 = vpop.f32.mrb[25].mxu1 }
 0x351   : > { %v2711_v46 = vpop.f32.mrb[26].mxu1 }
 0x352   : > { %v1308_v60 = vpack.c.bf16 %v2711_v46, %v2707_v23  ;;  %v2715_v48 = vpop.f32.mrb[27].mxu1 }
 0x353   : > { %v1306_v9 = vpack.c.bf16 %v2715_v48, %v2709_v1  ;;  %v1632_v1 = vld [vmem:[%s3044_s18 + $0x8] sm:$0xff] }
 0x357   : > { %v2719_v49 = vpop.f32.mrb[28].mxu1 }
 0x358   : > { %v2721_v11 = vpop.f32.mrb[29].mxu1 }
 0x359   : > { %v2723_v36 = vpop.f32.mrb[30].mxu1 }
 0x35a   : > { %v1312_v43 = vpack.c.bf16 %v2723_v36, %v2719_v49  ;;  %v2727_v12 = vpop.f32.mrb[31].mxu1 }
 0x35b   : > { %v1310_v53 = vpack.c.bf16 %v2727_v12, %v2721_v11  ;;  %v1634_v11 = vld [vmem:[%s3044_s18 + $0x18] sm:$0xff] }
 0x37f   : > { %v2034_v13 = vpop.f32.mrb[32].mxu1 }
 0x380   : > { %v922_v62 = vpop.f32.mrb[33].mxu1  ;;  %v987_v16 = vmul.f32 0.088388346, %v2034_v13 }
 0x381   : > { %v985_v25 = vmul.f32 0.088388346, %v922_v62  ;;  %v2035_v26 = vpop.f32.mrb[34].mxu1 }
 0x382   : > { %v925_v45 = vpop.f32.mrb[35].mxu1  ;;  %v988_v29 = vmul.f32 0.088388346, %v2035_v26  ;;  %v2746_v30 = vsel %vm497_vm0, -1e+30, %v987_v16 }
 0x383   : > { %v986_v0 = vmul.f32 0.088388346, %v925_v45  ;;  %v2734_v27 = vsel %vm495_vm1, -1e+30, %v985_v25 }
 0x384   : > { %1017 = vmax.xlane.f32.xlu0 %v2734_v27  ;;  %v2752_v31 = vsel %vm498_vm2, -1e+30, %v988_v29 }
 0x385   : > { %v2740_v20 = vsel %vm496_vm3, -1e+30, %v986_v0 }
 0x386   : > { %1019 = vmax.xlane.f32.xlu1 %v2740_v20 }
 0x387   : > { %v2038_v28 = vpop.f32.mrb[36].mxu1 }
 0x388   : > { %1021 = vmax.xlane.f32.xlu0 %v2746_v30  ;;  %v938_v38 = vpop.f32.mrb[37].mxu1  ;;  %v991_v58 = vmul.f32 0.088388346, %v2038_v28 }
 0x389   : > { %v989_v24 = vmul.f32 0.088388346, %v938_v38  ;;  %v2039_v33 = vpop.f32.mrb[38].mxu1 }
 0x38a   : > { %1023 = vmax.xlane.f32.xlu1 %v2752_v31  ;;  %v941_v37 = vpop.f32.mrb[39].mxu1  ;;  %v992_v40 = vmul.f32 0.088388346, %v2039_v33  ;;  %v2769_v41 = vsel %vm501_vm6, -1e+30, %v991_v58 }
 0x38b   : > { %v990_v5 = vmul.f32 0.088388346, %v941_v37  ;;  %v2758_v18 = vsel %vm499_vm4, -1e+30, %v989_v24  ;;  %v2153_v37 = vld [vmem:[%s2384_s20 + $0x14] ss:$24 sps:$4 sm:$0xff]  }
 0x38c   : > { %1025 = vmax.xlane.f32.xlu0 %v2758_v18  ;;  %v2775_v32 = vsel %vm502_vm7, -1e+30, %v992_v40  ;;  %2048 = vmatprep.subr.bf16.mxu0 %v2153_v37  ;;  %v2155_v40 = vld [vmem:[%s2384_s20 + $0x74] ss:$24 sps:$4 sm:$0xff]  }
 0x38d   : > { %v2764_v21 = vsel %vm500_vm5, -1e+30, %v990_v5  ;;  %2049 = vmatpush3.bf16.msra.mxu0 %v2153_v37 }
 0x38e   : > { %1027 = vmax.xlane.f32.xlu1 %v2764_v21  ;;  %2050 = vmatprep.subr.bf16.mxu0 %v2154_v2 }
 0x38f   : > { %v2042_v42 = vpop.f32.mrb[40].mxu1 }
 0x390   : > { %1029 = vmax.xlane.f32.xlu0 %v2769_v41  ;;  %v954_v14 = vpop.f32.mrb[41].mxu1  ;;  %v995_v44 = vmul.f32 0.088388346, %v2042_v42 }
 0x391   : > { %v993_v34 = vmul.f32 0.088388346, %v954_v14  ;;  %v2043_v13 = vpop.f32.mrb[42].mxu1  ;;  %2051 = vmatpush3.bf16.msra.mxu0 %v2154_v2 }
 0x392   : > { %1031 = vmax.xlane.f32.xlu1 %v2775_v32  ;;  %v957_v62 = vpop.f32.mrb[43].mxu1  ;;  %v996_v35 = vmul.f32 0.088388346, %v2043_v13  ;;  %v2793_v45 = vsel %vm505_vm10, -1e+30, %v995_v44  ;;  %2052 = vmatprep.subr.bf16.mxu0 %v2155_v40 }
 0x393   : > { %v994_v25 = vmul.f32 0.088388346, %v957_v62  ;;  %v2782_v26 = vsel %vm503_vm8, -1e+30, %v993_v34 }
 0x394   : > { %1033 = vmax.xlane.f32.xlu0 %v2782_v26  ;;  %v2799_v47 = vsel %vm506_vm11, -1e+30, %v996_v35 }
 0x395   : > { %v2788_v39 = vsel %vm504_vm9, -1e+30, %v994_v25  ;;  %2053 = vmatpush3.bf16.msra.mxu0 %v2155_v40 }
 0x396   : > { %1035 = vmax.xlane.f32.xlu1 %v2788_v39 }
 0x397   : > { %v2046_v16 = vpop.f32.mrb[44].mxu1 }
 0x398   : > { %1037 = vmax.xlane.f32.xlu0 %v2793_v45  ;;  %v970_v0 = vpop.f32.mrb[45].mxu1  ;;  %v999_v50 = vmul.f32 0.088388346, %v2046_v16 }
 0x399   : > { %v997_v29 = vmul.f32 0.088388346, %v970_v0  ;;  %v2047_v28 = vpop.f32.mrb[46].mxu1 }
 0x39a   : > { %1039 = vmax.xlane.f32.xlu1 %v2799_v47  ;;  %v973_v51 = vpop.f32.mrb[47].mxu1  ;;  %v1000_v38 = vmul.f32 0.088388346, %v2047_v28  ;;  %v2817_v33 = vsel %vm509_vm14, -1e+30, %v999_v50 }
 0x39b   : > { %v998_v58 = vmul.f32 0.088388346, %v973_v51  ;;  %v2806_v55 = vsel %vm507_vm12, -1e+30, %v997_v29 }
 0x39c   : > { %1041 = vmax.xlane.f32.xlu0 %v2806_v55  ;;  %v2823_v63 = vsel %vm510_vm15, -1e+30, %v1000_v38 }
 0x39d   : > { %v2812_v24 = vsel %vm508_vm13, -1e+30, %v998_v58 }
 0x39e   : > { %1043 = vmax.xlane.f32.xlu1 %v2812_v24 }
 0x3a0   : > { %1045 = vmax.xlane.f32.xlu0 %v2817_v33 }
 0x3a2   : > { %1047 = vmax.xlane.f32.xlu1 %v2823_v63 }
 0x411   : > { %v1018_v3 = vpop.xlane.xlu0 %1017 }
 0x412   : > { %v1049_v5 = vsub.f32 %v2734_v27, %v1018_v3 }
 0x413   : > { %v1020_v42 = vpop.xlane.xlu1 %1019 }
 0x414   : > { %v1065_v19 = vmul.f32 1.442695, %v1049_v5  ;;  %v1050_v7 = vsub.f32 %v2740_v20, %v1020_v42 }
 0x415   : > { %v1022_v14 = vpop.xlane.xlu0 %1021 }
 0x416   : > { %2273 = vpow2.f32 %v1065_v19  ;;  %v1067_v44 = vmul.f32 1.442695, %v1050_v7  ;;  %v1051_v34 = vsub.f32 %v2746_v30, %v1022_v14 }
 0x417   : > { %v1024_v13 = vpop.xlane.xlu1 %1023 }
 0x418   : > { %2275 = vpow2.f32 %v1067_v44  ;;  %v1069_v62 = vmul.f32 1.442695, %v1051_v34  ;;  %v1052_v35 = vsub.f32 %v2752_v31, %v1024_v13 }
 0x419   : > { %v1026_v25 = vpop.xlane.xlu0 %1025 }
 0x41a   : > { %2277 = vpow2.f32 %v1069_v62  ;;  %v1071_v16 = vmul.f32 1.442695, %v1052_v35  ;;  %v1053_v0 = vsub.f32 %v2758_v18, %v1026_v25 }
 0x41b   : > { %v1028_v27 = vpop.xlane.xlu1 %1027 }
 0x41c   : > { %2279 = vpow2.f32 %v1071_v16  ;;  %v1073_v50 = vmul.f32 1.442695, %v1053_v0  ;;  %v1054_v20 = vsub.f32 %v2764_v21, %v1028_v27 }
 0x41d   : > { %v1030_v29 = vpop.xlane.xlu0 %1029 }
 0x41e   : > { %2281 = vpow2.f32 %v1073_v50  ;;  %v1075_v28 = vmul.f32 1.442695, %v1054_v20  ;;  %v1055_v30 = vsub.f32 %v2769_v41, %v1030_v29 }
 0x41f   : > { %v1032_v51 = vpop.xlane.xlu1 %1031 }
 0x420   : > { %v2837_v38 = vpop.eup %2273  ;;  %2283 = vpow2.f32 %v1075_v28  ;;  %v1077_v31 = vmul.f32 1.442695, %v1055_v30  ;;  %v1056_v58 = vsub.f32 %v2775_v32, %v1032_v51 }
 0x421   : > { %v1034_v37 = vpop.xlane.xlu0 %1033  ;;  %1097 = vadd.xlane.f32.xlu0 %v2837_v38 }
 0x422   : > { %v2841_v18 = vpop.eup %2275  ;;  %2285 = vpow2.f32 %v1077_v31  ;;  %v1079_v2 = vmul.f32 1.442695, %v1056_v58  ;;  %v1057_v21 = vsub.f32 %v2782_v26, %v1034_v37  ;;  %v2158_v37 = vld [vmem:[%s2384_s20 + $0x104] ss:$24 sps:$4 sm:$0xff]  }
 0x423   : > { %v1036_v40 = vpop.xlane.xlu1 %1035  ;;  %1099 = vadd.xlane.f32.xlu1 %v2841_v18 }
 0x424   : > { %v2845_v41 = vpop.eup %2277  ;;  %2287 = vpow2.f32 %v1079_v2  ;;  %v1081_v3 = vmul.f32 1.442695, %v1057_v21  ;;  %v1058_v5 = vsub.f32 %v2788_v39, %v1036_v40  ;;  %v2159_v40 = vld [vmem:[%s2384_s20 + $0x134] ss:$24 sps:$4 sm:$0xff]  }
 0x425   : > { %v1038_v42 = vpop.xlane.xlu0 %1037  ;;  %1101 = vadd.xlane.f32.xlu0 %v2845_v41 }
 0x426   : > { %v2849_v32 = vpop.eup %2279  ;;  %2289 = vpow2.f32 %v1081_v3  ;;  %v1083_v19 = vmul.f32 1.442695, %v1058_v5  ;;  %v1059_v7 = vsub.f32 %v2793_v45, %v1038_v42  ;;  %v2160_v42 = vld [vmem:[%s2384_s20 + $0x164] ss:$24 sps:$4 sm:$0xff]  }
 0x427   : > { %v1040_v14 = vpop.xlane.xlu1 %1039  ;;  %1103 = vadd.xlane.f32.xlu1 %v2849_v32 }
 0x428   : > { %v2853_v26 = vpop.eup %2281  ;;  %2291 = vpow2.f32 %v1083_v19  ;;  %v1085_v44 = vmul.f32 1.442695, %v1059_v7  ;;  %v1060_v34 = vsub.f32 %v2799_v47, %v1040_v14  ;;  %v2163_v19 = vld [vmem:[%s3155_s1 + $0x4] ss:$8 sps:$4 sm:$0xff]  }
 0x429   : > { %1105 = vadd.xlane.f32.xlu0 %v2853_v26  ;;  %v1042_v39 = vpop.xlane.xlu0 %1041 }
 0x42a   : > { %v2857_v13 = vpop.eup %2283  ;;  %2293 = vpow2.f32 %v1085_v44  ;;  %v1087_v62 = vmul.f32 1.442695, %v1060_v34  ;;  %v1061_v35 = vsub.f32 %v2806_v55, %v1042_v39  ;;  %v2156_v55 = vld [vmem:[%s2384_s20 + $0xa4] ss:$24 sps:$4 sm:$0xff]  }
 0x42b   : > { %1107 = vadd.xlane.f32.xlu1 %v2857_v13  ;;  %v1044_v45 = vpop.xlane.xlu1 %1043  ;;  %2054 = vmatprep.subr.bf16.mxu0 %v2156_v55 }
 0x42c   : > { %v2861_v25 = vpop.eup %2285  ;;  %2295 = vpow2.f32 %v1087_v62  ;;  %v1089_v16 = vmul.f32 1.442695, %v1061_v35  ;;  %v1062_v0 = vsub.f32 %v2812_v24, %v1044_v45  ;;  %2055 = vmatpush3.bf16.msra.mxu0 %v2156_v55 }
 0x42d   : > { %1109 = vadd.xlane.f32.xlu0 %v2861_v25  ;;  %v1046_v47 = vpop.xlane.xlu0 %1045 }
 0x42e   : > { %v2865_v27 = vpop.eup %2287  ;;  %2297 = vpow2.f32 %v1089_v16  ;;  %v1091_v50 = vmul.f32 1.442695, %v1062_v0  ;;  %v1063_v20 = vsub.f32 %v2817_v33, %v1046_v47  ;;  %v2157_v33 = vld [vmem:[%s2384_s20 + $0xd4] ss:$24 sps:$4 sm:$0xff]   ;;  %s3056_s20 = scalar_lea.vmem %s3158_s4, %s1886_s11 }
 0x42f   : > { %1111 = vadd.xlane.f32.xlu1 %v2865_v27  ;;  %v1048_v29 = vpop.xlane.xlu1 %1047  ;;  %2056 = vmatprep.subr.bf16.mxu0 %v2157_v33 }
 0x430   : > { %v2870_v28 = vpop.eup %2289  ;;  %2299 = vpow2.f32 %v1091_v50  ;;  %v1093_v30 = vmul.f32 1.442695, %v1063_v20  ;;  %v1064_v24 = vsub.f32 %v2823_v63, %v1048_v29  ;;  %2057 = vmatpush3.bf16.msra.mxu0 %v2157_v33 }
 0x431   : > { %1113 = vadd.xlane.f32.xlu0 %v2870_v28  ;;  %2058 = vmatprep.subr.bf16.mxu0 %v2158_v37 }
 0x432   : > { %v2874_v51 = vpop.eup %2291  ;;  %2301 = vpow2.f32 %v1093_v30  ;;  %v1095_v31 = vmul.f32 1.442695, %v1064_v24 }
 0x433   : > { %1115 = vadd.xlane.f32.xlu1 %v2874_v51 }
 0x434   : > { %v2878_v58 = vpop.eup %2293  ;;  %2303 = vpow2.f32 %v1095_v31  ;;  %2059 = vmatpush3.bf16.msra.mxu0 %v2158_v37 }
 0x435   : > { %1117 = vadd.xlane.f32.xlu0 %v2878_v58  ;;  %2060 = vmatprep.subr.bf16.mxu0 %v2159_v40 }
 0x436   : > { %v2881_v63 = vpop.eup %2295 }
 0x437   : > { %1119 = vadd.xlane.f32.xlu1 %v2881_v63 }
 0x438   : > { %v2885_v2 = vpop.eup %2297  ;;  %2061 = vmatpush3.bf16.msra.mxu0 %v2159_v40 }
 0x439   : > { %1121 = vadd.xlane.f32.xlu0 %v2885_v2  ;;  %2062 = vmatprep.subr.bf16.mxu0 %v2160_v42 }
 0x43a   : > { %v2888_v21 = vpop.eup %2299 }
 0x43b   : > { %1123 = vadd.xlane.f32.xlu1 %v2888_v21 }
 0x43c   : > { %v2892_v3 = vpop.eup %2301  ;;  %2063 = vmatpush3.bf16.msra.mxu0 %v2160_v42  ;;  %v2166_v42 = vld [vmem:[%s3155_s1 + $0x14] ss:$8 sps:$4 sm:$0xff]  }
 0x43d   : > { %1125 = vadd.xlane.f32.xlu0 %v2892_v3  ;;  %1518 = vmatprep.subr.bf16.mxu0 %v2163_v19 }
 0x43e   : > { %v2895_v5 = vpop.eup %2303 }
 0x43f   : > { %1127 = vadd.xlane.f32.xlu1 %v2895_v5 }
 0x4ae   : > { %v1098_v7 = vpop.xlane.xlu0 %1097 }
 0x4af   : > { %2305 = vrcp.f32 %v1098_v7 }
 0x4b0   : > { %v1100_v14 = vpop.xlane.xlu1 %1099 }
 0x4b1   : > { %2307 = vrcp.f32 %v1100_v14 }
 0x4b2   : > { %v1102_v44 = vpop.xlane.xlu0 %1101 }
 0x4b3   : > { %2309 = vrcp.f32 %v1102_v44  ;;  %v2164_v44 = vld [vmem:[%s3155_s1 + $0x10] ss:$8 sps:$4 sm:$0xff]  }
 0x4b4   : > { %v1104_v34 = vpop.xlane.xlu1 %1103 }
 0x4b5   : > { %2311 = vrcp.f32 %v1104_v34 }
 0x4b6   : > { %v1106_v39 = vpop.xlane.xlu0 %1105 }
 0x4b7   : > { %2313 = vrcp.f32 %v1106_v39 }
 0x4b8   : > { %v1108_v62 = vpop.xlane.xlu1 %1107 }
 0x4b9   : > { %v2306_v35 = vpop.eup %2305  ;;  %2315 = vrcp.f32 %v1108_v62  ;;  %v2169_v62 = vld [vmem:[%s3155_s1 + $0x24] ss:$8 sps:$4 sm:$0xff]  }
 0x4ba   : > { %v1110_v45 = vpop.xlane.xlu0 %1109  ;;  %v1145_v47 = vmul.f32 %v2306_v35, %v2837_v38  ;;  %v2161_v38 = vld [vmem:[%s3155_s1] ss:$8 sps:$4 sm:$0xff]  }
 0x4bb   : > { %v2308_v16 = vpop.eup %2307  ;;  %2317 = vrcp.f32 %v1110_v45 }
 0x4bc   : > { %v1112_v0 = vpop.xlane.xlu1 %1111  ;;  %v1146_v50 = vmul.f32 %v2308_v16, %v2841_v18 }
 0x4bd   : > { %v2310_v20 = vpop.eup %2309  ;;  %2319 = vrcp.f32 %v1112_v0  ;;  %v2167_v0 = vld [vmem:[%s3155_s1 + $0x20] ss:$8 sps:$4 sm:$0xff]  }
 0x4be   : > { %v1114_v55 = vpop.xlane.xlu0 %1113  ;;  %v1161_v29 = vpack.c.bf16 %v1146_v50, %v1145_v47  ;;  %v1147_v31 = vmul.f32 %v2310_v20, %v2845_v41  ;;  %v2172_v20 = vld [vmem:[%s3155_s1 + $0x34] ss:$8 sps:$4 sm:$0xff]  }
 0x4bf   : > { %v2312_v30 = vpop.eup %2311  ;;  %2321 = vrcp.f32 %v1114_v55 }
 0x4c0   : > { %2064 = vmatprep.mubr.bf16.mxu0 %v1161_v29  ;;  %v1116_v24 = vpop.xlane.xlu1 %1115  ;;  %v1148_v33 = vmul.f32 %v2312_v30, %v2849_v32 }
 0x4c1   : > { %v2314_v37 = vpop.eup %2313  ;;  %2323 = vrcp.f32 %v1116_v24  ;;  %v2170_v24 = vld [vmem:[%s3155_s1 + $0x30] ss:$8 sps:$4 sm:$0xff]  }
 0x4c2   : > { %v1118_v40 = vpop.xlane.xlu0 %1117  ;;  %v1162_v18 = vpack.c.bf16 %v1148_v33, %v1147_v31  ;;  %v1149_v41 = vmul.f32 %v2314_v37, %v2853_v26  ;;  %v2175_v33 = vld [vmem:[%s3155_s1 + $0x44] ss:$8 sps:$4 sm:$0xff]  }
 0x4c3   : > { %v2316_v19 = vpop.eup %2315  ;;  %2325 = vrcp.f32 %v1118_v40  ;;  %v2173_v40 = vld [vmem:[%s3155_s1 + $0x40] ss:$8 sps:$4 sm:$0xff]  }
 0x4c4   : > { %2065 = vmatmul.mubr.bf16.vlgmr.msra.gmra.mrb[0].mxu0 %v1162_v18  ;;  %v1120_v7 = vpop.xlane.xlu1 %1119  ;;  %v1150_v32 = vmul.f32 %v2316_v19, %v2857_v13 }
 0x4c5   : > { %v2318_v14 = vpop.eup %2317  ;;  %2327 = vrcp.f32 %v1120_v7  ;;  %1519 = vmatpush1.bf16.msra.mxu0 %v2161_v38 }
 0x4c6   : > { %v1122_v34 = vpop.xlane.xlu0 %1121  ;;  %v1163_v39 = vpack.c.bf16 %v1150_v32, %v1149_v41  ;;  %1520 = vmatprep.subr.bf16.mxu0 %v2166_v42  ;;  %v1151_v13 = vmul.f32 %v2318_v14, %v2861_v25  ;;  %v2178_v42 = vld [vmem:[%s3155_s1 + $0x54] ss:$8 sps:$4 sm:$0xff]   ;;  %v2181_v14 = vld [vmem:[%s3155_s1 + $0x64] ss:$8 sps:$4 sm:$0xff]  }
 0x4c7   : > { %v2320_v35 = vpop.eup %2319  ;;  %2329 = vrcp.f32 %v1122_v34 }
 0x4c8   : > { %2068 = vmatprep.mubr.bf16.mxu0 %v1163_v39  ;;  %v1124_v26 = vpop.xlane.xlu1 %1123  ;;  %v1152_v45 = vmul.f32 %v2320_v35, %v2865_v27  ;;  %v2182_v35 = vld [vmem:[%s3155_s1 + $0x70] ss:$8 sps:$4 sm:$0xff]  }
 0x4c9   : > { %v2322_v16 = vpop.eup %2321  ;;  %2331 = vrcp.f32 %v1124_v26  ;;  %1521 = vmatpush1.bf16.msra.mxu0 %v2164_v44  ;;  %v2190_v26 = vld [vmem:[%s3155_s1 + $0x94] ss:$8 sps:$4 sm:$0xff]  }
 0x4ca   : > { %v1126_v47 = vpop.xlane.xlu0 %1125  ;;  %v1164_v50 = vpack.c.bf16 %v1152_v45, %v1151_v13  ;;  %1522 = vmatprep.subr.bf16.mxu0 %v2169_v62  ;;  %v1153_v27 = vmul.f32 %v2322_v16, %v2870_v28  ;;  %v2184_v62 = vld [vmem:[%s3155_s1 + $0x74] ss:$8 sps:$4 sm:$0xff]   ;;  %v2188_v13 = vld [vmem:[%s3155_s1 + $0x90] ss:$8 sps:$4 sm:$0xff]   ;;  %v2193_v45 = vld [vmem:[%s3155_s1 + $0xa4] ss:$8 sps:$4 sm:$0xff]  }
 0x4cb   : > { %v2324_v55 = vpop.eup %2323  ;;  %2333 = vrcp.f32 %v1126_v47  ;;  %v2191_v16 = vld [vmem:[%s3155_s1 + $0xa0] ss:$8 sps:$4 sm:$0xff]   ;;  %v2194_v47 = vld [vmem:[%s3155_s1 + $0xb0] ss:$8 sps:$4 sm:$0xff]  }
 0x4cc   : > { %2069 = vmatmul.mubr.bf16.gmra.mrb[4].mxu0 %v1164_v50  ;;  %v1128_v25 = vpop.xlane.xlu1 %1127  ;;  %v1154_v29 = vmul.f32 %v2324_v55, %v2874_v51  ;;  %v2199_v50 = vld [vmem:[%s3155_s1 + $0xc4] ss:$8 sps:$4 sm:$0xff]   ;;  %v2202_v55 = vld [vmem:[%s3155_s1 + $0xd4] ss:$8 sps:$4 sm:$0xff]  }
 0x4cd   : > { %v2326_v30 = vpop.eup %2325  ;;  %2335 = vrcp.f32 %v1128_v25  ;;  %1523 = vmatpush1.bf16.msra.mxu0 %v2167_v0  ;;  %v2196_v0 = vld [vmem:[%s3155_s1 + $0xb4] ss:$8 sps:$4 sm:$0xff]   ;;  %v2200_v25 = vld [vmem:[%s3155_s1 + $0xd0] ss:$8 sps:$4 sm:$0xff]  }
 0x4ce   : > { %v1165_v31 = vpack.c.bf16 %v1154_v29, %v1153_v27  ;;  %1524 = vmatprep.subr.bf16.mxu0 %v2172_v20  ;;  %v1155_v38 = vmul.f32 %v2326_v30, %v2878_v58  ;;  %v2197_v20 = vld [vmem:[%s3155_s1 + $0xc0] ss:$8 sps:$4 sm:$0xff]   ;;  %v2205_v27 = vld [vmem:[%s3155_s1 + $0xe4] ss:$8 sps:$4 sm:$0xff]   ;;  %v2208_v30 = vld [vmem:[%s3155_s1 + $0xf4] ss:$8 sps:$4 sm:$0xff]  }
 0x4cf   : > { %v2328_v37 = vpop.eup %2327  ;;  %v2203_v29 = vld [vmem:[%s3155_s1 + $0xe0] ss:$8 sps:$4 sm:$0xff]  }
 0x4d0   : > { %2072 = vmatprep.mubr.bf16.mxu0 %v1165_v31  ;;  %v1156_v28 = vmul.f32 %v2328_v37, %v2881_v63  ;;  %v2176_v63 = vld [vmem:[%s3155_s1 + $0x50] ss:$8 sps:$4 sm:$0xff]  }
 0x4d1   : > { %v2330_v51 = vpop.eup %2329  ;;  %1525 = vmatpush1.bf16.msra.mxu0 %v2170_v24  ;;  %v2206_v24 = vld [vmem:[%s3155_s1 + $0xf0] ss:$8 sps:$4 sm:$0xff]  }
 0x4d2   : > { %v1166_v18 = vpack.c.bf16 %v1156_v28, %v1155_v38  ;;  %1526 = vmatprep.subr.bf16.mxu0 %v2175_v33  ;;  %v1157_v7 = vmul.f32 %v2330_v51, %v2885_v2 }
 0x4d3   : > { %v2332_v19 = vpop.eup %2331 }
 0x4d4   : > { %2073 = vmatmul.mubr.bf16.gmra.mrb[8].mxu0 %v1166_v18  ;;  %v1158_v58 = vmul.f32 %v2332_v19, %v2888_v21  ;;  %v2179_v21 = vld [vmem:[%s3155_s1 + $0x60] ss:$8 sps:$4 sm:$0xff]  }
 0x4d5   : > { %v2334_v41 = vpop.eup %2333  ;;  %1527 = vmatpush1.bf16.msra.mxu0 %v2173_v40 }
 0x4d6   : > { %v1167_v32 = vpack.c.bf16 %v1158_v58, %v1157_v7  ;;  %1528 = vmatprep.subr.bf16.mxu0 %v2178_v42  ;;  %v1159_v34 = vmul.f32 %v2334_v41, %v2892_v3  ;;  %v2187_v3 = vld [vmem:[%s3155_s1 + $0x84] ss:$8 sps:$4 sm:$0xff]  }
 0x4d7   : > { %v2336_v44 = vpop.eup %2335 }
 0x4d8   : > { %2076 = vmatprep.mubr.bf16.mxu0 %v1167_v32  ;;  %v1160_v2 = vmul.f32 %v2336_v44, %v2895_v5  ;;  %v2185_v5 = vld [vmem:[%s3155_s1 + $0x80] ss:$8 sps:$4 sm:$0xff]  }
 0x4d9   : > { %1529 = vmatpush1.bf16.msra.mxu0 %v2176_v63 }
 0x4da   : > { %v1168_v39 = vpack.c.bf16 %v1160_v2, %v1159_v34  ;;  %1530 = vmatprep.subr.bf16.mxu0 %v2181_v14 }
 0x4dc   : > { %2077 = vmatmul.mubr.bf16.gmra.mrb[12].mxu0 %v1168_v39 }
 0x4dd   : > { %1531 = vmatpush1.bf16.msra.mxu0 %v2179_v21 }
 0x4de   : > { %1532 = vmatprep.subr.bf16.mxu0 %v2184_v62  ;;  %v1635_v62 = vld [vmem:[%s3044_s18 + $0x20] sm:$0xff] }
 0x4e1   : > { %1533 = vmatpush1.bf16.msra.mxu0 %v2182_v35 }
 0x4e2   : > { %1534 = vmatprep.subr.bf16.mxu0 %v2187_v3 }
 0x4e5   : > { %1535 = vmatpush1.bf16.msra.mxu0 %v2185_v5  ;;  %v1636_v5 = vld [vmem:[%s3044_s18 + $0x28] sm:$0xff] }
 0x4e6   : > { %1536 = vmatprep.subr.bf16.mxu0 %v2190_v26 }
 0x4e9   : > { %1537 = vmatpush1.bf16.msra.mxu0 %v2188_v13 }
 0x4ea   : > { %1538 = vmatprep.subr.bf16.mxu0 %v2193_v45  ;;  %v1637_v45 = vld [vmem:[%s3044_s18 + $0x30] sm:$0xff] }
 0x4ed   : > { %1539 = vmatpush1.bf16.msra.mxu0 %v2191_v16 }
 0x4ee   : > { %1540 = vmatprep.subr.bf16.mxu0 %v2196_v0 }
 0x4f1   : > { %1541 = vmatpush1.bf16.msra.mxu0 %v2194_v47 }
 0x4f2   : > { %1542 = vmatprep.subr.bf16.mxu0 %v2199_v50  ;;  %v1638_v50 = vld [vmem:[%s3044_s18 + $0x38] sm:$0xff] }
 0x4f5   : > { %1543 = vmatpush1.bf16.msra.mxu0 %v2197_v20 }
 0x4f6   : > { %1544 = vmatprep.subr.bf16.mxu0 %v2202_v55 }
 0x4f9   : > { %1545 = vmatpush1.bf16.msra.mxu0 %v2200_v25 }
 0x4fa   : > { %1546 = vmatprep.subr.bf16.mxu0 %v2205_v27 }
 0x4fd   : > { %1547 = vmatpush1.bf16.msra.mxu0 %v2203_v29 }
 0x4fe   : > { %1548 = vmatprep.subr.bf16.mxu0 %v2208_v30  ;;  %v1639_v30 = vld [vmem:[%s3044_s18 + $0x40] sm:$0xff] }
 0x501   : > { %1549 = vmatpush1.bf16.msra.mxu0 %v2206_v24 }
 0x597   : > { %v2066_v31 = vpop.f32.mrb[0].mxu0 }
 0x598   : > { %v1235_v33 = vpop.f32.mrb[1].mxu0 }
 0x599   : > { %v2067_v37 = vpop.f32.mrb[2].mxu0 }
 0x59a   : > { %v1301_v38 = vpack.c.bf16 %v2067_v37, %v2066_v31  ;;  %v1238_v28 = vpop.f32.mrb[3].mxu0 }
 0x59b   : > { %v1299_v51 = vpack.c.bf16 %v1238_v28, %v1235_v33  ;;  %v1640_v33 = vld [vmem:[%s3044_s18 + $0x48] sm:$0xff]  ;;  %v1641_v28 = vld [vmem:[%s3044_s18 + $0x50] sm:$0xff] }
 0x59d   : > { %1550 = vmatprep.mubr.bf16.mxu0 %v1299_v51 }
 0x59e   : > { %1551 = vmatmul.mubr.bf16.vlgmr.msra.gmra.mrb[16].mxu0 %v1298_v8 }
 0x59f   : > { %v2070_v40 = vpop.f32.mrb[4].mxu0  ;;  %1560 = vmatprep.mubr.bf16.mxu0 %v1301_v38 }
 0x5a0   : > { %v1251_v18 = vpop.f32.mrb[5].mxu0 }
 0x5a1   : > { %v2071_v42 = vpop.f32.mrb[6].mxu0 }
 0x5a2   : > { %v1305_v19 = vpack.c.bf16 %v2071_v42, %v2070_v40  ;;  %v1254_v7 = vpop.f32.mrb[7].mxu0  ;;  %v1642_v42 = vld [vmem:[%s3044_s18 + $0x58] sm:$0xff] }
 0x5a3   : > { %v1303_v58 = vpack.c.bf16 %v1254_v7, %v1251_v18 }
 0x5a6   : > { %1561 = vmatmul.mubr.bf16.gmra.mrb[20].mxu0 %v1300_v15  ;;  %v1346_v15 = vld [vmem:[%s3156_s2] sm:$0x3] }
 0x5a7   : > { %v2074_v41 = vpop.f32.mrb[8].mxu0  ;;  %1570 = vmatprep.mubr.bf16.mxu0 %v1303_v58  ;;  %v3046_v56 = vrot.slane %v1346_v15, %v1350_v52  ;;  %v3048_v57 = vrot.slane %v1346_v15, %v1354_v22  ;;  %v1646_v52 = vld [vmem:[%s3044_s18 + $0x78] sm:$0xff] }
 0x5a8   : > { %v1267_v63 = vpop.f32.mrb[9].mxu0 }
 0x5a9   : > { %v2075_v32 = vpop.f32.mrb[10].mxu0 }
 0x5aa   : > { %v1309_v14 = vpack.c.bf16 %v2075_v32, %v2074_v41  ;;  %v1270_v44 = vpop.f32.mrb[11].mxu0  ;;  %v1643_v32 = vld [vmem:[%s3044_s18 + $0x60] sm:$0xff] }
 0x5ab   : > { %v1307_v34 = vpack.c.bf16 %v1270_v44, %v1267_v63 }
 0x5ae   : > { %1571 = vmatmul.mubr.bf16.gmra.mrb[24].mxu0 %v1302_v6 }
 0x5af   : > { %v2078_v10 = vpop.f32.mrb[12].mxu0  ;;  %1580 = vmatprep.mubr.bf16.mxu0 %v1305_v19 }
 0x5b0   : > { %v1283_v54 = vpop.f32.mrb[13].mxu0 }
 0x5b1   : > { %v2079_v8 = vpop.f32.mrb[14].mxu0 }
 0x5b2   : > { %v1313_v2 = vpack.c.bf16 %v2079_v8, %v2078_v10  ;;  %v1286_v21 = vpop.f32.mrb[15].mxu0  ;;  %v1645_v8 = vld [vmem:[%s3044_s18 + $0x70] sm:$0xff] }
 0x5b3   : > { %v1311_v61 = vpack.c.bf16 %v1286_v21, %v1283_v54 }
 0x5b6   : > { %1581 = vmatmul.mubr.bf16.gmra.mrb[28].mxu0 %v1304_v59 }
 0x5b7   : > { %1590 = vmatprep.mubr.bf16.mxu0 %v1307_v34  ;;  %v1644_v34 = vld [vmem:[%s3044_s18 + $0x68] sm:$0xff] }
 0x5be   : > { %1591 = vmatmul.mubr.bf16.gmra.mrb[32].mxu0 %v1306_v9 }
 0x5bf   : > { %1600 = vmatprep.mubr.bf16.mxu0 %v1309_v14 }
 0x5c6   : > { %1601 = vmatmul.mubr.bf16.gmra.mrb[36].mxu0 %v1308_v60  ;;  %v1633_v60 = vld [vmem:[%s3044_s18 + $0x10] sm:$0xff] }
 0x5c7   : > { %1610 = vmatprep.mubr.bf16.mxu0 %v1311_v61 }
 0x5ce   : > { %1611 = vmatmul.mubr.bf16.gmra.mrb[40].mxu0 %v1310_v53 }
 0x5cf   : > { %1620 = vmatprep.mubr.bf16.mxu0 %v1313_v2 }
 0x5d6   : > { %1621 = vmatmul.mubr.bf16.gmra.mrb[44].mxu0 %v1312_v43 }
 0x671   : > { %v1552_v59 = vpop.f32.mrb[16].mxu0 }
 0x672   : > { %v1553_v6 = vadd.f32 %v1552_v59, %v3046_v56  ;;  %v1554_v23 = vpop.f32.mrb[17].mxu0 }
 0x673   : > { %v1555_v17 = vadd.f32 %v1554_v23, %v3048_v57  ;;  %v1556_v46 = vpop.f32.mrb[18].mxu0  ;;  %v1647_v23 = vld [vmem:[%s3044_s18 + $0x80] sm:$0xff] }
 0x674   : > { %v1663_v48 = vadd.f32 %v1631_v4, %v1553_v6  ;;  %v1557_v9 = vadd.f32 %v1556_v46, %v3046_v56  ;;  %v1558_v49 = vpop.f32.mrb[19].mxu0  ;;  %v1648_v46 = vld [vmem:[%s3044_s18 + $0x88] sm:$0xff] }
 0x675   : > { %v1664_v36 = vadd.f32 %v1632_v1, %v1555_v17  ;;  %v1559_v43 = vadd.f32 %v1558_v49, %v3048_v57 }
 0x676   : > { %1695 = vst [vmem:[%s3056_s20] sm:$0xff] %v1663_v48  ;;  %v1665_v12 = vadd.f32 %v1633_v60, %v1557_v9  ;;  %v1649_v9 = vld [vmem:[%s3044_s18 + $0x90] sm:$0xff] }
 0x677   : > { %1696 = vst [vmem:[%s3056_s20 + $0x8] sm:$0xff] %v1664_v36  ;;  %v1666_v53 = vadd.f32 %v1634_v11, %v1559_v43  ;;  %v1650_v43 = vld [vmem:[%s3044_s18 + $0x98] sm:$0xff] }
 0x678   : > { %1697 = vst [vmem:[%s3056_s20 + $0x10] sm:$0xff] %v1665_v12 }
 0x679   : > { %1698 = vst [vmem:[%s3056_s20 + $0x18] sm:$0xff] %v1666_v53  ;;  %v1562_v39 = vpop.f32.mrb[20].mxu0 }
 0x67a   : > { %v1563_v35 = vadd.f32 %v1562_v39, %v3046_v56  ;;  %v1564_v3 = vpop.f32.mrb[21].mxu0 }
 0x67b   : > { %v1565_v26 = vadd.f32 %v1564_v3, %v3048_v57  ;;  %v1566_v13 = vpop.f32.mrb[22].mxu0  ;;  %v1651_v3 = vld [vmem:[%s3044_s18 + $0xa0] sm:$0xff] }
 0x67c   : > { %v1667_v16 = vadd.f32 %v1635_v62, %v1563_v35  ;;  %v1567_v0 = vadd.f32 %v1566_v13, %v3046_v56  ;;  %v1568_v47 = vpop.f32.mrb[23].mxu0  ;;  %v1652_v13 = vld [vmem:[%s3044_s18 + $0xa8] sm:$0xff] }
 0x67d   : > { %v1668_v20 = vadd.f32 %v1636_v5, %v1565_v26  ;;  %v1569_v55 = vadd.f32 %v1568_v47, %v3048_v57 }
 0x67e   : > { %1699 = vst [vmem:[%s3056_s20 + $0x20] sm:$0xff] %v1667_v16  ;;  %v1669_v25 = vadd.f32 %v1637_v45, %v1567_v0  ;;  %v1653_v0 = vld [vmem:[%s3044_s18 + $0xb0] sm:$0xff] }
 0x67f   : > { %1700 = vst [vmem:[%s3056_s20 + $0x28] sm:$0xff] %v1668_v20  ;;  %v1670_v27 = vadd.f32 %v1638_v50, %v1569_v55  ;;  %v1654_v55 = vld [vmem:[%s3044_s18 + $0xb8] sm:$0xff] }
 0x680   : > { %1701 = vst [vmem:[%s3056_s20 + $0x30] sm:$0xff] %v1669_v25 }
 0x681   : > { %1702 = vst [vmem:[%s3056_s20 + $0x38] sm:$0xff] %v1670_v27  ;;  %v1572_v29 = vpop.f32.mrb[24].mxu0 }
 0x682   : > { %v1573_v24 = vadd.f32 %v1572_v29, %v3046_v56  ;;  %v1574_v31 = vpop.f32.mrb[25].mxu0 }
 0x683   : > { %v1575_v37 = vadd.f32 %v1574_v31, %v3048_v57  ;;  %v1576_v38 = vpop.f32.mrb[26].mxu0  ;;  %v1655_v31 = vld [vmem:[%s3044_s18 + $0xc0] sm:$0xff] }
 0x684   : > { %v1671_v51 = vadd.f32 %v1639_v30, %v1573_v24  ;;  %v1577_v40 = vadd.f32 %v1576_v38, %v3046_v56  ;;  %v1578_v18 = vpop.f32.mrb[27].mxu0  ;;  %v1656_v38 = vld [vmem:[%s3044_s18 + $0xc8] sm:$0xff] }
 0x685   : > { %v1672_v19 = vadd.f32 %v1640_v33, %v1575_v37  ;;  %v1579_v7 = vadd.f32 %v1578_v18, %v3048_v57 }
 0x686   : > { %1703 = vst [vmem:[%s3056_s20 + $0x40] sm:$0xff] %v1671_v51  ;;  %v1673_v58 = vadd.f32 %v1641_v28, %v1577_v40  ;;  %v1657_v40 = vld [vmem:[%s3044_s18 + $0xd0] sm:$0xff] }
 0x687   : > { %1704 = vst [vmem:[%s3056_s20 + $0x48] sm:$0xff] %v1672_v19  ;;  %v1674_v41 = vadd.f32 %v1642_v42, %v1579_v7  ;;  %v1658_v7 = vld [vmem:[%s3044_s18 + $0xd8] sm:$0xff] }
 0x688   : > { %1705 = vst [vmem:[%s3056_s20 + $0x50] sm:$0xff] %v1673_v58 }
 0x689   : > { %1706 = vst [vmem:[%s3056_s20 + $0x58] sm:$0xff] %v1674_v41  ;;  %v1582_v63 = vpop.f32.mrb[28].mxu0 }
 0x68a   : > { %v1583_v14 = vadd.f32 %v1582_v63, %v3046_v56  ;;  %v1584_v44 = vpop.f32.mrb[29].mxu0 }
 0x68b   : > { %v1585_v10 = vadd.f32 %v1584_v44, %v3048_v57  ;;  %v1586_v54 = vpop.f32.mrb[30].mxu0  ;;  %v1659_v44 = vld [vmem:[%s3044_s18 + $0xe0] sm:$0xff] }
 0x68c   : > { %v1675_v2 = vadd.f32 %v1643_v32, %v1583_v14  ;;  %v1587_v21 = vadd.f32 %v1586_v54, %v3046_v56  ;;  %v1588_v61 = vpop.f32.mrb[31].mxu0  ;;  %v1660_v54 = vld [vmem:[%s3044_s18 + $0xe8] sm:$0xff] }
 0x68d   : > { %v1676_v15 = vadd.f32 %v1644_v34, %v1585_v10  ;;  %v1589_v22 = vadd.f32 %v1588_v61, %v3048_v57 }
 0x68e   : > { %1707 = vst [vmem:[%s3056_s20 + $0x60] sm:$0xff] %v1675_v2  ;;  %v1677_v59 = vadd.f32 %v1645_v8, %v1587_v21  ;;  %v1661_v21 = vld [vmem:[%s3044_s18 + $0xf0] sm:$0xff] }
 0x68f   : > { %1708 = vst [vmem:[%s3056_s20 + $0x68] sm:$0xff] %v1676_v15  ;;  %v1678_v4 = vadd.f32 %v1646_v52, %v1589_v22  ;;  %v1662_v22 = vld [vmem:[%s3044_s18 + $0xf8] sm:$0xff] }
 0x690   : > { %1709 = vst [vmem:[%s3056_s20 + $0x70] sm:$0xff] %v1677_v59 }
 0x691   : > { %1710 = vst [vmem:[%s3056_s20 + $0x78] sm:$0xff] %v1678_v4  ;;  %v1592_v6 = vpop.f32.mrb[32].mxu0 }
 0x692   : > { %v1593_v1 = vadd.f32 %v1592_v6, %v3046_v56  ;;  %v1594_v17 = vpop.f32.mrb[33].mxu0 }
 0x693   : > { %v1595_v60 = vadd.f32 %v1594_v17, %v3048_v57  ;;  %v1596_v48 = vpop.f32.mrb[34].mxu0 }
 0x694   : > { %v1679_v49 = vadd.f32 %v1647_v23, %v1593_v1  ;;  %v1597_v11 = vadd.f32 %v1596_v48, %v3046_v56  ;;  %v1598_v36 = vpop.f32.mrb[35].mxu0 }
 0x695   : > { %v1680_v12 = vadd.f32 %v1648_v46, %v1595_v60  ;;  %v1599_v53 = vadd.f32 %v1598_v36, %v3048_v57 }
 0x696   : > { %1711 = vst [vmem:[%s3056_s20 + $0x80] sm:$0xff] %v1679_v49  ;;  %v1681_v39 = vadd.f32 %v1649_v9, %v1597_v11 }
 0x697   : > { %1712 = vst [vmem:[%s3056_s20 + $0x88] sm:$0xff] %v1680_v12  ;;  %v1682_v62 = vadd.f32 %v1650_v43, %v1599_v53 }
 0x698   : > { %1713 = vst [vmem:[%s3056_s20 + $0x90] sm:$0xff] %v1681_v39 }
 0x699   : > { %1714 = vst [vmem:[%s3056_s20 + $0x98] sm:$0xff] %v1682_v62  ;;  %v1602_v35 = vpop.f32.mrb[36].mxu0 }
 0x69a   : > { %v1603_v5 = vadd.f32 %v1602_v35, %v3046_v56  ;;  %v1604_v26 = vpop.f32.mrb[37].mxu0 }
 0x69b   : > { %v1605_v45 = vadd.f32 %v1604_v26, %v3048_v57  ;;  %v1606_v16 = vpop.f32.mrb[38].mxu0 }
 0x69c   : > { %v1683_v47 = vadd.f32 %v1651_v3, %v1603_v5  ;;  %v1607_v50 = vadd.f32 %v1606_v16, %v3046_v56  ;;  %v1608_v20 = vpop.f32.mrb[39].mxu0 }
 0x69d   : > { %v1684_v25 = vadd.f32 %v1652_v13, %v1605_v45  ;;  %v1609_v27 = vadd.f32 %v1608_v20, %v3048_v57 }
 0x69e   : > { %1715 = vst [vmem:[%s3056_s20 + $0xa0] sm:$0xff] %v1683_v47  ;;  %v1685_v29 = vadd.f32 %v1653_v0, %v1607_v50 }
 0x69f   : > { %1716 = vst [vmem:[%s3056_s20 + $0xa8] sm:$0xff] %v1684_v25  ;;  %v1686_v30 = vadd.f32 %v1654_v55, %v1609_v27 }
 0x6a0   : > { %1717 = vst [vmem:[%s3056_s20 + $0xb0] sm:$0xff] %v1685_v29 }
 0x6a1   : > { %1718 = vst [vmem:[%s3056_s20 + $0xb8] sm:$0xff] %v1686_v30  ;;  %v1612_v24 = vpop.f32.mrb[40].mxu0 }
 0x6a2   : > { %v1613_v33 = vadd.f32 %v1612_v24, %v3046_v56  ;;  %v1614_v37 = vpop.f32.mrb[41].mxu0 }
 0x6a3   : > { %v1615_v28 = vadd.f32 %v1614_v37, %v3048_v57  ;;  %v1616_v51 = vpop.f32.mrb[42].mxu0 }
 0x6a4   : > { %v1687_v18 = vadd.f32 %v1655_v31, %v1613_v33  ;;  %v1617_v42 = vadd.f32 %v1616_v51, %v3046_v56  ;;  %v1618_v19 = vpop.f32.mrb[43].mxu0 }
 0x6a5   : > { %v1688_v58 = vadd.f32 %v1656_v38, %v1615_v28  ;;  %v1619_v41 = vadd.f32 %v1618_v19, %v3048_v57 }
 0x6a6   : > { %1719 = vst [vmem:[%s3056_s20 + $0xc0] sm:$0xff] %v1687_v18  ;;  %v1689_v63 = vadd.f32 %v1657_v40, %v1617_v42 }
 0x6a7   : > { %1720 = vst [vmem:[%s3056_s20 + $0xc8] sm:$0xff] %v1688_v58  ;;  %v1690_v32 = vadd.f32 %v1658_v7, %v1619_v41 }
 0x6a8   : > { %1721 = vst [vmem:[%s3056_s20 + $0xd0] sm:$0xff] %v1689_v63 }
 0x6a9   : > { %1722 = vst [vmem:[%s3056_s20 + $0xd8] sm:$0xff] %v1690_v32  ;;  %v1622_v14 = vpop.f32.mrb[44].mxu0 }
 0x6aa   : > { %v1623_v34 = vadd.f32 %v1622_v14, %v3046_v56  ;;  %v1624_v10 = vpop.f32.mrb[45].mxu0 }
 0x6ab   : > { %v1625_v8 = vadd.f32 %v1624_v10, %v3048_v57  ;;  %v1626_v2 = vpop.f32.mrb[46].mxu0 }
 0x6ac   : > { %v1691_v61 = vadd.f32 %v1659_v44, %v1623_v34  ;;  %v1627_v52 = vadd.f32 %v1626_v2, %v3046_v56  ;;  %v1628_v15 = vpop.f32.mrb[47].mxu0 }
 0x6ad   : > { %v1692_v59 = vadd.f32 %v1660_v54, %v1625_v8  ;;  %v1629_v4 = vadd.f32 %v1628_v15, %v3048_v57 }
 0x6ae   : > { %1723 = vst [vmem:[%s3056_s20 + $0xe0] sm:$0xff] %v1691_v61  ;;  %v1693_v6 = vadd.f32 %v1661_v21, %v1627_v52 }
 0x6af   : > { %1724 = vst [vmem:[%s3056_s20 + $0xe8] sm:$0xff] %v1692_v59  ;;  %v1694_v23 = vadd.f32 %v1662_v22, %v1629_v4 }
 0x6b0   : > { %1725 = vst [vmem:[%s3056_s20 + $0xf0] sm:$0xff] %v1693_v6 }
 0x6b1   : > { %1726 = vst [vmem:[%s3056_s20 + $0xf8] sm:$0xff] %v1694_v23 }
 0x6b2 PF: > { %s14_s15 = sadd.s32 1, %s2343_s15  }
 0x6b3   : > { %p11_p4 = scmp.ge.s32.totalorder %s14_s15, 4  }
 0x6b5   :  { %13 = sbr.rel (!%p11_p4) target bundleno = 1 (0x1), region = 69 }

// kernel: _lambda_.9
= control target key start
LH: loop header
LB: loop body
LE: loop exit
PB: predicated region body
PF: predicated region fallthrough
CT: control target
= control target key end

     0   :  { %s2578_s18 = smov 0   ;;  %s2580_s19 = smov 0   ;;  %s3555_s0 = inlined_call_operand.vmem [shape: f32[256,256], index: 0, kind: input, shape index: {}]   ;;  %s3556_s1 = inlined_call_operand.vmem [shape: f32[1,256], index: 1, kind: input, shape index: {}]   ;;  %s3557_s2 = inlined_call_operand.vmem [shape: f32[1,256], index: 2, kind: input, shape index: {}]   ;;  %s3558_s3 = inlined_call_operand.vmem [shape: bf16[256,768], index: 3, kind: input, shape index: {}]   ;;  %s3559_s4 = inlined_call_operand.vmem [shape: f32[1,768], index: 4, kind: input, shape index: {}]   ;;  %s3560_s5 = inlined_call_operand.vmem [shape: bf16[256,768], index: 5, kind: output, shape index: {}]  }
   0x1   :  { %s2582_s20 = smov 0  }
   0x2 LB: > { %s27_s21 = sadd.s32 1, %s2542_s19  ;;  %p2090_p0 = scmp.ge.s32.totalorder %s2546_s20, 1  ;;  %s2546_s20 = sphi %s2582_s20, %s15_s20   ;;  %s2542_s19 = sphi %s2580_s19, %s3562_s19   ;;  %s2538_s18 = sphi %s2578_s18, %s3561_s18  }
   0x3   : > { %p29_p1 = scmp.ge.s32.totalorder %s27_s21, 2  ;;  %p224_p2 = scmp.lt.s32.totalorder %s2546_s20, 3 }
   0x5   : > { %s3564_s21 = smov (%p29_p1, %s27_s21), 0  ;;  %p225_p3 = pnand %p2090_p0, %p224_p2 }
   0x6   : > { %s2091_s22 = sshll.u32 (!%p225_p3), %s2538_s18, 4  ;;  %v2348_v48 = vld [vmem:[%s3558_s3 + $0x4] ss:$24 sps:$4 sm:$0xff] (!%p225_p3)   ;;  %v2352_v50 = vld [vmem:[%s3558_s3] ss:$24 sps:$4 sm:$0xff] (!%p225_p3)  }
   0x7   : > { %228 = sbr.rel (%p225_p3) target bundleno = 648 (0x288), region = 40  ;;  %p268_p4 = scmp.lt.s32.totalorder (!%p225_p3), %s2091_s22, 31  ;;  %v2350_v49 = vld [vmem:[%s3558_s3 + $0xc] ss:$24 sps:$4 sm:$0xff] (!%p225_p3)   ;;  %v2353_v51 = vld [vmem:[%s3558_s3 + $0x8] ss:$24 sps:$4 sm:$0xff] (!%p225_p3)   ;;  %1298 = vmatprep.subr.bf16.mxu0 (!%p225_p3), %v2348_v48 }
   0x8   : > { %v2354_v52 = vld [vmem:[%s3558_s3 + $0x34] ss:$24 sps:$4 sm:$0xff] (!%p225_p3)   ;;  %1411 = vmatprep.subr.bf16.mxu1 (!%p225_p3), %v2350_v49  ;;  %1299 = vmatpush1.bf16.msra.mxu0 (!%p225_p3), %v2352_v50  ;;  %v2358_v54 = vld [vmem:[%s3558_s3 + $0x30] ss:$24 sps:$4 sm:$0xff] (!%p225_p3)   ;;  %v2360_v56 = vld [vmem:[%s3558_s3 + $0x64] ss:$24 sps:$4 sm:$0xff] (!%p225_p3)  }
   0x9   : > { %v2356_v53 = vld [vmem:[%s3558_s3 + $0x3c] ss:$24 sps:$4 sm:$0xff] (!%p225_p3)   ;;  %1412 = vmatpush1.bf16.msra.mxu1 (!%p225_p3), %v2353_v51  ;;  %v2359_v55 = vld [vmem:[%s3558_s3 + $0x38] ss:$24 sps:$4 sm:$0xff] (!%p225_p3)   ;;  %1300 = vmatprep.subr.bf16.mxu0 (!%p225_p3), %v2354_v52  ;;  %v2362_v57 = vld [vmem:[%s3558_s3 + $0x6c] ss:$24 sps:$4 sm:$0xff] (!%p225_p3)  }
   0xa   : > { %1413 = vmatprep.subr.bf16.mxu1 (!%p225_p3), %v2356_v53  ;;  %v2364_v58 = vld [vmem:[%s3558_s3 + $0x60] ss:$24 sps:$4 sm:$0xff] (!%p225_p3)   ;;  %v2366_v60 = vld [vmem:[%s3558_s3 + $0x94] ss:$24 sps:$4 sm:$0xff] (!%p225_p3)   ;;  %v2370_v62 = vld [vmem:[%s3558_s3 + $0x90] ss:$24 sps:$4 sm:$0xff] (!%p225_p3)  }
   0xb   : > { %v2365_v59 = vld [vmem:[%s3558_s3 + $0x68] ss:$24 sps:$4 sm:$0xff] (!%p225_p3)   ;;  %v2368_v61 = vld [vmem:[%s3558_s3 + $0x9c] ss:$24 sps:$4 sm:$0xff] (!%p225_p3)   ;;  %v2371_v63 = vld [vmem:[%s3558_s3 + $0x98] ss:$24 sps:$4 sm:$0xff] (!%p225_p3)  }
   0xc   : > { %1301 = vmatpush1.bf16.msra.mxu0 (!%p225_p3), %v2358_v54  ;;  %v2396_v48 = vld [vmem:[%s3558_s3 + $0x184] ss:$24 sps:$4 sm:$0xff] (!%p225_p3)   ;;  %v2400_v50 = vld [vmem:[%s3558_s3 + $0x180] ss:$24 sps:$4 sm:$0xff] (!%p225_p3)   ;;  %v2402_v52 = vld [vmem:[%s3558_s3 + $0x1b4] ss:$24 sps:$4 sm:$0xff] (!%p225_p3)  }
   0xd   : > { %1414 = vmatpush1.bf16.msra.mxu1 (!%p225_p3), %v2359_v55  ;;  %1302 = vmatprep.subr.bf16.mxu0 (!%p225_p3), %v2360_v56  ;;  %v2398_v49 = vld [vmem:[%s3558_s3 + $0x18c] ss:$24 sps:$4 sm:$0xff] (!%p225_p3)   ;;  %v2401_v51 = vld [vmem:[%s3558_s3 + $0x188] ss:$24 sps:$4 sm:$0xff] (!%p225_p3)   ;;  %v2404_v53 = vld [vmem:[%s3558_s3 + $0x1bc] ss:$24 sps:$4 sm:$0xff] (!%p225_p3)  }
   0xe   : > { %s3566_s22 = smov (!%p268_p4, %s2091_s22), 31  ;;  %1415 = vmatprep.subr.bf16.mxu1 %v2362_v57 }
   0xf   : > { %s2242_s23 = sshll.u32 %s3566_s22, 4  ;;  %s2323_s11 = smul.u32 24, %s3566_s22 }
  0x10   : > { %s2602_s26 = scalar_lea.vmem %s3555_s0, %s2242_s23  ;;  %1303 = vmatpush1.bf16.msra.mxu0 %v2364_v58 }
  0x11   : > { %v2605_v0 = vld [vmem:[%s2602_s26] sm:$0xff]  ;;  %v2608_v1 = vld [vmem:[%s2602_s26 + $0x8] sm:$0xff]  ;;  %v2619_v5 = vld [vmem:[%s2602_s26 + $0x10] sm:$0xff]  ;;  %1416 = vmatpush1.bf16.msra.mxu1 %v2365_v59  ;;  %1304 = vmatprep.subr.bf16.mxu0 %v2366_v60  ;;  %s3396_s14 = scalar_lea.vmem %s3560_s5, %s2323_s11 }
  0x12   : > { %v2611_v2 = vld [vmem:[%s2602_s26 + $0x20] sm:$0xff]  ;;  %v329_v3 = vadd.f32 %v2608_v1, %v2605_v0  ;;  %v2616_v4 = vld [vmem:[%s2602_s26 + $0x28] sm:$0xff]  ;;  %v2622_v6 = vld [vmem:[%s2602_s26 + $0x18] sm:$0xff]  ;;  %1417 = vmatprep.subr.bf16.mxu1 %v2368_v61 }
  0x13   : > { %v335_v7 = vadd.f32 %v2616_v4, %v2611_v2  ;;  %v2627_v8 = vld [vmem:[%s2602_s26 + $0x30] sm:$0xff]  ;;  %v2630_v9 = vld [vmem:[%s2602_s26 + $0x38] sm:$0xff]  ;;  %v332_v10 = vadd.f32 %v2622_v6, %v2619_v5  ;;  %v2637_v12 = vld [vmem:[%s2602_s26 + $0x40] sm:$0xff] }
  0x14   : > { %330 = vadd.xlane.f32.xlu0 %v329_v3  ;;  %v338_v11 = vadd.f32 %v2630_v9, %v2627_v8  ;;  %v2640_v13 = vld [vmem:[%s2602_s26 + $0x48] sm:$0xff]  ;;  %v2643_v14 = vld [vmem:[%s2602_s26 + $0x50] sm:$0xff]  ;;  %v2646_v15 = vld [vmem:[%s2602_s26 + $0x58] sm:$0xff]  ;;  %1305 = vmatpush1.bf16.msra.mxu0 %v2370_v62 }
  0x15   : > { %336 = vadd.xlane.f32.xlu1 %v335_v7  ;;  %v341_v16 = vadd.f32 %v2640_v13, %v2637_v12  ;;  %v344_v17 = vadd.f32 %v2646_v15, %v2643_v14  ;;  %v2653_v18 = vld [vmem:[%s2602_s26 + $0x60] sm:$0xff]  ;;  %v2656_v19 = vld [vmem:[%s2602_s26 + $0x68] sm:$0xff]  ;;  %v2659_v20 = vld [vmem:[%s2602_s26 + $0x70] sm:$0xff]  ;;  %1418 = vmatpush1.bf16.msra.mxu1 %v2371_v63 }
  0x16   : > { %v2662_v21 = vld [vmem:[%s2602_s26 + $0x78] sm:$0xff]  ;;  %v2665_v22 = vld [vmem:[%s2602_s26 + $0x80] sm:$0xff]  ;;  %v2668_v23 = vld [vmem:[%s2602_s26 + $0x88] sm:$0xff]  ;;  %v347_v24 = vadd.f32 %v2656_v19, %v2653_v18 }
  0x17   : > { %v2673_v25 = vld [vmem:[%s2602_s26 + $0x90] sm:$0xff]  ;;  %v2676_v26 = vld [vmem:[%s2602_s26 + $0x98] sm:$0xff]  ;;  %v350_v27 = vadd.f32 %v2662_v21, %v2659_v20  ;;  %v2681_v28 = vld [vmem:[%s2602_s26 + $0xa0] sm:$0xff]  ;;  %v353_v30 = vadd.f32 %v2668_v23, %v2665_v22 }
  0x18   : > { %333 = vadd.xlane.f32.xlu0 %v332_v10  ;;  %v2684_v29 = vld [vmem:[%s2602_s26 + $0xa8] sm:$0xff]  ;;  %v2689_v31 = vld [vmem:[%s2602_s26 + $0xb0] sm:$0xff]  ;;  %v2692_v32 = vld [vmem:[%s2602_s26 + $0xb8] sm:$0xff]  ;;  %v356_v33 = vadd.f32 %v2676_v26, %v2673_v25 }
  0x19   : > { %339 = vadd.xlane.f32.xlu1 %v338_v11  ;;  %v2697_v34 = vld [vmem:[%s2602_s26 + $0xc0] sm:$0xff]  ;;  %v2700_v35 = vld [vmem:[%s2602_s26 + $0xc8] sm:$0xff]  ;;  %v359_v36 = vadd.f32 %v2684_v29, %v2681_v28  ;;  %v2705_v37 = vld [vmem:[%s2602_s26 + $0xd0] sm:$0xff]  ;;  %v362_v39 = vadd.f32 %v2692_v32, %v2689_v31 }
  0x1a   : > { %v2708_v38 = vld [vmem:[%s2602_s26 + $0xd8] sm:$0xff]  ;;  %v2713_v40 = vld [vmem:[%s2602_s26 + $0xe0] sm:$0xff]  ;;  %v2716_v41 = vld [vmem:[%s2602_s26 + $0xe8] sm:$0xff]  ;;  %v365_v42 = vadd.f32 %v2700_v35, %v2697_v34 }
  0x1b   : > { %v2721_v43 = vld [vmem:[%s2602_s26 + $0xf0] sm:$0xff]  ;;  %v2724_v44 = vld [vmem:[%s2602_s26 + $0xf8] sm:$0xff]  ;;  %v368_v45 = vadd.f32 %v2708_v38, %v2705_v37  ;;  %v371_v46 = vadd.f32 %v2716_v41, %v2713_v40  ;;  %v2374_v7 = vld [vmem:[%s3558_s3 + $0xcc] ss:$24 sps:$4 sm:$0xff]  }
  0x1c   : > { %342 = vadd.xlane.f32.xlu0 %v341_v16  ;;  %v374_v47 = vadd.f32 %v2724_v44, %v2721_v43  ;;  %v2372_v3 = vld [vmem:[%s3558_s3 + $0xc4] ss:$24 sps:$4 sm:$0xff]   ;;  %v2376_v10 = vld [vmem:[%s3558_s3 + $0xc0] ss:$24 sps:$4 sm:$0xff]   ;;  %1419 = vmatprep.subr.bf16.mxu1 %v2374_v7  ;;  %v2378_v16 = vld [vmem:[%s3558_s3 + $0xf4] ss:$24 sps:$4 sm:$0xff]  }
  0x1d   : > { %345 = vadd.xlane.f32.xlu1 %v344_v17  ;;  %v2377_v11 = vld [vmem:[%s3558_s3 + $0xc8] ss:$24 sps:$4 sm:$0xff]   ;;  %1306 = vmatprep.subr.bf16.mxu0 %v2372_v3  ;;  %v2380_v17 = vld [vmem:[%s3558_s3 + $0xfc] ss:$24 sps:$4 sm:$0xff]  }
  0x1e   : > { %1307 = vmatpush1.bf16.msra.mxu0 %v2376_v10  ;;  %1420 = vmatpush1.bf16.msra.mxu1 %v2377_v11 }
  0x1f   : > { %1308 = vmatprep.subr.bf16.mxu0 %v2378_v16  ;;  %1421 = vmatprep.subr.bf16.mxu1 %v2380_v17 }
  0x20   : > { %348 = vadd.xlane.f32.xlu0 %v347_v24  ;;  %v2382_v24 = vld [vmem:[%s3558_s3 + $0xf0] ss:$24 sps:$4 sm:$0xff]  }
  0x21   : > { %351 = vadd.xlane.f32.xlu1 %v350_v27  ;;  %v2383_v27 = vld [vmem:[%s3558_s3 + $0xf8] ss:$24 sps:$4 sm:$0xff]  }
  0x22   : > { %1309 = vmatpush1.bf16.msra.mxu0 %v2382_v24  ;;  %1422 = vmatpush1.bf16.msra.mxu1 %v2383_v27 }
  0x24   : > { %354 = vadd.xlane.f32.xlu0 %v353_v30  ;;  %v2384_v30 = vld [vmem:[%s3558_s3 + $0x124] ss:$24 sps:$4 sm:$0xff]  }
  0x25   : > { %357 = vadd.xlane.f32.xlu1 %v356_v33  ;;  %v2386_v33 = vld [vmem:[%s3558_s3 + $0x12c] ss:$24 sps:$4 sm:$0xff]   ;;  %1310 = vmatprep.subr.bf16.mxu0 %v2384_v30 }
  0x26   : > { %1423 = vmatprep.subr.bf16.mxu1 %v2386_v33 }
  0x28   : > { %360 = vadd.xlane.f32.xlu0 %v359_v36  ;;  %v2388_v36 = vld [vmem:[%s3558_s3 + $0x120] ss:$24 sps:$4 sm:$0xff]  }
  0x29   : > { %363 = vadd.xlane.f32.xlu1 %v362_v39  ;;  %v2389_v39 = vld [vmem:[%s3558_s3 + $0x128] ss:$24 sps:$4 sm:$0xff]   ;;  %1311 = vmatpush1.bf16.msra.mxu0 %v2388_v36 }
  0x2a   : > { %1424 = vmatpush1.bf16.msra.mxu1 %v2389_v39 }
  0x2c   : > { %366 = vadd.xlane.f32.xlu0 %v365_v42  ;;  %v2390_v42 = vld [vmem:[%s3558_s3 + $0x154] ss:$24 sps:$4 sm:$0xff]  }
  0x2d   : > { %369 = vadd.xlane.f32.xlu1 %v368_v45  ;;  %v2392_v45 = vld [vmem:[%s3558_s3 + $0x15c] ss:$24 sps:$4 sm:$0xff]   ;;  %1312 = vmatprep.subr.bf16.mxu0 %v2390_v42 }
  0x2e   : > { %1425 = vmatprep.subr.bf16.mxu1 %v2392_v45 }
  0x30   : > { %372 = vadd.xlane.f32.xlu0 %v371_v46  ;;  %v2394_v46 = vld [vmem:[%s3558_s3 + $0x150] ss:$24 sps:$4 sm:$0xff]  }
  0x31   : > { %375 = vadd.xlane.f32.xlu1 %v374_v47  ;;  %v2395_v47 = vld [vmem:[%s3558_s3 + $0x158] ss:$24 sps:$4 sm:$0xff]   ;;  %1313 = vmatpush1.bf16.msra.mxu0 %v2394_v46 }
  0x32   : > { %1426 = vmatpush1.bf16.msra.mxu1 %v2395_v47  ;;  %1314 = vmatprep.subr.bf16.mxu0 %v2396_v48 }
  0x33   : > { %1427 = vmatprep.subr.bf16.mxu1 %v2398_v49 }
  0x35   : > { %1315 = vmatpush1.bf16.msra.mxu0 %v2400_v50 }
  0x36   : > { %1428 = vmatpush1.bf16.msra.mxu1 %v2401_v51  ;;  %1316 = vmatprep.subr.bf16.mxu0 %v2402_v52 }
  0x37   : > { %1429 = vmatprep.subr.bf16.mxu1 %v2404_v53 }
  0xa1   : > { %v331_v54 = vpop.xlane.xlu0 %330 }
  0xa2   : > { %v378_v55 = vmul.f32 0.00390625, %v331_v54  ;;  %v337_v56 = vpop.xlane.xlu1 %336 }
  0xa3   : > { %v380_v57 = vmul.f32 0.00390625, %v337_v56 }
  0xa4   : > { %v2847_v58 = vsub.f32 %v2605_v0, %v378_v55  ;;  %v2850_v59 = vsub.f32 %v2608_v1, %v378_v55 }
  0xa5   : > { %v2853_v60 = vsub.f32 %v2611_v2, %v380_v57  ;;  %v2856_v61 = vsub.f32 %v2616_v4, %v380_v57  ;;  %v334_v62 = vpop.xlane.xlu0 %333 }
  0xa6   : > { %v379_v63 = vmul.f32 0.00390625, %v334_v62  ;;  %v340_v3 = vpop.xlane.xlu1 %339  ;;  %v426_v7 = vmul.f32 %v2847_v58, %v2847_v58  ;;  %v427_v10 = vmul.f32 %v2850_v59, %v2850_v59 }
  0xa7   : > { %v381_v0 = vmul.f32 0.00390625, %v340_v3  ;;  %v430_v1 = vmul.f32 %v2853_v60, %v2853_v60  ;;  %v431_v2 = vmul.f32 %v2856_v61, %v2856_v61 }
  0xa8   : > { %v2867_v11 = vsub.f32 %v2619_v5, %v379_v63  ;;  %v2870_v4 = vsub.f32 %v2622_v6, %v379_v63  ;;  %v458_v16 = vadd.f32 %v427_v10, %v426_v7 }
  0xa9   : > { %v2873_v17 = vsub.f32 %v2627_v8, %v381_v0  ;;  %v2876_v24 = vsub.f32 %v2630_v9, %v381_v0  ;;  %v343_v27 = vpop.xlane.xlu0 %342  ;;  %v464_v36 = vadd.f32 %v431_v2, %v430_v1 }
  0xaa   : > { %v382_v30 = vmul.f32 0.00390625, %v343_v27  ;;  %459 = vadd.xlane.f32.xlu0 %v458_v16  ;;  %v346_v33 = vpop.xlane.xlu1 %345  ;;  %v428_v39 = vmul.f32 %v2867_v11, %v2867_v11  ;;  %v429_v5 = vmul.f32 %v2870_v4, %v2870_v4 }
  0xab   : > { %v383_v6 = vmul.f32 0.00390625, %v346_v33  ;;  %v432_v42 = vmul.f32 %v2873_v17, %v2873_v17  ;;  %v433_v8 = vmul.f32 %v2876_v24, %v2876_v24 }
  0xac   : > { %v2887_v9 = vsub.f32 %v2637_v12, %v382_v30  ;;  %v2890_v45 = vsub.f32 %v2640_v13, %v382_v30  ;;  %v461_v46 = vadd.f32 %v429_v5, %v428_v39 }
  0xad   : > { %v2893_v47 = vsub.f32 %v2643_v14, %v383_v6  ;;  %v2896_v48 = vsub.f32 %v2646_v15, %v383_v6  ;;  %v349_v49 = vpop.xlane.xlu0 %348  ;;  %v467_v52 = vadd.f32 %v433_v8, %v432_v42  ;;  %v2406_v42 = vld [vmem:[%s3558_s3 + $0x1b0] ss:$24 sps:$4 sm:$0xff]  }
  0xae   : > { %v384_v50 = vmul.f32 0.00390625, %v349_v49  ;;  %465 = vadd.xlane.f32.xlu0 %v464_v36  ;;  %462 = vadd.xlane.f32.xlu1 %v461_v46  ;;  %v352_v51 = vpop.xlane.xlu1 %351  ;;  %v434_v12 = vmul.f32 %v2887_v9, %v2887_v9  ;;  %v435_v13 = vmul.f32 %v2890_v45, %v2890_v45  ;;  %v2407_v8 = vld [vmem:[%s3558_s3 + $0x1b8] ss:$24 sps:$4 sm:$0xff]  }
  0xaf   : > { %v385_v53 = vmul.f32 0.00390625, %v352_v51  ;;  %v436_v14 = vmul.f32 %v2893_v47, %v2893_v47  ;;  %v437_v15 = vmul.f32 %v2896_v48, %v2896_v48  ;;  %1317 = vmatpush1.bf16.msra.mxu0 %v2406_v42  ;;  %1430 = vmatpush1.bf16.msra.mxu1 %v2407_v8  ;;  %v2419_v42 = vld [vmem:[%s3558_s3 + $0x218] ss:$24 sps:$4 sm:$0xff]  }
  0xb0   : > { %v2907_v54 = vsub.f32 %v2653_v18, %v384_v50  ;;  %v2910_v55 = vsub.f32 %v2656_v19, %v384_v50  ;;  %v470_v56 = vadd.f32 %v435_v13, %v434_v12 }
  0xb1   : > { %v2913_v57 = vsub.f32 %v2659_v20, %v385_v53  ;;  %v2916_v62 = vsub.f32 %v2662_v21, %v385_v53  ;;  %v355_v63 = vpop.xlane.xlu0 %354  ;;  %v473_v10 = vadd.f32 %v437_v15, %v436_v14 }
  0xb2   : > { %v386_v3 = vmul.f32 0.00390625, %v355_v63  ;;  %468 = vadd.xlane.f32.xlu1 %v467_v52  ;;  %471 = vadd.xlane.f32.xlu0 %v470_v56  ;;  %v358_v7 = vpop.xlane.xlu1 %357  ;;  %v438_v18 = vmul.f32 %v2907_v54, %v2907_v54  ;;  %v439_v19 = vmul.f32 %v2910_v55, %v2910_v55 }
  0xb3   : > { %v387_v0 = vmul.f32 0.00390625, %v358_v7  ;;  %v440_v20 = vmul.f32 %v2913_v57, %v2913_v57  ;;  %v441_v21 = vmul.f32 %v2916_v62, %v2916_v62 }
  0xb4   : > { %v2927_v1 = vsub.f32 %v2665_v22, %v386_v3  ;;  %v2930_v2 = vsub.f32 %v2668_v23, %v386_v3  ;;  %v476_v16 = vadd.f32 %v439_v19, %v438_v18  ;;  %v2412_v18 = vld [vmem:[%s3558_s3 + $0x1e0] ss:$24 sps:$4 sm:$0xff]  }
  0xb5   : > { %v2933_v27 = vsub.f32 %v2673_v25, %v387_v0  ;;  %v2936_v30 = vsub.f32 %v2676_v26, %v387_v0  ;;  %v361_v33 = vpop.xlane.xlu0 %360  ;;  %v479_v5 = vadd.f32 %v441_v21, %v440_v20  ;;  %v2413_v19 = vld [vmem:[%s3558_s3 + $0x1e8] ss:$24 sps:$4 sm:$0xff]  }
  0xb6   : > { %v388_v36 = vmul.f32 0.00390625, %v361_v33  ;;  %474 = vadd.xlane.f32.xlu1 %v473_v10  ;;  %477 = vadd.xlane.f32.xlu0 %v476_v16  ;;  %v364_v39 = vpop.xlane.xlu1 %363  ;;  %v442_v22 = vmul.f32 %v2927_v1, %v2927_v1  ;;  %v443_v23 = vmul.f32 %v2930_v2, %v2930_v2 }
  0xb7   : > { %v389_v6 = vmul.f32 0.00390625, %v364_v39  ;;  %v444_v25 = vmul.f32 %v2933_v27, %v2933_v27  ;;  %v445_v26 = vmul.f32 %v2936_v30, %v2936_v30 }
  0xb8   : > { %v2953_v46 = vsub.f32 %v2681_v28, %v388_v36  ;;  %v2956_v49 = vsub.f32 %v2684_v29, %v388_v36  ;;  %v482_v50 = vadd.f32 %v443_v23, %v442_v22  ;;  %v2416_v22 = vld [vmem:[%s3558_s3 + $0x21c] ss:$24 sps:$4 sm:$0xff]  }
  0xb9   : > { %v2959_v51 = vsub.f32 %v2689_v31, %v389_v6  ;;  %v2962_v52 = vsub.f32 %v2692_v32, %v389_v6  ;;  %v367_v12 = vpop.xlane.xlu0 %366  ;;  %v485_v14 = vadd.f32 %v445_v26, %v444_v25  ;;  %v2408_v31 = vld [vmem:[%s3558_s3 + $0x1e4] ss:$24 sps:$4 sm:$0xff]   ;;  %v2418_v26 = vld [vmem:[%s3558_s3 + $0x210] ss:$24 sps:$4 sm:$0xff]  }
  0xba   : > { %v390_v13 = vmul.f32 0.00390625, %v367_v12  ;;  %480 = vadd.xlane.f32.xlu1 %v479_v5  ;;  %483 = vadd.xlane.f32.xlu0 %v482_v50  ;;  %v370_v53 = vpop.xlane.xlu1 %369  ;;  %v446_v28 = vmul.f32 %v2953_v46, %v2953_v46  ;;  %v447_v29 = vmul.f32 %v2956_v49, %v2956_v49  ;;  %v2410_v32 = vld [vmem:[%s3558_s3 + $0x1ec] ss:$24 sps:$4 sm:$0xff]  }
  0xbb   : > { %v391_v15 = vmul.f32 0.00390625, %v370_v53  ;;  %v448_v56 = vmul.f32 %v2959_v51, %v2959_v51  ;;  %v449_v63 = vmul.f32 %v2962_v52, %v2962_v52  ;;  %1318 = vmatprep.subr.bf16.mxu0 %v2408_v31  ;;  %1431 = vmatprep.subr.bf16.mxu1 %v2410_v32  ;;  %v2414_v5 = vld [vmem:[%s3558_s3 + $0x214] ss:$24 sps:$4 sm:$0xff]  }
  0xbc   : > { %v2979_v3 = vsub.f32 %v2697_v34, %v390_v13  ;;  %v2982_v7 = vsub.f32 %v2700_v35, %v390_v13  ;;  %v488_v10 = vadd.f32 %v447_v29, %v446_v28  ;;  %1319 = vmatpush1.bf16.msra.mxu0 %v2412_v18  ;;  %1432 = vmatpush1.bf16.msra.mxu1 %v2413_v19  ;;  %v2422_v53 = vld [vmem:[%s3558_s3 + $0x24c] ss:$24 sps:$4 sm:$0xff]   ;;  %v2424_v28 = vld [vmem:[%s3558_s3 + $0x240] ss:$24 sps:$4 sm:$0xff]  }
  0xbd   : > { %v2991_v0 = vsub.f32 %v2705_v37, %v391_v15  ;;  %v2994_v34 = vsub.f32 %v2708_v38, %v391_v15  ;;  %v373_v20 = vpop.xlane.xlu0 %372  ;;  %v491_v16 = vadd.f32 %v449_v63, %v448_v56  ;;  %1320 = vmatprep.subr.bf16.mxu0 %v2414_v5  ;;  %1433 = vmatprep.subr.bf16.mxu1 %v2416_v22  ;;  %v2425_v29 = vld [vmem:[%s3558_s3 + $0x248] ss:$24 sps:$4 sm:$0xff]   ;;  %v2426_v32 = vld [vmem:[%s3558_s3 + $0x274] ss:$24 sps:$4 sm:$0xff]   ;;  %v2431_v63 = vld [vmem:[%s3558_s3 + $0x278] ss:$24 sps:$4 sm:$0xff]  }
  0xbe   : > { %v392_v35 = vmul.f32 0.00390625, %v373_v20  ;;  %486 = vadd.xlane.f32.xlu1 %v485_v14  ;;  %489 = vadd.xlane.f32.xlu0 %v488_v10  ;;  %v376_v21 = vpop.xlane.xlu1 %375  ;;  %v450_v33 = vmul.f32 %v2979_v3, %v2979_v3  ;;  %v451_v36 = vmul.f32 %v2982_v7, %v2982_v7  ;;  %v2428_v15 = vld [vmem:[%s3558_s3 + $0x27c] ss:$24 sps:$4 sm:$0xff]   ;;  %v2430_v56 = vld [vmem:[%s3558_s3 + $0x270] ss:$24 sps:$4 sm:$0xff]  }
  0xbf   : > { %v393_v39 = vmul.f32 0.00390625, %v376_v21  ;;  %v452_v37 = vmul.f32 %v2991_v0, %v2991_v0  ;;  %v453_v38 = vmul.f32 %v2994_v34, %v2994_v34  ;;  %v2432_v10 = vld [vmem:[%s3558_s3 + $0x2a4] ss:$24 sps:$4 sm:$0xff]   ;;  %v2436_v19 = vld [vmem:[%s3558_s3 + $0x2a0] ss:$24 sps:$4 sm:$0xff]  }
  0xc0   : > { %v3011_v23 = vsub.f32 %v2713_v40, %v392_v35  ;;  %v3014_v6 = vsub.f32 %v2716_v41, %v392_v35  ;;  %v494_v25 = vadd.f32 %v451_v36, %v450_v33  ;;  %1321 = vmatpush1.bf16.msra.mxu0 %v2418_v26  ;;  %1434 = vmatpush1.bf16.msra.mxu1 %v2419_v42  ;;  %v2434_v18 = vld [vmem:[%s3558_s3 + $0x2ac] ss:$24 sps:$4 sm:$0xff]   ;;  %v2437_v20 = vld [vmem:[%s3558_s3 + $0x2a8] ss:$24 sps:$4 sm:$0xff]   ;;  %v2440_v21 = vld [vmem:[%s3558_s3 + $0x2dc] ss:$24 sps:$4 sm:$0xff]  }
  0xc1   : > { %v3023_v8 = vsub.f32 %v2721_v43, %v393_v39  ;;  %v3026_v50 = vsub.f32 %v2724_v44, %v393_v39  ;;  %v497_v40 = vadd.f32 %v453_v38, %v452_v37  ;;  %v2420_v44 = vld [vmem:[%s3558_s3 + $0x244] ss:$24 sps:$4 sm:$0xff]   ;;  %1435 = vmatprep.subr.bf16.mxu1 %v2422_v53  ;;  %v2438_v35 = vld [vmem:[%s3558_s3 + $0x2d4] ss:$24 sps:$4 sm:$0xff]   ;;  %v2443_v33 = vld [vmem:[%s3558_s3 + $0x2d8] ss:$24 sps:$4 sm:$0xff]   ;;  %v588_v38 = vlaneseq }
  0xc2   : > { %492 = vadd.xlane.f32.xlu1 %v491_v16  ;;  %495 = vadd.xlane.f32.xlu0 %v494_v25  ;;  %v454_v41 = vmul.f32 %v3011_v23, %v3011_v23  ;;  %v455_v12 = vmul.f32 %v3014_v6, %v3014_v6  ;;  %v2442_v16 = vld [vmem:[%s3558_s3 + $0x2d0] ss:$24 sps:$4 sm:$0xff]   ;;  %v2446_v36 = vld [vmem:[%s3558_s3 + $0x14] ss:$24 sps:$4 sm:$0xff]  }
  0xc3   : > { %v456_v13 = vmul.f32 %v3023_v8, %v3023_v8  ;;  %v457_v43 = vmul.f32 %v3026_v50, %v3026_v50  ;;  %1322 = vmatprep.subr.bf16.mxu0 %v2420_v44 }
  0xc4   : > { %v500_v14 = vadd.f32 %v455_v12, %v454_v41  ;;  %1323 = vmatpush1.bf16.msra.mxu0 %v2424_v28  ;;  %1436 = vmatpush1.bf16.msra.mxu1 %v2425_v29 }
  0xc5   : > { %v503_v31 = vadd.f32 %v457_v43, %v456_v13  ;;  %1324 = vmatprep.subr.bf16.mxu0 %v2426_v32  ;;  %1437 = vmatprep.subr.bf16.mxu1 %v2428_v15  ;;  %v586_v32 = vld [vmem:[%s3556_s1] sm:$0x3] }
  0xc6   : > { %498 = vadd.xlane.f32.xlu1 %v497_v40  ;;  %501 = vadd.xlane.f32.xlu0 %v500_v14  ;;  %v3087_v40 = vshrl.u32 %v588_v38, 7 }
  0xc8   : > { %1325 = vmatpush1.bf16.msra.mxu0 %v2430_v56  ;;  %1438 = vmatpush1.bf16.msra.mxu1 %v2431_v63  ;;  %v3090_v14 = vsub.s32 1, %v3087_v40  ;;  %v3093_v28 = vsub.s32 0, %v3087_v40 }
  0xc9   : > { %1326 = vmatprep.subr.bf16.mxu0 %v2432_v10  ;;  %1439 = vmatprep.subr.bf16.mxu1 %v2434_v18 }
  0xca   : > { %504 = vadd.xlane.f32.xlu1 %v503_v31  ;;  %v3099_v18 = vrot.slane %v586_v32, %v3090_v14 }
  0xcc   : > { %1327 = vmatpush1.bf16.msra.mxu0 %v2436_v19  ;;  %1440 = vmatpush1.bf16.msra.mxu1 %v2437_v20 }
  0xcd   : > { %1328 = vmatprep.subr.bf16.mxu0 %v2438_v35  ;;  %1441 = vmatprep.subr.bf16.mxu1 %v2440_v21  ;;  %v630_v35 = vld [vmem:[%s3557_s2] sm:$0x3]  ;;  %v3105_v21 = vrot.slane %v586_v32, %v3093_v28 }
  0xd0   : > { %1329 = vmatpush1.bf16.msra.mxu0 %v2442_v16  ;;  %1442 = vmatpush1.bf16.msra.mxu1 %v2443_v33 }
  0xd1   : > { %1524 = vmatprep.subr.bf16.mxu0 %v2446_v36  ;;  %2291 = vmatprep.subr.bf16.mxu1 %v2446_v36 }
 0x137   : > { %v460_v39 = vpop.xlane.xlu0 %459 }
 0x138   : > { %v506_v37 = vmul.f32 0.00390625, %v460_v39 }
 0x13a   : > { %v522_v5 = vadd.f32 1e-05, %v506_v37 }
 0x13b   : > { %v463_v22 = vpop.xlane.xlu1 %462  ;;  %v466_v25 = vpop.xlane.xlu0 %465 }
 0x13c   : > { %2492 = vrsqrt.f32 %v522_v5  ;;  %v507_v26 = vmul.f32 0.00390625, %v463_v22  ;;  %v508_v42 = vmul.f32 0.00390625, %v466_v25  ;;  %v3111_v22 = vrot.slane %v630_v35, %v3090_v14 }
 0x13e   : > { %v523_v41 = vadd.f32 1e-05, %v507_v26  ;;  %v524_v12 = vadd.f32 1e-05, %v508_v42 }
 0x13f   : > { %v469_v13 = vpop.xlane.xlu1 %468  ;;  %v472_v43 = vpop.xlane.xlu0 %471 }
 0x140   : > { %2494 = vrsqrt.f32 %v523_v41  ;;  %v509_v44 = vmul.f32 0.00390625, %v469_v13  ;;  %v510_v53 = vmul.f32 0.00390625, %v472_v43  ;;  %v3115_v41 = vrot.slane %v630_v35, %v3093_v28 }
 0x141   : > { %2496 = vrsqrt.f32 %v524_v12 }
 0x142   : > { %v525_v29 = vadd.f32 1e-05, %v509_v44  ;;  %v526_v31 = vadd.f32 1e-05, %v510_v53 }
 0x143   : > { %v475_v15 = vpop.xlane.xlu1 %474  ;;  %v478_v56 = vpop.xlane.xlu0 %477 }
 0x144   : > { %2498 = vrsqrt.f32 %v525_v29  ;;  %v511_v63 = vmul.f32 0.00390625, %v475_v15  ;;  %v512_v10 = vmul.f32 0.00390625, %v478_v56 }
 0x145   : > { %2500 = vrsqrt.f32 %v526_v31 }
 0x146   : > { %v2493_v19 = vpop.eup %2492  ;;  %v527_v20 = vadd.f32 1e-05, %v511_v63  ;;  %v528_v37 = vadd.f32 1e-05, %v512_v10 }
 0x147   : > { %v481_v16 = vpop.xlane.xlu1 %480  ;;  %v555_v33 = vmul.f32 %v2493_v19, %v2850_v59  ;;  %v554_v36 = vmul.f32 %v2493_v19, %v2847_v58  ;;  %v484_v38 = vpop.xlane.xlu0 %483 }
 0x148   : > { %2502 = vrsqrt.f32 %v527_v20  ;;  %v513_v39 = vmul.f32 0.00390625, %v481_v16  ;;  %v514_v43 = vmul.f32 0.00390625, %v484_v38 }
 0x149   : > { %v599_v5 = vmul.f32 %v3099_v18, %v555_v33  ;;  %v598_v42 = vmul.f32 %v3105_v21, %v554_v36  ;;  %v2444_v36 = vld [vmem:[%s3558_s3 + $0x10] ss:$24 sps:$4 sm:$0xff]  }
 0x14a   : > { %v2495_v25 = vpop.eup %2494  ;;  %v529_v26 = vadd.f32 1e-05, %v513_v39  ;;  %v530_v16 = vadd.f32 1e-05, %v514_v43 }
 0x14b   : > { %v2497_v12 = vpop.eup %2496  ;;  %v487_v59 = vpop.xlane.xlu1 %486  ;;  %v557_v58 = vmul.f32 %v2495_v25, %v2870_v4  ;;  %v556_v13 = vmul.f32 %v2495_v25, %v2867_v11  ;;  %v643_v31 = vadd.f32 %v3111_v22, %v599_v5  ;;  %v642_v63 = vadd.f32 %v3115_v41, %v598_v42 }
 0x14c   : > { %2504 = vrsqrt.f32 %v529_v26  ;;  %v515_v44 = vmul.f32 0.00390625, %v487_v59  ;;  %v559_v53 = vmul.f32 %v2497_v12, %v2856_v61  ;;  %v558_v11 = vmul.f32 %v2497_v12, %v2853_v60  ;;  %v490_v5 = vpop.xlane.xlu0 %489 }
 0x14d   : > { %2506 = vrsqrt.f32 %v528_v37  ;;  %v601_v29 = vmul.f32 %v3099_v18, %v557_v58  ;;  %v600_v32 = vmul.f32 %v3105_v21, %v556_v13  ;;  %v516_v13 = vmul.f32 0.00390625, %v490_v5 }
 0x14e   : > { %v2499_v15 = vpop.eup %2498  ;;  %v531_v56 = vadd.f32 1e-05, %v515_v44  ;;  %v603_v4 = vmul.f32 %v3099_v18, %v559_v53  ;;  %v602_v25 = vmul.f32 %v3105_v21, %v558_v11  ;;  %v2447_v44 = vld [vmem:[%s3558_s3 + $0x40] ss:$24 sps:$4 sm:$0xff]  }
 0x14f   : > { %v645_v10 = vadd.f32 %v3111_v22, %v601_v29  ;;  %v644_v19 = vadd.f32 %v3115_v41, %v600_v32  ;;  %v561_v61 = vmul.f32 %v2499_v15, %v2876_v24  ;;  %v560_v20 = vmul.f32 %v2499_v15, %v2873_v17  ;;  %v2501_v35 = vpop.eup %2500  ;;  %v493_v33 = vpop.xlane.xlu1 %492  ;;  %v2449_v17 = vld [vmem:[%s3558_s3 + $0x44] ss:$24 sps:$4 sm:$0xff]  }
 0x150   : > { %2508 = vrsqrt.f32 %v531_v56  ;;  %v647_v24 = vadd.f32 %v3111_v22, %v603_v4  ;;  %v517_v42 = vmul.f32 0.00390625, %v493_v33  ;;  %v563_v59 = vmul.f32 %v2501_v35, %v2890_v45  ;;  %v2452_v45 = vld [vmem:[%s3558_s3 + $0x74] ss:$24 sps:$4 sm:$0xff]   ;;  %v496_v4 = vpop.xlane.xlu0 %495 }
 0x151   : > { %v3133_v39 = vpack.c.bf16 %v645_v10, %v643_v31  ;;  %v3135_v37 = vpack.c.bf16 %v644_v19, %v642_v63  ;;  %v605_v60 = vmul.f32 %v3099_v18, %v561_v61  ;;  %v604_v26 = vmul.f32 %v3105_v21, %v560_v20  ;;  %v2450_v20 = vld [vmem:[%s3558_s3 + $0x70] ss:$24 sps:$4 sm:$0xff]  }
 0x152   : > { %v2503_v38 = vpop.eup %2502  ;;  %2510 = vrsqrt.f32 %v530_v16  ;;  %v533_v15 = vadd.f32 1e-05, %v517_v42  ;;  %v646_v56 = vadd.f32 %v3115_v41, %v602_v25  ;;  %v562_v19 = vmul.f32 %v2501_v35, %v2887_v9 }
 0x153   : > { %1330 = vmatprep.mubr.bf16.mxu0 %v3133_v39  ;;  %1443 = vmatprep.mubr.bf16.mxu1 %v3133_v39  ;;  %v649_v12 = vadd.f32 %v3111_v22, %v605_v60  ;;  %v565_v58 = vmul.f32 %v2503_v38, %v2896_v48  ;;  %v648_v53 = vadd.f32 %v3115_v41, %v604_v26  ;;  %v499_v11 = vpop.xlane.xlu1 %498  ;;  %v532_v61 = vadd.f32 1e-05, %v516_v13  ;;  %v2458_v26 = vld [vmem:[%s3558_s3 + $0xd4] ss:$24 sps:$4 sm:$0xff]  }
 0x154   : > { %1331 = vmatmul.mubr.bf16.vlgmr.msra.gmra.mrb[0].mxu0 %v3135_v37  ;;  %1444 = vmatmul.mubr.bf16.vlgmr.msra.gmra.mrb[0].mxu1 %v3135_v37  ;;  %v607_v48 = vmul.f32 %v3099_v18, %v563_v59  ;;  %v564_v63 = vmul.f32 %v2503_v38, %v2893_v47  ;;  %2512 = vrsqrt.f32 %v533_v15  ;;  %v518_v9 = vmul.f32 0.00390625, %v496_v4  ;;  %v2455_v38 = vld [vmem:[%s3558_s3 + $0xa4] ss:$24 sps:$4 sm:$0xff]   ;;  %v2456_v15 = vld [vmem:[%s3558_s3 + $0xd0] ss:$24 sps:$4 sm:$0xff]  }
 0x155   : > { %1525 = vmatpush1.bf16.msra.mxu0 %v2444_v36  ;;  %2307 = vmatpush1.bf16.msra.mxu1 %v2444_v36  ;;  %v3151_v43 = vpack.c.bf16 %v649_v12, %v647_v24  ;;  %v609_v31 = vmul.f32 %v3099_v18, %v565_v58  ;;  %v3171_v16 = vpack.c.bf16 %v648_v53, %v646_v56  ;;  %v519_v35 = vmul.f32 0.00390625, %v499_v11 }
 0x156   : > { %v2505_v29 = vpop.eup %2504  ;;  %1526 = vmatprep.subr.bf16.mxu0 %v2449_v17  ;;  %2292 = vmatprep.subr.bf16.mxu1 %v2449_v17  ;;  %v651_v47 = vadd.f32 %v3111_v22, %v607_v48  ;;  %v608_v36 = vmul.f32 %v3105_v21, %v564_v63  ;;  %v606_v24 = vmul.f32 %v3105_v21, %v562_v19  ;;  %2514 = vrsqrt.f32 %v532_v61  ;;  %v2459_v61 = vld [vmem:[%s3558_s3 + $0x100] ss:$24 sps:$4 sm:$0xff]  }
 0x157   : > { %v2507_v32 = vpop.eup %2506  ;;  %1340 = vmatprep.mubr.bf16.mxu0 %v3151_v43  ;;  %1453 = vmatprep.mubr.bf16.mxu1 %v3151_v43  ;;  %v653_v10 = vadd.f32 %v3111_v22, %v609_v31  ;;  %v569_v33 = vmul.f32 %v2505_v29, %v2916_v62  ;;  %v568_v59 = vmul.f32 %v2505_v29, %v2913_v57  ;;  %v534_v58 = vadd.f32 1e-05, %v518_v9  ;;  %v502_v29 = vpop.xlane.xlu0 %501 }
 0x158   : > { %v567_v60 = vmul.f32 %v2507_v32, %v2910_v55  ;;  %v2453_v55 = vld [vmem:[%s3558_s3 + $0xa0] ss:$24 sps:$4 sm:$0xff]   ;;  %v652_v42 = vadd.f32 %v3115_v41, %v608_v36  ;;  %v535_v13 = vadd.f32 1e-05, %v519_v35  ;;  %v650_v53 = vadd.f32 %v3115_v41, %v606_v24 }
 0x159   : > { %1527 = vmatpush1.bf16.msra.mxu0 %v2447_v44  ;;  %2308 = vmatpush1.bf16.msra.mxu1 %v2447_v44  ;;  %v3182_v62 = vpack.c.bf16 %v653_v10, %v651_v47  ;;  %v613_v17 = vmul.f32 %v3099_v18, %v569_v33  ;;  %v505_v44 = vpop.xlane.xlu1 %504  ;;  %v566_v48 = vmul.f32 %v2507_v32, %v2907_v54  ;;  %v520_v19 = vmul.f32 0.00390625, %v502_v29  ;;  %v2464_v33 = vld [vmem:[%s3558_s3 + $0x134] ss:$24 sps:$4 sm:$0xff]  }
 0x15a   : > { %1528 = vmatprep.subr.bf16.mxu0 %v2452_v45  ;;  %2293 = vmatprep.subr.bf16.mxu1 %v2452_v45  ;;  %v2509_v5 = vpop.eup %2508  ;;  %v611_v12 = vmul.f32 %v3099_v18, %v567_v60  ;;  %v3205_v56 = vpack.c.bf16 %v652_v42, %v650_v53  ;;  %v612_v4 = vmul.f32 %v3105_v21, %v568_v59  ;;  %2516 = vrsqrt.f32 %v535_v13 }
 0x15b   : > { %v657_v45 = vadd.f32 %v3111_v22, %v613_v17  ;;  %v573_v31 = vmul.f32 %v2509_v5, %v2936_v30  ;;  %v521_v54 = vmul.f32 0.00390625, %v505_v44  ;;  %v2461_v30 = vld [vmem:[%s3558_s3 + $0x104] ss:$24 sps:$4 sm:$0xff]   ;;  %2518 = vrsqrt.f32 %v534_v58  ;;  %v2470_v44 = vld [vmem:[%s3558_s3 + $0x194] ss:$24 sps:$4 sm:$0xff]  }
 0x15c   : > { %1341 = vmatmul.mubr.bf16.gmra.mrb[4].mxu0 %v3171_v16  ;;  %1454 = vmatmul.mubr.bf16.gmra.mrb[4].mxu1 %v3171_v16  ;;  %v2511_v25 = vpop.eup %2510  ;;  %v655_v63 = vadd.f32 %v3111_v22, %v611_v12  ;;  %v610_v32 = vmul.f32 %v3105_v21, %v566_v48  ;;  %v656_v47 = vadd.f32 %v3115_v41, %v612_v4 }
 0x15d   : > { %1529 = vmatpush1.bf16.msra.mxu0 %v2450_v20  ;;  %2309 = vmatpush1.bf16.msra.mxu1 %v2450_v20  ;;  %v571_v57 = vmul.f32 %v2511_v25, %v2930_v2  ;;  %v617_v11 = vmul.f32 %v3099_v18, %v573_v31  ;;  %v572_v36 = vmul.f32 %v2509_v5, %v2933_v27  ;;  %v537_v9 = vadd.f32 1e-05, %v521_v54 }
 0x15e   : > { %1350 = vmatprep.mubr.bf16.mxu0 %v3182_v62  ;;  %1463 = vmatprep.mubr.bf16.mxu1 %v3182_v62  ;;  %v3214_v2 = vpack.c.bf16 %v657_v45, %v655_v63  ;;  %v2513_v10 = vpop.eup %2512  ;;  %v654_v35 = vadd.f32 %v3115_v41, %v610_v32  ;;  %v570_v24 = vmul.f32 %v2511_v25, %v2927_v1  ;;  %v2467_v1 = vld [vmem:[%s3558_s3 + $0x164] ss:$24 sps:$4 sm:$0xff]   ;;  %v2468_v63 = vld [vmem:[%s3558_s3 + $0x190] ss:$24 sps:$4 sm:$0xff]  }
 0x15f   : > { %1530 = vmatprep.subr.bf16.mxu0 %v2455_v38  ;;  %2294 = vmatprep.subr.bf16.mxu1 %v2455_v38  ;;  %v615_v20 = vmul.f32 %v3099_v18, %v571_v57  ;;  %v661_v38 = vadd.f32 %v3111_v22, %v617_v11  ;;  %v577_v17 = vmul.f32 %v2513_v10, %v2962_v52  ;;  %2520 = vrsqrt.f32 %v537_v9 }
 0x160   : > { %v2515_v60 = vpop.eup %2514  ;;  %v3237_v5 = vpack.c.bf16 %v656_v47, %v654_v35  ;;  %v616_v42 = vmul.f32 %v3105_v21, %v572_v36  ;;  %v614_v25 = vmul.f32 %v3105_v21, %v570_v24  ;;  %v576_v48 = vmul.f32 %v2513_v10, %v2959_v51  ;;  %v2471_v10 = vld [vmem:[%s3558_s3 + $0x1c0] ss:$24 sps:$4 sm:$0xff]  }
 0x161   : > { %1531 = vmatpush1.bf16.msra.mxu0 %v2453_v55  ;;  %2310 = vmatpush1.bf16.msra.mxu1 %v2453_v55  ;;  %v536_v55 = vadd.f32 1e-05, %v520_v19  ;;  %v659_v27 = vadd.f32 %v3111_v22, %v615_v20  ;;  %v575_v12 = vmul.f32 %v2515_v60, %v2956_v49  ;;  %v621_v59 = vmul.f32 %v3099_v18, %v577_v17  ;;  %v2465_v49 = vld [vmem:[%s3558_s3 + $0x160] ss:$24 sps:$4 sm:$0xff]  }
 0x162   : > { %1532 = vmatprep.subr.bf16.mxu0 %v2458_v26  ;;  %2295 = vmatprep.subr.bf16.mxu1 %v2458_v26  ;;  %v2462_v26 = vld [vmem:[%s3558_s3 + $0x130] ss:$24 sps:$4 sm:$0xff]   ;;  %v660_v53 = vadd.f32 %v3115_v41, %v616_v42  ;;  %v658_v31 = vadd.f32 %v3115_v41, %v614_v25  ;;  %v574_v57 = vmul.f32 %v2515_v60, %v2953_v46  ;;  %v2473_v46 = vld [vmem:[%s3558_s3 + $0x1c4] ss:$24 sps:$4 sm:$0xff]   ;;  %v2482_v42 = vld [vmem:[%s3558_s3 + $0x254] ss:$24 sps:$4 sm:$0xff]  }
 0x163   : > { %v3246_v52 = vpack.c.bf16 %v661_v38, %v659_v27  ;;  %2522 = vrsqrt.f32 %v536_v55  ;;  %v619_v45 = vmul.f32 %v3099_v18, %v575_v12  ;;  %v2474_v38 = vld [vmem:[%s3558_s3 + $0x1f0] ss:$24 sps:$4 sm:$0xff]  }
 0x164   : > { %1351 = vmatmul.mubr.bf16.gmra.mrb[8].mxu0 %v3205_v56  ;;  %1464 = vmatmul.mubr.bf16.gmra.mrb[8].mxu1 %v3205_v56  ;;  %v2517_v58 = vpop.eup %2516  ;;  %v3269_v51 = vpack.c.bf16 %v660_v53, %v658_v31  ;;  %v2485_v53 = vld [vmem:[%s3558_s3 + $0x284] ss:$24 sps:$4 sm:$0xff]  }
 0x165   : > { %1533 = vmatpush1.bf16.msra.mxu0 %v2456_v15  ;;  %2311 = vmatpush1.bf16.msra.mxu1 %v2456_v15  ;;  %v2519_v13 = vpop.eup %2518  ;;  %v665_v15 = vadd.f32 %v3111_v22, %v621_v59  ;;  %v581_v29 = vmul.f32 %v2517_v58, %v2994_v34  ;;  %v663_v54 = vadd.f32 %v3111_v22, %v619_v45 }
 0x166   : > { %1360 = vmatprep.mubr.bf16.mxu0 %v3214_v2  ;;  %1473 = vmatprep.mubr.bf16.mxu1 %v3214_v2  ;;  %v579_v4 = vmul.f32 %v2519_v13, %v2982_v7  ;;  %v618_v7 = vmul.f32 %v3105_v21, %v574_v57  ;;  %v578_v9 = vmul.f32 %v2519_v13, %v2979_v3  ;;  %v2479_v3 = vld [vmem:[%s3558_s3 + $0x224] ss:$24 sps:$4 sm:$0xff]   ;;  %v2480_v13 = vld [vmem:[%s3558_s3 + $0x250] ss:$24 sps:$4 sm:$0xff]  }
 0x167   : > { %1534 = vmatprep.subr.bf16.mxu0 %v2461_v30  ;;  %2296 = vmatprep.subr.bf16.mxu1 %v2461_v30  ;;  %v620_v30 = vmul.f32 %v3105_v21, %v576_v48  ;;  %v3278_v34 = vpack.c.bf16 %v665_v15, %v663_v54  ;;  %v625_v32 = vmul.f32 %v3099_v18, %v581_v29  ;;  %v2483_v48 = vld [vmem:[%s3558_s3 + $0x280] ss:$24 sps:$4 sm:$0xff]   ;;  %v2491_v29 = vld [vmem:[%s3558_s3 + $0x2e4] ss:$24 sps:$4 sm:$0xff]  }
 0x168   : > { %v623_v19 = vmul.f32 %v3099_v18, %v579_v4  ;;  %v662_v36 = vadd.f32 %v3115_v41, %v618_v7 }
 0x169   : > { %1535 = vmatpush1.bf16.msra.mxu0 %v2459_v61  ;;  %2312 = vmatpush1.bf16.msra.mxu1 %v2459_v61  ;;  %v2521_v11 = vpop.eup %2520  ;;  %v2476_v61 = vld [vmem:[%s3558_s3 + $0x1f4] ss:$24 sps:$4 sm:$0xff]   ;;  %v664_v20 = vadd.f32 %v3115_v41, %v620_v30  ;;  %v669_v60 = vadd.f32 %v3111_v22, %v625_v32 }
 0x16a   : > { %1536 = vmatprep.subr.bf16.mxu0 %v2464_v33  ;;  %2297 = vmatprep.subr.bf16.mxu1 %v2464_v33  ;;  %v580_v33 = vmul.f32 %v2517_v58, %v2991_v0  ;;  %v585_v35 = vmul.f32 %v2521_v11, %v3026_v50  ;;  %v667_v24 = vadd.f32 %v3111_v22, %v623_v19 }
 0x16b   : > { %v3301_v0 = vpack.c.bf16 %v664_v20, %v662_v36  ;;  %v584_v25 = vmul.f32 %v2521_v11, %v3023_v8 }
 0x16c   : > { %1361 = vmatmul.mubr.bf16.gmra.mrb[12].mxu0 %v3237_v5  ;;  %1474 = vmatmul.mubr.bf16.gmra.mrb[12].mxu1 %v3237_v5  ;;  %v624_v17 = vmul.f32 %v3105_v21, %v580_v33  ;;  %v3310_v50 = vpack.c.bf16 %v669_v60, %v667_v24  ;;  %v629_v27 = vmul.f32 %v3099_v18, %v585_v35 }
 0x16d   : > { %1537 = vmatpush1.bf16.msra.mxu0 %v2462_v26  ;;  %2313 = vmatpush1.bf16.msra.mxu1 %v2462_v26  ;;  %v2523_v47 = vpop.eup %2522  ;;  %v622_v26 = vmul.f32 %v3105_v21, %v578_v9  ;;  %v628_v8 = vmul.f32 %v3105_v21, %v584_v25 }
 0x16e   : > { %1370 = vmatprep.mubr.bf16.mxu0 %v3246_v52  ;;  %1483 = vmatprep.mubr.bf16.mxu1 %v3246_v52  ;;  %v583_v55 = vmul.f32 %v2523_v47, %v3014_v6  ;;  %v2477_v6 = vld [vmem:[%s3558_s3 + $0x220] ss:$24 sps:$4 sm:$0xff]   ;;  %v668_v12 = vadd.f32 %v3115_v41, %v624_v17  ;;  %v673_v58 = vadd.f32 %v3111_v22, %v629_v27 }
 0x16f   : > { %1538 = vmatprep.subr.bf16.mxu0 %v2467_v1  ;;  %2298 = vmatprep.subr.bf16.mxu1 %v2467_v1  ;;  %v666_v59 = vadd.f32 %v3115_v41, %v622_v26  ;;  %v672_v31 = vadd.f32 %v3115_v41, %v628_v8 }
 0x170   : > { %v627_v1 = vmul.f32 %v3099_v18, %v583_v55 }
 0x171   : > { %1539 = vmatpush1.bf16.msra.mxu0 %v2465_v49  ;;  %2314 = vmatpush1.bf16.msra.mxu1 %v2465_v49  ;;  %v582_v49 = vmul.f32 %v2523_v47, %v3011_v23 }
 0x172   : > { %1540 = vmatprep.subr.bf16.mxu0 %v2470_v44  ;;  %2299 = vmatprep.subr.bf16.mxu1 %v2470_v44  ;;  %v686_v44 = vpack.c.bf16 %v668_v12, %v666_v59  ;;  %v671_v18 = vadd.f32 %v3111_v22, %v627_v1  ;;  %v2488_v22 = vld [vmem:[%s3558_s3 + $0x2b4] ss:$24 sps:$4 sm:$0xff]  }
 0x173   : > { %v626_v45 = vmul.f32 %v3105_v21, %v582_v49  ;;  %v2486_v21 = vld [vmem:[%s3558_s3 + $0x2b0] ss:$24 sps:$4 sm:$0xff]  }
 0x174   : > { %1371 = vmatmul.mubr.bf16.gmra.mrb[16].mxu0 %v3269_v51  ;;  %1484 = vmatmul.mubr.bf16.gmra.mrb[16].mxu1 %v3269_v51  ;;  %v689_v23 = vpack.c.bf16 %v673_v58, %v671_v18 }
 0x175   : > { %1541 = vmatpush1.bf16.msra.mxu0 %v2468_v63  ;;  %2315 = vmatpush1.bf16.msra.mxu1 %v2468_v63  ;;  %v670_v15 = vadd.f32 %v3115_v41, %v626_v45  ;;  %v2489_v41 = vld [vmem:[%s3558_s3 + $0x2e0] ss:$24 sps:$4 sm:$0xff]  }
 0x176   : > { %1380 = vmatprep.mubr.bf16.mxu0 %v3278_v34  ;;  %1493 = vmatprep.mubr.bf16.mxu1 %v3278_v34 }
 0x177   : > { %1542 = vmatprep.subr.bf16.mxu0 %v2473_v46  ;;  %2300 = vmatprep.subr.bf16.mxu1 %v2473_v46  ;;  %v688_v57 = vpack.c.bf16 %v672_v31, %v670_v15 }
 0x179   : > { %1543 = vmatpush1.bf16.msra.mxu0 %v2471_v10  ;;  %2316 = vmatpush1.bf16.msra.mxu1 %v2471_v10 }
 0x17a   : > { %1544 = vmatprep.subr.bf16.mxu0 %v2476_v61  ;;  %2301 = vmatprep.subr.bf16.mxu1 %v2476_v61 }
 0x17c   : > { %1381 = vmatmul.mubr.bf16.gmra.mrb[20].mxu0 %v3301_v0  ;;  %1494 = vmatmul.mubr.bf16.gmra.mrb[20].mxu1 %v3301_v0 }
 0x17d   : > { %1545 = vmatpush1.bf16.msra.mxu0 %v2474_v38  ;;  %2317 = vmatpush1.bf16.msra.mxu1 %v2474_v38 }
 0x17e   : > { %1390 = vmatprep.mubr.bf16.mxu0 %v3310_v50  ;;  %1503 = vmatprep.mubr.bf16.mxu1 %v3310_v50 }
 0x17f   : > { %1546 = vmatprep.subr.bf16.mxu0 %v2479_v3  ;;  %2302 = vmatprep.subr.bf16.mxu1 %v2479_v3 }
 0x181   : > { %1547 = vmatpush1.bf16.msra.mxu0 %v2477_v6  ;;  %2318 = vmatpush1.bf16.msra.mxu1 %v2477_v6 }
 0x182   : > { %1548 = vmatprep.subr.bf16.mxu0 %v2482_v42  ;;  %2303 = vmatprep.subr.bf16.mxu1 %v2482_v42 }
 0x184   : > { %1391 = vmatmul.mubr.bf16.gmra.mrb[24].mxu0 %v686_v44  ;;  %1504 = vmatmul.mubr.bf16.gmra.mrb[24].mxu1 %v686_v44 }
 0x185   : > { %1549 = vmatpush1.bf16.msra.mxu0 %v2480_v13  ;;  %2319 = vmatpush1.bf16.msra.mxu1 %v2480_v13 }
 0x186   : > { %1400 = vmatprep.mubr.bf16.mxu0 %v689_v23  ;;  %1513 = vmatprep.mubr.bf16.mxu1 %v689_v23 }
 0x187   : > { %1550 = vmatprep.subr.bf16.mxu0 %v2485_v53  ;;  %2304 = vmatprep.subr.bf16.mxu1 %v2485_v53 }
 0x189   : > { %1551 = vmatpush1.bf16.msra.mxu0 %v2483_v48  ;;  %2320 = vmatpush1.bf16.msra.mxu1 %v2483_v48 }
 0x18a   : > { %1552 = vmatprep.subr.bf16.mxu0 %v2488_v22  ;;  %2305 = vmatprep.subr.bf16.mxu1 %v2488_v22 }
 0x18c   : > { %1401 = vmatmul.mubr.bf16.gmra.mrb[28].mxu0 %v688_v57  ;;  %1514 = vmatmul.mubr.bf16.gmra.mrb[28].mxu1 %v688_v57 }
 0x18d   : > { %1553 = vmatpush1.bf16.msra.mxu0 %v2486_v21  ;;  %2321 = vmatpush1.bf16.msra.mxu1 %v2486_v21 }
 0x18e   : > { %1556 = vmatprep.mubr.bf16.mxu0 %v3133_v39  ;;  %1596 = vmatprep.mubr.bf16.mxu1 %v3246_v52  ;;  %v798_v39 = vsub.s32 2, %v3087_v40 }
 0x18f   : > { %1554 = vmatprep.subr.bf16.mxu0 %v2491_v29  ;;  %2306 = vmatprep.subr.bf16.mxu1 %v2491_v29 }
 0x191   : > { %1555 = vmatpush1.bf16.msra.mxu0 %v2489_v41  ;;  %2322 = vmatpush1.bf16.msra.mxu1 %v2489_v41 }
 0x194   : > { %1557 = vmatmul.mubr.bf16.vlgmr.msra.gmra.mrb[32].mxu0 %v3135_v37  ;;  %1597 = vmatmul.mubr.bf16.vlgmr.msra.gmra.mrb[32].mxu1 %v3269_v51  ;;  %v3371_v37 = vld [vmem:[%s3559_s4] sm:$0x3f] }
 0x195   : > { %1566 = vmatprep.mubr.bf16.mxu0 %v3151_v43  ;;  %1606 = vmatprep.mubr.bf16.mxu1 %v3278_v34  ;;  %v802_v43 = vsub.s32 3, %v3087_v40 }
 0x19c   : > { %1567 = vmatmul.mubr.bf16.gmra.mrb[36].mxu0 %v3171_v16  ;;  %1607 = vmatmul.mubr.bf16.gmra.mrb[36].mxu1 %v3301_v0  ;;  %v3376_v16 = vrot.slane %v3371_v37, %v3093_v28 }
 0x19d   : > { %1576 = vmatprep.mubr.bf16.mxu0 %v3182_v62  ;;  %1616 = vmatprep.mubr.bf16.mxu1 %v3310_v50  ;;  %v3379_v62 = vrot.slane %v3371_v37, %v798_v39 }
 0x1a4   : > { %1577 = vmatmul.mubr.bf16.gmra.mrb[40].mxu0 %v3205_v56  ;;  %1617 = vmatmul.mubr.bf16.gmra.mrb[40].mxu1 %v686_v44  ;;  %v3383_v56 = vrot.slane %v3371_v37, %v3090_v14 }
 0x1a5   : > { %1586 = vmatprep.mubr.bf16.mxu0 %v3214_v2  ;;  %1626 = vmatprep.mubr.bf16.mxu1 %v689_v23  ;;  %v3386_v2 = vrot.slane %v3371_v37, %v802_v43 }
 0x1ac   : > { %1587 = vmatmul.mubr.bf16.gmra.mrb[44].mxu0 %v3237_v5  ;;  %1627 = vmatmul.mubr.bf16.gmra.mrb[44].mxu1 %v688_v57 }
 0x227   : > { %v1332_v5 = vpop.f32.mrb[0].mxu0  ;;  %v1445_v52 = vpop.f32.mrb[0].mxu1 }
 0x228   : > { %v1333_v63 = vadd.f32 %v1332_v5, %v3376_v16  ;;  %v1446_v4 = vadd.f32 %v1445_v52, %v3379_v62  ;;  %v1334_v51 = vpop.f32.mrb[1].mxu0  ;;  %v1447_v28 = vpop.f32.mrb[1].mxu1 }
 0x229   : > { %v1335_v54 = vadd.f32 %v1334_v51, %v3383_v56  ;;  %v1448_v30 = vadd.f32 %v1447_v28, %v3386_v2  ;;  %v1336_v46 = vpop.f32.mrb[2].mxu0  ;;  %v1449_v34 = vpop.f32.mrb[2].mxu1 }
 0x22a   : > { %v1337_v14 = vadd.f32 %v1336_v46, %v3376_v16  ;;  %v1450_v7 = vadd.f32 %v1449_v34, %v3379_v62  ;;  %v1338_v32 = vpop.f32.mrb[3].mxu0  ;;  %v1451_v11 = vpop.f32.mrb[3].mxu1 }
 0x22b   : > { %v2243_v10 = vpack.c.bf16 %v1335_v54, %v1333_v63  ;;  %v2244_v19 = vpack.c.bf16 %v1448_v30, %v1446_v4  ;;  %v1339_v61 = vadd.f32 %v1338_v32, %v3383_v56  ;;  %v1452_v20 = vadd.f32 %v1451_v11, %v3386_v2 }
 0x22d   : > { %1925 = vst [vmem:[%s3396_s14] sm:$0xff] %v2243_v10  ;;  %1926 = vst [vmem:[%s3396_s14 + $0x8] sm:$0xff] %v2244_v19  ;;  %v2246_v33 = vpack.c.bf16 %v1339_v61, %v1337_v14  ;;  %v2247_v47 = vpack.c.bf16 %v1452_v20, %v1450_v7 }
 0x22f   : > { %1928 = vst [vmem:[%s3396_s14 + $0x18] sm:$0xff] %v2246_v33  ;;  %1929 = vst [vmem:[%s3396_s14 + $0x20] sm:$0xff] %v2247_v47  ;;  %v1342_v36 = vpop.f32.mrb[4].mxu0  ;;  %v1455_v60 = vpop.f32.mrb[4].mxu1 }
 0x230   : > { %v1343_v9 = vadd.f32 %v1342_v36, %v3376_v16  ;;  %v1456_v35 = vadd.f32 %v1455_v60, %v3379_v62  ;;  %v1344_v38 = vpop.f32.mrb[5].mxu0  ;;  %v1457_v24 = vpop.f32.mrb[5].mxu1 }
 0x231   : > { %v1345_v0 = vadd.f32 %v1344_v38, %v3383_v56  ;;  %v1458_v17 = vadd.f32 %v1457_v24, %v3386_v2  ;;  %v1346_v55 = vpop.f32.mrb[6].mxu0  ;;  %v1459_v3 = vpop.f32.mrb[6].mxu1 }
 0x232   : > { %v1347_v50 = vadd.f32 %v1346_v55, %v3376_v16  ;;  %v1460_v26 = vadd.f32 %v1459_v3, %v3379_v62  ;;  %v1348_v27 = vpop.f32.mrb[7].mxu0  ;;  %v1461_v6 = vpop.f32.mrb[7].mxu1 }
 0x233   : > { %v2249_v42 = vpack.c.bf16 %v1345_v0, %v1343_v9  ;;  %v2250_v12 = vpack.c.bf16 %v1458_v17, %v1456_v35  ;;  %v1349_v1 = vadd.f32 %v1348_v27, %v3383_v56  ;;  %v1462_v25 = vadd.f32 %v1461_v6, %v3386_v2 }
 0x235   : > { %1931 = vst [vmem:[%s3396_s14 + $0x30] sm:$0xff] %v2249_v42  ;;  %1932 = vst [vmem:[%s3396_s14 + $0x38] sm:$0xff] %v2250_v12  ;;  %v2252_v59 = vpack.c.bf16 %v1349_v1, %v1347_v50  ;;  %v2253_v58 = vpack.c.bf16 %v1462_v25, %v1460_v26 }
 0x237   : > { %1934 = vst [vmem:[%s3396_s14 + $0x48] sm:$0xff] %v2252_v59  ;;  %1935 = vst [vmem:[%s3396_s14 + $0x50] sm:$0xff] %v2253_v58  ;;  %v1352_v49 = vpop.f32.mrb[8].mxu0  ;;  %v1465_v13 = vpop.f32.mrb[8].mxu1 }
 0x238   : > { %v1353_v44 = vadd.f32 %v1352_v49, %v3376_v16  ;;  %v1466_v18 = vadd.f32 %v1465_v13, %v3379_v62  ;;  %v1354_v8 = vpop.f32.mrb[9].mxu0  ;;  %v1467_v53 = vpop.f32.mrb[9].mxu1 }
 0x239   : > { %v1355_v23 = vadd.f32 %v1354_v8, %v3383_v56  ;;  %v1468_v45 = vadd.f32 %v1467_v53, %v3386_v2  ;;  %v1356_v48 = vpop.f32.mrb[10].mxu0  ;;  %v1469_v22 = vpop.f32.mrb[10].mxu1 }
 0x23a   : > { %v1357_v31 = vadd.f32 %v1356_v48, %v3376_v16  ;;  %v1470_v15 = vadd.f32 %v1469_v22, %v3379_v62  ;;  %v1358_v21 = vpop.f32.mrb[11].mxu0  ;;  %v1471_v57 = vpop.f32.mrb[11].mxu1 }
 0x23b   : > { %v2255_v29 = vpack.c.bf16 %v1355_v23, %v1353_v44  ;;  %v2256_v41 = vpack.c.bf16 %v1468_v45, %v1466_v18  ;;  %v1359_v39 = vadd.f32 %v1358_v21, %v3383_v56  ;;  %v1472_v43 = vadd.f32 %v1471_v57, %v3386_v2 }
 0x23d   : > { %1937 = vst [vmem:[%s3396_s14 + $0x60] sm:$0xff] %v2255_v29  ;;  %1938 = vst [vmem:[%s3396_s14 + $0x68] sm:$0xff] %v2256_v41  ;;  %v2258_v5 = vpack.c.bf16 %v1359_v39, %v1357_v31  ;;  %v2259_v52 = vpack.c.bf16 %v1472_v43, %v1470_v15 }
 0x23f   : > { %1940 = vst [vmem:[%s3396_s14 + $0x78] sm:$0xff] %v2258_v5  ;;  %1941 = vst [vmem:[%s3396_s14 + $0x80] sm:$0xff] %v2259_v52  ;;  %v1362_v63 = vpop.f32.mrb[12].mxu0  ;;  %v1475_v4 = vpop.f32.mrb[12].mxu1 }
 0x240   : > { %v1363_v51 = vadd.f32 %v1362_v63, %v3376_v16  ;;  %v1476_v28 = vadd.f32 %v1475_v4, %v3379_v62  ;;  %v1364_v54 = vpop.f32.mrb[13].mxu0  ;;  %v1477_v30 = vpop.f32.mrb[13].mxu1 }
 0x241   : > { %v1365_v46 = vadd.f32 %v1364_v54, %v3383_v56  ;;  %v1478_v34 = vadd.f32 %v1477_v30, %v3386_v2  ;;  %v1366_v14 = vpop.f32.mrb[14].mxu0  ;;  %v1479_v7 = vpop.f32.mrb[14].mxu1 }
 0x242   : > { %v1367_v32 = vadd.f32 %v1366_v14, %v3376_v16  ;;  %v1480_v11 = vadd.f32 %v1479_v7, %v3379_v62  ;;  %v1368_v10 = vpop.f32.mrb[15].mxu0  ;;  %v1481_v19 = vpop.f32.mrb[15].mxu1 }
 0x243   : > { %v2261_v61 = vpack.c.bf16 %v1365_v46, %v1363_v51  ;;  %v2262_v20 = vpack.c.bf16 %v1478_v34, %v1476_v28  ;;  %v1369_v33 = vadd.f32 %v1368_v10, %v3383_v56  ;;  %v1482_v47 = vadd.f32 %v1481_v19, %v3386_v2 }
 0x245   : > { %1943 = vst [vmem:[%s3396_s14 + $0x90] sm:$0xff] %v2261_v61  ;;  %1944 = vst [vmem:[%s3396_s14 + $0x98] sm:$0xff] %v2262_v20  ;;  %v2264_v36 = vpack.c.bf16 %v1369_v33, %v1367_v32  ;;  %v2265_v60 = vpack.c.bf16 %v1482_v47, %v1480_v11 }
 0x247   : > { %1946 = vst [vmem:[%s3396_s14 + $0xa8] sm:$0xff] %v2264_v36  ;;  %1947 = vst [vmem:[%s3396_s14 + $0xb0] sm:$0xff] %v2265_v60  ;;  %v1372_v9 = vpop.f32.mrb[16].mxu0  ;;  %v1485_v35 = vpop.f32.mrb[16].mxu1 }
 0x248   : > { %v1373_v38 = vadd.f32 %v1372_v9, %v3376_v16  ;;  %v1486_v24 = vadd.f32 %v1485_v35, %v3379_v62  ;;  %v1374_v0 = vpop.f32.mrb[17].mxu0  ;;  %v1487_v17 = vpop.f32.mrb[17].mxu1 }
 0x249   : > { %v1375_v55 = vadd.f32 %v1374_v0, %v3383_v56  ;;  %v1488_v3 = vadd.f32 %v1487_v17, %v3386_v2  ;;  %v1376_v50 = vpop.f32.mrb[18].mxu0  ;;  %v1489_v26 = vpop.f32.mrb[18].mxu1 }
 0x24a   : > { %v1377_v27 = vadd.f32 %v1376_v50, %v3376_v16  ;;  %v1490_v6 = vadd.f32 %v1489_v26, %v3379_v62  ;;  %v1378_v42 = vpop.f32.mrb[19].mxu0  ;;  %v1491_v12 = vpop.f32.mrb[19].mxu1  ;;  %v806_v50 = vsub.s32 4, %v3087_v40 }
 0x24b   : > { %v2267_v1 = vpack.c.bf16 %v1375_v55, %v1373_v38  ;;  %v2268_v25 = vpack.c.bf16 %v1488_v3, %v1486_v24  ;;  %v1379_v59 = vadd.f32 %v1378_v42, %v3383_v56  ;;  %v1492_v58 = vadd.f32 %v1491_v12, %v3386_v2 }
 0x24c   : > { %v810_v12 = vsub.s32 5, %v3087_v40 }
 0x24d   : > { %1949 = vst [vmem:[%s3396_s14 + $0xc0] sm:$0xff] %v2267_v1  ;;  %1950 = vst [vmem:[%s3396_s14 + $0xc8] sm:$0xff] %v2268_v25  ;;  %v2270_v49 = vpack.c.bf16 %v1379_v59, %v1377_v27  ;;  %v2271_v13 = vpack.c.bf16 %v1492_v58, %v1490_v6 }
 0x24f   : > { %1952 = vst [vmem:[%s3396_s14 + $0xd8] sm:$0xff] %v2270_v49  ;;  %1953 = vst [vmem:[%s3396_s14 + $0xe0] sm:$0xff] %v2271_v13  ;;  %v1382_v44 = vpop.f32.mrb[20].mxu0  ;;  %v1495_v18 = vpop.f32.mrb[20].mxu1 }
 0x250   : > { %v1383_v8 = vadd.f32 %v1382_v44, %v3376_v16  ;;  %v1496_v53 = vadd.f32 %v1495_v18, %v3379_v62  ;;  %v1384_v23 = vpop.f32.mrb[21].mxu0  ;;  %v1497_v45 = vpop.f32.mrb[21].mxu1 }
 0x251   : > { %v1385_v48 = vadd.f32 %v1384_v23, %v3383_v56  ;;  %v1498_v22 = vadd.f32 %v1497_v45, %v3386_v2  ;;  %v1386_v31 = vpop.f32.mrb[22].mxu0  ;;  %v1499_v15 = vpop.f32.mrb[22].mxu1  ;;  %v3494_v23 = vrot.slane %v3371_v37, %v810_v12 }
 0x252   : > { %v1387_v21 = vadd.f32 %v1386_v31, %v3376_v16  ;;  %v1500_v57 = vadd.f32 %v1499_v15, %v3379_v62  ;;  %v1388_v29 = vpop.f32.mrb[23].mxu0  ;;  %v1501_v41 = vpop.f32.mrb[23].mxu1 }
 0x253   : > { %v2273_v39 = vpack.c.bf16 %v1385_v48, %v1383_v8  ;;  %v2274_v43 = vpack.c.bf16 %v1498_v22, %v1496_v53  ;;  %v1389_v5 = vadd.f32 %v1388_v29, %v3383_v56  ;;  %v1502_v52 = vadd.f32 %v1501_v41, %v3386_v2 }
 0x254   : > { %v3489_v8 = vrot.slane %v3371_v37, %v806_v50 }
 0x255   : > { %1955 = vst [vmem:[%s3396_s14 + $0xf0] sm:$0xff] %v2273_v39  ;;  %1956 = vst [vmem:[%s3396_s14 + $0xf8] sm:$0xff] %v2274_v43  ;;  %v2276_v63 = vpack.c.bf16 %v1389_v5, %v1387_v21  ;;  %v2277_v4 = vpack.c.bf16 %v1502_v52, %v1500_v57 }
 0x257   : > { %1958 = vst [vmem:[%s3396_s14 + $0x108] sm:$0xff] %v2276_v63  ;;  %1959 = vst [vmem:[%s3396_s14 + $0x110] sm:$0xff] %v2277_v4  ;;  %v1392_v51 = vpop.f32.mrb[24].mxu0  ;;  %v1505_v28 = vpop.f32.mrb[24].mxu1 }
 0x258   : > { %v1393_v54 = vadd.f32 %v1392_v51, %v3376_v16  ;;  %v1506_v30 = vadd.f32 %v1505_v28, %v3379_v62  ;;  %v1394_v46 = vpop.f32.mrb[25].mxu0  ;;  %v1507_v34 = vpop.f32.mrb[25].mxu1 }
 0x259   : > { %v1395_v14 = vadd.f32 %v1394_v46, %v3383_v56  ;;  %v1508_v7 = vadd.f32 %v1507_v34, %v3386_v2  ;;  %v1396_v32 = vpop.f32.mrb[26].mxu0  ;;  %v1509_v11 = vpop.f32.mrb[26].mxu1 }
 0x25a   : > { %v1397_v10 = vadd.f32 %v1396_v32, %v3376_v16  ;;  %v1510_v19 = vadd.f32 %v1509_v11, %v3379_v62  ;;  %v1398_v61 = vpop.f32.mrb[27].mxu0  ;;  %v1511_v20 = vpop.f32.mrb[27].mxu1 }
 0x25b   : > { %v2279_v33 = vpack.c.bf16 %v1395_v14, %v1393_v54  ;;  %v2280_v47 = vpack.c.bf16 %v1508_v7, %v1506_v30  ;;  %v1399_v36 = vadd.f32 %v1398_v61, %v3383_v56  ;;  %v1512_v60 = vadd.f32 %v1511_v20, %v3386_v2 }
 0x25d   : > { %1961 = vst [vmem:[%s3396_s14 + $0x120] sm:$0xff] %v2279_v33  ;;  %1962 = vst [vmem:[%s3396_s14 + $0x128] sm:$0xff] %v2280_v47  ;;  %v2282_v9 = vpack.c.bf16 %v1399_v36, %v1397_v10  ;;  %v2283_v35 = vpack.c.bf16 %v1512_v60, %v1510_v19 }
 0x25f   : > { %1964 = vst [vmem:[%s3396_s14 + $0x138] sm:$0xff] %v2282_v9  ;;  %1965 = vst [vmem:[%s3396_s14 + $0x140] sm:$0xff] %v2283_v35  ;;  %v1402_v38 = vpop.f32.mrb[28].mxu0  ;;  %v1515_v24 = vpop.f32.mrb[28].mxu1 }
 0x260   : > { %v1403_v0 = vadd.f32 %v1402_v38, %v3376_v16  ;;  %v1516_v17 = vadd.f32 %v1515_v24, %v3379_v62  ;;  %v1404_v55 = vpop.f32.mrb[29].mxu0  ;;  %v1517_v3 = vpop.f32.mrb[29].mxu1 }
 0x261   : > { %v1405_v26 = vadd.f32 %v1404_v55, %v3383_v56  ;;  %v1518_v27 = vadd.f32 %v1517_v3, %v3386_v2  ;;  %v1406_v6 = vpop.f32.mrb[30].mxu0  ;;  %v1519_v42 = vpop.f32.mrb[30].mxu1 }
 0x262   : > { %v1407_v1 = vadd.f32 %v1406_v6, %v3376_v16  ;;  %v1520_v25 = vadd.f32 %v1519_v42, %v3379_v62  ;;  %v1408_v59 = vpop.f32.mrb[31].mxu0  ;;  %v1521_v58 = vpop.f32.mrb[31].mxu1 }
 0x263   : > { %v2285_v49 = vpack.c.bf16 %v1405_v26, %v1403_v0  ;;  %v2286_v13 = vpack.c.bf16 %v1518_v27, %v1516_v17  ;;  %v1409_v44 = vadd.f32 %v1408_v59, %v3383_v56  ;;  %v1522_v18 = vadd.f32 %v1521_v58, %v3386_v2 }
 0x265   : > { %1967 = vst [vmem:[%s3396_s14 + $0x150] sm:$0xff] %v2285_v49  ;;  %1968 = vst [vmem:[%s3396_s14 + $0x158] sm:$0xff] %v2286_v13  ;;  %v2288_v53 = vpack.c.bf16 %v1409_v44, %v1407_v1  ;;  %v2289_v40 = vpack.c.bf16 %v1522_v18, %v1520_v25 }
 0x267   : > { %1970 = vst [vmem:[%s3396_s14 + $0x168] sm:$0xff] %v2288_v53  ;;  %1971 = vst [vmem:[%s3396_s14 + $0x170] sm:$0xff] %v2289_v40  ;;  %v1558_v16 = vpop.f32.mrb[32].mxu0  ;;  %v1598_v62 = vpop.f32.mrb[32].mxu1 }
 0x268   : > { %v1559_v45 = vadd.f32 %v1558_v16, %v3489_v8  ;;  %v1599_v56 = vadd.f32 %v1598_v62, %v3489_v8  ;;  %v1560_v2 = vpop.f32.mrb[33].mxu0  ;;  %v1600_v48 = vpop.f32.mrb[33].mxu1 }
 0x269   : > { %v1561_v22 = vadd.f32 %v1560_v2, %v3494_v23  ;;  %v1601_v31 = vadd.f32 %v1600_v48, %v3494_v23  ;;  %v1562_v37 = vpop.f32.mrb[34].mxu0  ;;  %v1602_v15 = vpop.f32.mrb[34].mxu1 }
 0x26a   : > { %v1563_v21 = vadd.f32 %v1562_v37, %v3489_v8  ;;  %v1603_v57 = vadd.f32 %v1602_v15, %v3489_v8  ;;  %v1564_v29 = vpop.f32.mrb[35].mxu0  ;;  %v1604_v41 = vpop.f32.mrb[35].mxu1 }
 0x26b   : > { %v2245_v39 = vpack.c.bf16 %v1561_v22, %v1559_v45  ;;  %v2269_v43 = vpack.c.bf16 %v1601_v31, %v1599_v56  ;;  %v1565_v5 = vadd.f32 %v1564_v29, %v3494_v23  ;;  %v1605_v52 = vadd.f32 %v1604_v41, %v3494_v23 }
 0x26d   : > { %1927 = vst [vmem:[%s3396_s14 + $0x10] sm:$0xff] %v2245_v39  ;;  %1951 = vst [vmem:[%s3396_s14 + $0xd0] sm:$0xff] %v2269_v43  ;;  %v2248_v63 = vpack.c.bf16 %v1565_v5, %v1563_v21  ;;  %v2272_v4 = vpack.c.bf16 %v1605_v52, %v1603_v57 }
 0x26f   : > { %1930 = vst [vmem:[%s3396_s14 + $0x28] sm:$0xff] %v2248_v63  ;;  %1954 = vst [vmem:[%s3396_s14 + $0xe8] sm:$0xff] %v2272_v4  ;;  %v1568_v51 = vpop.f32.mrb[36].mxu0  ;;  %v1608_v28 = vpop.f32.mrb[36].mxu1 }
 0x270   : > { %v1569_v54 = vadd.f32 %v1568_v51, %v3489_v8  ;;  %v1609_v30 = vadd.f32 %v1608_v28, %v3489_v8  ;;  %v1570_v46 = vpop.f32.mrb[37].mxu0  ;;  %v1610_v34 = vpop.f32.mrb[37].mxu1 }
 0x271   : > { %v1571_v14 = vadd.f32 %v1570_v46, %v3494_v23  ;;  %v1611_v7 = vadd.f32 %v1610_v34, %v3494_v23  ;;  %v1572_v32 = vpop.f32.mrb[38].mxu0  ;;  %v1612_v11 = vpop.f32.mrb[38].mxu1 }
 0x272   : > { %v1573_v10 = vadd.f32 %v1572_v32, %v3489_v8  ;;  %v1613_v19 = vadd.f32 %v1612_v11, %v3489_v8  ;;  %v1574_v61 = vpop.f32.mrb[39].mxu0  ;;  %v1614_v20 = vpop.f32.mrb[39].mxu1 }
 0x273   : > { %v2251_v33 = vpack.c.bf16 %v1571_v14, %v1569_v54  ;;  %v2275_v47 = vpack.c.bf16 %v1611_v7, %v1609_v30  ;;  %v1575_v36 = vadd.f32 %v1574_v61, %v3494_v23  ;;  %v1615_v60 = vadd.f32 %v1614_v20, %v3494_v23 }
 0x275   : > { %1933 = vst [vmem:[%s3396_s14 + $0x40] sm:$0xff] %v2251_v33  ;;  %1957 = vst [vmem:[%s3396_s14 + $0x100] sm:$0xff] %v2275_v47  ;;  %v2254_v9 = vpack.c.bf16 %v1575_v36, %v1573_v10  ;;  %v2278_v35 = vpack.c.bf16 %v1615_v60, %v1613_v19 }
 0x277   : > { %1936 = vst [vmem:[%s3396_s14 + $0x58] sm:$0xff] %v2254_v9  ;;  %1960 = vst [vmem:[%s3396_s14 + $0x118] sm:$0xff] %v2278_v35  ;;  %v1578_v38 = vpop.f32.mrb[40].mxu0  ;;  %v1618_v24 = vpop.f32.mrb[40].mxu1 }
 0x278   : > { %v1579_v0 = vadd.f32 %v1578_v38, %v3489_v8  ;;  %v1619_v17 = vadd.f32 %v1618_v24, %v3489_v8  ;;  %v1580_v55 = vpop.f32.mrb[41].mxu0  ;;  %v1620_v3 = vpop.f32.mrb[41].mxu1 }
 0x279   : > { %v1581_v50 = vadd.f32 %v1580_v55, %v3494_v23  ;;  %v1621_v26 = vadd.f32 %v1620_v3, %v3494_v23  ;;  %v1582_v27 = vpop.f32.mrb[42].mxu0  ;;  %v1622_v6 = vpop.f32.mrb[42].mxu1 }
 0x27a   : > { %v1583_v42 = vadd.f32 %v1582_v27, %v3489_v8  ;;  %v1623_v12 = vadd.f32 %v1622_v6, %v3489_v8  ;;  %v1584_v1 = vpop.f32.mrb[43].mxu0  ;;  %v1624_v25 = vpop.f32.mrb[43].mxu1 }
 0x27b   : > { %v2257_v59 = vpack.c.bf16 %v1581_v50, %v1579_v0  ;;  %v2281_v58 = vpack.c.bf16 %v1621_v26, %v1619_v17  ;;  %v1585_v49 = vadd.f32 %v1584_v1, %v3494_v23  ;;  %v1625_v13 = vadd.f32 %v1624_v25, %v3494_v23 }
 0x27d   : > { %1939 = vst [vmem:[%s3396_s14 + $0x70] sm:$0xff] %v2257_v59  ;;  %1963 = vst [vmem:[%s3396_s14 + $0x130] sm:$0xff] %v2281_v58  ;;  %v2260_v44 = vpack.c.bf16 %v1585_v49, %v1583_v42  ;;  %v2284_v18 = vpack.c.bf16 %v1625_v13, %v1623_v12 }
 0x27f   : > { %1942 = vst [vmem:[%s3396_s14 + $0x88] sm:$0xff] %v2260_v44  ;;  %1966 = vst [vmem:[%s3396_s14 + $0x148] sm:$0xff] %v2284_v18  ;;  %v1588_v53 = vpop.f32.mrb[44].mxu0  ;;  %v1628_v40 = vpop.f32.mrb[44].mxu1 }
 0x280   : > { %v1589_v16 = vadd.f32 %v1588_v53, %v3489_v8  ;;  %v1629_v62 = vadd.f32 %v1628_v40, %v3489_v8  ;;  %v1590_v45 = vpop.f32.mrb[45].mxu0  ;;  %v1630_v56 = vpop.f32.mrb[45].mxu1 }
 0x281   : > { %v1591_v2 = vadd.f32 %v1590_v45, %v3494_v23  ;;  %v1631_v48 = vadd.f32 %v1630_v56, %v3494_v23  ;;  %v1592_v22 = vpop.f32.mrb[46].mxu0  ;;  %v1632_v31 = vpop.f32.mrb[46].mxu1 }
 0x282   : > { %v1593_v37 = vadd.f32 %v1592_v22, %v3489_v8  ;;  %v1633_v15 = vadd.f32 %v1632_v31, %v3489_v8  ;;  %v1594_v21 = vpop.f32.mrb[47].mxu0  ;;  %v1634_v57 = vpop.f32.mrb[47].mxu1 }
 0x283   : > { %v2263_v29 = vpack.c.bf16 %v1591_v2, %v1589_v16  ;;  %v2287_v41 = vpack.c.bf16 %v1631_v48, %v1629_v62  ;;  %v1595_v39 = vadd.f32 %v1594_v21, %v3494_v23  ;;  %v1635_v43 = vadd.f32 %v1634_v57, %v3494_v23 }
 0x285   : > { %1945 = vst [vmem:[%s3396_s14 + $0xa0] sm:$0xff] %v2263_v29  ;;  %1969 = vst [vmem:[%s3396_s14 + $0x160] sm:$0xff] %v2287_v41  ;;  %v2266_v5 = vpack.c.bf16 %v1595_v39, %v1593_v37  ;;  %v2290_v52 = vpack.c.bf16 %v1635_v43, %v1633_v15 }
 0x287   : > { %1948 = vst [vmem:[%s3396_s14 + $0xb8] sm:$0xff] %v2266_v5  ;;  %1972 = vst [vmem:[%s3396_s14 + $0x178] sm:$0xff] %v2290_v52 }
 0x288 PF: > { %s15_s20 = sadd.s32 1, %s2546_s20   ;;  %s3561_s18 = smov %s2542_s19 }
 0x289   : > { %p12_p5 = scmp.ge.s32.totalorder %s15_s20, 4   ;;  %s3562_s19 = smov %s3564_s21 }
 0x28b   :  { %14 = sbr.rel (!%p12_p5) target bundleno = 2 (0x2), region = 76 }

// kernel: _lambda_.12
= control target key start
LH: loop header
LB: loop body
LE: loop exit
PB: predicated region body
PF: predicated region fallthrough
CT: control target
= control target key end

     0   :  { %s2758_s15 = smov 0   ;;  %s2760_s16 = smov 0   ;;  %s3358_s0 = inlined_call_operand.vmem [shape: bf16[256,1024], index: 0, kind: input, shape index: {}]   ;;  %s3359_s1 = inlined_call_operand.vmem [shape: bf16[1024,256], index: 1, kind: input, shape index: {}]   ;;  %s3360_s2 = inlined_call_operand.vmem [shape: f32[1,256], index: 2, kind: input, shape index: {}]   ;;  %s3361_s3 = inlined_call_operand.vmem [shape: f32[256,256], index: 3, kind: input, shape index: {}]   ;;  %s3362_s4 = inlined_call_operand.vmem [shape: f32[256,256], index: 4, kind: output, shape index: {}]  }
   0x1   :  { %s2762_s17 = smov 0  }
   0x2 LB: > { %s26_s18 = sadd.s32 1, %s2727_s16  ;;  %p2158_p0 = scmp.ge.s32.totalorder %s2731_s17, 1  ;;  %s2731_s17 = sphi %s2762_s17, %s14_s17   ;;  %s2727_s16 = sphi %s2760_s16, %s3364_s16   ;;  %s2723_s15 = sphi %s2758_s15, %s3363_s15  }
   0x3   : > { %p28_p1 = scmp.ge.s32.totalorder %s26_s18, 2  ;;  %p218_p2 = scmp.lt.s32.totalorder %s2731_s17, 3 }
   0x5   : > { %s3366_s18 = smov (%p28_p1, %s26_s18), 0  ;;  %p219_p3 = pnand %p2158_p0, %p218_p2 }
   0x6   : > { %v2517_v0 = vld [vmem:[%s3359_s1 + $0x4] ss:$8 sps:$4 sm:$0xff] (!%p219_p3)   ;;  %v2521_v2 = vld [vmem:[%s3359_s1] ss:$8 sps:$4 sm:$0xff] (!%p219_p3)   ;;  %v2523_v4 = vld [vmem:[%s3359_s1 + $0x14] ss:$8 sps:$4 sm:$0xff] (!%p219_p3)  }
   0x7   : > { %222 = sbr.rel (%p219_p3) target bundleno = 413 (0x19d), region = 36  ;;  %v2519_v1 = vld [vmem:[%s3359_s1 + $0x204] ss:$8 sps:$4 sm:$0xff] (!%p219_p3)   ;;  %1475 = vmatprep.subr.bf16.mxu1 (!%p219_p3), %v2517_v0  ;;  %v2522_v3 = vld [vmem:[%s3359_s1 + $0x200] ss:$8 sps:$4 sm:$0xff] (!%p219_p3)   ;;  %s2159_s9 = sshll.u32 (!%p219_p3), %s2723_s15, 4 }
   0x8   : > { %1701 = vmatprep.subr.bf16.mxu0 (!%p219_p3), %v2519_v1  ;;  %1476 = vmatpush1.bf16.msra.mxu1 (!%p219_p3), %v2521_v2  ;;  %v2525_v5 = vld [vmem:[%s3359_s1 + $0x214] ss:$8 sps:$4 sm:$0xff] (!%p219_p3)   ;;  %v2527_v6 = vld [vmem:[%s3359_s1 + $0x10] ss:$8 sps:$4 sm:$0xff] (!%p219_p3)   ;;  %v2529_v8 = vld [vmem:[%s3359_s1 + $0x24] ss:$8 sps:$4 sm:$0xff] (!%p219_p3)  }
   0x9   : > { %1702 = vmatpush1.bf16.msra.mxu0 (!%p219_p3), %v2522_v3  ;;  %1477 = vmatprep.subr.bf16.mxu1 (!%p219_p3), %v2523_v4  ;;  %v2528_v7 = vld [vmem:[%s3359_s1 + $0x210] ss:$8 sps:$4 sm:$0xff] (!%p219_p3)   ;;  %v2531_v9 = vld [vmem:[%s3359_s1 + $0x224] ss:$8 sps:$4 sm:$0xff] (!%p219_p3)   ;;  %v2533_v10 = vld [vmem:[%s3359_s1 + $0x20] ss:$8 sps:$4 sm:$0xff] (!%p219_p3)  }
   0xa   : > { %1703 = vmatprep.subr.bf16.mxu0 (!%p219_p3), %v2525_v5  ;;  %v2534_v11 = vld [vmem:[%s3359_s1 + $0x220] ss:$8 sps:$4 sm:$0xff] (!%p219_p3)   ;;  %v2535_v12 = vld [vmem:[%s3359_s1 + $0x34] ss:$8 sps:$4 sm:$0xff] (!%p219_p3)   ;;  %v2539_v14 = vld [vmem:[%s3359_s1 + $0x30] ss:$8 sps:$4 sm:$0xff] (!%p219_p3)  }
   0xb   : > { %v2537_v13 = vld [vmem:[%s3359_s1 + $0x234] ss:$8 sps:$4 sm:$0xff] (!%p219_p3)   ;;  %v2540_v15 = vld [vmem:[%s3359_s1 + $0x230] ss:$8 sps:$4 sm:$0xff] (!%p219_p3)   ;;  %v2541_v16 = vld [vmem:[%s3359_s1 + $0x44] ss:$8 sps:$4 sm:$0xff] (!%p219_p3)  }
   0xc   : > { %1478 = vmatpush1.bf16.msra.mxu1 (!%p219_p3), %v2527_v6  ;;  %v2543_v17 = vld [vmem:[%s3359_s1 + $0x244] ss:$8 sps:$4 sm:$0xff] (!%p219_p3)   ;;  %v2545_v18 = vld [vmem:[%s3359_s1 + $0x40] ss:$8 sps:$4 sm:$0xff] (!%p219_p3)   ;;  %v2547_v20 = vld [vmem:[%s3359_s1 + $0x54] ss:$8 sps:$4 sm:$0xff] (!%p219_p3)  }
   0xd   : > { %1704 = vmatpush1.bf16.msra.mxu0 (!%p219_p3), %v2528_v7  ;;  %1479 = vmatprep.subr.bf16.mxu1 (!%p219_p3), %v2529_v8  ;;  %v2546_v19 = vld [vmem:[%s3359_s1 + $0x240] ss:$8 sps:$4 sm:$0xff] (!%p219_p3)   ;;  %v2549_v21 = vld [vmem:[%s3359_s1 + $0x254] ss:$8 sps:$4 sm:$0xff] (!%p219_p3)   ;;  %v2551_v22 = vld [vmem:[%s3359_s1 + $0x50] ss:$8 sps:$4 sm:$0xff] (!%p219_p3)  }
   0xe   : > { %1705 = vmatprep.subr.bf16.mxu0 %v2531_v9  ;;  %v2552_v23 = vld [vmem:[%s3359_s1 + $0x250] ss:$8 sps:$4 sm:$0xff]   ;;  %v2553_v24 = vld [vmem:[%s3359_s1 + $0x64] ss:$8 sps:$4 sm:$0xff]   ;;  %v2557_v26 = vld [vmem:[%s3359_s1 + $0x60] ss:$8 sps:$4 sm:$0xff]  }
   0xf   : > { %v2555_v25 = vld [vmem:[%s3359_s1 + $0x264] ss:$8 sps:$4 sm:$0xff]   ;;  %v2558_v27 = vld [vmem:[%s3359_s1 + $0x260] ss:$8 sps:$4 sm:$0xff]   ;;  %v2559_v28 = vld [vmem:[%s3359_s1 + $0x74] ss:$8 sps:$4 sm:$0xff]  }
  0x10   : > { %1480 = vmatpush1.bf16.msra.mxu1 %v2533_v10  ;;  %v2561_v29 = vld [vmem:[%s3359_s1 + $0x274] ss:$8 sps:$4 sm:$0xff]   ;;  %v2563_v30 = vld [vmem:[%s3359_s1 + $0x70] ss:$8 sps:$4 sm:$0xff]   ;;  %v2565_v32 = vld [vmem:[%s3359_s1 + $0x84] ss:$8 sps:$4 sm:$0xff]  }
  0x11   : > { %1706 = vmatpush1.bf16.msra.mxu0 %v2534_v11  ;;  %1481 = vmatprep.subr.bf16.mxu1 %v2535_v12  ;;  %v2564_v31 = vld [vmem:[%s3359_s1 + $0x270] ss:$8 sps:$4 sm:$0xff]   ;;  %p270_p4 = scmp.lt.s32.totalorder %s2159_s9, 31  ;;  %v2567_v33 = vld [vmem:[%s3359_s1 + $0x284] ss:$8 sps:$4 sm:$0xff]  }
  0x12   : > { %1707 = vmatprep.subr.bf16.mxu0 %v2537_v13  ;;  %v2569_v34 = vld [vmem:[%s3359_s1 + $0x80] ss:$8 sps:$4 sm:$0xff]   ;;  %v2571_v36 = vld [vmem:[%s3359_s1 + $0x94] ss:$8 sps:$4 sm:$0xff]   ;;  %v2575_v38 = vld [vmem:[%s3359_s1 + $0x90] ss:$8 sps:$4 sm:$0xff]  }
  0x13   : > { %v2570_v35 = vld [vmem:[%s3359_s1 + $0x280] ss:$8 sps:$4 sm:$0xff]   ;;  %s3368_s9 = smov (!%p270_p4, %s2159_s9), 31  ;;  %v2573_v37 = vld [vmem:[%s3359_s1 + $0x294] ss:$8 sps:$4 sm:$0xff]  }
  0x14   : > { %1482 = vmatpush1.bf16.msra.mxu1 %v2539_v14  ;;  %v2576_v39 = vld [vmem:[%s3359_s1 + $0x290] ss:$8 sps:$4 sm:$0xff]   ;;  %v2577_v40 = vld [vmem:[%s3359_s1 + $0xa4] ss:$8 sps:$4 sm:$0xff]   ;;  %s2362_s10 = sshll.u32 %s3368_s9, 5 }
  0x15   : > { %1708 = vmatpush1.bf16.msra.mxu0 %v2540_v15  ;;  %1483 = vmatprep.subr.bf16.mxu1 %v2541_v16  ;;  %v2579_v41 = vld [vmem:[%s3359_s1 + $0x2a4] ss:$8 sps:$4 sm:$0xff]   ;;  %v2581_v42 = vld [vmem:[%s3359_s1 + $0xa0] ss:$8 sps:$4 sm:$0xff]   ;;  %s2917_s22 = scalar_lea.vmem %s3358_s0, %s2362_s10  ;;  %v2583_v44 = vld [vmem:[%s3359_s1 + $0xb4] ss:$8 sps:$4 sm:$0xff]  }
  0x16   : > { %1709 = vmatprep.subr.bf16.mxu0 %v2543_v17  ;;  %v2582_v43 = vld [vmem:[%s3359_s1 + $0x2a0] ss:$8 sps:$4 sm:$0xff]   ;;  %v2585_v45 = vld [vmem:[%s3359_s1 + $0x2b4] ss:$8 sps:$4 sm:$0xff]   ;;  %v2587_v46 = vld [vmem:[%s3359_s1 + $0xb0] ss:$8 sps:$4 sm:$0xff]  }
  0x17   : > { %v2588_v47 = vld [vmem:[%s3359_s1 + $0x2b0] ss:$8 sps:$4 sm:$0xff]   ;;  %v311_v48 = vld [vmem:[%s2917_s22] sm:$0xff]  ;;  %v2595_v58 = vld [vmem:[%s3359_s1 + $0xd4] ss:$8 sps:$4 sm:$0xff]  }
  0x18   : > { %1484 = vmatpush1.bf16.msra.mxu1 %v2545_v18  ;;  %v315_v49 = vld [vmem:[%s2917_s22 + $0x20] sm:$0xff]  ;;  %v313_v50 = vld [vmem:[%s2917_s22 + $0x10] sm:$0xff] }
  0x19   : > { %1710 = vmatpush1.bf16.msra.mxu0 %v2546_v19  ;;  %1485 = vmatprep.subr.bf16.mxu1 %v2547_v20  ;;  %v317_v51 = vld [vmem:[%s2917_s22 + $0x30] sm:$0xff]  ;;  %v2589_v52 = vld [vmem:[%s3359_s1 + $0xc4] ss:$8 sps:$4 sm:$0xff]   ;;  %v2169_v53 = vcombine.high %v311_v48, %v315_v49  ;;  %v2593_v56 = vld [vmem:[%s3359_s1 + $0xc0] ss:$8 sps:$4 sm:$0xff]   ;;  %v2168_v11 = vcombine.low %v311_v48, %v315_v49 }
  0x1a   : > { %1711 = vmatprep.subr.bf16.mxu0 %v2549_v21  ;;  %v2591_v54 = vld [vmem:[%s3359_s1 + $0x2c4] ss:$8 sps:$4 sm:$0xff]   ;;  %v2173_v55 = vcombine.high %v313_v50, %v317_v51  ;;  %v2594_v57 = vld [vmem:[%s3359_s1 + $0x2c0] ss:$8 sps:$4 sm:$0xff]   ;;  %v2597_v59 = vld [vmem:[%s3359_s1 + $0x2d4] ss:$8 sps:$4 sm:$0xff]   ;;  %v2172_v12 = vcombine.low %v313_v50, %v317_v51 }
  0x1b   : > { %1507 = vmatprep.mubr.bf16.mxu1 %v2169_v53  ;;  %v2599_v60 = vld [vmem:[%s3359_s1 + $0xd0] ss:$8 sps:$4 sm:$0xff]   ;;  %v2601_v62 = vld [vmem:[%s3359_s1 + $0xe4] ss:$8 sps:$4 sm:$0xff]   ;;  %v2605_v0 = vld [vmem:[%s3359_s1 + $0xe0] ss:$8 sps:$4 sm:$0xff]  }
  0x1c   : > { %1486 = vmatpush1.bf16.msra.mxu1 %v2551_v22  ;;  %1733 = vmatprep.mubr.bf16.mxu0 %v2173_v55  ;;  %v2600_v61 = vld [vmem:[%s3359_s1 + $0x2d0] ss:$8 sps:$4 sm:$0xff]   ;;  %v2603_v63 = vld [vmem:[%s3359_s1 + $0x2e4] ss:$8 sps:$4 sm:$0xff]   ;;  %v2606_v1 = vld [vmem:[%s3359_s1 + $0x2e0] ss:$8 sps:$4 sm:$0xff]  }
  0x1d   : > { %1712 = vmatpush1.bf16.msra.mxu0 %v2552_v23  ;;  %1487 = vmatprep.subr.bf16.mxu1 %v2553_v24  ;;  %v2607_v2 = vld [vmem:[%s3359_s1 + $0xf4] ss:$8 sps:$4 sm:$0xff]   ;;  %v2611_v4 = vld [vmem:[%s3359_s1 + $0xf0] ss:$8 sps:$4 sm:$0xff]   ;;  %v2615_v6 = vld [vmem:[%s3359_s1 + $0x104] ss:$8 sps:$4 sm:$0xff]  }
  0x1e   : > { %1713 = vmatprep.subr.bf16.mxu0 %v2555_v25  ;;  %v2609_v3 = vld [vmem:[%s3359_s1 + $0x2f4] ss:$8 sps:$4 sm:$0xff]   ;;  %v2612_v5 = vld [vmem:[%s3359_s1 + $0x2f0] ss:$8 sps:$4 sm:$0xff]   ;;  %v2618_v7 = vld [vmem:[%s3359_s1 + $0x304] ss:$8 sps:$4 sm:$0xff]  }
  0x1f   : > { %v2613_v8 = vld [vmem:[%s3359_s1 + $0x100] ss:$8 sps:$4 sm:$0xff]   ;;  %v321_v14 = vld [vmem:[%s2917_s22 + $0x50] sm:$0xff]  ;;  %v2627_v22 = vld [vmem:[%s3359_s1 + $0x124] ss:$8 sps:$4 sm:$0xff]  }
  0x20   : > { %1488 = vmatpush1.bf16.msra.mxu1 %v2557_v26  ;;  %v2616_v9 = vld [vmem:[%s3359_s1 + $0x300] ss:$8 sps:$4 sm:$0xff]   ;;  %v325_v15 = vld [vmem:[%s2917_s22 + $0x70] sm:$0xff]  ;;  %v2630_v23 = vld [vmem:[%s3359_s1 + $0x324] ss:$8 sps:$4 sm:$0xff]  }
  0x21   : > { %1714 = vmatpush1.bf16.msra.mxu0 %v2558_v27  ;;  %1489 = vmatprep.subr.bf16.mxu1 %v2559_v28  ;;  %v319_v10 = vld [vmem:[%s2917_s22 + $0x40] sm:$0xff]  ;;  %v2621_v16 = vld [vmem:[%s3359_s1 + $0x114] ss:$8 sps:$4 sm:$0xff]   ;;  %v2181_v19 = vcombine.high %v321_v14, %v325_v15  ;;  %v2619_v20 = vld [vmem:[%s3359_s1 + $0x110] ss:$8 sps:$4 sm:$0xff]  }
  0x22   : > { %1715 = vmatprep.subr.bf16.mxu0 %v2561_v29  ;;  %v323_v13 = vld [vmem:[%s2917_s22 + $0x60] sm:$0xff]  ;;  %v2624_v17 = vld [vmem:[%s3359_s1 + $0x314] ss:$8 sps:$4 sm:$0xff]   ;;  %v2622_v21 = vld [vmem:[%s3359_s1 + $0x310] ss:$8 sps:$4 sm:$0xff]   ;;  %v2180_v29 = vcombine.low %v321_v14, %v325_v15 }
  0x23   : > { %v2177_v18 = vcombine.high %v319_v10, %v323_v13  ;;  %v2625_v24 = vld [vmem:[%s3359_s1 + $0x120] ss:$8 sps:$4 sm:$0xff]   ;;  %v2176_v28 = vcombine.low %v319_v10, %v323_v13  ;;  %v2645_v48 = vld [vmem:[%s3359_s1 + $0x154] ss:$8 sps:$4 sm:$0xff]   ;;  %v2646_v53 = vld [vmem:[%s3359_s1 + $0x350] ss:$8 sps:$4 sm:$0xff]  }
  0x24   : > { %1490 = vmatpush1.bf16.msra.mxu1 %v2563_v30  ;;  %v2628_v25 = vld [vmem:[%s3359_s1 + $0x320] ss:$8 sps:$4 sm:$0xff]   ;;  %v329_v30 = vld [vmem:[%s2917_s22 + $0x90] sm:$0xff]  ;;  %v2654_v55 = vld [vmem:[%s3359_s1 + $0x364] ss:$8 sps:$4 sm:$0xff]  }
  0x25   : > { %1716 = vmatpush1.bf16.msra.mxu0 %v2564_v31  ;;  %1491 = vmatprep.subr.bf16.mxu1 %v2565_v32  ;;  %v327_v26 = vld [vmem:[%s2917_s22 + $0x80] sm:$0xff]  ;;  %v333_v31 = vld [vmem:[%s2917_s22 + $0xb0] sm:$0xff] }
  0x26   : > { %1717 = vmatprep.subr.bf16.mxu0 %v2567_v33  ;;  %v331_v27 = vld [vmem:[%s2917_s22 + $0xa0] sm:$0xff]  ;;  %v2633_v32 = vld [vmem:[%s3359_s1 + $0x134] ss:$8 sps:$4 sm:$0xff]  }
  0x27   : > { %v2636_v33 = vld [vmem:[%s3359_s1 + $0x334] ss:$8 sps:$4 sm:$0xff]   ;;  %v2661_v14 = vld [vmem:[%s3359_s1 + $0x180] ss:$8 sps:$4 sm:$0xff]  }
  0x28   : > { %1492 = vmatpush1.bf16.msra.mxu1 %v2569_v34  ;;  %v2185_v34 = vcombine.high %v327_v26, %v331_v27  ;;  %v2648_v49 = vld [vmem:[%s3359_s1 + $0x354] ss:$8 sps:$4 sm:$0xff]   ;;  %v2664_v15 = vld [vmem:[%s3359_s1 + $0x380] ss:$8 sps:$4 sm:$0xff]  }
  0x29   : > { %1718 = vmatpush1.bf16.msra.mxu0 %v2570_v35  ;;  %1493 = vmatprep.subr.bf16.mxu1 %v2571_v36  ;;  %v2189_v35 = vcombine.high %v329_v30, %v333_v31  ;;  %v2631_v36 = vld [vmem:[%s3359_s1 + $0x130] ss:$8 sps:$4 sm:$0xff]  }
  0x2a   : > { %1719 = vmatprep.subr.bf16.mxu0 %v2573_v37  ;;  %v2634_v37 = vld [vmem:[%s3359_s1 + $0x330] ss:$8 sps:$4 sm:$0xff]  }
  0x2b   : > { %v357_v13 = vld [vmem:[%s2917_s22 + $0x170] sm:$0xff] }
  0x2c   : > { %1494 = vmatpush1.bf16.msra.mxu1 %v2575_v38  ;;  %v2639_v38 = vld [vmem:[%s3359_s1 + $0x144] ss:$8 sps:$4 sm:$0xff]  }
  0x2d   : > { %1720 = vmatpush1.bf16.msra.mxu0 %v2576_v39  ;;  %1495 = vmatprep.subr.bf16.mxu1 %v2577_v40  ;;  %v2642_v39 = vld [vmem:[%s3359_s1 + $0x344] ss:$8 sps:$4 sm:$0xff]   ;;  %v2637_v40 = vld [vmem:[%s3359_s1 + $0x140] ss:$8 sps:$4 sm:$0xff]  }
  0x2e   : > { %1721 = vmatprep.subr.bf16.mxu0 %v2579_v41  ;;  %v2640_v41 = vld [vmem:[%s3359_s1 + $0x340] ss:$8 sps:$4 sm:$0xff]  }
  0x30   : > { %1496 = vmatpush1.bf16.msra.mxu1 %v2581_v42  ;;  %v335_v42 = vld [vmem:[%s2917_s22 + $0xc0] sm:$0xff] }
  0x31   : > { %1722 = vmatpush1.bf16.msra.mxu0 %v2582_v43  ;;  %1497 = vmatprep.subr.bf16.mxu1 %v2583_v44  ;;  %v339_v43 = vld [vmem:[%s2917_s22 + $0xe0] sm:$0xff]  ;;  %v2184_v44 = vcombine.low %v327_v26, %v331_v27 }
  0x32   : > { %1723 = vmatprep.subr.bf16.mxu0 %v2585_v45  ;;  %v2188_v45 = vcombine.low %v329_v30, %v333_v31  ;;  %v2193_v50 = vcombine.high %v335_v42, %v339_v43  ;;  %v363_v27 = vld [vmem:[%s2917_s22 + $0x1a0] sm:$0xff] }
  0x33   : > { %v2673_v30 = vld [vmem:[%s3359_s1 + $0x1a0] ss:$8 sps:$4 sm:$0xff]  }
  0x34   : > { %1498 = vmatpush1.bf16.msra.mxu1 %v2587_v46  ;;  %v337_v46 = vld [vmem:[%s2917_s22 + $0xd0] sm:$0xff]  ;;  %v2676_v31 = vld [vmem:[%s3359_s1 + $0x3a0] ss:$8 sps:$4 sm:$0xff]  }
  0x35   : > { %1724 = vmatpush1.bf16.msra.mxu0 %v2588_v47  ;;  %1499 = vmatprep.subr.bf16.mxu1 %v2589_v52  ;;  %v341_v47 = vld [vmem:[%s2917_s22 + $0xf0] sm:$0xff] }
  0x36   : > { %1725 = vmatprep.subr.bf16.mxu0 %v2591_v54  ;;  %v2197_v51 = vcombine.high %v337_v46, %v341_v47  ;;  %v2643_v52 = vld [vmem:[%s3359_s1 + $0x150] ss:$8 sps:$4 sm:$0xff]   ;;  %v2651_v54 = vld [vmem:[%s3359_s1 + $0x164] ss:$8 sps:$4 sm:$0xff]  }
  0x38   : > { %1500 = vmatpush1.bf16.msra.mxu1 %v2593_v56  ;;  %v2649_v56 = vld [vmem:[%s3359_s1 + $0x160] ss:$8 sps:$4 sm:$0xff]  }
  0x39   : > { %1726 = vmatpush1.bf16.msra.mxu0 %v2594_v57  ;;  %1501 = vmatprep.subr.bf16.mxu1 %v2595_v58  ;;  %v343_v57 = vld [vmem:[%s2917_s22 + $0x100] sm:$0xff] }
  0x3a   : > { %1727 = vmatprep.subr.bf16.mxu0 %v2597_v59  ;;  %v347_v58 = vld [vmem:[%s2917_s22 + $0x120] sm:$0xff]  ;;  %v2192_v59 = vcombine.low %v335_v42, %v339_v43 }
  0x3b   : > { %v2200_v10 = vcombine.low %v343_v57, %v347_v58  ;;  %v371_v43 = vld [vmem:[%s2917_s22 + $0x1e0] sm:$0xff] }
  0x3c   : > { %1502 = vmatpush1.bf16.msra.mxu1 %v2599_v60  ;;  %v2196_v60 = vcombine.low %v337_v46, %v341_v47  ;;  %v2685_v46 = vld [vmem:[%s3359_s1 + $0x1c0] ss:$8 sps:$4 sm:$0xff]  }
  0x3d   : > { %1728 = vmatpush1.bf16.msra.mxu0 %v2600_v61  ;;  %1503 = vmatprep.subr.bf16.mxu1 %v2601_v62  ;;  %v345_v61 = vld [vmem:[%s2917_s22 + $0x110] sm:$0xff]  ;;  %v2688_v47 = vld [vmem:[%s3359_s1 + $0x3c0] ss:$8 sps:$4 sm:$0xff]  }
  0x3e   : > { %1729 = vmatprep.subr.bf16.mxu0 %v2603_v63  ;;  %v349_v62 = vld [vmem:[%s2917_s22 + $0x130] sm:$0xff]  ;;  %v2652_v63 = vld [vmem:[%s3359_s1 + $0x360] ss:$8 sps:$4 sm:$0xff]  }
  0x40   : > { %1504 = vmatpush1.bf16.msra.mxu1 %v2605_v0  ;;  %v2657_v0 = vld [vmem:[%s3359_s1 + $0x174] ss:$8 sps:$4 sm:$0xff]  }
  0x41   : > { %1730 = vmatpush1.bf16.msra.mxu0 %v2606_v1  ;;  %1505 = vmatprep.subr.bf16.mxu1 %v2607_v2  ;;  %v2660_v1 = vld [vmem:[%s3359_s1 + $0x374] ss:$8 sps:$4 sm:$0xff]   ;;  %v2201_v2 = vcombine.high %v343_v57, %v347_v58 }
  0x42   : > { %1731 = vmatprep.subr.bf16.mxu0 %v2609_v3  ;;  %v2205_v3 = vcombine.high %v345_v61, %v349_v62 }
  0x44   : > { %1506 = vmatpush1.bf16.msra.mxu1 %v2611_v4  ;;  %v2655_v4 = vld [vmem:[%s3359_s1 + $0x170] ss:$8 sps:$4 sm:$0xff]  }
  0x45   : > { %1732 = vmatpush1.bf16.msra.mxu0 %v2612_v5  ;;  %1588 = vmatprep.subr.bf16.mxu1 %v2615_v6  ;;  %v2658_v5 = vld [vmem:[%s3359_s1 + $0x370] ss:$8 sps:$4 sm:$0xff]   ;;  %v2663_v6 = vld [vmem:[%s3359_s1 + $0x184] ss:$8 sps:$4 sm:$0xff]  }
  0x46   : > { %1814 = vmatprep.subr.bf16.mxu0 %v2618_v7  ;;  %v2666_v7 = vld [vmem:[%s3359_s1 + $0x384] ss:$8 sps:$4 sm:$0xff]  }
  0x47   : > { %1508 = vmatmul.mubr.bf16.vlgmr.msra.gmra.mrb[0].mxu1 %v2168_v11  ;;  %v2204_v11 = vcombine.low %v345_v61, %v349_v62  ;;  %v318_v61 = vld [vmem:[%s2917_s22 + $0x38] sm:$0xff]  ;;  %v2697_v62 = vld [vmem:[%s3359_s1 + $0x1e0] ss:$8 sps:$4 sm:$0xff]  }
  0x48   : > { %1734 = vmatmul.mubr.bf16.vlgmr.msra.gmra.mrb[0].mxu0 %v2172_v12  ;;  %1589 = vmatpush1.bf16.msra.mxu1 %v2613_v8  ;;  %v351_v8 = vld [vmem:[%s2917_s22 + $0x140] sm:$0xff]  ;;  %v353_v12 = vld [vmem:[%s2917_s22 + $0x150] sm:$0xff] }
  0x49   : > { %1815 = vmatpush1.bf16.msra.mxu0 %v2616_v9  ;;  %1590 = vmatprep.subr.bf16.mxu1 %v2621_v16  ;;  %v355_v9 = vld [vmem:[%s2917_s22 + $0x160] sm:$0xff]  ;;  %v2669_v16 = vld [vmem:[%s3359_s1 + $0x194] ss:$8 sps:$4 sm:$0xff]   ;;  %v2212_v26 = vcombine.low %v353_v12, %v357_v13 }
  0x4a   : > { %1816 = vmatprep.subr.bf16.mxu0 %v2624_v17  ;;  %1517 = vmatprep.mubr.bf16.mxu1 %v2177_v18  ;;  %v2672_v17 = vld [vmem:[%s3359_s1 + $0x394] ss:$8 sps:$4 sm:$0xff]   ;;  %v2209_v18 = vcombine.high %v351_v8, %v355_v9 }
  0x4b   : > { %1743 = vmatprep.mubr.bf16.mxu0 %v2181_v19  ;;  %v2213_v19 = vcombine.high %v353_v12, %v357_v13 }
  0x4c   : > { %1591 = vmatpush1.bf16.msra.mxu1 %v2619_v20  ;;  %v2667_v20 = vld [vmem:[%s3359_s1 + $0x190] ss:$8 sps:$4 sm:$0xff]  }
  0x4d   : > { %1817 = vmatpush1.bf16.msra.mxu0 %v2622_v21  ;;  %1592 = vmatprep.subr.bf16.mxu1 %v2627_v22  ;;  %v2670_v21 = vld [vmem:[%s3359_s1 + $0x390] ss:$8 sps:$4 sm:$0xff]   ;;  %v2675_v22 = vld [vmem:[%s3359_s1 + $0x1a4] ss:$8 sps:$4 sm:$0xff]  }
  0x4e   : > { %1818 = vmatprep.subr.bf16.mxu0 %v2630_v23  ;;  %v2678_v23 = vld [vmem:[%s3359_s1 + $0x3a4] ss:$8 sps:$4 sm:$0xff]  }
  0x4f   : > { %1518 = vmatmul.mubr.bf16.gmra.mrb[4].mxu1 %v2176_v28  ;;  %v361_v28 = vld [vmem:[%s2917_s22 + $0x190] sm:$0xff] }
  0x50   : > { %1744 = vmatmul.mubr.bf16.gmra.mrb[4].mxu0 %v2180_v29  ;;  %1593 = vmatpush1.bf16.msra.mxu1 %v2625_v24  ;;  %v359_v24 = vld [vmem:[%s2917_s22 + $0x180] sm:$0xff]  ;;  %v365_v29 = vld [vmem:[%s2917_s22 + $0x1b0] sm:$0xff] }
  0x51   : > { %1819 = vmatpush1.bf16.msra.mxu0 %v2628_v25  ;;  %1594 = vmatprep.subr.bf16.mxu1 %v2633_v32  ;;  %v2208_v25 = vcombine.low %v351_v8, %v355_v9  ;;  %v2681_v32 = vld [vmem:[%s3359_s1 + $0x1b4] ss:$8 sps:$4 sm:$0xff]   ;;  %v2220_v42 = vcombine.low %v361_v28, %v365_v29 }
  0x52   : > { %1820 = vmatprep.subr.bf16.mxu0 %v2636_v33  ;;  %1527 = vmatprep.mubr.bf16.mxu1 %v2185_v34  ;;  %v2684_v33 = vld [vmem:[%s3359_s1 + $0x3b4] ss:$8 sps:$4 sm:$0xff]   ;;  %v2217_v34 = vcombine.high %v359_v24, %v363_v27 }
  0x53   : > { %1753 = vmatprep.mubr.bf16.mxu0 %v2189_v35  ;;  %v2221_v35 = vcombine.high %v361_v28, %v365_v29  ;;  %v322_v8 = vld [vmem:[%s2917_s22 + $0x58] sm:$0xff] }
  0x54   : > { %1595 = vmatpush1.bf16.msra.mxu1 %v2631_v36  ;;  %v2679_v36 = vld [vmem:[%s3359_s1 + $0x1b0] ss:$8 sps:$4 sm:$0xff]  }
  0x55   : > { %1821 = vmatpush1.bf16.msra.mxu0 %v2634_v37  ;;  %1596 = vmatprep.subr.bf16.mxu1 %v2639_v38  ;;  %v2682_v37 = vld [vmem:[%s3359_s1 + $0x3b0] ss:$8 sps:$4 sm:$0xff]   ;;  %v2687_v38 = vld [vmem:[%s3359_s1 + $0x1c4] ss:$8 sps:$4 sm:$0xff]  }
  0x56   : > { %1822 = vmatprep.subr.bf16.mxu0 %v2642_v39  ;;  %v2690_v39 = vld [vmem:[%s3359_s1 + $0x3c4] ss:$8 sps:$4 sm:$0xff]   ;;  %v326_v9 = vld [vmem:[%s2917_s22 + $0x78] sm:$0xff] }
  0x57   : > { %1528 = vmatmul.mubr.bf16.gmra.mrb[8].mxu1 %v2184_v44  ;;  %v369_v44 = vld [vmem:[%s2917_s22 + $0x1d0] sm:$0xff]  ;;  %v2183_v13 = vcombine.high %v322_v8, %v326_v9 }
  0x58   : > { %1754 = vmatmul.mubr.bf16.gmra.mrb[8].mxu0 %v2188_v45  ;;  %1597 = vmatpush1.bf16.msra.mxu1 %v2637_v40  ;;  %v367_v40 = vld [vmem:[%s2917_s22 + $0x1c0] sm:$0xff]  ;;  %v373_v45 = vld [vmem:[%s2917_s22 + $0x1f0] sm:$0xff] }
  0x59   : > { %1823 = vmatpush1.bf16.msra.mxu0 %v2640_v41  ;;  %1598 = vmatprep.subr.bf16.mxu1 %v2645_v48  ;;  %v2216_v41 = vcombine.low %v359_v24, %v363_v27  ;;  %v2693_v48 = vld [vmem:[%s3359_s1 + $0x1d4] ss:$8 sps:$4 sm:$0xff]   ;;  %v2224_v57 = vcombine.low %v367_v40, %v371_v43  ;;  %v2228_v58 = vcombine.low %v369_v44, %v373_v45 }
  0x5a   : > { %1824 = vmatprep.subr.bf16.mxu0 %v2648_v49  ;;  %1537 = vmatprep.mubr.bf16.mxu1 %v2193_v50  ;;  %v2696_v49 = vld [vmem:[%s3359_s1 + $0x3d4] ss:$8 sps:$4 sm:$0xff]   ;;  %v2225_v50 = vcombine.high %v367_v40, %v371_v43 }
  0x5b   : > { %1763 = vmatprep.mubr.bf16.mxu0 %v2197_v51  ;;  %v2229_v51 = vcombine.high %v369_v44, %v373_v45  ;;  %v338_v24 = vld [vmem:[%s2917_s22 + $0xd8] sm:$0xff] }
  0x5c   : > { %1599 = vmatpush1.bf16.msra.mxu1 %v2643_v52  ;;  %v2691_v52 = vld [vmem:[%s3359_s1 + $0x1d0] ss:$8 sps:$4 sm:$0xff]  }
  0x5d   : > { %1825 = vmatpush1.bf16.msra.mxu0 %v2646_v53  ;;  %1600 = vmatprep.subr.bf16.mxu1 %v2651_v54  ;;  %v2694_v53 = vld [vmem:[%s3359_s1 + $0x3d0] ss:$8 sps:$4 sm:$0xff]   ;;  %v2699_v54 = vld [vmem:[%s3359_s1 + $0x1e4] ss:$8 sps:$4 sm:$0xff]  }
  0x5e   : > { %1826 = vmatprep.subr.bf16.mxu0 %v2654_v55  ;;  %v2702_v55 = vld [vmem:[%s3359_s1 + $0x3e4] ss:$8 sps:$4 sm:$0xff]   ;;  %v354_v40 = vld [vmem:[%s2917_s22 + $0x158] sm:$0xff] }
  0x5f   : > { %1538 = vmatmul.mubr.bf16.gmra.mrb[12].mxu1 %v2192_v59  ;;  %v316_v59 = vld [vmem:[%s2917_s22 + $0x28] sm:$0xff] }
  0x60   : > { %1764 = vmatmul.mubr.bf16.gmra.mrb[12].mxu0 %v2196_v60  ;;  %1601 = vmatpush1.bf16.msra.mxu1 %v2649_v56  ;;  %v312_v56 = vld [vmem:[%s2917_s22 + $0x8] sm:$0xff]  ;;  %v314_v60 = vld [vmem:[%s2917_s22 + $0x18] sm:$0xff] }
  0x61   : > { %1827 = vmatpush1.bf16.msra.mxu0 %v2652_v63  ;;  %1602 = vmatprep.subr.bf16.mxu1 %v2657_v0  ;;  %v2700_v63 = vld [vmem:[%s3359_s1 + $0x3e0] ss:$8 sps:$4 sm:$0xff]   ;;  %v2705_v0 = vld [vmem:[%s3359_s1 + $0x1f4] ss:$8 sps:$4 sm:$0xff]  }
  0x62   : > { %1828 = vmatprep.subr.bf16.mxu0 %v2660_v1  ;;  %1547 = vmatprep.mubr.bf16.mxu1 %v2201_v2  ;;  %v2708_v1 = vld [vmem:[%s3359_s1 + $0x3f4] ss:$8 sps:$4 sm:$0xff]   ;;  %v2171_v2 = vcombine.high %v312_v56, %v316_v59 }
  0x63   : > { %1773 = vmatprep.mubr.bf16.mxu0 %v2205_v3  ;;  %v2175_v3 = vcombine.high %v314_v60, %v318_v61 }
  0x64   : > { %1603 = vmatpush1.bf16.msra.mxu1 %v2655_v4  ;;  %v2703_v4 = vld [vmem:[%s3359_s1 + $0x1f0] ss:$8 sps:$4 sm:$0xff]  }
  0x65   : > { %1829 = vmatpush1.bf16.msra.mxu0 %v2658_v5  ;;  %1604 = vmatprep.subr.bf16.mxu1 %v2663_v6  ;;  %v2706_v5 = vld [vmem:[%s3359_s1 + $0x3f0] ss:$8 sps:$4 sm:$0xff]   ;;  %v320_v6 = vld [vmem:[%s2917_s22 + $0x48] sm:$0xff] }
  0x66   : > { %1830 = vmatprep.subr.bf16.mxu0 %v2666_v7  ;;  %v324_v7 = vld [vmem:[%s2917_s22 + $0x68] sm:$0xff] }
  0x67   : > { %1548 = vmatmul.mubr.bf16.gmra.mrb[16].mxu1 %v2200_v10  ;;  %v2170_v10 = vcombine.low %v312_v56, %v316_v59  ;;  %v2179_v12 = vcombine.high %v320_v6, %v324_v7  ;;  %v370_v56 = vld [vmem:[%s2917_s22 + $0x1d8] sm:$0xff] }
  0x68   : > { %1774 = vmatmul.mubr.bf16.gmra.mrb[16].mxu0 %v2204_v11  ;;  %1605 = vmatpush1.bf16.msra.mxu1 %v2661_v14  ;;  %v2174_v11 = vcombine.low %v314_v60, %v318_v61  ;;  %v328_v14 = vld [vmem:[%s2917_s22 + $0x88] sm:$0xff] }
  0x69   : > { %1831 = vmatpush1.bf16.msra.mxu0 %v2664_v15  ;;  %1606 = vmatprep.subr.bf16.mxu1 %v2669_v16  ;;  %v332_v15 = vld [vmem:[%s2917_s22 + $0xa8] sm:$0xff]  ;;  %v330_v16 = vld [vmem:[%s2917_s22 + $0x98] sm:$0xff] }
  0x6a   : > { %1832 = vmatprep.subr.bf16.mxu0 %v2672_v17  ;;  %1557 = vmatprep.mubr.bf16.mxu1 %v2209_v18  ;;  %v334_v17 = vld [vmem:[%s2917_s22 + $0xb8] sm:$0xff]  ;;  %v2178_v18 = vcombine.low %v320_v6, %v324_v7 }
  0x6b   : > { %1783 = vmatprep.mubr.bf16.mxu0 %v2213_v19  ;;  %v2182_v19 = vcombine.low %v322_v8, %v326_v9  ;;  %v2190_v27 = vcombine.low %v330_v16, %v334_v17 }
  0x6c   : > { %1607 = vmatpush1.bf16.msra.mxu1 %v2667_v20  ;;  %v2187_v20 = vcombine.high %v328_v14, %v332_v15 }
  0x6d   : > { %1833 = vmatpush1.bf16.msra.mxu0 %v2670_v21  ;;  %1608 = vmatprep.subr.bf16.mxu1 %v2675_v22  ;;  %v2191_v21 = vcombine.high %v330_v16, %v334_v17  ;;  %v336_v22 = vld [vmem:[%s2917_s22 + $0xc8] sm:$0xff] }
  0x6e   : > { %1834 = vmatprep.subr.bf16.mxu0 %v2678_v23  ;;  %v340_v23 = vld [vmem:[%s2917_s22 + $0xe8] sm:$0xff] }
  0x6f   : > { %1558 = vmatmul.mubr.bf16.gmra.mrb[20].mxu1 %v2208_v25  ;;  %v342_v25 = vld [vmem:[%s2917_s22 + $0xf8] sm:$0xff]  ;;  %v2195_v28 = vcombine.high %v336_v22, %v340_v23 }
  0x70   : > { %1784 = vmatmul.mubr.bf16.gmra.mrb[20].mxu0 %v2212_v26  ;;  %1609 = vmatpush1.bf16.msra.mxu1 %v2673_v30  ;;  %v2186_v26 = vcombine.low %v328_v14, %v332_v15  ;;  %v2199_v29 = vcombine.high %v338_v24, %v342_v25  ;;  %v344_v30 = vld [vmem:[%s2917_s22 + $0x108] sm:$0xff] }
  0x71   : > { %1835 = vmatpush1.bf16.msra.mxu0 %v2676_v31  ;;  %1610 = vmatprep.subr.bf16.mxu1 %v2681_v32  ;;  %v348_v31 = vld [vmem:[%s2917_s22 + $0x128] sm:$0xff]  ;;  %v346_v32 = vld [vmem:[%s2917_s22 + $0x118] sm:$0xff] }
  0x72   : > { %1836 = vmatprep.subr.bf16.mxu0 %v2684_v33  ;;  %1567 = vmatprep.mubr.bf16.mxu1 %v2217_v34  ;;  %v350_v33 = vld [vmem:[%s2917_s22 + $0x138] sm:$0xff]  ;;  %v2194_v34 = vcombine.low %v336_v22, %v340_v23 }
  0x73   : > { %1793 = vmatprep.mubr.bf16.mxu0 %v2221_v35  ;;  %v2198_v35 = vcombine.low %v338_v24, %v342_v25  ;;  %v2206_v43 = vcombine.low %v346_v32, %v350_v33 }
  0x74   : > { %1611 = vmatpush1.bf16.msra.mxu1 %v2679_v36  ;;  %v2203_v36 = vcombine.high %v344_v30, %v348_v31 }
  0x75   : > { %1837 = vmatpush1.bf16.msra.mxu0 %v2682_v37  ;;  %1612 = vmatprep.subr.bf16.mxu1 %v2687_v38  ;;  %v2207_v37 = vcombine.high %v346_v32, %v350_v33  ;;  %v352_v38 = vld [vmem:[%s2917_s22 + $0x148] sm:$0xff] }
  0x76   : > { %1838 = vmatprep.subr.bf16.mxu0 %v2690_v39  ;;  %v356_v39 = vld [vmem:[%s2917_s22 + $0x168] sm:$0xff] }
  0x77   : > { %1568 = vmatmul.mubr.bf16.gmra.mrb[24].mxu1 %v2216_v41  ;;  %v358_v41 = vld [vmem:[%s2917_s22 + $0x178] sm:$0xff]  ;;  %v2211_v44 = vcombine.high %v352_v38, %v356_v39 }
  0x78   : > { %1794 = vmatmul.mubr.bf16.gmra.mrb[24].mxu0 %v2220_v42  ;;  %1613 = vmatpush1.bf16.msra.mxu1 %v2685_v46  ;;  %v2202_v42 = vcombine.low %v344_v30, %v348_v31  ;;  %v2215_v45 = vcombine.high %v354_v40, %v358_v41  ;;  %v360_v46 = vld [vmem:[%s2917_s22 + $0x188] sm:$0xff] }
  0x79   : > { %1839 = vmatpush1.bf16.msra.mxu0 %v2688_v47  ;;  %1614 = vmatprep.subr.bf16.mxu1 %v2693_v48  ;;  %v364_v47 = vld [vmem:[%s2917_s22 + $0x1a8] sm:$0xff]  ;;  %v362_v48 = vld [vmem:[%s2917_s22 + $0x198] sm:$0xff] }
  0x7a   : > { %1840 = vmatprep.subr.bf16.mxu0 %v2696_v49  ;;  %1577 = vmatprep.mubr.bf16.mxu1 %v2225_v50  ;;  %v366_v49 = vld [vmem:[%s2917_s22 + $0x1b8] sm:$0xff]  ;;  %v2210_v50 = vcombine.low %v352_v38, %v356_v39 }
  0x7b   : > { %1803 = vmatprep.mubr.bf16.mxu0 %v2229_v51  ;;  %v2214_v51 = vcombine.low %v354_v40, %v358_v41  ;;  %v2222_v59 = vcombine.low %v362_v48, %v366_v49 }
  0x7c   : > { %1615 = vmatpush1.bf16.msra.mxu1 %v2691_v52  ;;  %v2219_v52 = vcombine.high %v360_v46, %v364_v47 }
  0x7d   : > { %1841 = vmatpush1.bf16.msra.mxu0 %v2694_v53  ;;  %1616 = vmatprep.subr.bf16.mxu1 %v2699_v54  ;;  %v2223_v53 = vcombine.high %v362_v48, %v366_v49  ;;  %v368_v54 = vld [vmem:[%s2917_s22 + $0x1c8] sm:$0xff] }
  0x7e   : > { %1842 = vmatprep.subr.bf16.mxu0 %v2702_v55  ;;  %v372_v55 = vld [vmem:[%s2917_s22 + $0x1e8] sm:$0xff] }
  0x7f   : > { %1578 = vmatmul.mubr.bf16.gmra.mrb[28].mxu1 %v2224_v57  ;;  %v374_v57 = vld [vmem:[%s2917_s22 + $0x1f8] sm:$0xff]  ;;  %v2227_v60 = vcombine.high %v368_v54, %v372_v55  ;;  %s2363_s22 = sshll.u32 %s3368_s9, 4 }
  0x80   : > { %1804 = vmatmul.mubr.bf16.gmra.mrb[28].mxu0 %v2228_v58  ;;  %1617 = vmatpush1.bf16.msra.mxu1 %v2697_v62  ;;  %v2218_v58 = vcombine.low %v360_v46, %v364_v47  ;;  %v2231_v61 = vcombine.high %v370_v56, %v374_v57  ;;  %v2226_v62 = vcombine.low %v368_v54, %v372_v55  ;;  %s3246_s27 = scalar_lea.vmem %s3361_s3, %s2363_s22  ;;  %s3256_s29 = scalar_lea.vmem %s3362_s4, %s2363_s22 }
  0x81   : > { %1843 = vmatpush1.bf16.msra.mxu0 %v2700_v63  ;;  %1618 = vmatprep.subr.bf16.mxu1 %v2705_v0  ;;  %v2230_v63 = vcombine.low %v370_v56, %v374_v57  ;;  %v505_v0 = vlaneseq  ;;  %v1928_v17 = vld [vmem:[%s3246_s27 + $0x8] sm:$0xff]  ;;  %v1929_v22 = vld [vmem:[%s3246_s27 + $0x10] sm:$0xff] }
  0x82   : > { %1844 = vmatprep.subr.bf16.mxu0 %v2708_v1  ;;  %1620 = vmatprep.mubr.bf16.mxu1 %v2171_v2  ;;  %v1932_v41 = vld [vmem:[%s3246_s27 + $0x28] sm:$0xff]  ;;  %v1933_v46 = vld [vmem:[%s3246_s27 + $0x30] sm:$0xff] }
  0x83   : > { %1846 = vmatprep.mubr.bf16.mxu0 %v2175_v3  ;;  %v506_v1 = vshrl.u32 %v505_v0, 7  ;;  %v503_v3 = vld [vmem:[%s3360_s2] sm:$0x3] }
  0x84   : > { %1619 = vmatpush1.bf16.msra.mxu1 %v2703_v4 }
  0x85   : > { %1845 = vmatpush1.bf16.msra.mxu0 %v2706_v5  ;;  %v507_v2 = vsub.s32 0, %v506_v1  ;;  %v511_v4 = vsub.s32 1, %v506_v1  ;;  %v1936_v1 = vld [vmem:[%s3246_s27 + $0x48] sm:$0xff] }
  0x87   : > { %1621 = vmatmul.mubr.bf16.vlgmr.msra.gmra.mrb[0].mxu1 %v2170_v10  ;;  %v3239_v5 = vrot.slane %v503_v3, %v507_v2  ;;  %v3241_v6 = vrot.slane %v503_v3, %v511_v4 }
  0x88   : > { %1847 = vmatmul.mubr.bf16.vlgmr.msra.gmra.mrb[0].mxu0 %v2174_v11  ;;  %1630 = vmatprep.mubr.bf16.mxu1 %v2179_v12  ;;  %v1927_v12 = vld [vmem:[%s3246_s27] sm:$0xff] }
  0x89   : > { %1856 = vmatprep.mubr.bf16.mxu0 %v2183_v13 }
  0x8f   : > { %1631 = vmatmul.mubr.bf16.gmra.mrb[4].mxu1 %v2178_v18 }
  0x90   : > { %1857 = vmatmul.mubr.bf16.gmra.mrb[4].mxu0 %v2182_v19  ;;  %1640 = vmatprep.mubr.bf16.mxu1 %v2187_v20 }
  0x91   : > { %1866 = vmatprep.mubr.bf16.mxu0 %v2191_v21 }
  0x97   : > { %1641 = vmatmul.mubr.bf16.gmra.mrb[8].mxu1 %v2186_v26  ;;  %v1930_v26 = vld [vmem:[%s3246_s27 + $0x18] sm:$0xff] }
  0x98   : > { %1867 = vmatmul.mubr.bf16.gmra.mrb[8].mxu0 %v2190_v27  ;;  %1650 = vmatprep.mubr.bf16.mxu1 %v2195_v28 }
  0x99   : > { %1876 = vmatprep.mubr.bf16.mxu0 %v2199_v29 }
  0x9f   : > { %1651 = vmatmul.mubr.bf16.gmra.mrb[12].mxu1 %v2194_v34 }
  0xa0   : > { %1877 = vmatmul.mubr.bf16.gmra.mrb[12].mxu0 %v2198_v35  ;;  %1660 = vmatprep.mubr.bf16.mxu1 %v2203_v36  ;;  %v1931_v36 = vld [vmem:[%s3246_s27 + $0x20] sm:$0xff] }
  0xa1   : > { %1886 = vmatprep.mubr.bf16.mxu0 %v2207_v37 }
  0xa7   : > { %1661 = vmatmul.mubr.bf16.gmra.mrb[16].mxu1 %v2202_v42 }
  0xa8   : > { %1887 = vmatmul.mubr.bf16.gmra.mrb[16].mxu0 %v2206_v43  ;;  %1670 = vmatprep.mubr.bf16.mxu1 %v2211_v44 }
  0xa9   : > { %1896 = vmatprep.mubr.bf16.mxu0 %v2215_v45 }
  0xaf   : > { %1671 = vmatmul.mubr.bf16.gmra.mrb[20].mxu1 %v2210_v50  ;;  %v1934_v50 = vld [vmem:[%s3246_s27 + $0x38] sm:$0xff] }
  0xb0   : > { %1897 = vmatmul.mubr.bf16.gmra.mrb[20].mxu0 %v2214_v51  ;;  %1680 = vmatprep.mubr.bf16.mxu1 %v2219_v52 }
  0xb1   : > { %1906 = vmatprep.mubr.bf16.mxu0 %v2223_v53 }
  0xb7   : > { %1681 = vmatmul.mubr.bf16.gmra.mrb[24].mxu1 %v2218_v58 }
  0xb8   : > { %1907 = vmatmul.mubr.bf16.gmra.mrb[24].mxu0 %v2222_v59  ;;  %1690 = vmatprep.mubr.bf16.mxu1 %v2227_v60  ;;  %v1935_v60 = vld [vmem:[%s3246_s27 + $0x40] sm:$0xff] }
  0xb9   : > { %1916 = vmatprep.mubr.bf16.mxu0 %v2231_v61 }
  0xbf   : > { %1691 = vmatmul.mubr.bf16.gmra.mrb[28].mxu1 %v2226_v62 }
  0xc0   : > { %1917 = vmatmul.mubr.bf16.gmra.mrb[28].mxu0 %v2230_v63 }
 0x15a   : > { %v1622_v7 = vpop.f32.mrb[0].mxu1 }
 0x15b   : > { %v1848_v8 = vpop.f32.mrb[0].mxu0  ;;  %v2365_v9 = vadd.f32 %v1622_v7, %v3239_v5  ;;  %v1624_v10 = vpop.f32.mrb[1].mxu1 }
 0x15c   : > { %v1850_v11 = vpop.f32.mrb[1].mxu0  ;;  %v2367_v13 = vadd.f32 %v1624_v10, %v3241_v6  ;;  %v1626_v14 = vpop.f32.mrb[2].mxu1 }
 0x15d   : > { %v1852_v15 = vpop.f32.mrb[2].mxu0  ;;  %v2366_v16 = vadd.f32 %v2365_v9, %v1848_v8  ;;  %v2369_v18 = vadd.f32 %v1626_v14, %v3239_v5  ;;  %v1628_v19 = vpop.f32.mrb[3].mxu1  ;;  %v1937_v8 = vld [vmem:[%s3246_s27 + $0x50] sm:$0xff] }
 0x15e   : > { %v1854_v20 = vpop.f32.mrb[3].mxu0  ;;  %v2368_v21 = vadd.f32 %v2367_v13, %v1850_v11  ;;  %v2371_v23 = vadd.f32 %v1628_v19, %v3241_v6 }
 0x15f   : > { %v1959_v24 = vadd.f32 %v2366_v16, %v1927_v12  ;;  %v2370_v25 = vadd.f32 %v2369_v18, %v1852_v15  ;;  %v1938_v12 = vld [vmem:[%s3246_s27 + $0x58] sm:$0xff] }
 0x160   : > { %v1960_v27 = vadd.f32 %v2368_v21, %v1928_v17  ;;  %v2372_v28 = vadd.f32 %v2371_v23, %v1854_v20 }
 0x161   : > { %1991 = vst [vmem:[%s3256_s29] sm:$0xff] %v1959_v24  ;;  %v1961_v29 = vadd.f32 %v2370_v25, %v1929_v22  ;;  %v1939_v22 = vld [vmem:[%s3246_s27 + $0x60] sm:$0xff] }
 0x162   : > { %1992 = vst [vmem:[%s3256_s29 + $0x8] sm:$0xff] %v1960_v27  ;;  %v1962_v30 = vadd.f32 %v2372_v28, %v1930_v26  ;;  %v1632_v31 = vpop.f32.mrb[4].mxu1  ;;  %v1940_v27 = vld [vmem:[%s3246_s27 + $0x68] sm:$0xff] }
 0x163   : > { %v1858_v32 = vpop.f32.mrb[4].mxu0  ;;  %1993 = vst [vmem:[%s3256_s29 + $0x10] sm:$0xff] %v1961_v29  ;;  %v2373_v33 = vadd.f32 %v1632_v31, %v3239_v5  ;;  %v1634_v34 = vpop.f32.mrb[5].mxu1 }
 0x164   : > { %v1860_v35 = vpop.f32.mrb[5].mxu0  ;;  %1994 = vst [vmem:[%s3256_s29 + $0x18] sm:$0xff] %v1962_v30  ;;  %v2375_v37 = vadd.f32 %v1634_v34, %v3241_v6  ;;  %v1636_v38 = vpop.f32.mrb[6].mxu1 }
 0x165   : > { %v1862_v39 = vpop.f32.mrb[6].mxu0  ;;  %v2374_v40 = vadd.f32 %v2373_v33, %v1858_v32  ;;  %v2377_v42 = vadd.f32 %v1636_v38, %v3239_v5  ;;  %v1638_v43 = vpop.f32.mrb[7].mxu1  ;;  %v1941_v32 = vld [vmem:[%s3246_s27 + $0x70] sm:$0xff] }
 0x166   : > { %v1864_v44 = vpop.f32.mrb[7].mxu0  ;;  %v2376_v45 = vadd.f32 %v2375_v37, %v1860_v35  ;;  %v2379_v47 = vadd.f32 %v1638_v43, %v3241_v6 }
 0x167   : > { %v1963_v48 = vadd.f32 %v2374_v40, %v1931_v36  ;;  %v2378_v49 = vadd.f32 %v2377_v42, %v1862_v39  ;;  %v1942_v36 = vld [vmem:[%s3246_s27 + $0x78] sm:$0xff] }
 0x168   : > { %v1964_v51 = vadd.f32 %v2376_v45, %v1932_v41  ;;  %v2380_v52 = vadd.f32 %v2379_v47, %v1864_v44 }
 0x169   : > { %1995 = vst [vmem:[%s3256_s29 + $0x20] sm:$0xff] %v1963_v48  ;;  %v1965_v53 = vadd.f32 %v2378_v49, %v1933_v46  ;;  %v1943_v46 = vld [vmem:[%s3246_s27 + $0x80] sm:$0xff] }
 0x16a   : > { %1996 = vst [vmem:[%s3256_s29 + $0x28] sm:$0xff] %v1964_v51  ;;  %v1966_v54 = vadd.f32 %v2380_v52, %v1934_v50  ;;  %v1642_v55 = vpop.f32.mrb[8].mxu1  ;;  %v1944_v51 = vld [vmem:[%s3246_s27 + $0x88] sm:$0xff] }
 0x16b   : > { %v1868_v56 = vpop.f32.mrb[8].mxu0  ;;  %1997 = vst [vmem:[%s3256_s29 + $0x30] sm:$0xff] %v1965_v53  ;;  %v2381_v57 = vadd.f32 %v1642_v55, %v3239_v5  ;;  %v1644_v58 = vpop.f32.mrb[9].mxu1 }
 0x16c   : > { %v1870_v59 = vpop.f32.mrb[9].mxu0  ;;  %1998 = vst [vmem:[%s3256_s29 + $0x38] sm:$0xff] %v1966_v54  ;;  %v2383_v61 = vadd.f32 %v1644_v58, %v3241_v6  ;;  %v1646_v62 = vpop.f32.mrb[10].mxu1 }
 0x16d   : > { %v1872_v63 = vpop.f32.mrb[10].mxu0  ;;  %v2382_v0 = vadd.f32 %v2381_v57, %v1868_v56  ;;  %v2385_v2 = vadd.f32 %v1646_v62, %v3239_v5  ;;  %v1648_v3 = vpop.f32.mrb[11].mxu1  ;;  %v1945_v56 = vld [vmem:[%s3246_s27 + $0x90] sm:$0xff] }
 0x16e   : > { %v1874_v4 = vpop.f32.mrb[11].mxu0  ;;  %v2384_v7 = vadd.f32 %v2383_v61, %v1870_v59  ;;  %v2387_v9 = vadd.f32 %v1648_v3, %v3241_v6 }
 0x16f   : > { %v1967_v10 = vadd.f32 %v2382_v0, %v1935_v60  ;;  %v2386_v11 = vadd.f32 %v2385_v2, %v1872_v63  ;;  %v1946_v60 = vld [vmem:[%s3246_s27 + $0x98] sm:$0xff] }
 0x170   : > { %v1968_v13 = vadd.f32 %v2384_v7, %v1936_v1  ;;  %v2388_v14 = vadd.f32 %v2387_v9, %v1874_v4 }
 0x171   : > { %1999 = vst [vmem:[%s3256_s29 + $0x40] sm:$0xff] %v1967_v10  ;;  %v1969_v15 = vadd.f32 %v2386_v11, %v1937_v8  ;;  %v1947_v8 = vld [vmem:[%s3246_s27 + $0xa0] sm:$0xff] }
 0x172   : > { %2000 = vst [vmem:[%s3256_s29 + $0x48] sm:$0xff] %v1968_v13  ;;  %v1970_v16 = vadd.f32 %v2388_v14, %v1938_v12  ;;  %v1652_v17 = vpop.f32.mrb[12].mxu1  ;;  %v1948_v13 = vld [vmem:[%s3246_s27 + $0xa8] sm:$0xff] }
 0x173   : > { %v1878_v18 = vpop.f32.mrb[12].mxu0  ;;  %2001 = vst [vmem:[%s3256_s29 + $0x50] sm:$0xff] %v1969_v15  ;;  %v2389_v19 = vadd.f32 %v1652_v17, %v3239_v5  ;;  %v1654_v20 = vpop.f32.mrb[13].mxu1 }
 0x174   : > { %v1880_v21 = vpop.f32.mrb[13].mxu0  ;;  %2002 = vst [vmem:[%s3256_s29 + $0x58] sm:$0xff] %v1970_v16  ;;  %v2391_v23 = vadd.f32 %v1654_v20, %v3241_v6  ;;  %v1656_v24 = vpop.f32.mrb[14].mxu1 }
 0x175   : > { %v1882_v25 = vpop.f32.mrb[14].mxu0  ;;  %v2390_v26 = vadd.f32 %v2389_v19, %v1878_v18  ;;  %v2393_v28 = vadd.f32 %v1656_v24, %v3239_v5  ;;  %v1658_v29 = vpop.f32.mrb[15].mxu1  ;;  %v1949_v18 = vld [vmem:[%s3246_s27 + $0xb0] sm:$0xff] }
 0x176   : > { %v1884_v30 = vpop.f32.mrb[15].mxu0  ;;  %v2392_v31 = vadd.f32 %v2391_v23, %v1880_v21  ;;  %v2395_v33 = vadd.f32 %v1658_v29, %v3241_v6 }
 0x177   : > { %v1971_v34 = vadd.f32 %v2390_v26, %v1939_v22  ;;  %v2394_v35 = vadd.f32 %v2393_v28, %v1882_v25  ;;  %v1950_v22 = vld [vmem:[%s3246_s27 + $0xb8] sm:$0xff] }
 0x178   : > { %v1972_v37 = vadd.f32 %v2392_v31, %v1940_v27  ;;  %v2396_v38 = vadd.f32 %v2395_v33, %v1884_v30 }
 0x179   : > { %2003 = vst [vmem:[%s3256_s29 + $0x60] sm:$0xff] %v1971_v34  ;;  %v1973_v39 = vadd.f32 %v2394_v35, %v1941_v32  ;;  %v1951_v32 = vld [vmem:[%s3246_s27 + $0xc0] sm:$0xff] }
 0x17a   : > { %2004 = vst [vmem:[%s3256_s29 + $0x68] sm:$0xff] %v1972_v37  ;;  %v1974_v40 = vadd.f32 %v2396_v38, %v1942_v36  ;;  %v1662_v41 = vpop.f32.mrb[16].mxu1  ;;  %v1952_v37 = vld [vmem:[%s3246_s27 + $0xc8] sm:$0xff] }
 0x17b   : > { %v1888_v42 = vpop.f32.mrb[16].mxu0  ;;  %2005 = vst [vmem:[%s3256_s29 + $0x70] sm:$0xff] %v1973_v39  ;;  %v2397_v43 = vadd.f32 %v1662_v41, %v3239_v5  ;;  %v1664_v44 = vpop.f32.mrb[17].mxu1 }
 0x17c   : > { %v1890_v45 = vpop.f32.mrb[17].mxu0  ;;  %2006 = vst [vmem:[%s3256_s29 + $0x78] sm:$0xff] %v1974_v40  ;;  %v2399_v47 = vadd.f32 %v1664_v44, %v3241_v6  ;;  %v1666_v48 = vpop.f32.mrb[18].mxu1 }
 0x17d   : > { %v1892_v49 = vpop.f32.mrb[18].mxu0  ;;  %v2398_v50 = vadd.f32 %v2397_v43, %v1888_v42  ;;  %v2401_v52 = vadd.f32 %v1666_v48, %v3239_v5  ;;  %v1668_v53 = vpop.f32.mrb[19].mxu1  ;;  %v1953_v42 = vld [vmem:[%s3246_s27 + $0xd0] sm:$0xff] }
 0x17e   : > { %v1894_v54 = vpop.f32.mrb[19].mxu0  ;;  %v2400_v55 = vadd.f32 %v2399_v47, %v1890_v45  ;;  %v2403_v57 = vadd.f32 %v1668_v53, %v3241_v6 }
 0x17f   : > { %v1975_v58 = vadd.f32 %v2398_v50, %v1943_v46  ;;  %v2402_v59 = vadd.f32 %v2401_v52, %v1892_v49  ;;  %v1954_v46 = vld [vmem:[%s3246_s27 + $0xd8] sm:$0xff] }
 0x180   : > { %v1976_v61 = vadd.f32 %v2400_v55, %v1944_v51  ;;  %v2404_v62 = vadd.f32 %v2403_v57, %v1894_v54 }
 0x181   : > { %2007 = vst [vmem:[%s3256_s29 + $0x80] sm:$0xff] %v1975_v58  ;;  %v1977_v63 = vadd.f32 %v2402_v59, %v1945_v56  ;;  %v1955_v56 = vld [vmem:[%s3246_s27 + $0xe0] sm:$0xff] }
 0x182   : > { %2008 = vst [vmem:[%s3256_s29 + $0x88] sm:$0xff] %v1976_v61  ;;  %v1978_v0 = vadd.f32 %v2404_v62, %v1946_v60  ;;  %v1672_v1 = vpop.f32.mrb[20].mxu1  ;;  %v1956_v61 = vld [vmem:[%s3246_s27 + $0xe8] sm:$0xff] }
 0x183   : > { %v1898_v2 = vpop.f32.mrb[20].mxu0  ;;  %2009 = vst [vmem:[%s3256_s29 + $0x90] sm:$0xff] %v1977_v63  ;;  %v2405_v3 = vadd.f32 %v1672_v1, %v3239_v5  ;;  %v1674_v4 = vpop.f32.mrb[21].mxu1 }
 0x184   : > { %v1900_v7 = vpop.f32.mrb[21].mxu0  ;;  %2010 = vst [vmem:[%s3256_s29 + $0x98] sm:$0xff] %v1978_v0  ;;  %v2407_v9 = vadd.f32 %v1674_v4, %v3241_v6  ;;  %v1676_v10 = vpop.f32.mrb[22].mxu1 }
 0x185   : > { %v1902_v11 = vpop.f32.mrb[22].mxu0  ;;  %v2406_v12 = vadd.f32 %v2405_v3, %v1898_v2  ;;  %v2409_v14 = vadd.f32 %v1676_v10, %v3239_v5  ;;  %v1678_v15 = vpop.f32.mrb[23].mxu1  ;;  %v1957_v2 = vld [vmem:[%s3246_s27 + $0xf0] sm:$0xff] }
 0x186   : > { %v1904_v16 = vpop.f32.mrb[23].mxu0  ;;  %v2408_v17 = vadd.f32 %v2407_v9, %v1900_v7  ;;  %v2411_v19 = vadd.f32 %v1678_v15, %v3241_v6 }
 0x187   : > { %v1979_v20 = vadd.f32 %v2406_v12, %v1947_v8  ;;  %v2410_v21 = vadd.f32 %v2409_v14, %v1902_v11  ;;  %v1958_v8 = vld [vmem:[%s3246_s27 + $0xf8] sm:$0xff] }
 0x188   : > { %v1980_v23 = vadd.f32 %v2408_v17, %v1948_v13  ;;  %v2412_v24 = vadd.f32 %v2411_v19, %v1904_v16 }
 0x189   : > { %2011 = vst [vmem:[%s3256_s29 + $0xa0] sm:$0xff] %v1979_v20  ;;  %v1981_v25 = vadd.f32 %v2410_v21, %v1949_v18 }
 0x18a   : > { %2012 = vst [vmem:[%s3256_s29 + $0xa8] sm:$0xff] %v1980_v23  ;;  %v1982_v26 = vadd.f32 %v2412_v24, %v1950_v22  ;;  %v1682_v27 = vpop.f32.mrb[24].mxu1 }
 0x18b   : > { %v1908_v28 = vpop.f32.mrb[24].mxu0  ;;  %2013 = vst [vmem:[%s3256_s29 + $0xb0] sm:$0xff] %v1981_v25  ;;  %v2413_v29 = vadd.f32 %v1682_v27, %v3239_v5  ;;  %v1684_v30 = vpop.f32.mrb[25].mxu1 }
 0x18c   : > { %v1910_v31 = vpop.f32.mrb[25].mxu0  ;;  %2014 = vst [vmem:[%s3256_s29 + $0xb8] sm:$0xff] %v1982_v26  ;;  %v2415_v33 = vadd.f32 %v1684_v30, %v3241_v6  ;;  %v1686_v34 = vpop.f32.mrb[26].mxu1 }
 0x18d   : > { %v1912_v35 = vpop.f32.mrb[26].mxu0  ;;  %v2414_v36 = vadd.f32 %v2413_v29, %v1908_v28  ;;  %v2417_v38 = vadd.f32 %v1686_v34, %v3239_v5  ;;  %v1688_v39 = vpop.f32.mrb[27].mxu1 }
 0x18e   : > { %v1914_v40 = vpop.f32.mrb[27].mxu0  ;;  %v2416_v41 = vadd.f32 %v2415_v33, %v1910_v31  ;;  %v2419_v43 = vadd.f32 %v1688_v39, %v3241_v6 }
 0x18f   : > { %v1983_v44 = vadd.f32 %v2414_v36, %v1951_v32  ;;  %v2418_v45 = vadd.f32 %v2417_v38, %v1912_v35 }
 0x190   : > { %v1984_v47 = vadd.f32 %v2416_v41, %v1952_v37  ;;  %v2420_v48 = vadd.f32 %v2419_v43, %v1914_v40 }
 0x191   : > { %2015 = vst [vmem:[%s3256_s29 + $0xc0] sm:$0xff] %v1983_v44  ;;  %v1985_v49 = vadd.f32 %v2418_v45, %v1953_v42 }
 0x192   : > { %2016 = vst [vmem:[%s3256_s29 + $0xc8] sm:$0xff] %v1984_v47  ;;  %v1986_v50 = vadd.f32 %v2420_v48, %v1954_v46  ;;  %v1692_v51 = vpop.f32.mrb[28].mxu1 }
 0x193   : > { %v1918_v52 = vpop.f32.mrb[28].mxu0  ;;  %2017 = vst [vmem:[%s3256_s29 + $0xd0] sm:$0xff] %v1985_v49  ;;  %v2421_v53 = vadd.f32 %v1692_v51, %v3239_v5  ;;  %v1694_v54 = vpop.f32.mrb[29].mxu1 }
 0x194   : > { %v1920_v55 = vpop.f32.mrb[29].mxu0  ;;  %2018 = vst [vmem:[%s3256_s29 + $0xd8] sm:$0xff] %v1986_v50  ;;  %v2423_v57 = vadd.f32 %v1694_v54, %v3241_v6  ;;  %v1696_v58 = vpop.f32.mrb[30].mxu1 }
 0x195   : > { %v1922_v59 = vpop.f32.mrb[30].mxu0  ;;  %v2422_v60 = vadd.f32 %v2421_v53, %v1918_v52  ;;  %v2425_v62 = vadd.f32 %v1696_v58, %v3239_v5  ;;  %v1698_v63 = vpop.f32.mrb[31].mxu1 }
 0x196   : > { %v1924_v0 = vpop.f32.mrb[31].mxu0  ;;  %v2424_v1 = vadd.f32 %v2423_v57, %v1920_v55  ;;  %v2427_v3 = vadd.f32 %v1698_v63, %v3241_v6 }
 0x197   : > { %v1987_v4 = vadd.f32 %v2422_v60, %v1955_v56  ;;  %v2426_v7 = vadd.f32 %v2425_v62, %v1922_v59 }
 0x198   : > { %v1988_v9 = vadd.f32 %v2424_v1, %v1956_v61  ;;  %v2428_v10 = vadd.f32 %v2427_v3, %v1924_v0 }
 0x199   : > { %2019 = vst [vmem:[%s3256_s29 + $0xe0] sm:$0xff] %v1987_v4  ;;  %v1989_v11 = vadd.f32 %v2426_v7, %v1957_v2 }
 0x19a   : > { %2020 = vst [vmem:[%s3256_s29 + $0xe8] sm:$0xff] %v1988_v9  ;;  %v1990_v12 = vadd.f32 %v2428_v10, %v1958_v8 }
 0x19b   : > { %2021 = vst [vmem:[%s3256_s29 + $0xf0] sm:$0xff] %v1989_v11 }
 0x19c   : > { %2022 = vst [vmem:[%s3256_s29 + $0xf8] sm:$0xff] %v1990_v12 }
 0x19d PF: > { %s14_s17 = sadd.s32 1, %s2731_s17   ;;  %s3363_s15 = smov %s2727_s16 }
 0x19e   : > { %p11_p5 = scmp.ge.s32.totalorder %s14_s17, 4   ;;  %s3364_s16 = smov %s3366_s18 }
 0x1a0   :  { %13 = sbr.rel (!%p11_p5) target bundleno = 2 (0x2), region = 75 }

// kernel: _lambda_.11
= control target key start
LH: loop header
LB: loop body
LE: loop exit
PB: predicated region body
PF: predicated region fallthrough
CT: control target
= control target key end

     0   :  { %s3790_s18 = smov 0   ;;  %s3792_s19 = smov 0   ;;  %s5757_s0 = inlined_call_operand.vmem [shape: f32[256,256], index: 0, kind: input, shape index: {}]   ;;  %s5758_s1 = inlined_call_operand.vmem [shape: f32[1,256], index: 1, kind: input, shape index: {}]   ;;  %s5759_s2 = inlined_call_operand.vmem [shape: f32[1,256], index: 2, kind: input, shape index: {}]   ;;  %s5760_s3 = inlined_call_operand.vmem [shape: bf16[256,1024], index: 3, kind: input, shape index: {}]   ;;  %s5761_s4 = inlined_call_operand.vmem [shape: f32[1,1024], index: 4, kind: input, shape index: {}]   ;;  %s5762_s5 = inlined_call_operand.vmem [shape: bf16[256,1024], index: 5, kind: output, shape index: {}]  }
   0x1   :  { %s3794_s20 = smov 0  }
   0x2 LB: > { %s27_s21 = sadd.s32 1, %s3754_s19  ;;  %p3157_p0 = scmp.ge.s32.totalorder %s3758_s20, 1  ;;  %s3758_s20 = sphi %s3794_s20, %s15_s20   ;;  %s3754_s19 = sphi %s3792_s19, %s5803_s19   ;;  %s3750_s18 = sphi %s3790_s18, %s5802_s18  }
   0x3   : > { %p29_p1 = scmp.ge.s32.totalorder %s27_s21, 2  ;;  %p224_p2 = scmp.lt.s32.totalorder %s3758_s20, 3 }
   0x5   : > { %s5805_s21 = smov (%p29_p1, %s27_s21), 0  ;;  %p225_p3 = pnand %p3157_p0, %p224_p2 }
   0x7   : > { %228 = sbr.rel (%p225_p3) target bundleno = 777 (0x309), region = 40 }
   0xe   : > { %s3158_s22 = sshll.u32 %s3750_s18, 4  ;;  %v690_v48 = vld [vmem:[%s5760_s3] sm:$0xff]  ;;  %v691_v50 = vld [vmem:[%s5760_s3 + $0x8] sm:$0xff] }
   0xf   : > { %p268_p4 = scmp.lt.s32.totalorder %s3158_s22, 31  ;;  %v694_v49 = vld [vmem:[%s5760_s3 + $0x20] sm:$0xff]  ;;  %v695_v52 = vld [vmem:[%s5760_s3 + $0x28] sm:$0xff] }
  0x10   : > { %v3165_v51 = vcombine.high %v690_v48, %v694_v49  ;;  %v3164_v53 = vcombine.low %v690_v48, %v694_v49  ;;  %v698_v54 = vld [vmem:[%s5760_s3 + $0x40] sm:$0xff]  ;;  %v3167_v56 = vcombine.high %v691_v50, %v695_v52  ;;  %v3166_v57 = vcombine.low %v691_v50, %v695_v52  ;;  %v699_v59 = vld [vmem:[%s5760_s3 + $0x48] sm:$0xff] }
  0x11   : > { %s5807_s22 = smov (!%p268_p4, %s3158_s22), 31  ;;  %v702_v55 = vld [vmem:[%s5760_s3 + $0x60] sm:$0xff]  ;;  %v703_v60 = vld [vmem:[%s5760_s3 + $0x68] sm:$0xff] }
  0x12   : > { %s3358_s23 = sshll.u32 %s5807_s22, 4  ;;  %v3173_v58 = vcombine.high %v698_v54, %v702_v55  ;;  %v706_v61 = vld [vmem:[%s5760_s3 + $0x80] sm:$0xff]  ;;  %1500 = vmatprep.subr.bf16.mxu0 %v3165_v51  ;;  %v3175_v62 = vcombine.high %v699_v59, %v703_v60  ;;  %1613 = vmatprep.subr.bf16.mxu1 %v3167_v56  ;;  %v723_v48 = vld [vmem:[%s5760_s3 + $0x108] sm:$0xff]  ;;  %s3359_s12 = sshll.u32 %s5807_s22, 5 }
  0x13   : > { %s3814_s26 = scalar_lea.vmem %s5757_s0, %s3358_s23  ;;  %v710_v63 = vld [vmem:[%s5760_s3 + $0xa0] sm:$0xff]  ;;  %1501 = vmatpush1.bf16.msra.mxu0 %v3164_v53  ;;  %1614 = vmatpush1.bf16.msra.mxu1 %v3166_v57  ;;  %v727_v49 = vld [vmem:[%s5760_s3 + $0x128] sm:$0xff]  ;;  %s4901_s14 = scalar_lea.vmem %s5762_s5, %s3359_s12 }
  0x14   : > { %v3817_v0 = vld [vmem:[%s3814_s26] sm:$0xff]  ;;  %v3820_v1 = vld [vmem:[%s3814_s26 + $0x8] sm:$0xff]  ;;  %v3831_v5 = vld [vmem:[%s3814_s26 + $0x10] sm:$0xff]  ;;  %1502 = vmatprep.subr.bf16.mxu0 %v3173_v58  ;;  %1615 = vmatprep.subr.bf16.mxu1 %v3175_v62  ;;  %v3199_v53 = vcombine.high %v723_v48, %v727_v49 }
  0x15   : > { %v3823_v2 = vld [vmem:[%s3814_s26 + $0x20] sm:$0xff]  ;;  %v329_v3 = vadd.f32 %v3820_v1, %v3817_v0  ;;  %v3828_v4 = vld [vmem:[%s3814_s26 + $0x28] sm:$0xff]  ;;  %v3834_v6 = vld [vmem:[%s3814_s26 + $0x18] sm:$0xff] }
  0x16   : > { %v335_v7 = vadd.f32 %v3828_v4, %v3823_v2  ;;  %v3839_v8 = vld [vmem:[%s3814_s26 + $0x30] sm:$0xff]  ;;  %v3842_v9 = vld [vmem:[%s3814_s26 + $0x38] sm:$0xff]  ;;  %v332_v10 = vadd.f32 %v3834_v6, %v3831_v5  ;;  %v3849_v12 = vld [vmem:[%s3814_s26 + $0x40] sm:$0xff] }
  0x17   : > { %330 = vadd.xlane.f32.xlu0 %v329_v3  ;;  %v338_v11 = vadd.f32 %v3842_v9, %v3839_v8  ;;  %v3852_v13 = vld [vmem:[%s3814_s26 + $0x48] sm:$0xff]  ;;  %v3855_v14 = vld [vmem:[%s3814_s26 + $0x50] sm:$0xff]  ;;  %v3858_v15 = vld [vmem:[%s3814_s26 + $0x58] sm:$0xff] }
  0x18   : > { %336 = vadd.xlane.f32.xlu1 %v335_v7  ;;  %v341_v16 = vadd.f32 %v3852_v13, %v3849_v12  ;;  %v344_v17 = vadd.f32 %v3858_v15, %v3855_v14  ;;  %v3865_v18 = vld [vmem:[%s3814_s26 + $0x60] sm:$0xff]  ;;  %v3868_v19 = vld [vmem:[%s3814_s26 + $0x68] sm:$0xff]  ;;  %v3871_v20 = vld [vmem:[%s3814_s26 + $0x70] sm:$0xff] }
  0x19   : > { %v3874_v21 = vld [vmem:[%s3814_s26 + $0x78] sm:$0xff]  ;;  %v347_v22 = vadd.f32 %v3868_v19, %v3865_v18  ;;  %v3881_v24 = vld [vmem:[%s3814_s26 + $0x80] sm:$0xff]  ;;  %v3884_v25 = vld [vmem:[%s3814_s26 + $0x88] sm:$0xff] }
  0x1a   : > { %v350_v23 = vadd.f32 %v3874_v21, %v3871_v20  ;;  %v3887_v26 = vld [vmem:[%s3814_s26 + $0x90] sm:$0xff]  ;;  %v3890_v27 = vld [vmem:[%s3814_s26 + $0x98] sm:$0xff]  ;;  %v353_v28 = vadd.f32 %v3884_v25, %v3881_v24  ;;  %v3897_v30 = vld [vmem:[%s3814_s26 + $0xa0] sm:$0xff] }
  0x1b   : > { %333 = vadd.xlane.f32.xlu0 %v332_v10  ;;  %v356_v29 = vadd.f32 %v3890_v27, %v3887_v26  ;;  %v3900_v31 = vld [vmem:[%s3814_s26 + $0xa8] sm:$0xff]  ;;  %v3903_v32 = vld [vmem:[%s3814_s26 + $0xb0] sm:$0xff]  ;;  %v3906_v33 = vld [vmem:[%s3814_s26 + $0xb8] sm:$0xff]  ;;  %v3172_v10 = vcombine.low %v698_v54, %v702_v55 }
  0x1c   : > { %339 = vadd.xlane.f32.xlu1 %v338_v11  ;;  %v359_v34 = vadd.f32 %v3900_v31, %v3897_v30  ;;  %v362_v35 = vadd.f32 %v3906_v33, %v3903_v32  ;;  %v3913_v36 = vld [vmem:[%s3814_s26 + $0xc0] sm:$0xff]  ;;  %v3916_v37 = vld [vmem:[%s3814_s26 + $0xc8] sm:$0xff]  ;;  %v3919_v38 = vld [vmem:[%s3814_s26 + $0xd0] sm:$0xff]  ;;  %v3174_v11 = vcombine.low %v699_v59, %v703_v60  ;;  %v3198_v59 = vcombine.low %v723_v48, %v727_v49 }
  0x1d   : > { %v3922_v39 = vld [vmem:[%s3814_s26 + $0xd8] sm:$0xff]  ;;  %v365_v40 = vadd.f32 %v3916_v37, %v3913_v36  ;;  %v3929_v42 = vld [vmem:[%s3814_s26 + $0xe0] sm:$0xff]  ;;  %v3932_v43 = vld [vmem:[%s3814_s26 + $0xe8] sm:$0xff]  ;;  %1503 = vmatpush1.bf16.msra.mxu0 %v3172_v10 }
  0x1e   : > { %v368_v41 = vadd.f32 %v3922_v39, %v3919_v38  ;;  %v3935_v44 = vld [vmem:[%s3814_s26 + $0xf0] sm:$0xff]  ;;  %v3938_v45 = vld [vmem:[%s3814_s26 + $0xf8] sm:$0xff]  ;;  %v371_v46 = vadd.f32 %v3932_v43, %v3929_v42  ;;  %v707_v3 = vld [vmem:[%s5760_s3 + $0x88] sm:$0xff]  ;;  %1616 = vmatpush1.bf16.msra.mxu1 %v3174_v11 }
  0x1f   : > { %342 = vadd.xlane.f32.xlu0 %v341_v16  ;;  %v374_v47 = vadd.f32 %v3938_v45, %v3935_v44  ;;  %v711_v7 = vld [vmem:[%s5760_s3 + $0xa8] sm:$0xff]  ;;  %v3181_v16 = vcombine.high %v706_v61, %v710_v63  ;;  %v730_v54 = vld [vmem:[%s5760_s3 + $0x140] sm:$0xff] }
  0x20   : > { %345 = vadd.xlane.f32.xlu1 %v344_v17  ;;  %v3183_v17 = vcombine.high %v707_v3, %v711_v7  ;;  %v734_v55 = vld [vmem:[%s5760_s3 + $0x160] sm:$0xff]  ;;  %v731_v56 = vld [vmem:[%s5760_s3 + $0x148] sm:$0xff] }
  0x21   : > { %1504 = vmatprep.subr.bf16.mxu0 %v3181_v16  ;;  %v735_v57 = vld [vmem:[%s5760_s3 + $0x168] sm:$0xff]  ;;  %v3205_v60 = vcombine.high %v730_v54, %v734_v55  ;;  %v738_v62 = vld [vmem:[%s5760_s3 + $0x180] sm:$0xff]  ;;  %v3204_v10 = vcombine.low %v730_v54, %v734_v55 }
  0x22   : > { %1617 = vmatprep.subr.bf16.mxu1 %v3183_v17  ;;  %v3206_v11 = vcombine.low %v731_v56, %v735_v57  ;;  %v755_v48 = vld [vmem:[%s5760_s3 + $0x208] sm:$0xff]  ;;  %v4055_v54 = vld [vmem:[%s5760_s3 + $0x240] sm:$0xff] }
  0x23   : > { %348 = vadd.xlane.f32.xlu0 %v347_v22  ;;  %v714_v22 = vld [vmem:[%s5760_s3 + $0xc0] sm:$0xff]  ;;  %v759_v49 = vld [vmem:[%s5760_s3 + $0x228] sm:$0xff] }
  0x24   : > { %351 = vadd.xlane.f32.xlu1 %v350_v23  ;;  %v718_v23 = vld [vmem:[%s5760_s3 + $0xe0] sm:$0xff] }
  0x25   : > { %v3188_v50 = vcombine.low %v714_v22, %v718_v23  ;;  %v4060_v55 = vld [vmem:[%s5760_s3 + $0x260] sm:$0xff] }
  0x27   : > { %354 = vadd.xlane.f32.xlu0 %v353_v28  ;;  %v715_v28 = vld [vmem:[%s5760_s3 + $0xc8] sm:$0xff] }
  0x28   : > { %357 = vadd.xlane.f32.xlu1 %v356_v29  ;;  %v719_v29 = vld [vmem:[%s5760_s3 + $0xe8] sm:$0xff] }
  0x29   : > { %v3190_v51 = vcombine.low %v715_v28, %v719_v29 }
  0x2b   : > { %360 = vadd.xlane.f32.xlu0 %v359_v34  ;;  %v3180_v34 = vcombine.low %v706_v61, %v710_v63  ;;  %v3207_v61 = vcombine.high %v731_v56, %v735_v57  ;;  %v742_v63 = vld [vmem:[%s5760_s3 + $0x1a0] sm:$0xff]  ;;  %v4065_v56 = vld [vmem:[%s5760_s3 + $0x248] sm:$0xff] }
  0x2c   : > { %363 = vadd.xlane.f32.xlu1 %v362_v35  ;;  %v3182_v35 = vcombine.low %v707_v3, %v711_v7  ;;  %v739_v3 = vld [vmem:[%s5760_s3 + $0x188] sm:$0xff]  ;;  %v3213_v16 = vcombine.high %v738_v62, %v742_v63 }
  0x2d   : > { %1505 = vmatpush1.bf16.msra.mxu0 %v3180_v34  ;;  %v743_v7 = vld [vmem:[%s5760_s3 + $0x1a8] sm:$0xff]  ;;  %v3212_v34 = vcombine.low %v738_v62, %v742_v63 }
  0x2e   : > { %1618 = vmatpush1.bf16.msra.mxu1 %v3182_v35  ;;  %v3215_v17 = vcombine.high %v739_v3, %v743_v7  ;;  %v3214_v35 = vcombine.low %v739_v3, %v743_v7  ;;  %v4070_v57 = vld [vmem:[%s5760_s3 + $0x268] sm:$0xff] }
  0x2f   : > { %366 = vadd.xlane.f32.xlu0 %v365_v40  ;;  %v3189_v40 = vcombine.high %v714_v22, %v718_v23  ;;  %v746_v22 = vld [vmem:[%s5760_s3 + $0x1c0] sm:$0xff] }
  0x30   : > { %369 = vadd.xlane.f32.xlu1 %v368_v41  ;;  %v3191_v41 = vcombine.high %v715_v28, %v719_v29  ;;  %v750_v23 = vld [vmem:[%s5760_s3 + $0x1e0] sm:$0xff]  ;;  %v747_v28 = vld [vmem:[%s5760_s3 + $0x1c8] sm:$0xff] }
  0x31   : > { %1506 = vmatprep.subr.bf16.mxu0 %v3189_v40  ;;  %v751_v29 = vld [vmem:[%s5760_s3 + $0x1e8] sm:$0xff]  ;;  %v3221_v40 = vcombine.high %v746_v22, %v750_v23 }
  0x32   : > { %1619 = vmatprep.subr.bf16.mxu1 %v3191_v41  ;;  %1507 = vmatpush1.bf16.msra.mxu0 %v3188_v50  ;;  %v3223_v41 = vcombine.high %v747_v28, %v751_v29  ;;  %v3220_v50 = vcombine.low %v746_v22, %v750_v23 }
  0x33   : > { %372 = vadd.xlane.f32.xlu0 %v371_v46  ;;  %v722_v46 = vld [vmem:[%s5760_s3 + $0x100] sm:$0xff]  ;;  %1620 = vmatpush1.bf16.msra.mxu1 %v3190_v51  ;;  %v3222_v51 = vcombine.low %v747_v28, %v751_v29 }
  0x34   : > { %375 = vadd.xlane.f32.xlu1 %v374_v47  ;;  %v726_v47 = vld [vmem:[%s5760_s3 + $0x120] sm:$0xff]  ;;  %1621 = vmatprep.subr.bf16.mxu1 %v3199_v53  ;;  %v3231_v53 = vcombine.high %v755_v48, %v759_v49 }
  0x35   : > { %v3197_v52 = vcombine.high %v722_v46, %v726_v47  ;;  %v3196_v58 = vcombine.low %v722_v46, %v726_v47  ;;  %v754_v46 = vld [vmem:[%s5760_s3 + $0x200] sm:$0xff] }
  0x36   : > { %v758_v47 = vld [vmem:[%s5760_s3 + $0x220] sm:$0xff] }
  0x37   : > { %1508 = vmatprep.subr.bf16.mxu0 %v3197_v52  ;;  %1622 = vmatpush1.bf16.msra.mxu1 %v3198_v59  ;;  %v3229_v52 = vcombine.high %v754_v46, %v758_v47  ;;  %v3230_v59 = vcombine.low %v755_v48, %v759_v49 }
  0x38   : > { %1509 = vmatpush1.bf16.msra.mxu0 %v3196_v58  ;;  %1623 = vmatprep.subr.bf16.mxu1 %v3207_v61  ;;  %v3228_v58 = vcombine.low %v754_v46, %v758_v47  ;;  %v3239_v61 = vcombine.high %v4065_v56, %v4070_v57 }
  0x39   : > { %1510 = vmatprep.subr.bf16.mxu0 %v3205_v60  ;;  %v3237_v60 = vcombine.high %v4055_v54, %v4060_v55 }
  0x3b   : > { %1624 = vmatpush1.bf16.msra.mxu1 %v3206_v11 }
  0x3c   : > { %1511 = vmatpush1.bf16.msra.mxu0 %v3204_v10  ;;  %1625 = vmatprep.subr.bf16.mxu1 %v3215_v17 }
  0x3d   : > { %1512 = vmatprep.subr.bf16.mxu0 %v3213_v16 }
  0x3f   : > { %1626 = vmatpush1.bf16.msra.mxu1 %v3214_v35 }
  0x40   : > { %1513 = vmatpush1.bf16.msra.mxu0 %v3212_v34  ;;  %1627 = vmatprep.subr.bf16.mxu1 %v3223_v41 }
  0x41   : > { %1514 = vmatprep.subr.bf16.mxu0 %v3221_v40 }
  0x43   : > { %1628 = vmatpush1.bf16.msra.mxu1 %v3222_v51 }
  0x44   : > { %1515 = vmatpush1.bf16.msra.mxu0 %v3220_v50  ;;  %1629 = vmatprep.subr.bf16.mxu1 %v3231_v53 }
  0x45   : > { %1516 = vmatprep.subr.bf16.mxu0 %v3229_v52 }
  0x47   : > { %1630 = vmatpush1.bf16.msra.mxu1 %v3230_v59 }
  0x48   : > { %1517 = vmatpush1.bf16.msra.mxu0 %v3228_v58  ;;  %1631 = vmatprep.subr.bf16.mxu1 %v3239_v61 }
  0x49   : > { %1518 = vmatprep.subr.bf16.mxu0 %v3237_v60 }
  0xa4   : > { %v331_v62 = vpop.xlane.xlu0 %330 }
  0xa5   : > { %v378_v63 = vmul.f32 0.00390625, %v331_v62  ;;  %v337_v3 = vpop.xlane.xlu1 %336 }
  0xa6   : > { %v380_v7 = vmul.f32 0.00390625, %v337_v3 }
  0xa7   : > { %v4077_v10 = vsub.f32 %v3817_v0, %v378_v63  ;;  %v4080_v11 = vsub.f32 %v3820_v1, %v378_v63 }
  0xa8   : > { %v4083_v16 = vsub.f32 %v3823_v2, %v380_v7  ;;  %v4086_v17 = vsub.f32 %v3828_v4, %v380_v7  ;;  %v334_v22 = vpop.xlane.xlu0 %333 }
  0xa9   : > { %v379_v23 = vmul.f32 0.00390625, %v334_v22  ;;  %v340_v28 = vpop.xlane.xlu1 %339  ;;  %v426_v29 = vmul.f32 %v4077_v10, %v4077_v10  ;;  %v427_v34 = vmul.f32 %v4080_v11, %v4080_v11 }
  0xaa   : > { %v381_v0 = vmul.f32 0.00390625, %v340_v28  ;;  %v430_v1 = vmul.f32 %v4083_v16, %v4083_v16  ;;  %v431_v2 = vmul.f32 %v4086_v17, %v4086_v17 }
  0xab   : > { %v4097_v35 = vsub.f32 %v3831_v5, %v379_v23  ;;  %v4100_v4 = vsub.f32 %v3834_v6, %v379_v23  ;;  %v458_v40 = vadd.f32 %v427_v34, %v426_v29 }
  0xac   : > { %v4103_v41 = vsub.f32 %v3839_v8, %v381_v0  ;;  %v4106_v46 = vsub.f32 %v3842_v9, %v381_v0  ;;  %v343_v47 = vpop.xlane.xlu0 %342  ;;  %v464_v50 = vadd.f32 %v431_v2, %v430_v1 }
  0xad   : > { %v382_v48 = vmul.f32 0.00390625, %v343_v47  ;;  %459 = vadd.xlane.f32.xlu0 %v458_v40  ;;  %v346_v49 = vpop.xlane.xlu1 %345  ;;  %v428_v51 = vmul.f32 %v4097_v35, %v4097_v35  ;;  %v429_v5 = vmul.f32 %v4100_v4, %v4100_v4 }
  0xae   : > { %v383_v6 = vmul.f32 0.00390625, %v346_v49  ;;  %v432_v52 = vmul.f32 %v4103_v41, %v4103_v41  ;;  %v433_v8 = vmul.f32 %v4106_v46, %v4106_v46 }
  0xaf   : > { %v4117_v9 = vsub.f32 %v3849_v12, %v382_v48  ;;  %v4120_v53 = vsub.f32 %v3852_v13, %v382_v48  ;;  %v461_v58 = vadd.f32 %v429_v5, %v428_v51 }
  0xb0   : > { %v4123_v59 = vsub.f32 %v3855_v14, %v383_v6  ;;  %v4126_v60 = vsub.f32 %v3858_v15, %v383_v6  ;;  %v349_v61 = vpop.xlane.xlu0 %348  ;;  %v467_v3 = vadd.f32 %v433_v8, %v432_v52 }
  0xb1   : > { %v384_v62 = vmul.f32 0.00390625, %v349_v61  ;;  %465 = vadd.xlane.f32.xlu0 %v464_v50  ;;  %462 = vadd.xlane.f32.xlu1 %v461_v58  ;;  %v352_v63 = vpop.xlane.xlu1 %351  ;;  %v434_v12 = vmul.f32 %v4117_v9, %v4117_v9  ;;  %v435_v13 = vmul.f32 %v4120_v53, %v4120_v53 }
  0xb2   : > { %v385_v7 = vmul.f32 0.00390625, %v352_v63  ;;  %v436_v14 = vmul.f32 %v4123_v59, %v4123_v59  ;;  %v437_v15 = vmul.f32 %v4126_v60, %v4126_v60 }
  0xb3   : > { %v4137_v22 = vsub.f32 %v3865_v18, %v384_v62  ;;  %v4140_v23 = vsub.f32 %v3868_v19, %v384_v62  ;;  %v470_v28 = vadd.f32 %v435_v13, %v434_v12  ;;  %v3236_v62 = vcombine.low %v4055_v54, %v4060_v55  ;;  %v771_v54 = vld [vmem:[%s5760_s3 + $0x288] sm:$0xff] }
  0xb4   : > { %v4143_v29 = vsub.f32 %v3871_v20, %v385_v7  ;;  %v4146_v34 = vsub.f32 %v3874_v21, %v385_v7  ;;  %v355_v0 = vpop.xlane.xlu0 %354  ;;  %v473_v40 = vadd.f32 %v437_v15, %v436_v14  ;;  %v3238_v13 = vcombine.low %v4065_v56, %v4070_v57 }
  0xb5   : > { %v386_v1 = vmul.f32 0.00390625, %v355_v0  ;;  %468 = vadd.xlane.f32.xlu1 %v467_v3  ;;  %471 = vadd.xlane.f32.xlu0 %v470_v28  ;;  %v358_v2 = vpop.xlane.xlu1 %357  ;;  %v438_v18 = vmul.f32 %v4137_v22, %v4137_v22  ;;  %v439_v19 = vmul.f32 %v4140_v23, %v4140_v23  ;;  %v775_v0 = vld [vmem:[%s5760_s3 + $0x2a8] sm:$0xff] }
  0xb6   : > { %v387_v47 = vmul.f32 0.00390625, %v358_v2  ;;  %v440_v20 = vmul.f32 %v4143_v29, %v4143_v29  ;;  %v441_v21 = vmul.f32 %v4146_v34, %v4146_v34  ;;  %1519 = vmatpush1.bf16.msra.mxu0 %v3236_v62  ;;  %1632 = vmatpush1.bf16.msra.mxu1 %v3238_v13  ;;  %v783_v13 = vld [vmem:[%s5760_s3 + $0x2e8] sm:$0xff] }
  0xb7   : > { %v4157_v48 = vsub.f32 %v3881_v24, %v386_v1  ;;  %v4160_v49 = vsub.f32 %v3884_v25, %v386_v1  ;;  %v476_v50 = vadd.f32 %v439_v19, %v438_v18  ;;  %v3247_v18 = vcombine.high %v771_v54, %v775_v0 }
  0xb8   : > { %v4163_v51 = vsub.f32 %v3887_v26, %v387_v47  ;;  %v4166_v5 = vsub.f32 %v3890_v27, %v387_v47  ;;  %v361_v6 = vpop.xlane.xlu0 %360  ;;  %v479_v58 = vadd.f32 %v441_v21, %v440_v20 }
  0xb9   : > { %v388_v52 = vmul.f32 0.00390625, %v361_v6  ;;  %474 = vadd.xlane.f32.xlu1 %v473_v40  ;;  %477 = vadd.xlane.f32.xlu0 %v476_v50  ;;  %v364_v8 = vpop.xlane.xlu1 %363  ;;  %v442_v24 = vmul.f32 %v4157_v48, %v4157_v48  ;;  %v443_v25 = vmul.f32 %v4160_v49, %v4160_v49 }
  0xba   : > { %v389_v61 = vmul.f32 0.00390625, %v364_v8  ;;  %v444_v26 = vmul.f32 %v4163_v51, %v4163_v51  ;;  %v445_v27 = vmul.f32 %v4166_v5, %v4166_v5  ;;  %1633 = vmatprep.subr.bf16.mxu1 %v3247_v18  ;;  %v3246_v8 = vcombine.low %v771_v54, %v775_v0 }
  0xbb   : > { %v4179_v63 = vsub.f32 %v3897_v30, %v388_v52  ;;  %v4182_v3 = vsub.f32 %v3900_v31, %v388_v52  ;;  %v482_v12 = vadd.f32 %v443_v25, %v442_v24  ;;  %v770_v30 = vld [vmem:[%s5760_s3 + $0x280] sm:$0xff] }
  0xbc   : > { %v4187_v7 = vsub.f32 %v3903_v32, %v389_v61  ;;  %v4190_v14 = vsub.f32 %v3906_v33, %v389_v61  ;;  %v367_v15 = vpop.xlane.xlu0 %366  ;;  %v485_v28 = vadd.f32 %v445_v27, %v444_v26  ;;  %v774_v31 = vld [vmem:[%s5760_s3 + $0x2a0] sm:$0xff]  ;;  %v779_v61 = vld [vmem:[%s5760_s3 + $0x2c8] sm:$0xff]  ;;  %1634 = vmatpush1.bf16.msra.mxu1 %v3246_v8 }
  0xbd   : > { %v390_v32 = vmul.f32 0.00390625, %v367_v15  ;;  %480 = vadd.xlane.f32.xlu1 %v479_v58  ;;  %483 = vadd.xlane.f32.xlu0 %v482_v12  ;;  %v370_v33 = vpop.xlane.xlu1 %369  ;;  %v446_v55 = vmul.f32 %v4179_v63, %v4179_v63  ;;  %v447_v56 = vmul.f32 %v4182_v3, %v4182_v3  ;;  %v3245_v57 = vcombine.high %v770_v30, %v774_v31 }
  0xbe   : > { %v391_v1 = vmul.f32 0.00390625, %v370_v33  ;;  %v448_v2 = vmul.f32 %v4187_v7, %v4187_v7  ;;  %v449_v40 = vmul.f32 %v4190_v14, %v4190_v14  ;;  %v3244_v21 = vcombine.low %v770_v30, %v774_v31 }
  0xbf   : > { %v4213_v19 = vsub.f32 %v3913_v36, %v390_v32  ;;  %v4216_v47 = vsub.f32 %v3916_v37, %v390_v32  ;;  %v488_v20 = vadd.f32 %v447_v56, %v446_v55  ;;  %1520 = vmatprep.subr.bf16.mxu0 %v3245_v57  ;;  %v3255_v31 = vcombine.high %v779_v61, %v783_v13  ;;  %v787_v57 = vld [vmem:[%s5760_s3 + $0x308] sm:$0xff] }
  0xc0   : > { %v4219_v50 = vsub.f32 %v3919_v38, %v391_v1  ;;  %v4222_v6 = vsub.f32 %v3922_v39, %v391_v1  ;;  %v373_v52 = vpop.xlane.xlu0 %372  ;;  %v491_v24 = vadd.f32 %v449_v40, %v448_v2  ;;  %v778_v38 = vld [vmem:[%s5760_s3 + $0x2c0] sm:$0xff]  ;;  %1521 = vmatpush1.bf16.msra.mxu0 %v3244_v21  ;;  %v3254_v56 = vcombine.low %v779_v61, %v783_v13  ;;  %v791_v40 = vld [vmem:[%s5760_s3 + $0x328] sm:$0xff] }
  0xc1   : > { %v392_v58 = vmul.f32 0.00390625, %v373_v52  ;;  %486 = vadd.xlane.f32.xlu1 %v485_v28  ;;  %489 = vadd.xlane.f32.xlu0 %v488_v20  ;;  %v376_v36 = vpop.xlane.xlu1 %375  ;;  %v450_v37 = vmul.f32 %v4213_v19, %v4213_v19  ;;  %v451_v25 = vmul.f32 %v4216_v47, %v4216_v47  ;;  %v782_v39 = vld [vmem:[%s5760_s3 + $0x2e0] sm:$0xff]  ;;  %v3263_v20 = vcombine.high %v787_v57, %v791_v40  ;;  %v807_v13 = vld [vmem:[%s5760_s3 + $0x3a8] sm:$0xff] }
  0xc2   : > { %v393_v26 = vmul.f32 0.00390625, %v376_v36  ;;  %v452_v27 = vmul.f32 %v4219_v50, %v4219_v50  ;;  %v453_v62 = vmul.f32 %v4222_v6, %v4222_v6  ;;  %v3253_v12 = vcombine.high %v778_v38, %v782_v39  ;;  %1635 = vmatprep.subr.bf16.mxu1 %v3255_v31  ;;  %v798_v36 = vld [vmem:[%s5760_s3 + $0x360] sm:$0xff] }
  0xc3   : > { %v4245_v15 = vsub.f32 %v3929_v42, %v392_v58  ;;  %v4248_v28 = vsub.f32 %v3932_v43, %v392_v58  ;;  %v494_v30 = vadd.f32 %v451_v25, %v450_v37  ;;  %v3252_v55 = vcombine.low %v778_v38, %v782_v39  ;;  %1636 = vmatpush1.bf16.msra.mxu1 %v3254_v56  ;;  %v794_v58 = vld [vmem:[%s5760_s3 + $0x340] sm:$0xff]  ;;  %v799_v25 = vld [vmem:[%s5760_s3 + $0x368] sm:$0xff] }
  0xc4   : > { %v4251_v54 = vsub.f32 %v3935_v44, %v393_v26  ;;  %v4254_v32 = vsub.f32 %v3938_v45, %v393_v26  ;;  %v497_v33 = vadd.f32 %v453_v62, %v452_v27  ;;  %1522 = vmatprep.subr.bf16.mxu0 %v3253_v12  ;;  %v786_v44 = vld [vmem:[%s5760_s3 + $0x300] sm:$0xff]  ;;  %v3262_v52 = vcombine.low %v787_v57, %v791_v40  ;;  %v803_v62 = vld [vmem:[%s5760_s3 + $0x388] sm:$0xff]  ;;  %v4325_v40 = vld [vmem:[%s5760_s3 + $0x18] sm:$0xff] }
  0xc5   : > { %492 = vadd.xlane.f32.xlu1 %v491_v24  ;;  %495 = vadd.xlane.f32.xlu0 %v494_v30  ;;  %v454_v42 = vmul.f32 %v4245_v15, %v4245_v15  ;;  %v455_v43 = vmul.f32 %v4248_v28, %v4248_v28  ;;  %v790_v45 = vld [vmem:[%s5760_s3 + $0x320] sm:$0xff]  ;;  %v795_v24 = vld [vmem:[%s5760_s3 + $0x348] sm:$0xff]  ;;  %v3269_v37 = vcombine.high %v794_v58, %v798_v36 }
  0xc6   : > { %v456_v0 = vmul.f32 %v4251_v54, %v4251_v54  ;;  %v457_v1 = vmul.f32 %v4254_v32, %v4254_v32  ;;  %1523 = vmatpush1.bf16.msra.mxu0 %v3252_v55  ;;  %v3261_v2 = vcombine.high %v786_v44, %v790_v45  ;;  %v3260_v21 = vcombine.low %v786_v44, %v790_v45  ;;  %v802_v26 = vld [vmem:[%s5760_s3 + $0x380] sm:$0xff]  ;;  %v815_v44 = vld [vmem:[%s5760_s3 + $0x3e8] sm:$0xff] }
  0xc7   : > { %v500_v18 = vadd.f32 %v455_v43, %v454_v42  ;;  %1637 = vmatprep.subr.bf16.mxu1 %v3263_v20  ;;  %v3271_v38 = vcombine.high %v795_v24, %v799_v25  ;;  %v3268_v39 = vcombine.low %v794_v58, %v798_v36  ;;  %v3270_v61 = vcombine.low %v795_v24, %v799_v25  ;;  %v806_v27 = vld [vmem:[%s5760_s3 + $0x3a0] sm:$0xff]  ;;  %v811_v43 = vld [vmem:[%s5760_s3 + $0x3c8] sm:$0xff]  ;;  %v4332_v20 = vld [vmem:[%s5760_s3 + $0x38] sm:$0xff] }
  0xc8   : > { %1524 = vmatprep.subr.bf16.mxu0 %v3261_v2  ;;  %v503_v8 = vadd.f32 %v457_v1, %v456_v0  ;;  %1638 = vmatpush1.bf16.msra.mxu1 %v3262_v52  ;;  %v3277_v12 = vcombine.high %v802_v26, %v806_v27  ;;  %v3279_v30 = vcombine.high %v803_v62, %v807_v13  ;;  %v810_v55 = vld [vmem:[%s5760_s3 + $0x3c0] sm:$0xff]  ;;  %v4315_v1 = vld [vmem:[%s5760_s3 + $0x10] sm:$0xff] }
  0xc9   : > { %498 = vadd.xlane.f32.xlu1 %v497_v33  ;;  %501 = vadd.xlane.f32.xlu0 %v500_v18  ;;  %v3276_v31 = vcombine.low %v802_v26, %v806_v27  ;;  %v3278_v33 = vcombine.low %v803_v62, %v807_v13  ;;  %v814_v42 = vld [vmem:[%s5760_s3 + $0x3e0] sm:$0xff]  ;;  %v3287_v45 = vcombine.high %v811_v43, %v815_v44  ;;  %v4320_v2 = vld [vmem:[%s5760_s3 + $0x30] sm:$0xff] }
  0xca   : > { %1525 = vmatpush1.bf16.msra.mxu0 %v3260_v21  ;;  %1639 = vmatprep.subr.bf16.mxu1 %v3271_v38  ;;  %v3285_v56 = vcombine.high %v810_v55, %v814_v42  ;;  %v3284_v57 = vcombine.low %v810_v55, %v814_v42  ;;  %v3286_v0 = vcombine.low %v811_v43, %v815_v44  ;;  %v588_v38 = vlaneseq }
  0xcb   : > { %1526 = vmatprep.subr.bf16.mxu0 %v3269_v37  ;;  %v3169_v18 = vcombine.high %v4315_v1, %v4320_v2  ;;  %v3168_v21 = vcombine.low %v4315_v1, %v4320_v2  ;;  %v4467_v2 = vld [vmem:[%s5760_s3 + $0xd0] sm:$0xff] }
  0xcc   : > { %1640 = vmatpush1.bf16.msra.mxu1 %v3270_v61  ;;  %v4340_v13 = vshrl.u32 %v588_v38, 7 }
  0xcd   : > { %504 = vadd.xlane.f32.xlu1 %v503_v8  ;;  %1641 = vmatprep.subr.bf16.mxu1 %v3279_v30  ;;  %v3171_v8 = vcombine.high %v4325_v40, %v4332_v20 }
  0xce   : > { %1527 = vmatpush1.bf16.msra.mxu0 %v3268_v39 }
  0xcf   : > { %1528 = vmatprep.subr.bf16.mxu0 %v3277_v12 }
  0xd0   : > { %1642 = vmatpush1.bf16.msra.mxu1 %v3278_v33 }
  0xd1   : > { %1643 = vmatprep.subr.bf16.mxu1 %v3287_v45  ;;  %v586_v45 = vld [vmem:[%s5758_s1] sm:$0x3] }
  0xd2   : > { %1529 = vmatpush1.bf16.msra.mxu0 %v3276_v31 }
  0xd3   : > { %1530 = vmatprep.subr.bf16.mxu0 %v3285_v56  ;;  %v4343_v56 = vsub.s32 1, %v4340_v13 }
  0xd4   : > { %1644 = vmatpush1.bf16.msra.mxu1 %v3286_v0 }
  0xd5   : > { %1839 = vmatprep.subr.bf16.mxu1 %v3171_v8 }
  0xd6   : > { %1531 = vmatpush1.bf16.msra.mxu0 %v3284_v57  ;;  %v4349_v57 = vsub.s32 0, %v4340_v13 }
  0xd7   : > { %1726 = vmatprep.subr.bf16.mxu0 %v3169_v18 }
 0x13a   : > { %v460_v58 = vpop.xlane.xlu0 %459 }
 0x13b   : > { %v506_v36 = vmul.f32 0.00390625, %v460_v58 }
 0x13d   : > { %v522_v24 = vadd.f32 1e-05, %v506_v36 }
 0x13e   : > { %v463_v37 = vpop.xlane.xlu1 %462  ;;  %v466_v25 = vpop.xlane.xlu0 %465 }
 0x13f   : > { %3448 = vrsqrt.f32 %v522_v24  ;;  %v507_v39 = vmul.f32 0.00390625, %v463_v37  ;;  %v508_v61 = vmul.f32 0.00390625, %v466_v25  ;;  %v4353_v37 = vrot.slane %v586_v45, %v4343_v56 }
 0x141   : > { %v523_v26 = vadd.f32 1e-05, %v507_v39  ;;  %v524_v27 = vadd.f32 1e-05, %v508_v61  ;;  %v630_v39 = vld [vmem:[%s5759_s2] sm:$0x3]  ;;  %v4360_v61 = vrot.slane %v586_v45, %v4349_v57 }
 0x142   : > { %v469_v62 = vpop.xlane.xlu1 %468  ;;  %v472_v12 = vpop.xlane.xlu0 %471 }
 0x143   : > { %3450 = vrsqrt.f32 %v523_v26  ;;  %v509_v30 = vmul.f32 0.00390625, %v469_v62  ;;  %v510_v31 = vmul.f32 0.00390625, %v472_v12 }
 0x144   : > { %3452 = vrsqrt.f32 %v524_v27 }
 0x145   : > { %v525_v33 = vadd.f32 1e-05, %v509_v30  ;;  %v526_v55 = vadd.f32 1e-05, %v510_v31 }
 0x146   : > { %v475_v42 = vpop.xlane.xlu1 %474  ;;  %v478_v43 = vpop.xlane.xlu0 %477 }
 0x147   : > { %3454 = vrsqrt.f32 %v525_v33  ;;  %v511_v44 = vmul.f32 0.00390625, %v475_v42  ;;  %v512_v0 = vmul.f32 0.00390625, %v478_v43 }
 0x148   : > { %3456 = vrsqrt.f32 %v526_v55  ;;  %v4366_v55 = vrot.slane %v630_v39, %v4343_v56 }
 0x149   : > { %v3449_v18 = vpop.eup %3448  ;;  %v527_v8 = vadd.f32 1e-05, %v511_v44  ;;  %v528_v26 = vadd.f32 1e-05, %v512_v0  ;;  %v4370_v44 = vrot.slane %v630_v39, %v4349_v57  ;;  %v4378_v0 = vld [vmem:[%s5760_s3 + $0x50] sm:$0xff]  ;;  %v4392_v39 = vld [vmem:[%s5760_s3 + $0x58] sm:$0xff] }
 0x14a   : > { %v555_v58 = vmul.f32 %v3449_v18, %v4080_v11  ;;  %v481_v36 = vpop.xlane.xlu1 %480  ;;  %v484_v24 = vpop.xlane.xlu0 %483  ;;  %v554_v25 = vmul.f32 %v3449_v18, %v4077_v10  ;;  %v4383_v18 = vld [vmem:[%s5760_s3 + $0x70] sm:$0xff] }
 0x14b   : > { %3458 = vrsqrt.f32 %v527_v8  ;;  %v513_v38 = vmul.f32 0.00390625, %v481_v36  ;;  %v514_v11 = vmul.f32 0.00390625, %v484_v24 }
 0x14c   : > { %v599_v10 = vmul.f32 %v4353_v37, %v555_v58  ;;  %v598_v43 = vmul.f32 %v4360_v61, %v554_v25 }
 0x14d   : > { %v3451_v27 = vpop.eup %3450  ;;  %v529_v62 = vadd.f32 1e-05, %v513_v38  ;;  %v530_v58 = vadd.f32 1e-05, %v514_v11 }
 0x14e   : > { %v3453_v12 = vpop.eup %3452  ;;  %v556_v30 = vmul.f32 %v3451_v27, %v4097_v35  ;;  %v557_v31 = vmul.f32 %v3451_v27, %v4100_v4  ;;  %v487_v33 = vpop.xlane.xlu1 %486  ;;  %v643_v25 = vadd.f32 %v4366_v55, %v599_v10  ;;  %v4410_v10 = vld [vmem:[%s5760_s3 + $0x90] sm:$0xff] }
 0x14f   : > { %3460 = vrsqrt.f32 %v529_v62  ;;  %v515_v42 = vmul.f32 0.00390625, %v487_v33  ;;  %v559_v45 = vmul.f32 %v3453_v12, %v4086_v17  ;;  %v642_v62 = vadd.f32 %v4370_v44, %v598_v43 }
 0x150   : > { %3462 = vrsqrt.f32 %v528_v26  ;;  %v601_v35 = vmul.f32 %v4353_v37, %v557_v31  ;;  %v600_v4 = vmul.f32 %v4360_v61, %v556_v30  ;;  %v4397_v26 = vld [vmem:[%s5760_s3 + $0x78] sm:$0xff] }
 0x151   : > { %v3455_v8 = vpop.eup %3454  ;;  %v531_v27 = vadd.f32 1e-05, %v515_v42  ;;  %v603_v33 = vmul.f32 %v4353_v37, %v559_v45  ;;  %v4415_v42 = vld [vmem:[%s5760_s3 + $0xb0] sm:$0xff]  ;;  %v3179_v45 = vcombine.high %v4392_v39, %v4397_v26  ;;  %3464 = vrsqrt.f32 %v530_v58 }
 0x152   : > { %v3457_v36 = vpop.eup %3456  ;;  %v560_v17 = vmul.f32 %v3455_v8, %v4103_v41  ;;  %v561_v24 = vmul.f32 %v3455_v8, %v4106_v46  ;;  %v645_v38 = vadd.f32 %v4366_v55, %v601_v35  ;;  %v3177_v41 = vcombine.high %v4378_v0, %v4383_v18  ;;  %v493_v11 = vpop.xlane.xlu1 %492 }
 0x153   : > { %v558_v46 = vmul.f32 %v3453_v12, %v4083_v16  ;;  %v644_v31 = vadd.f32 %v4370_v44, %v600_v4  ;;  %v563_v16 = vmul.f32 %v3457_v36, %v4120_v53  ;;  %v490_v12 = vpop.xlane.xlu0 %489  ;;  %v3176_v4 = vcombine.low %v4378_v0, %v4383_v18  ;;  %v4431_v53 = vld [vmem:[%s5760_s3 + $0x98] sm:$0xff] }
 0x154   : > { %v4403_v30 = vpack.c.bf16 %v645_v38, %v643_v25  ;;  %v605_v35 = vmul.f32 %v4353_v37, %v561_v24  ;;  %v4436_v0 = vld [vmem:[%s5760_s3 + $0xb8] sm:$0xff]  ;;  %v604_v18 = vmul.f32 %v4360_v61, %v560_v17  ;;  %3466 = vrsqrt.f32 %v531_v27 }
 0x155   : > { %v3459_v43 = vpop.eup %3458  ;;  %v4426_v25 = vpack.c.bf16 %v644_v31, %v642_v62  ;;  %v3178_v58 = vcombine.low %v4392_v39, %v4397_v26  ;;  %v3185_v24 = vcombine.high %v4410_v10, %v4415_v42  ;;  %v516_v38 = vmul.f32 0.00390625, %v490_v12 }
 0x156   : > { %v565_v8 = vmul.f32 %v3459_v43, %v4126_v60  ;;  %1532 = vmatprep.mubr.bf16.mxu0 %v4403_v30  ;;  %1645 = vmatprep.mubr.bf16.mxu1 %v4403_v30  ;;  %v517_v60 = vmul.f32 0.00390625, %v493_v11  ;;  %v647_v62 = vadd.f32 %v4366_v55, %v603_v33  ;;  %v649_v31 = vadd.f32 %v4366_v55, %v605_v35 }
 0x157   : > { %1533 = vmatmul.mubr.bf16.vlgmr.msra.gmra.mrb[0].mxu0 %v4426_v25  ;;  %1646 = vmatmul.mubr.bf16.vlgmr.msra.gmra.mrb[0].mxu1 %v4426_v25  ;;  %v602_v52 = vmul.f32 %v4360_v61, %v558_v46  ;;  %v564_v27 = vmul.f32 %v3459_v43, %v4123_v59  ;;  %v5763_v39 = vcombine.low %v4325_v40, %v4332_v20  ;;  %v4472_v40 = vld [vmem:[%s5760_s3 + $0xf0] sm:$0xff]  ;;  %v496_v35 = vpop.xlane.xlu0 %495 }
 0x158   : > { %1727 = vmatpush1.bf16.msra.mxu0 %v3168_v21  ;;  %v3187_v26 = vcombine.high %v4431_v53, %v4436_v0  ;;  %v609_v11 = vmul.f32 %v4353_v37, %v565_v8  ;;  %v4460_v12 = vpack.c.bf16 %v649_v31, %v647_v62  ;;  %v648_v59 = vadd.f32 %v4370_v44, %v604_v18 }
 0x159   : > { %v3461_v17 = vpop.eup %3460  ;;  %1840 = vmatpush1.bf16.msra.mxu1 %v5763_v39  ;;  %1728 = vmatprep.subr.bf16.mxu0 %v3177_v41  ;;  %v607_v1 = vmul.f32 %v4353_v37, %v563_v16  ;;  %v562_v20 = vmul.f32 %v3457_v36, %v4117_v9  ;;  %v533_v21 = vadd.f32 1e-05, %v517_v60  ;;  %v3184_v41 = vcombine.low %v4410_v10, %v4415_v42  ;;  %v717_v36 = vld [vmem:[%s5760_s3 + $0xd8] sm:$0xff] }
 0x15a   : > { %v4458_v33 = vpop.eup %3462  ;;  %1841 = vmatprep.subr.bf16.mxu1 %v3179_v45  ;;  %v3186_v46 = vcombine.low %v4431_v53, %v4436_v0  ;;  %v569_v43 = vmul.f32 %v3461_v17, %v4146_v34  ;;  %v532_v16 = vadd.f32 1e-05, %v516_v38  ;;  %v499_v45 = vpop.xlane.xlu1 %498  ;;  %1542 = vmatprep.mubr.bf16.mxu0 %v4460_v12  ;;  %v646_v8 = vadd.f32 %v4370_v44, %v602_v52  ;;  %v721_v10 = vld [vmem:[%s5760_s3 + $0xf8] sm:$0xff]  ;;  %v4499_v53 = vld [vmem:[%s5760_s3 + $0x110] sm:$0xff] }
 0x15b   : > { %1655 = vmatprep.mubr.bf16.mxu1 %v4460_v12  ;;  %v653_v9 = vadd.f32 %v4366_v55, %v609_v11  ;;  %v567_v34 = vmul.f32 %v4458_v33, %v4140_v23  ;;  %v3192_v42 = vcombine.low %v4467_v2, %v4472_v40  ;;  %v3193_v52 = vcombine.high %v4467_v2, %v4472_v40  ;;  %v4507_v23 = vld [vmem:[%s5760_s3 + $0x130] sm:$0xff]  ;;  %v4517_v60 = vld [vmem:[%s5760_s3 + $0x138] sm:$0xff]  ;;  %v4520_v31 = vpop.eup %3464 }
 0x15c   : > { %1729 = vmatpush1.bf16.msra.mxu0 %v3176_v4  ;;  %v4501_v0 = vpack.c.bf16 %v648_v59, %v646_v8  ;;  %v651_v18 = vadd.f32 %v4366_v55, %v607_v1  ;;  %v4512_v4 = vld [vmem:[%s5760_s3 + $0x118] sm:$0xff]  ;;  %3468 = vrsqrt.f32 %v533_v21  ;;  %v519_v38 = vmul.f32 0.00390625, %v499_v45  ;;  %v502_v8 = vpop.xlane.xlu0 %501 }
 0x15d   : > { %1842 = vmatpush1.bf16.msra.mxu1 %v3178_v58  ;;  %1730 = vmatprep.subr.bf16.mxu0 %v3185_v24  ;;  %v608_v58 = vmul.f32 %v4360_v61, %v564_v27  ;;  %v518_v24 = vmul.f32 0.00390625, %v496_v35  ;;  %v3195_v62 = vcombine.high %v717_v36, %v721_v10  ;;  %3470 = vrsqrt.f32 %v532_v16 }
 0x15e   : > { %1843 = vmatprep.subr.bf16.mxu1 %v3187_v26  ;;  %v4524_v39 = vpack.c.bf16 %v653_v9, %v651_v18  ;;  %v606_v26 = vmul.f32 %v4360_v61, %v562_v20  ;;  %v613_v11 = vmul.f32 %v4353_v37, %v569_v43  ;;  %v3467_v59 = vpop.eup %3466  ;;  %v3194_v27 = vcombine.low %v717_v36, %v721_v10  ;;  %v505_v9 = vpop.xlane.xlu1 %504 }
 0x15f   : > { %1543 = vmatmul.mubr.bf16.gmra.mrb[4].mxu0 %v4501_v0  ;;  %1656 = vmatmul.mubr.bf16.gmra.mrb[4].mxu1 %v4501_v0  ;;  %v3201_v1 = vcombine.high %v4499_v53, %v4507_v23  ;;  %v3203_v2 = vcombine.high %v4512_v4, %v4517_v60  ;;  %v568_v40 = vmul.f32 %v3461_v17, %v4143_v29  ;;  %v534_v43 = vadd.f32 1e-05, %v518_v24 }
 0x160   : > { %1731 = vmatpush1.bf16.msra.mxu0 %v3184_v41  ;;  %1552 = vmatprep.mubr.bf16.mxu0 %v4524_v39  ;;  %v652_v20 = vadd.f32 %v4370_v44, %v608_v58  ;;  %v611_v21 = vmul.f32 %v4353_v37, %v567_v34  ;;  %v4540_v41 = vld [vmem:[%s5760_s3 + $0x150] sm:$0xff]  ;;  %v535_v29 = vadd.f32 1e-05, %v519_v38  ;;  %v3200_v17 = vcombine.low %v4499_v53, %v4507_v23  ;;  %v733_v34 = vld [vmem:[%s5760_s3 + $0x158] sm:$0xff] }
 0x161   : > { %1844 = vmatpush1.bf16.msra.mxu1 %v3186_v46  ;;  %1665 = vmatprep.mubr.bf16.mxu1 %v4524_v39  ;;  %v4545_v46 = vld [vmem:[%s5760_s3 + $0x170] sm:$0xff]  ;;  %v3202_v16 = vcombine.low %v4512_v4, %v4517_v60  ;;  %v566_v35 = vmul.f32 %v4458_v33, %v4137_v22  ;;  %v573_v45 = vmul.f32 %v3467_v59, %v4166_v5  ;;  %v745_v4 = vld [vmem:[%s5760_s3 + $0x1b8] sm:$0xff]  ;;  %v520_v58 = vmul.f32 0.00390625, %v502_v8 }
 0x162   : > { %1732 = vmatprep.subr.bf16.mxu0 %v3193_v52  ;;  %1845 = vmatprep.subr.bf16.mxu1 %v3195_v62  ;;  %v650_v36 = vadd.f32 %v4370_v44, %v606_v26  ;;  %v657_v10 = vadd.f32 %v4366_v55, %v613_v11  ;;  %v737_v52 = vld [vmem:[%s5760_s3 + $0x178] sm:$0xff]  ;;  %v571_v53 = vmul.f32 %v4520_v31, %v4160_v49  ;;  %v4571_v33 = vld [vmem:[%s5760_s3 + $0x190] sm:$0xff]  ;;  %3472 = vrsqrt.f32 %v535_v29 }
 0x163   : > { %v3208_v22 = vcombine.low %v4540_v41, %v4545_v46  ;;  %v3209_v5 = vcombine.high %v4540_v41, %v4545_v46  ;;  %v655_v23 = vadd.f32 %v4366_v55, %v611_v21  ;;  %v4579_v49 = vld [vmem:[%s5760_s3 + $0x1b0] sm:$0xff]  ;;  %v612_v60 = vmul.f32 %v4360_v61, %v568_v40  ;;  %v749_v8 = vld [vmem:[%s5760_s3 + $0x1d8] sm:$0xff] }
 0x164   : > { %1733 = vmatpush1.bf16.msra.mxu0 %v3192_v42  ;;  %v4573_v18 = vpack.c.bf16 %v652_v20, %v650_v36  ;;  %v4584_v42 = vld [vmem:[%s5760_s3 + $0x198] sm:$0xff]  ;;  %v521_v24 = vmul.f32 0.00390625, %v505_v9  ;;  %v3211_v38 = vcombine.high %v733_v34, %v737_v52  ;;  %3474 = vrsqrt.f32 %v534_v43  ;;  %v4628_v36 = vld [vmem:[%s5760_s3 + $0x210] sm:$0xff] }
 0x165   : > { %1846 = vmatpush1.bf16.msra.mxu1 %v3194_v27  ;;  %1734 = vmatprep.subr.bf16.mxu0 %v3201_v1  ;;  %v4592_v62 = vpack.c.bf16 %v657_v10, %v655_v23  ;;  %v610_v26 = vmul.f32 %v4360_v61, %v566_v35  ;;  %v617_v11 = vmul.f32 %v4353_v37, %v573_v45  ;;  %v536_v43 = vadd.f32 1e-05, %v520_v58  ;;  %v752_v45 = vld [vmem:[%s5760_s3 + $0x1f0] sm:$0xff]  ;;  %v753_v9 = vld [vmem:[%s5760_s3 + $0x1f8] sm:$0xff] }
 0x166   : > { %1847 = vmatprep.subr.bf16.mxu1 %v3203_v2  ;;  %v3469_v27 = vpop.eup %3468  ;;  %v3210_v1 = vcombine.low %v733_v34, %v737_v52  ;;  %v3217_v2 = vcombine.high %v4571_v33, %v4579_v49  ;;  %v3219_v40 = vcombine.high %v4584_v42, %v745_v4  ;;  %v572_v21 = vmul.f32 %v3467_v59, %v4163_v51  ;;  %v757_v52 = vld [vmem:[%s5760_s3 + $0x218] sm:$0xff] }
 0x167   : > { %1553 = vmatmul.mubr.bf16.gmra.mrb[8].mxu0 %v4573_v18  ;;  %1666 = vmatmul.mubr.bf16.gmra.mrb[8].mxu1 %v4573_v18  ;;  %v3471_v20 = vpop.eup %3470  ;;  %v656_v41 = vadd.f32 %v4370_v44, %v612_v60  ;;  %v615_v46 = vmul.f32 %v4353_v37, %v571_v53  ;;  %v537_v29 = vadd.f32 1e-05, %v521_v24  ;;  %v577_v51 = vmul.f32 %v3469_v27, %v4190_v14  ;;  %v761_v53 = vld [vmem:[%s5760_s3 + $0x238] sm:$0xff] }
 0x168   : > { %1735 = vmatpush1.bf16.msra.mxu0 %v3200_v17  ;;  %1562 = vmatprep.mubr.bf16.mxu0 %v4592_v62  ;;  %v748_v17 = vld [vmem:[%s5760_s3 + $0x1d0] sm:$0xff]  ;;  %v654_v59 = vadd.f32 %v4370_v44, %v610_v26  ;;  %v661_v35 = vadd.f32 %v4366_v55, %v617_v11  ;;  %v3216_v14 = vcombine.low %v4571_v33, %v4579_v49 }
 0x169   : > { %1848 = vmatpush1.bf16.msra.mxu1 %v3202_v16  ;;  %1675 = vmatprep.mubr.bf16.mxu1 %v4592_v62  ;;  %v570_v16 = vmul.f32 %v4520_v31, %v4157_v48  ;;  %v575_v48 = vmul.f32 %v3471_v20, %v4182_v3  ;;  %v3218_v31 = vcombine.low %v4584_v42, %v745_v4  ;;  %v760_v3 = vld [vmem:[%s5760_s3 + $0x230] sm:$0xff]  ;;  %3476 = vrsqrt.f32 %v537_v29  ;;  %v769_v29 = vld [vmem:[%s5760_s3 + $0x278] sm:$0xff] }
 0x16a   : > { %1736 = vmatprep.subr.bf16.mxu0 %v3209_v5  ;;  %1849 = vmatprep.subr.bf16.mxu1 %v3211_v38  ;;  %v4630_v10 = vpack.c.bf16 %v656_v41, %v654_v59  ;;  %v659_v34 = vadd.f32 %v4366_v55, %v615_v46  ;;  %v3224_v5 = vcombine.low %v748_v17, %v752_v45  ;;  %3478 = vrsqrt.f32 %v536_v43  ;;  %v768_v46 = vld [vmem:[%s5760_s3 + $0x270] sm:$0xff]  ;;  %v765_v43 = vld [vmem:[%s5760_s3 + $0x258] sm:$0xff] }
 0x16b   : > { %v3225_v33 = vcombine.high %v748_v17, %v752_v45  ;;  %v3227_v23 = vcombine.high %v749_v8, %v753_v9  ;;  %v614_v42 = vmul.f32 %v4360_v61, %v570_v16  ;;  %v621_v4 = vmul.f32 %v4353_v37, %v577_v51  ;;  %v772_v17 = vld [vmem:[%s5760_s3 + $0x290] sm:$0xff] }
 0x16c   : > { %1737 = vmatpush1.bf16.msra.mxu0 %v3208_v22  ;;  %v616_v22 = vmul.f32 %v4360_v61, %v572_v21  ;;  %v4645_v49 = vpack.c.bf16 %v661_v35, %v659_v34  ;;  %v3473_v60 = vpop.eup %3472  ;;  %v3226_v58 = vcombine.low %v749_v8, %v753_v9  ;;  %v3233_v24 = vcombine.high %v4628_v36, %v760_v3  ;;  %v776_v59 = vld [vmem:[%s5760_s3 + $0x2b0] sm:$0xff]  ;;  %v777_v35 = vld [vmem:[%s5760_s3 + $0x2b8] sm:$0xff] }
 0x16d   : > { %1850 = vmatpush1.bf16.msra.mxu1 %v3210_v1  ;;  %1738 = vmatprep.subr.bf16.mxu0 %v3217_v2  ;;  %v3235_v38 = vcombine.high %v757_v52, %v761_v53  ;;  %v576_v11 = vmul.f32 %v3469_v27, %v4187_v7  ;;  %v619_v2 = vmul.f32 %v4353_v37, %v575_v48 }
 0x16e   : > { %1851 = vmatprep.subr.bf16.mxu1 %v3219_v40  ;;  %v3475_v26 = vpop.eup %3474  ;;  %v660_v1 = vadd.f32 %v4370_v44, %v616_v22  ;;  %v764_v40 = vld [vmem:[%s5760_s3 + $0x250] sm:$0xff]  ;;  %v574_v21 = vmul.f32 %v3471_v20, %v4179_v63  ;;  %v581_v41 = vmul.f32 %v3473_v60, %v4222_v6  ;;  %v658_v7 = vadd.f32 %v4370_v44, %v614_v42 }
 0x16f   : > { %1563 = vmatmul.mubr.bf16.gmra.mrb[12].mxu0 %v4630_v10  ;;  %1676 = vmatmul.mubr.bf16.gmra.mrb[12].mxu1 %v4630_v10  ;;  %v665_v27 = vadd.f32 %v4366_v55, %v621_v4  ;;  %v579_v63 = vmul.f32 %v3475_v26, %v4216_v47  ;;  %v3232_v6 = vcombine.low %v4628_v36, %v760_v3  ;;  %v773_v47 = vld [vmem:[%s5760_s3 + $0x298] sm:$0xff]  ;;  %v780_v42 = vld [vmem:[%s5760_s3 + $0x2d0] sm:$0xff] }
 0x170   : > { %1739 = vmatpush1.bf16.msra.mxu0 %v3216_v14  ;;  %1572 = vmatprep.mubr.bf16.mxu0 %v4645_v49  ;;  %v3234_v20 = vcombine.low %v757_v52, %v761_v53  ;;  %v4676_v16 = vpack.c.bf16 %v660_v1, %v658_v7  ;;  %v663_v51 = vadd.f32 %v4366_v55, %v619_v2  ;;  %v788_v1 = vld [vmem:[%s5760_s3 + $0x310] sm:$0xff] }
 0x171   : > { %1852 = vmatpush1.bf16.msra.mxu1 %v3218_v31  ;;  %1685 = vmatprep.mubr.bf16.mxu1 %v4645_v49  ;;  %v620_v45 = vmul.f32 %v4360_v61, %v576_v11  ;;  %v3240_v8 = vcombine.low %v764_v40, %v768_v46  ;;  %v3241_v9 = vcombine.high %v764_v40, %v768_v46  ;;  %v785_v11 = vld [vmem:[%s5760_s3 + $0x2f8] sm:$0xff] }
 0x172   : > { %1740 = vmatprep.subr.bf16.mxu0 %v3225_v33  ;;  %1853 = vmatprep.subr.bf16.mxu1 %v3227_v23  ;;  %v3243_v48 = vcombine.high %v765_v43, %v769_v29  ;;  %v4691_v14 = vpack.c.bf16 %v665_v27, %v663_v51  ;;  %v618_v31 = vmul.f32 %v4360_v61, %v574_v21  ;;  %v792_v21 = vld [vmem:[%s5760_s3 + $0x330] sm:$0xff] }
 0x173   : > { %v625_v36 = vmul.f32 %v4353_v37, %v581_v41  ;;  %v3477_v34 = vpop.eup %3476  ;;  %v3242_v3 = vcombine.low %v765_v43, %v769_v29  ;;  %v3249_v52 = vcombine.high %v772_v17, %v776_v59  ;;  %v3251_v53 = vcombine.high %v773_v47, %v777_v35  ;;  %v793_v41 = vld [vmem:[%s5760_s3 + $0x338] sm:$0xff] }
 0x174   : > { %1741 = vmatpush1.bf16.msra.mxu0 %v3224_v5  ;;  %v3479_v22 = vpop.eup %3478  ;;  %v580_v5 = vmul.f32 %v3473_v60, %v4219_v50  ;;  %v664_v33 = vadd.f32 %v4370_v44, %v620_v45  ;;  %v623_v23 = vmul.f32 %v4353_v37, %v579_v63  ;;  %v578_v4 = vmul.f32 %v3475_v26, %v4213_v19  ;;  %v796_v45 = vld [vmem:[%s5760_s3 + $0x350] sm:$0xff] }
 0x175   : > { %1854 = vmatpush1.bf16.msra.mxu1 %v3226_v58  ;;  %1742 = vmatprep.subr.bf16.mxu0 %v3233_v24  ;;  %v585_v58 = vmul.f32 %v3477_v34, %v4254_v32  ;;  %v662_v50 = vadd.f32 %v4370_v44, %v618_v31  ;;  %v669_v60 = vadd.f32 %v4366_v55, %v625_v36  ;;  %v784_v24 = vld [vmem:[%s5760_s3 + $0x2f0] sm:$0xff]  ;;  %v801_v31 = vld [vmem:[%s5760_s3 + $0x378] sm:$0xff] }
 0x176   : > { %1855 = vmatprep.subr.bf16.mxu1 %v3235_v38  ;;  %v781_v38 = vld [vmem:[%s5760_s3 + $0x2d8] sm:$0xff]  ;;  %v583_v19 = vmul.f32 %v3479_v22, %v4248_v28  ;;  %v3248_v32 = vcombine.low %v772_v17, %v776_v59  ;;  %v3250_v26 = vcombine.low %v773_v47, %v777_v35  ;;  %v667_v40 = vadd.f32 %v4366_v55, %v623_v23 }
 0x177   : > { %1573 = vmatmul.mubr.bf16.gmra.mrb[16].mxu0 %v4676_v16  ;;  %1686 = vmatmul.mubr.bf16.gmra.mrb[16].mxu1 %v4676_v16  ;;  %v4720_v2 = vpack.c.bf16 %v664_v33, %v662_v50  ;;  %v789_v28 = vld [vmem:[%s5760_s3 + $0x318] sm:$0xff]  ;;  %v624_v7 = vmul.f32 %v4360_v61, %v580_v5  ;;  %v3256_v27 = vcombine.low %v780_v42, %v784_v24  ;;  %v808_v33 = vld [vmem:[%s5760_s3 + $0x3b0] sm:$0xff] }
 0x178   : > { %1743 = vmatpush1.bf16.msra.mxu0 %v3232_v6  ;;  %1582 = vmatprep.mubr.bf16.mxu0 %v4691_v14  ;;  %v3257_v46 = vcombine.high %v780_v42, %v784_v24  ;;  %v3259_v43 = vcombine.high %v781_v38, %v785_v11  ;;  %v4735_v29 = vpack.c.bf16 %v669_v60, %v667_v40  ;;  %v805_v23 = vld [vmem:[%s5760_s3 + $0x398] sm:$0xff] }
 0x179   : > { %1856 = vmatpush1.bf16.msra.mxu1 %v3234_v20  ;;  %1695 = vmatprep.mubr.bf16.mxu1 %v4691_v14  ;;  %v622_v63 = vmul.f32 %v4360_v61, %v578_v4  ;;  %v629_v6 = vmul.f32 %v4353_v37, %v585_v58  ;;  %v3258_v20 = vcombine.low %v781_v38, %v785_v11  ;;  %v812_v11 = vld [vmem:[%s5760_s3 + $0x3d0] sm:$0xff] }
 0x17a   : > { %1744 = vmatprep.subr.bf16.mxu0 %v3241_v9  ;;  %1857 = vmatprep.subr.bf16.mxu1 %v3243_v48  ;;  %v3265_v17 = vcombine.high %v788_v1, %v792_v21  ;;  %v3267_v51 = vcombine.high %v789_v28, %v793_v41  ;;  %v584_v59 = vmul.f32 %v3477_v34, %v4251_v54  ;;  %v800_v48 = vld [vmem:[%s5760_s3 + $0x370] sm:$0xff] }
 0x17b   : > { %v668_v47 = vadd.f32 %v4370_v44, %v624_v7  ;;  %v627_v35 = vmul.f32 %v4353_v37, %v583_v19  ;;  %v666_v9 = vadd.f32 %v4370_v44, %v622_v63  ;;  %v673_v54 = vadd.f32 %v4366_v55, %v629_v6  ;;  %v797_v37 = vld [vmem:[%s5760_s3 + $0x358] sm:$0xff]  ;;  %v816_v19 = vld [vmem:[%s5760_s3 + $0x3f0] sm:$0xff] }
 0x17c   : > { %1745 = vmatpush1.bf16.msra.mxu0 %v3240_v8  ;;  %v582_v8 = vmul.f32 %v3479_v22, %v4245_v15  ;;  %v3264_v36 = vcombine.low %v788_v1, %v792_v21  ;;  %v3266_v15 = vcombine.low %v789_v28, %v793_v41  ;;  %v3273_v22 = vcombine.high %v796_v45, %v800_v48 }
 0x17d   : > { %1858 = vmatpush1.bf16.msra.mxu1 %v3242_v3  ;;  %1746 = vmatprep.subr.bf16.mxu0 %v3249_v52  ;;  %v4759_v34 = vpack.c.bf16 %v668_v47, %v666_v9  ;;  %v671_v3 = vadd.f32 %v4366_v55, %v627_v35  ;;  %v804_v52 = vld [vmem:[%s5760_s3 + $0x390] sm:$0xff]  ;;  %v3275_v5 = vcombine.high %v797_v37, %v801_v31  ;;  %v809_v55 = vld [vmem:[%s5760_s3 + $0x3b8] sm:$0xff] }
 0x17e   : > { %1859 = vmatprep.subr.bf16.mxu1 %v3251_v53  ;;  %v628_v53 = vmul.f32 %v4360_v61, %v584_v59  ;;  %v626_v4 = vmul.f32 %v4360_v61, %v582_v8  ;;  %v3272_v58 = vcombine.low %v796_v45, %v800_v48  ;;  %v3274_v50 = vcombine.low %v797_v37, %v801_v31 }
 0x17f   : > { %1583 = vmatmul.mubr.bf16.gmra.mrb[20].mxu0 %v4720_v2  ;;  %1696 = vmatmul.mubr.bf16.gmra.mrb[20].mxu1 %v4720_v2  ;;  %v4777_v42 = vpack.c.bf16 %v673_v54, %v671_v3  ;;  %v3281_v60 = vcombine.high %v804_v52, %v808_v33  ;;  %v3283_v24 = vcombine.high %v805_v23, %v809_v55  ;;  %v846_v45 = vsub.s32 6, %v4340_v13 }
 0x180   : > { %1747 = vmatpush1.bf16.msra.mxu0 %v3248_v32  ;;  %1592 = vmatprep.mubr.bf16.mxu0 %v4735_v29  ;;  %v672_v38 = vadd.f32 %v4370_v44, %v628_v53  ;;  %v670_v61 = vadd.f32 %v4370_v44, %v626_v4  ;;  %v813_v32 = vld [vmem:[%s5760_s3 + $0x3d8] sm:$0xff]  ;;  %v3280_v1 = vcombine.low %v804_v52, %v808_v33  ;;  %v842_v48 = vsub.s32 5, %v4340_v13 }
 0x181   : > { %1860 = vmatpush1.bf16.msra.mxu1 %v3250_v26  ;;  %1705 = vmatprep.mubr.bf16.mxu1 %v4735_v29  ;;  %v817_v26 = vld [vmem:[%s5760_s3 + $0x3f8] sm:$0xff]  ;;  %v3282_v40 = vcombine.low %v805_v23, %v809_v55  ;;  %v3289_v44 = vcombine.high %v812_v11, %v816_v19  ;;  %v3288_v41 = vcombine.low %v812_v11, %v816_v19  ;;  %v850_v37 = vsub.s32 7, %v4340_v13 }
 0x182   : > { %1748 = vmatprep.subr.bf16.mxu0 %v3257_v46  ;;  %1861 = vmatprep.subr.bf16.mxu1 %v3259_v43  ;;  %v688_v21 = vpack.c.bf16 %v672_v38, %v670_v61  ;;  %v3291_v28 = vcombine.high %v813_v32, %v817_v26  ;;  %v3290_v7 = vcombine.low %v813_v32, %v817_v26 }
 0x184   : > { %1749 = vmatpush1.bf16.msra.mxu0 %v3256_v27 }
 0x185   : > { %1862 = vmatpush1.bf16.msra.mxu1 %v3258_v20  ;;  %1750 = vmatprep.subr.bf16.mxu0 %v3265_v17  ;;  %v838_v17 = vsub.s32 4, %v4340_v13 }
 0x186   : > { %1863 = vmatprep.subr.bf16.mxu1 %v3267_v51 }
 0x187   : > { %1593 = vmatmul.mubr.bf16.gmra.mrb[24].mxu0 %v4759_v34  ;;  %1706 = vmatmul.mubr.bf16.gmra.mrb[24].mxu1 %v4759_v34 }
 0x188   : > { %1751 = vmatpush1.bf16.msra.mxu0 %v3264_v36  ;;  %1602 = vmatprep.mubr.bf16.mxu0 %v4777_v42 }
 0x189   : > { %1864 = vmatpush1.bf16.msra.mxu1 %v3266_v15  ;;  %1715 = vmatprep.mubr.bf16.mxu1 %v4777_v42 }
 0x18a   : > { %1752 = vmatprep.subr.bf16.mxu0 %v3273_v22  ;;  %1865 = vmatprep.subr.bf16.mxu1 %v3275_v5 }
 0x18c   : > { %1753 = vmatpush1.bf16.msra.mxu0 %v3272_v58 }
 0x18d   : > { %1866 = vmatpush1.bf16.msra.mxu1 %v3274_v50  ;;  %1754 = vmatprep.subr.bf16.mxu0 %v3281_v60 }
 0x18e   : > { %1867 = vmatprep.subr.bf16.mxu1 %v3283_v24 }
 0x18f   : > { %1603 = vmatmul.mubr.bf16.gmra.mrb[28].mxu0 %v688_v21  ;;  %1716 = vmatmul.mubr.bf16.gmra.mrb[28].mxu1 %v688_v21 }
 0x190   : > { %1755 = vmatpush1.bf16.msra.mxu0 %v3280_v1  ;;  %1758 = vmatprep.mubr.bf16.mxu0 %v4403_v30 }
 0x191   : > { %1868 = vmatpush1.bf16.msra.mxu1 %v3282_v40  ;;  %1871 = vmatprep.mubr.bf16.mxu1 %v4403_v30  ;;  %v830_v30 = vsub.s32 2, %v4340_v13 }
 0x192   : > { %1756 = vmatprep.subr.bf16.mxu0 %v3289_v44  ;;  %1869 = vmatprep.subr.bf16.mxu1 %v3291_v28 }
 0x194   : > { %1757 = vmatpush1.bf16.msra.mxu0 %v3288_v41 }
 0x195   : > { %1870 = vmatpush1.bf16.msra.mxu1 %v3290_v7 }
 0x197   : > { %1759 = vmatmul.mubr.bf16.vlgmr.msra.gmra.mrb[32].mxu0 %v4426_v25 }
 0x198   : > { %1872 = vmatmul.mubr.bf16.vlgmr.msra.gmra.mrb[32].mxu1 %v4426_v25  ;;  %1768 = vmatprep.mubr.bf16.mxu0 %v4460_v12  ;;  %v4830_v25 = vld [vmem:[%s5761_s4] sm:$0xff] }
 0x199   : > { %1881 = vmatprep.mubr.bf16.mxu1 %v4460_v12  ;;  %v834_v12 = vsub.s32 3, %v4340_v13  ;;  %v4864_v5 = vrot.slane %v4830_v25, %v846_v45 }
 0x19f   : > { %1769 = vmatmul.mubr.bf16.gmra.mrb[36].mxu0 %v4501_v0 }
 0x1a0   : > { %1882 = vmatmul.mubr.bf16.gmra.mrb[36].mxu1 %v4501_v0  ;;  %1778 = vmatprep.mubr.bf16.mxu0 %v4524_v39  ;;  %v4835_v0 = vrot.slane %v4830_v25, %v4349_v57 }
 0x1a1   : > { %1891 = vmatprep.mubr.bf16.mxu1 %v4524_v39  ;;  %v4838_v39 = vrot.slane %v4830_v25, %v830_v30 }
 0x1a7   : > { %1779 = vmatmul.mubr.bf16.gmra.mrb[40].mxu0 %v4573_v18 }
 0x1a8   : > { %1892 = vmatmul.mubr.bf16.gmra.mrb[40].mxu1 %v4573_v18  ;;  %1788 = vmatprep.mubr.bf16.mxu0 %v4592_v62  ;;  %v4842_v18 = vrot.slane %v4830_v25, %v4343_v56 }
 0x1a9   : > { %1901 = vmatprep.mubr.bf16.mxu1 %v4592_v62  ;;  %v4845_v62 = vrot.slane %v4830_v25, %v834_v12 }
 0x1af   : > { %1789 = vmatmul.mubr.bf16.gmra.mrb[44].mxu0 %v4630_v10 }
 0x1b0   : > { %1902 = vmatmul.mubr.bf16.gmra.mrb[44].mxu1 %v4630_v10  ;;  %1798 = vmatprep.mubr.bf16.mxu0 %v4645_v49 }
 0x1b1   : > { %1911 = vmatprep.mubr.bf16.mxu1 %v4645_v49 }
 0x1b7   : > { %1799 = vmatmul.mubr.bf16.gmra.mrb[48].mxu0 %v4676_v16 }
 0x1b8   : > { %1912 = vmatmul.mubr.bf16.gmra.mrb[48].mxu1 %v4676_v16  ;;  %1808 = vmatprep.mubr.bf16.mxu0 %v4691_v14 }
 0x1b9   : > { %1921 = vmatprep.mubr.bf16.mxu1 %v4691_v14 }
 0x1bf   : > { %1809 = vmatmul.mubr.bf16.gmra.mrb[52].mxu0 %v4720_v2 }
 0x1c0   : > { %1922 = vmatmul.mubr.bf16.gmra.mrb[52].mxu1 %v4720_v2  ;;  %1818 = vmatprep.mubr.bf16.mxu0 %v4735_v29 }
 0x1c1   : > { %1931 = vmatprep.mubr.bf16.mxu1 %v4735_v29 }
 0x1c7   : > { %1819 = vmatmul.mubr.bf16.gmra.mrb[56].mxu0 %v4759_v34 }
 0x1c8   : > { %1932 = vmatmul.mubr.bf16.gmra.mrb[56].mxu1 %v4759_v34  ;;  %1828 = vmatprep.mubr.bf16.mxu0 %v4777_v42  ;;  %v4860_v34 = vrot.slane %v4830_v25, %v838_v17 }
 0x1c9   : > { %1941 = vmatprep.mubr.bf16.mxu1 %v4777_v42 }
 0x1cf   : > { %1829 = vmatmul.mubr.bf16.gmra.mrb[60].mxu0 %v688_v21 }
 0x1d0   : > { %1942 = vmatmul.mubr.bf16.gmra.mrb[60].mxu1 %v688_v21 }
 0x22a   : > { %v1534_v10 = vpop.f32.mrb[0].mxu0  ;;  %v1647_v49 = vpop.f32.mrb[0].mxu1 }
 0x22b   : > { %v1535_v16 = vadd.f32 %v1534_v10, %v4835_v0  ;;  %v1648_v14 = vadd.f32 %v1647_v49, %v4838_v39  ;;  %v1536_v2 = vpop.f32.mrb[1].mxu0  ;;  %v1649_v27 = vpop.f32.mrb[1].mxu1 }
 0x22c   : > { %v1537_v57 = vadd.f32 %v1536_v2, %v4842_v18  ;;  %v1650_v46 = vadd.f32 %v1649_v27, %v4845_v62  ;;  %v1538_v43 = vpop.f32.mrb[2].mxu0  ;;  %v1651_v29 = vpop.f32.mrb[2].mxu1 }
 0x22d   : > { %v2080_v63 = vmul.f32 0.70710677, %v1535_v16  ;;  %v2082_v56 = vmul.f32 0.70710677, %v1648_v14  ;;  %v1539_v51 = vadd.f32 %v1538_v43, %v4835_v0  ;;  %v1652_v59 = vadd.f32 %v1651_v29, %v4838_v39  ;;  %v1540_v47 = vpop.f32.mrb[3].mxu0  ;;  %v1653_v35 = vpop.f32.mrb[3].mxu1 }
 0x22e   : > { %v2081_v6 = vmul.f32 0.70710677, %v1537_v57  ;;  %v2083_v20 = vmul.f32 0.70710677, %v1650_v46  ;;  %v1541_v8 = vadd.f32 %v1540_v47, %v4842_v18  ;;  %v1654_v9 = vadd.f32 %v1653_v35, %v4845_v62 }
 0x22f   : > { %3480 = verf.f32 %v2080_v63  ;;  %v2088_v54 = vmul.f32 0.70710677, %v1539_v51  ;;  %v2090_v31 = vmul.f32 0.70710677, %v1652_v59  ;;  %v1952_v33 = vmul.f32 0.5, %v1535_v16 }
 0x230   : > { %3482 = verf.f32 %v2082_v56  ;;  %v2089_v36 = vmul.f32 0.70710677, %v1541_v8  ;;  %v2091_v3 = vmul.f32 0.70710677, %v1654_v9  ;;  %v1954_v58 = vmul.f32 0.5, %v1648_v14 }
 0x231   : > { %3484 = verf.f32 %v2081_v6  ;;  %v1953_v11 = vmul.f32 0.5, %v1537_v57  ;;  %v1955_v61 = vmul.f32 0.5, %v1650_v46  ;;  %v1960_v26 = vmul.f32 0.5, %v1539_v51 }
 0x232   : > { %3486 = verf.f32 %v2083_v20  ;;  %v1544_v15 = vpop.f32.mrb[4].mxu0  ;;  %v1657_v53 = vpop.f32.mrb[4].mxu1  ;;  %v1962_v7 = vmul.f32 0.5, %v1652_v59  ;;  %v1961_v30 = vmul.f32 0.5, %v1541_v8  ;;  %v1963_v12 = vmul.f32 0.5, %v1654_v9 }
 0x233   : > { %3488 = verf.f32 %v2088_v54  ;;  %v1545_v52 = vadd.f32 %v1544_v15, %v4835_v0  ;;  %v1546_v22 = vpop.f32.mrb[5].mxu0  ;;  %v1658_v23 = vadd.f32 %v1657_v53, %v4838_v39  ;;  %v1659_v42 = vpop.f32.mrb[5].mxu1 }
 0x234   : > { %3490 = verf.f32 %v2090_v31  ;;  %v1547_v55 = vadd.f32 %v1546_v22, %v4842_v18  ;;  %v1548_v4 = vpop.f32.mrb[6].mxu0  ;;  %v4869_v60 = vadd.f32 %v1659_v42, %v4845_v62  ;;  %v1661_v24 = vpop.f32.mrb[6].mxu1 }
 0x235   : > { %3492 = verf.f32 %v2089_v36  ;;  %v2096_v50 = vmul.f32 0.70710677, %v1545_v52  ;;  %v1550_v38 = vpop.f32.mrb[7].mxu0  ;;  %v2098_v19 = vmul.f32 0.70710677, %v1658_v23  ;;  %v1663_v32 = vpop.f32.mrb[7].mxu1  ;;  %v1549_v21 = vadd.f32 %v1548_v4, %v4835_v0 }
 0x236   : > { %3494 = verf.f32 %v2091_v3  ;;  %v2097_v1 = vmul.f32 0.70710677, %v1547_v55  ;;  %v2099_v40 = vmul.f32 0.70710677, %v4869_v60  ;;  %v4874_v44 = vadd.f32 %v1661_v24, %v4838_v39 }
 0x237   : > { %3496 = verf.f32 %v2096_v50  ;;  %v4877_v28 = vadd.f32 %v1550_v38, %v4842_v18  ;;  %v2104_v16 = vmul.f32 0.70710677, %v1549_v21  ;;  %v4880_v14 = vadd.f32 %v1663_v32, %v4845_v62 }
 0x238   : > { %3498 = verf.f32 %v2098_v19  ;;  %v1968_v43 = vmul.f32 0.5, %v1545_v52  ;;  %v4882_v29 = vmul.f32 0.5, %v1658_v23  ;;  %v2106_v63 = vmul.f32 0.70710677, %v4874_v44 }
 0x239   : > { %v3481_v41 = vpop.eup %3480  ;;  %3500 = verf.f32 %v2097_v1  ;;  %v2105_v51 = vmul.f32 0.70710677, %v4877_v28  ;;  %v1969_v9 = vmul.f32 0.5, %v1547_v55  ;;  %v2107_v52 = vmul.f32 0.70710677, %v4880_v14 }
 0x23a   : > { %v3483_v10 = vpop.eup %3482  ;;  %v2336_v49 = vadd.f32 1.0, %v3481_v41  ;;  %3502 = verf.f32 %v2099_v40  ;;  %v1554_v2 = vpop.f32.mrb[8].mxu0  ;;  %v1971_v1 = vmul.f32 0.5, %v4869_v60 }
 0x23b   : > { %v1667_v27 = vpop.f32.mrb[8].mxu1  ;;  %v3485_v57 = vpop.eup %3484  ;;  %v2338_v46 = vadd.f32 1.0, %v3483_v10  ;;  %3504 = verf.f32 %v2104_v16  ;;  %v4904_v55 = vadd.f32 %v1554_v2, %v4835_v0  ;;  %v1976_v10 = vmul.f32 0.5, %v1549_v21 }
 0x23c   : > { %v1556_v56 = vpop.f32.mrb[9].mxu0  ;;  %v3487_v6 = vpop.eup %3486  ;;  %v2464_v20 = vmul.f32 %v2336_v49, %v1952_v33  ;;  %v2337_v17 = vadd.f32 1.0, %v3485_v57  ;;  %3506 = verf.f32 %v2106_v63  ;;  %v4907_v42 = vadd.f32 %v1667_v27, %v4838_v39 }
 0x23d   : > { %v4887_v59 = vpop.f32.mrb[9].mxu1  ;;  %v4889_v47 = vpop.f32.mrb[10].mxu0  ;;  %v2466_v45 = vmul.f32 %v2338_v46, %v1954_v58  ;;  %v2339_v8 = vadd.f32 1.0, %v3487_v6  ;;  %3508 = verf.f32 %v2105_v51  ;;  %v2112_v49 = vmul.f32 0.70710677, %v4904_v55 }
 0x23e   : > { %v3489_v35 = vpop.eup %3488  ;;  %v4891_v54 = vpop.f32.mrb[10].mxu1  ;;  %v2465_v15 = vmul.f32 %v2337_v17, %v1953_v11  ;;  %3510 = verf.f32 %v2107_v52  ;;  %v2114_v46 = vmul.f32 0.70710677, %v4907_v42  ;;  %v1670_v52 = vadd.f32 %v4887_v59, %v4845_v62 }
 0x23f   : > { %v4893_v31 = vpop.f32.mrb[11].mxu0  ;;  %v3491_v36 = vpop.eup %3490  ;;  %v2344_v3 = vadd.f32 1.0, %v3489_v35  ;;  %v2467_v33 = vmul.f32 %v2339_v8, %v1955_v61  ;;  %3512 = verf.f32 %v2112_v49 }
 0x240   : > { %v4896_v53 = vpop.f32.mrb[11].mxu1  ;;  %v3493_v22 = vpop.eup %3492  ;;  %v2346_v23 = vadd.f32 1.0, %v3491_v36  ;;  %v3360_v58 = vpack.c.bf16 %v2465_v15, %v2464_v20  ;;  %3514 = verf.f32 %v2114_v46 }
 0x241   : > { %v3495_v4 = vpop.eup %3494  ;;  %v2472_v50 = vmul.f32 %v2344_v3, %v1960_v26  ;;  %v2345_v24 = vadd.f32 1.0, %v3493_v22  ;;  %v3361_v11 = vpack.c.bf16 %v2467_v33, %v2466_v45 }
 0x242   : > { %v3497_v38 = vpop.eup %3496  ;;  %v2474_v19 = vmul.f32 %v2346_v23, %v1962_v7  ;;  %v2347_v32 = vadd.f32 1.0, %v3495_v4  ;;  %2976 = vst [vmem:[%s4901_s14] sm:$0xff] %v3360_v58  ;;  %v1564_v16 = vpop.f32.mrb[12].mxu0  ;;  %v4917_v7 = vadd.f32 %v1556_v56, %v4842_v18  ;;  %v1559_v23 = vadd.f32 %v4889_v47, %v4835_v0 }
 0x243   : > { %v3499_v61 = vpop.eup %3498  ;;  %v2473_v40 = vmul.f32 %v2345_v24, %v1961_v30  ;;  %v2352_v41 = vadd.f32 1.0, %v3497_v38  ;;  %v4912_v2 = vpop.f32.mrb[12].mxu1  ;;  %2977 = vst [vmem:[%s4901_s14 + $0x8] sm:$0xff] %v3361_v11  ;;  %v4942_v4 = vadd.f32 %v4891_v54, %v4838_v39  ;;  %v2115_v11 = vmul.f32 0.70710677, %v1670_v52 }
 0x244   : > { %v3501_v26 = vpop.eup %3500  ;;  %v2475_v27 = vmul.f32 %v2347_v32, %v1963_v12  ;;  %v2354_v57 = vadd.f32 1.0, %v3499_v61  ;;  %v4919_v60 = vpop.f32.mrb[13].mxu0  ;;  %v2113_v3 = vmul.f32 0.70710677, %v4917_v7  ;;  %v1979_v47 = vmul.f32 0.5, %v4880_v14 }
 0x245   : > { %v4921_v30 = vpop.f32.mrb[13].mxu1  ;;  %v3503_v21 = vpop.eup %3502  ;;  %v3364_v63 = vpack.c.bf16 %v2473_v40, %v2472_v50  ;;  %v2480_v6 = vmul.f32 %v2352_v41, %v1968_v43  ;;  %v2353_v20 = vadd.f32 1.0, %v3501_v26  ;;  %v1978_v43 = vmul.f32 0.5, %v4874_v44 }
 0x246   : > { %v4923_v17 = vpop.f32.mrb[14].mxu0  ;;  %v4925_v12 = vpop.f32.mrb[14].mxu1  ;;  %v3365_v51 = vpack.c.bf16 %v2475_v27, %v2474_v19  ;;  %v2482_v35 = vmul.f32 %v2354_v57, %v4882_v29  ;;  %v2355_v56 = vadd.f32 1.0, %v3503_v21  ;;  %v1977_v50 = vmul.f32 0.5, %v4877_v28 }
 0x247   : > { %v4928_v45 = vpop.f32.mrb[15].mxu0  ;;  %v4930_v8 = vpop.f32.mrb[15].mxu1  ;;  %2980 = vst [vmem:[%s4901_s14 + $0x20] sm:$0xff] %v3364_v63  ;;  %v2481_v15 = vmul.f32 %v2353_v20, %v1969_v9  ;;  %3516 = verf.f32 %v2113_v3  ;;  %v4954_v40 = vrot.slane %v4830_v25, %v842_v48  ;;  %v1561_v14 = vadd.f32 %v4893_v31, %v4842_v18 }
 0x248   : > { %v3505_v36 = vpop.eup %3504  ;;  %2981 = vst [vmem:[%s4901_s14 + $0x28] sm:$0xff] %v3365_v51  ;;  %v2483_v29 = vmul.f32 %v2355_v56, %v1971_v1  ;;  %v2120_v1 = vmul.f32 0.70710677, %v1559_v23  ;;  %3518 = verf.f32 %v2115_v11  ;;  %v4966_v27 = vadd.f32 %v4896_v53, %v4845_v62 }
 0x249   : > { %v3507_v22 = vpop.eup %3506  ;;  %v2360_v33 = vadd.f32 1.0, %v3505_v36  ;;  %v3368_v58 = vpack.c.bf16 %v2481_v15, %v2480_v6  ;;  %v4969_v48 = vadd.f32 %v1564_v16, %v4835_v0  ;;  %v4977_v6 = vadd.f32 %v4912_v2, %v4838_v39 }
 0x24a   : > { %v3509_v9 = vpop.eup %3508  ;;  %v2362_v44 = vadd.f32 1.0, %v3507_v22  ;;  %v3369_v59 = vpack.c.bf16 %v2483_v29, %v2482_v35  ;;  %v4947_v61 = vpop.f32.mrb[16].mxu0  ;;  %3520 = verf.f32 %v2120_v1  ;;  %v1984_v16 = vmul.f32 0.5, %v4904_v55 }
 0x24b   : > { %v2488_v24 = vmul.f32 %v2360_v33, %v1976_v10  ;;  %v2361_v38 = vadd.f32 1.0, %v3509_v9  ;;  %v3511_v19 = vpop.eup %3510  ;;  %2984 = vst [vmem:[%s4901_s14 + $0x40] sm:$0xff] %v3368_v58  ;;  %v4949_v54 = vpop.f32.mrb[16].mxu1  ;;  %v2122_v10 = vmul.f32 0.70710677, %v4942_v4  ;;  %v4988_v56 = vrot.slane %v4830_v25, %v850_v37 }
 0x24c   : > { %v2490_v32 = vmul.f32 %v2362_v44, %v1978_v43  ;;  %2985 = vst [vmem:[%s4901_s14 + $0x48] sm:$0xff] %v3369_v59  ;;  %v2363_v41 = vadd.f32 1.0, %v3511_v19  ;;  %v4958_v49 = vpop.f32.mrb[17].mxu0  ;;  %v4960_v26 = vpop.f32.mrb[17].mxu1  ;;  %v2121_v51 = vmul.f32 0.70710677, %v1561_v14  ;;  %v1567_v13 = vadd.f32 %v4919_v60, %v4842_v18 }
 0x24d   : > { %v2489_v28 = vmul.f32 %v2361_v38, %v1977_v50  ;;  %v4971_v57 = vpop.f32.mrb[18].mxu0  ;;  %v4973_v46 = vpop.f32.mrb[18].mxu1  ;;  %3522 = verf.f32 %v2122_v10  ;;  %v2123_v35 = vmul.f32 0.70710677, %v4966_v27  ;;  %v1986_v43 = vmul.f32 0.5, %v4907_v42 }
 0x24e   : > { %v2491_v63 = vmul.f32 %v2363_v41, %v1979_v47  ;;  %v4979_v31 = vpop.f32.mrb[19].mxu0  ;;  %v4981_v20 = vpop.f32.mrb[19].mxu1  ;;  %v2128_v3 = vmul.f32 0.70710677, %v4969_v48  ;;  %v1985_v22 = vmul.f32 0.5, %v4917_v7  ;;  %v1987_v29 = vmul.f32 0.5, %v1670_v52 }
 0x24f   : > { %v3372_v21 = vpack.c.bf16 %v2489_v28, %v2488_v24  ;;  %v3513_v53 = vpop.eup %3512  ;;  %3524 = verf.f32 %v2121_v51  ;;  %v2130_v55 = vmul.f32 0.70710677, %v4977_v6  ;;  %v5000_v25 = vadd.f32 %v4921_v30, %v4845_v62 }
 0x250   : > { %v3515_v36 = vpop.eup %3514  ;;  %v3373_v2 = vpack.c.bf16 %v2491_v63, %v2490_v32  ;;  %v2368_v15 = vadd.f32 1.0, %v3513_v53  ;;  %3526 = verf.f32 %v2123_v35  ;;  %v1992_v42 = vmul.f32 0.5, %v1559_v23 }
 0x251   : > { %2988 = vst [vmem:[%s4901_s14 + $0x60] sm:$0xff] %v3372_v21  ;;  %v2370_v33 = vadd.f32 1.0, %v3515_v36  ;;  %v3517_v37 = vpop.eup %3516  ;;  %3528 = verf.f32 %v2128_v3  ;;  %v5004_v7 = vadd.f32 %v4923_v17, %v4835_v0  ;;  %v5008_v52 = vadd.f32 %v4925_v12, %v4838_v39 }
 0x252   : > { %2989 = vst [vmem:[%s4901_s14 + $0x68] sm:$0xff] %v3373_v2  ;;  %v5010_v9 = vpop.f32.mrb[20].mxu0  ;;  %v5012_v58 = vpop.f32.mrb[20].mxu1  ;;  %v2496_v60 = vmul.f32 %v2368_v15, %v1984_v16  ;;  %v2369_v44 = vadd.f32 1.0, %v3517_v37  ;;  %3530 = verf.f32 %v2130_v55  ;;  %v2129_v30 = vmul.f32 0.70710677, %v1567_v13 }
 0x253   : > { %v5014_v50 = vpop.f32.mrb[21].mxu0  ;;  %v5016_v23 = vpop.f32.mrb[21].mxu1  ;;  %v1994_v59 = vmul.f32 0.5, %v4942_v4  ;;  %v1993_v17 = vmul.f32 0.5, %v1561_v14  ;;  %v2131_v24 = vmul.f32 0.70710677, %v5000_v25  ;;  %v2498_v11 = vmul.f32 %v2370_v33, %v1986_v43 }
 0x254   : > { %v2136_v12 = vmul.f32 0.70710677, %v5004_v7  ;;  %v3519_v38 = vpop.eup %3518  ;;  %v2497_v19 = vmul.f32 %v2369_v44, %v1985_v22  ;;  %3532 = verf.f32 %v2129_v30  ;;  %v2138_v32 = vmul.f32 0.70710677, %v5008_v52  ;;  %v5022_v47 = vpop.f32.mrb[22].mxu0 }
 0x255   : > { %v5024_v1 = vpop.f32.mrb[22].mxu1  ;;  %v3521_v28 = vpop.eup %3520  ;;  %v2371_v41 = vadd.f32 1.0, %v3519_v38  ;;  %3534 = verf.f32 %v2131_v24  ;;  %v5028_v4 = vadd.f32 %v4928_v45, %v4842_v18  ;;  %v5032_v10 = vadd.f32 %v4930_v8, %v4845_v62 }
 0x256   : > { %v5034_v14 = vpop.f32.mrb[23].mxu0  ;;  %v5036_v21 = vpop.f32.mrb[23].mxu1  ;;  %v3376_v53 = vpack.c.bf16 %v2497_v19, %v2496_v60  ;;  %v2376_v16 = vadd.f32 1.0, %v3521_v28  ;;  %3536 = verf.f32 %v2136_v12  ;;  %v5040_v51 = vadd.f32 %v4947_v61, %v4835_v0 }
 0x257   : > { %v3523_v63 = vpop.eup %3522  ;;  %v2499_v35 = vmul.f32 %v2371_v41, %v1987_v29  ;;  %v1995_v45 = vmul.f32 0.5, %v4966_v27  ;;  %3538 = verf.f32 %v2138_v32  ;;  %v2000_v8 = vmul.f32 0.5, %v4969_v48 }
 0x258   : > { %v2378_v36 = vadd.f32 1.0, %v3523_v63  ;;  %2992 = vst [vmem:[%s4901_s14 + $0x80] sm:$0xff] %v3376_v53  ;;  %v2002_v2 = vmul.f32 0.5, %v4977_v6  ;;  %v2137_v15 = vmul.f32 0.70710677, %v5028_v4  ;;  %v2504_v55 = vmul.f32 %v2376_v16, %v1992_v42 }
 0x259   : > { %v2139_v43 = vmul.f32 0.70710677, %v5032_v10  ;;  %v3525_v3 = vpop.eup %3524  ;;  %v3377_v22 = vpack.c.bf16 %v2499_v35, %v2498_v11  ;;  %v2001_v61 = vmul.f32 0.5, %v1567_v13  ;;  %v2144_v29 = vmul.f32 0.70710677, %v5040_v51 }
 0x25a   : > { %v5049_v33 = vpop.f32.mrb[24].mxu0  ;;  %v5051_v27 = vpop.f32.mrb[24].mxu1  ;;  %v2377_v60 = vadd.f32 1.0, %v3525_v3  ;;  %3540 = verf.f32 %v2137_v15  ;;  %v5055_v48 = vadd.f32 %v4949_v54, %v4838_v39  ;;  %v5059_v6 = vadd.f32 %v4958_v49, %v4842_v18 }
 0x25b   : > { %v3527_v37 = vpop.eup %3526  ;;  %v5061_v44 = vpop.f32.mrb[25].mxu0  ;;  %2993 = vst [vmem:[%s4901_s14 + $0x88] sm:$0xff] %v3377_v22  ;;  %v2506_v30 = vmul.f32 %v2378_v36, %v1994_v59  ;;  %v2003_v12 = vmul.f32 0.5, %v5000_v25  ;;  %3542 = verf.f32 %v2139_v43  ;;  %v5073_v49 = vadd.f32 %v4960_v26, %v4845_v62 }
 0x25c   : > { %v5063_v13 = vpop.f32.mrb[25].mxu1  ;;  %v3529_v42 = vpop.eup %3528  ;;  %v2379_v24 = vadd.f32 1.0, %v3527_v37  ;;  %v2505_v19 = vmul.f32 %v2377_v60, %v1993_v17  ;;  %3544 = verf.f32 %v2144_v29  ;;  %v2146_v63 = vmul.f32 0.70710677, %v5055_v48 }
 0x25d   : > { %v5067_v38 = vpop.f32.mrb[26].mxu0  ;;  %v5069_v11 = vpop.f32.mrb[26].mxu1  ;;  %v2384_v32 = vadd.f32 1.0, %v3529_v42  ;;  %v5082_v53 = vadd.f32 %v4971_v57, %v4835_v0  ;;  %v2008_v35 = vmul.f32 0.5, %v5004_v7  ;;  %v2010_v26 = vmul.f32 0.5, %v5008_v52 }
 0x25e   : > { %v3531_v54 = vpop.eup %3530  ;;  %v5075_v28 = vpop.f32.mrb[27].mxu0  ;;  %v2507_v59 = vmul.f32 %v2379_v24, %v1995_v45  ;;  %v3380_v16 = vpack.c.bf16 %v2505_v19, %v2504_v55  ;;  %v2145_v36 = vmul.f32 0.70710677, %v5059_v6  ;;  %3546 = verf.f32 %v2146_v63 }
 0x25f   : > { %v5077_v41 = vpop.f32.mrb[27].mxu1  ;;  %v2386_v25 = vadd.f32 1.0, %v3531_v54  ;;  %v3533_v17 = vpop.eup %3532  ;;  %v2512_v3 = vmul.f32 %v2384_v32, %v2000_v8  ;;  %v2147_v57 = vmul.f32 0.70710677, %v5073_v49  ;;  %v2152_v52 = vmul.f32 0.70710677, %v5082_v53 }
 0x260   : > { %v3535_v15 = vpop.eup %3534  ;;  %v3381_v43 = vpack.c.bf16 %v2507_v59, %v2506_v30  ;;  %v2385_v45 = vadd.f32 1.0, %v3533_v17  ;;  %2996 = vst [vmem:[%s4901_s14 + $0xa0] sm:$0xff] %v3380_v16  ;;  %3548 = verf.f32 %v2145_v36  ;;  %v5093_v42 = vadd.f32 %v4973_v46, %v4838_v39 }
 0x261   : > { %v3537_v22 = vpop.eup %3536  ;;  %v2514_v29 = vmul.f32 %v2386_v25, %v2002_v2  ;;  %v2387_v37 = vadd.f32 1.0, %v3535_v15  ;;  %3550 = verf.f32 %v2147_v57  ;;  %v5101_v54 = vadd.f32 %v4979_v31, %v4842_v18 }
 0x262   : > { %v3539_v55 = vpop.eup %3538  ;;  %2997 = vst [vmem:[%s4901_s14 + $0xa8] sm:$0xff] %v3381_v43  ;;  %v2513_v60 = vmul.f32 %v2385_v45, %v2001_v61  ;;  %v2392_v7 = vadd.f32 1.0, %v3537_v22  ;;  %v5095_v8 = vpop.f32.mrb[28].mxu0  ;;  %v2009_v46 = vmul.f32 0.5, %v5028_v4  ;;  %v2011_v59 = vmul.f32 0.5, %v5032_v10 }
 0x263   : > { %v5097_v30 = vpop.f32.mrb[28].mxu1  ;;  %v2515_v24 = vmul.f32 %v2387_v37, %v2003_v12  ;;  %v2394_v2 = vadd.f32 1.0, %v3539_v55  ;;  %v5103_v19 = vpop.f32.mrb[29].mxu0  ;;  %3552 = verf.f32 %v2152_v52  ;;  %v2016_v16 = vmul.f32 0.5, %v5040_v51 }
 0x264   : > { %v5105_v61 = vpop.f32.mrb[29].mxu1  ;;  %v3384_v32 = vpack.c.bf16 %v2513_v60, %v2512_v3  ;;  %v5109_v25 = vpop.f32.mrb[30].mxu0  ;;  %v2520_v31 = vmul.f32 %v2392_v7, %v2008_v35  ;;  %v2154_v36 = vmul.f32 0.70710677, %v5093_v42  ;;  %v2153_v3 = vmul.f32 0.70710677, %v5101_v54 }
 0x265   : > { %v5111_v12 = vpop.f32.mrb[30].mxu1  ;;  %v3541_v63 = vpop.eup %3540  ;;  %v3385_v17 = vpack.c.bf16 %v2515_v24, %v2514_v29  ;;  %v1694_v45 = vadd.f32 %v4981_v20, %v4845_v62  ;;  %v5125_v22 = vadd.f32 %v5010_v9, %v4835_v0  ;;  %v2522_v51 = vmul.f32 %v2394_v2, %v2010_v26 }
 0x266   : > { %v5115_v15 = vpop.f32.mrb[31].mxu0  ;;  %v5117_v43 = vpop.f32.mrb[31].mxu1  ;;  %3000 = vst [vmem:[%s4901_s14 + $0xc0] sm:$0xff] %v3384_v32  ;;  %v2393_v10 = vadd.f32 1.0, %v3541_v63  ;;  %3554 = verf.f32 %v2154_v36  ;;  %v5130_v37 = vadd.f32 %v5012_v58, %v4838_v39  ;;  %v5134_v60 = vadd.f32 %v5014_v50, %v4842_v18 }
 0x267   : > { %v3543_v4 = vpop.eup %3542  ;;  %3001 = vst [vmem:[%s4901_s14 + $0xc8] sm:$0xff] %v3385_v17  ;;  %3556 = verf.f32 %v2153_v3  ;;  %v2018_v9 = vmul.f32 0.5, %v5055_v48  ;;  %v2155_v7 = vmul.f32 0.70710677, %v1694_v45  ;;  %v2160_v26 = vmul.f32 0.70710677, %v5125_v22 }
 0x268   : > { %v3545_v35 = vpop.eup %3544  ;;  %v2395_v29 = vadd.f32 1.0, %v3543_v4  ;;  %v2521_v57 = vmul.f32 %v2393_v10, %v2009_v46  ;;  %v2017_v2 = vmul.f32 0.5, %v5059_v6  ;;  %v2019_v58 = vmul.f32 0.5, %v5073_v49 }
 0x269   : > { %v2400_v55 = vadd.f32 1.0, %v3545_v35  ;;  %v3547_v52 = vpop.eup %3546  ;;  %v2162_v32 = vmul.f32 0.70710677, %v5130_v37  ;;  %3558 = verf.f32 %v2155_v7  ;;  %v2161_v49 = vmul.f32 0.70710677, %v5134_v60 }
 0x26a   : > { %v2523_v20 = vmul.f32 %v2395_v29, %v2011_v59  ;;  %v3388_v24 = vpack.c.bf16 %v2521_v57, %v2520_v31  ;;  %v5141_v46 = vpop.f32.mrb[32].mxu0  ;;  %v3549_v50 = vpop.eup %3548  ;;  %v2402_v17 = vadd.f32 1.0, %v3547_v52  ;;  %3560 = verf.f32 %v2160_v26 }
 0x26b   : > { %v5143_v63 = vpop.f32.mrb[32].mxu1  ;;  %v2528_v48 = vmul.f32 %v2400_v55, %v2016_v16  ;;  %v5145_v36 = vpop.f32.mrb[33].mxu0  ;;  %v2401_v6 = vadd.f32 1.0, %v3549_v50  ;;  %v5153_v31 = vadd.f32 %v5016_v23, %v4845_v62  ;;  %v2024_v35 = vmul.f32 0.5, %v5082_v53 }
 0x26c   : > { %v3389_v59 = vpack.c.bf16 %v2523_v20, %v2522_v51  ;;  %v5147_v4 = vpop.f32.mrb[33].mxu1  ;;  %3004 = vst [vmem:[%s4901_s14 + $0xe0] sm:$0xff] %v3388_v24  ;;  %v5155_v10 = vpop.f32.mrb[34].mxu0  ;;  %3562 = verf.f32 %v2162_v32  ;;  %v5163_v51 = vadd.f32 %v5022_v47, %v4835_v0  ;;  %v5167_v29 = vadd.f32 %v5024_v1, %v4838_v39 }
 0x26d   : > { %v5157_v3 = vpop.f32.mrb[34].mxu1  ;;  %v3551_v16 = vpop.eup %3550  ;;  %v2530_v20 = vmul.f32 %v2402_v17, %v2018_v9  ;;  %v2529_v7 = vmul.f32 %v2401_v6, %v2017_v2  ;;  %3564 = verf.f32 %v2161_v49  ;;  %v2026_v52 = vmul.f32 0.5, %v5093_v42 }
 0x26e   : > { %3005 = vst [vmem:[%s4901_s14 + $0xe8] sm:$0xff] %v3389_v59  ;;  %v5169_v57 = vpop.f32.mrb[35].mxu0  ;;  %v5171_v23 = vpop.f32.mrb[35].mxu1  ;;  %v2403_v26 = vadd.f32 1.0, %v3551_v16  ;;  %v2163_v47 = vmul.f32 0.70710677, %v5153_v31  ;;  %v5180_v9 = vadd.f32 %v5034_v14, %v4842_v18  ;;  %v5184_v42 = vadd.f32 %v5036_v21, %v4845_v62 }
 0x26f   : > { %5764 = vst [vmem:[#allocation2_spill] sm:$0xff] %v5169_v57  ;;  %5765 = vst [vmem:[#allocation3_spill] sm:$0xff] %v5171_v23  ;;  %v3553_v55 = vpop.eup %3552  ;;  %v2168_v24 = vmul.f32 0.70710677, %v5163_v51  ;;  %v3392_v32 = vpack.c.bf16 %v2529_v7, %v2528_v48  ;;  %v2025_v50 = vmul.f32 0.5, %v5101_v54  ;;  %v2027_v57 = vmul.f32 0.5, %v1694_v45 }
 0x270   : > { %v2408_v53 = vadd.f32 1.0, %v3553_v55  ;;  %v2531_v1 = vmul.f32 %v2403_v26, %v2019_v58  ;;  %v2170_v59 = vmul.f32 0.70710677, %v5167_v29  ;;  %v3555_v23 = vpop.eup %3554  ;;  %3566 = verf.f32 %v2163_v47 }
 0x271   : > { %v3557_v2 = vpop.eup %3556  ;;  %3008 = vst [vmem:[%s4901_s14 + $0x100] sm:$0xff] %v3392_v32  ;;  %v2410_v58 = vadd.f32 1.0, %v3555_v23  ;;  %3568 = verf.f32 %v2168_v24  ;;  %v5189_v54 = vadd.f32 %v5049_v33, %v4835_v0  ;;  %v2169_v49 = vmul.f32 0.70710677, %v5180_v9 }
 0x272   : > { %v3393_v48 = vpack.c.bf16 %v2531_v1, %v2530_v20  ;;  %v5191_v45 = vpop.f32.mrb[36].mxu0  ;;  %v2536_v14 = vmul.f32 %v2408_v53, %v2024_v35  ;;  %v2409_v6 = vadd.f32 1.0, %v3557_v2  ;;  %3570 = verf.f32 %v2170_v59 }
 0x273   : > { %v5193_v17 = vpop.f32.mrb[36].mxu1  ;;  %v5196_v21 = vpop.f32.mrb[37].mxu0  ;;  %v2538_v23 = vmul.f32 %v2410_v58, %v2026_v52  ;;  %v2032_v55 = vmul.f32 0.5, %v5125_v22  ;;  %v2034_v33 = vmul.f32 0.5, %v5130_v37  ;;  %v2171_v20 = vmul.f32 0.70710677, %v5184_v42 }
 0x274   : > { %v5198_v16 = vpop.f32.mrb[37].mxu1  ;;  %3009 = vst [vmem:[%s4901_s14 + $0x108] sm:$0xff] %v3393_v48  ;;  %v5204_v7 = vpop.f32.mrb[38].mxu0  ;;  %v2537_v53 = vmul.f32 %v2409_v6, %v2025_v50  ;;  %3572 = verf.f32 %v2169_v49  ;;  %v2176_v47 = vmul.f32 0.70710677, %v5189_v54  ;;  %v5211_v24 = vadd.f32 %v5051_v27, %v4838_v39 }
 0x275   : > { %v5206_v26 = vpop.f32.mrb[38].mxu1  ;;  %v3559_v35 = vpop.eup %3558  ;;  %3574 = verf.f32 %v2171_v20  ;;  %v5219_v1 = vadd.f32 %v5061_v44, %v4842_v18  ;;  %v5223_v50 = vadd.f32 %v5063_v13, %v4845_v62  ;;  %v2033_v48 = vmul.f32 0.5, %v5134_v60 }
 0x276   : > { %v5213_v52 = vpop.f32.mrb[39].mxu0  ;;  %v5215_v22 = vpop.f32.mrb[39].mxu1  ;;  %v2411_v32 = vadd.f32 1.0, %v3559_v35  ;;  %v3396_v2 = vpack.c.bf16 %v2537_v53, %v2536_v14  ;;  %3576 = verf.f32 %v2176_v47  ;;  %v2035_v35 = vmul.f32 0.5, %v5153_v31 }
 0x277   : > { %5766 = vst [vmem:[#allocation4_spill] sm:$0xff] %v5213_v52  ;;  %5767 = vst [vmem:[#allocation5_spill] sm:$0xff] %v5215_v22  ;;  %v3561_v37 = vpop.eup %3560  ;;  %v2178_v20 = vmul.f32 0.70710677, %v5211_v24  ;;  %v2040_v52 = vmul.f32 0.5, %v5163_v51  ;;  %v2042_v53 = vmul.f32 0.5, %v5167_v29  ;;  %v5243_v51 = vadd.f32 %v5069_v11, %v4838_v39 }
 0x278   : > { %v3563_v59 = vpop.eup %3562  ;;  %v2416_v27 = vadd.f32 1.0, %v3561_v37  ;;  %v2539_v6 = vmul.f32 %v2411_v32, %v2027_v57  ;;  %3012 = vst [vmem:[%s4901_s14 + $0x120] sm:$0xff] %v3396_v2  ;;  %v2177_v13 = vmul.f32 0.70710677, %v5219_v1  ;;  %v2179_v60 = vmul.f32 0.70710677, %v5223_v50 }
 0x279   : > { %v3565_v58 = vpop.eup %3564  ;;  %v2418_v49 = vadd.f32 1.0, %v3563_v59  ;;  %3578 = verf.f32 %v2178_v20  ;;  %v5261_v20 = vadd.f32 %v5077_v41, %v4845_v62 }
 0x27a   : > { %v2544_v44 = vmul.f32 %v2416_v27, %v2032_v55  ;;  %v2417_v22 = vadd.f32 1.0, %v3565_v58  ;;  %v3397_v14 = vpack.c.bf16 %v2539_v6, %v2538_v23  ;;  %v5233_v57 = vpop.f32.mrb[40].mxu0  ;;  %v3567_v31 = vpop.eup %3566  ;;  %3580 = verf.f32 %v2177_v13 }
 0x27b   : > { %v5235_v47 = vpop.f32.mrb[40].mxu1  ;;  %v5239_v55 = vadd.f32 %v5067_v38, %v4835_v0  ;;  %v5245_v23 = vpop.f32.mrb[41].mxu0  ;;  %v2546_v59 = vmul.f32 %v2418_v49, %v2034_v33  ;;  %v2419_v2 = vadd.f32 1.0, %v3567_v31  ;;  %3582 = verf.f32 %v2179_v60 }
 0x27c   : > { %v2545_v37 = vmul.f32 %v2417_v22, %v2033_v48  ;;  %v5247_v29 = vpop.f32.mrb[41].mxu1  ;;  %v3569_v32 = vpop.eup %3568  ;;  %3013 = vst [vmem:[%s4901_s14 + $0x128] sm:$0xff] %v3397_v14  ;;  %v5252_v22 = vadd.f32 %v5075_v28, %v4842_v18  ;;  %v2041_v14 = vmul.f32 0.5, %v5180_v9  ;;  %v2186_v60 = vmul.f32 0.70710677, %v5243_v51 }
 0x27d   : > { %v5254_v38 = vpop.f32.mrb[42].mxu0  ;;  %v5256_v27 = vpop.f32.mrb[42].mxu1  ;;  %v2424_v58 = vadd.f32 1.0, %v3569_v32  ;;  %v2184_v6 = vmul.f32 0.70710677, %v5239_v55  ;;  %v2547_v13 = vmul.f32 %v2419_v2, %v2035_v35 }
 0x27e   : > { %5768 = vst [vmem:[#allocation6_spill] sm:$0xff] %v5254_v38  ;;  %5769 = vst [vmem:[#allocation7_spill] sm:$0xff] %v5256_v27  ;;  %v3571_v11 = vpop.eup %3570  ;;  %v3400_v48 = vpack.c.bf16 %v2545_v37, %v2544_v44  ;;  %v5263_v33 = vpop.f32.mrb[43].mxu0  ;;  %v2043_v44 = vmul.f32 0.5, %v5184_v42  ;;  %v2048_v37 = vmul.f32 0.5, %v5189_v54  ;;  %v5277_v42 = vadd.f32 %v5095_v8, %v4835_v0 }
 0x27f   : > { %5770 = vst [vmem:[#allocation8_spill] sm:$0xff] %v5263_v33  ;;  %v5265_v49 = vpop.f32.mrb[43].mxu1  ;;  %v2426_v28 = vadd.f32 1.0, %v3571_v11  ;;  %v3573_v31 = vpop.eup %3572  ;;  %3584 = verf.f32 %v2184_v6  ;;  %v2185_v41 = vmul.f32 0.70710677, %v5252_v22  ;;  %v3401_v33 = vpack.c.bf16 %v2547_v13, %v2546_v59 }
 0x280   : > { %5771 = vst [vmem:[#allocation9_spill] sm:$0xff] %v5265_v49  ;;  %3016 = vst [vmem:[%s4901_s14 + $0x140] sm:$0xff] %v3400_v48  ;;  %v3575_v32 = vpop.eup %3574  ;;  %v2552_v27 = vmul.f32 %v2424_v58, %v2040_v52  ;;  %v2425_v49 = vadd.f32 1.0, %v3573_v31  ;;  %3586 = verf.f32 %v2186_v60  ;;  %v2187_v11 = vmul.f32 0.70710677, %v5261_v20 }
 0x281   : > { %v3577_v35 = vpop.eup %3576  ;;  %v2554_v2 = vmul.f32 %v2426_v28, %v2042_v53  ;;  %v2427_v9 = vadd.f32 1.0, %v3575_v32  ;;  %3588 = verf.f32 %v2185_v41  ;;  %3017 = vst [vmem:[%s4901_s14 + $0x148] sm:$0xff] %v3401_v33  ;;  %v5281_v54 = vadd.f32 %v5097_v30, %v4838_v39 }
 0x282   : > { %v2553_v48 = vmul.f32 %v2425_v49, %v2041_v14  ;;  %v2432_v38 = vadd.f32 1.0, %v3577_v35  ;;  %v5283_v52 = vpop.f32.mrb[44].mxu0  ;;  %v2050_v58 = vmul.f32 0.5, %v5211_v24  ;;  %3590 = verf.f32 %v2187_v11 }
 0x283   : > { %v5285_v59 = vpop.f32.mrb[44].mxu1  ;;  %v2555_v53 = vmul.f32 %v2427_v9, %v2043_v44  ;;  %v5290_v6 = vadd.f32 %v5103_v19, %v4842_v18  ;;  %v5292_v33 = vpop.f32.mrb[45].mxu0  ;;  %v2049_v13 = vmul.f32 0.5, %v5219_v1  ;;  %v2192_v28 = vmul.f32 0.70710677, %v5277_v42 }
 0x284   : > { %v5294_v8 = vpop.f32.mrb[45].mxu1  ;;  %v3579_v49 = vpop.eup %3578  ;;  %v3404_v30 = vpack.c.bf16 %v2553_v48, %v2552_v27  ;;  %v5300_v14 = vadd.f32 %v5105_v61, %v4845_v62  ;;  %v2051_v41 = vmul.f32 0.5, %v5223_v50  ;;  %v2194_v27 = vmul.f32 0.70710677, %v5281_v54 }
 0x285   : > { %v5302_v24 = vpop.f32.mrb[46].mxu0  ;;  %v5304_v19 = vpop.f32.mrb[46].mxu1  ;;  %v3405_v31 = vpack.c.bf16 %v2555_v53, %v2554_v2  ;;  %v2434_v44 = vadd.f32 1.0, %v3579_v49  ;;  %v2560_v61 = vmul.f32 %v2432_v38, %v2048_v37  ;;  %3592 = verf.f32 %v2192_v28 }
 0x286   : > { %5772 = vst [vmem:[#allocation10_spill] sm:$0xff] %v5304_v19  ;;  %v3581_v60 = vpop.eup %3580  ;;  %v5308_v32 = vpop.f32.mrb[47].mxu0  ;;  %3020 = vst [vmem:[%s4901_s14 + $0x160] sm:$0xff] %v3404_v30  ;;  %v2193_v11 = vmul.f32 0.70710677, %v5290_v6  ;;  %v2056_v2 = vmul.f32 0.5, %v5239_v55  ;;  %3594 = verf.f32 %v2194_v27  ;;  %v5319_v49 = vadd.f32 %v5109_v25, %v4835_v0 }
 0x287   : > { %v5310_v1 = vpop.f32.mrb[47].mxu1  ;;  %v3583_v35 = vpop.eup %3582  ;;  %v2433_v9 = vadd.f32 1.0, %v3581_v60  ;;  %3021 = vst [vmem:[%s4901_s14 + $0x168] sm:$0xff] %v3405_v31  ;;  %v2562_v48 = vmul.f32 %v2434_v44, %v2050_v58  ;;  %v2195_v53 = vmul.f32 0.70710677, %v5300_v14  ;;  %v2058_v37 = vmul.f32 0.5, %v5243_v51 }
 0x288   : > { %v2435_v19 = vadd.f32 1.0, %v3583_v35  ;;  %3596 = verf.f32 %v2193_v11  ;;  %v5324_v28 = vadd.f32 %v5111_v12, %v4838_v39  ;;  %v5328_v55 = vadd.f32 %v5115_v15, %v4842_v18 }
 0x289   : > { %v2561_v50 = vmul.f32 %v2433_v9, %v2049_v13  ;;  %v3585_v30 = vpop.eup %3584  ;;  %3598 = verf.f32 %v2195_v53  ;;  %v5332_v0 = vadd.f32 %v5117_v43, %v4845_v62  ;;  %v2057_v31 = vmul.f32 0.5, %v5252_v22 }
 0x28a   : > { %v2563_v38 = vmul.f32 %v2435_v19, %v2051_v41  ;;  %v3587_v58 = vpop.eup %3586  ;;  %v2440_v60 = vadd.f32 1.0, %v3585_v30  ;;  %v5334_v25 = vpop.f32.mrb[48].mxu0  ;;  %v2200_v18 = vmul.f32 0.70710677, %v5319_v49  ;;  %v2059_v43 = vmul.f32 0.5, %v5261_v20 }
 0x28b   : > { %v3408_v13 = vpack.c.bf16 %v2561_v50, %v2560_v61  ;;  %v5336_v51 = vpop.f32.mrb[48].mxu1  ;;  %v3589_v39 = vpop.eup %3588  ;;  %v2442_v19 = vadd.f32 1.0, %v3587_v58  ;;  %v2202_v27 = vmul.f32 0.70710677, %v5324_v28  ;;  %v2064_v11 = vmul.f32 0.5, %v5277_v42 }
 0x28c   : > { %v3409_v12 = vpack.c.bf16 %v2563_v38, %v2562_v48  ;;  %v5340_v15 = vpop.f32.mrb[49].mxu0  ;;  %v5342_v44 = vpop.f32.mrb[49].mxu1  ;;  %v2568_v41 = vmul.f32 %v2440_v60, %v2056_v2  ;;  %v2441_v62 = vadd.f32 1.0, %v3589_v39  ;;  %3600 = verf.f32 %v2200_v18 }
 0x28d   : > { %3024 = vst [vmem:[%s4901_s14 + $0x180] sm:$0xff] %v3408_v13  ;;  %v5347_v35 = vpop.f32.mrb[50].mxu0  ;;  %v5349_v61 = vpop.f32.mrb[50].mxu1  ;;  %v2570_v22 = vmul.f32 %v2442_v19, %v2058_v37  ;;  %v2201_v48 = vmul.f32 0.70710677, %v5328_v55  ;;  %3602 = verf.f32 %v2202_v27  ;;  %v5361_v38 = vadd.f32 %v5141_v46, %v4860_v34 }
 0x28e   : > { %v3591_v9 = vpop.eup %3590  ;;  %3025 = vst [vmem:[%s4901_s14 + $0x188] sm:$0xff] %v3409_v12  ;;  %v5354_v50 = vpop.f32.mrb[51].mxu0  ;;  %v2569_v53 = vmul.f32 %v2441_v62, %v2057_v31  ;;  %v2203_v30 = vmul.f32 0.70710677, %v5332_v0  ;;  %v5365_v42 = vadd.f32 %v5143_v63, %v4864_v5  ;;  %v5369_v37 = vadd.f32 %v5145_v36, %v4954_v40 }
 0x28f   : > { %v5356_v2 = vpop.f32.mrb[51].mxu1  ;;  %v2443_v20 = vadd.f32 1.0, %v3591_v9  ;;  %3604 = verf.f32 %v2201_v48  ;;  %v3593_v58 = vpop.eup %3592  ;;  %v5373_v39 = vadd.f32 %v5147_v4, %v4988_v56  ;;  %v2066_v46 = vmul.f32 0.5, %v5281_v54 }
 0x290   : > { %v3412_v13 = vpack.c.bf16 %v2569_v53, %v2568_v41  ;;  %3606 = verf.f32 %v2203_v30  ;;  %v3595_v12 = vpop.eup %3594  ;;  %v2448_v19 = vadd.f32 1.0, %v3593_v58  ;;  %v2065_v31 = vmul.f32 0.5, %v5290_v6 }
 0x291   : > { %v2571_v60 = vmul.f32 %v2443_v20, %v2059_v43  ;;  %v2084_v63 = vmul.f32 0.70710677, %v5361_v38  ;;  %v2450_v62 = vadd.f32 1.0, %v3595_v12  ;;  %v2067_v41 = vmul.f32 0.5, %v5300_v14 }
 0x292   : > { %v3597_v18 = vpop.eup %3596  ;;  %3028 = vst [vmem:[%s4901_s14 + $0x1a0] sm:$0xff] %v3412_v13  ;;  %v2086_v43 = vmul.f32 0.70710677, %v5365_v42  ;;  %v5381_v27 = vpop.f32.mrb[52].mxu0  ;;  %v2576_v9 = vmul.f32 %v2448_v19, %v2064_v11  ;;  %v2085_v54 = vmul.f32 0.70710677, %v5369_v37  ;;  %v5399_v12 = vadd.f32 %v5155_v10, %v4860_v34 }
 0x293   : > { %v3413_v36 = vpack.c.bf16 %v2571_v60, %v2570_v22  ;;  %v5383_v4 = vpop.f32.mrb[52].mxu1  ;;  %v2449_v48 = vadd.f32 1.0, %v3597_v18  ;;  %3608 = verf.f32 %v2084_v63  ;;  %v5386_v6 = vpop.f32.mrb[53].mxu0  ;;  %v2578_v22 = vmul.f32 %v2450_v62, %v2066_v46 }
 0x294   : > { %v5388_v53 = vpop.f32.mrb[53].mxu1  ;;  %v3599_v20 = vpop.eup %3598  ;;  %v2072_v14 = vmul.f32 0.5, %v5319_v49  ;;  %3610 = verf.f32 %v2086_v43  ;;  %v2087_v30 = vmul.f32 0.70710677, %v5373_v39  ;;  %v2074_v49 = vmul.f32 0.5, %v5324_v28 }
 0x295   : > { %3029 = vst [vmem:[%s4901_s14 + $0x1a8] sm:$0xff] %v3413_v36  ;;  %v5393_v58 = vpop.f32.mrb[54].mxu0  ;;  %v5395_v13 = vpop.f32.mrb[54].mxu1  ;;  %v2577_v11 = vmul.f32 %v2449_v48, %v2065_v31  ;;  %v2451_v60 = vadd.f32 1.0, %v3599_v20  ;;  %3612 = verf.f32 %v2085_v54  ;;  %v5408_v46 = vadd.f32 %v5157_v3, %v4864_v5  ;;  %v5777_v31 = vld [vmem:[#allocation2_spill] sm:$0xff]  ;;  %v5778_v48 = vld [vmem:[#allocation3_spill] sm:$0xff] }
 0x296   : > { %5773 = vst [vmem:[#allocation11_spill] sm:$0xff] %v5393_v58  ;;  %5774 = vst [vmem:[#allocation12_spill] sm:$0xff] %v5395_v13  ;;  %v5401_v19 = vpop.f32.mrb[55].mxu0  ;;  %v5403_v63 = vpop.f32.mrb[55].mxu1  ;;  %3614 = verf.f32 %v2087_v30  ;;  %v5412_v18 = vadd.f32 %v5777_v31, %v4954_v40  ;;  %v2092_v43 = vmul.f32 0.70710677, %v5399_v12  ;;  %v5417_v54 = vadd.f32 %v5778_v48, %v4988_v56 }
 0x297   : > { %5775 = vst [vmem:[#allocation13_spill] sm:$0xff] %v5401_v19  ;;  %5776 = vst [vmem:[#allocation14_spill] sm:$0xff] %v5403_v63  ;;  %v3601_v36 = vpop.eup %3600  ;;  %v3416_v62 = vpack.c.bf16 %v2577_v11, %v2576_v9  ;;  %v2579_v10 = vmul.f32 %v2451_v60, %v2067_v41  ;;  %v2073_v30 = vmul.f32 0.5, %v5328_v55  ;;  %v2075_v3 = vmul.f32 0.5, %v5332_v0 }
 0x298   : > { %v3603_v20 = vpop.eup %3602  ;;  %v2456_v28 = vadd.f32 1.0, %v3601_v36  ;;  %v2094_v63 = vmul.f32 0.70710677, %v5408_v46  ;;  %3616 = verf.f32 %v2092_v43  ;;  %v2093_v41 = vmul.f32 0.70710677, %v5412_v18 }
 0x299   : > { %v3605_v31 = vpop.eup %3604  ;;  %3032 = vst [vmem:[%s4901_s14 + $0x1c0] sm:$0xff] %v3416_v62  ;;  %v3417_v19 = vpack.c.bf16 %v2579_v10, %v2578_v22  ;;  %v2458_v9 = vadd.f32 1.0, %v3603_v20  ;;  %v1956_v13 = vmul.f32 0.5, %v5361_v38  ;;  %v2095_v22 = vmul.f32 0.70710677, %v5417_v54 }
 0x29a   : > { %v3607_v11 = vpop.eup %3606  ;;  %v2584_v60 = vmul.f32 %v2456_v28, %v2072_v14  ;;  %v2457_v48 = vadd.f32 1.0, %v3605_v31  ;;  %3618 = verf.f32 %v2094_v63  ;;  %v5425_v36 = vpop.f32.mrb[56].mxu0  ;;  %v1958_v14 = vmul.f32 0.5, %v5365_v42 }
 0x29b   : > { %v5427_v55 = vpop.f32.mrb[56].mxu1  ;;  %3033 = vst [vmem:[%s4901_s14 + $0x1c8] sm:$0xff] %v3417_v19  ;;  %v2586_v0 = vmul.f32 %v2458_v9, %v2074_v49  ;;  %v2459_v58 = vadd.f32 1.0, %v3607_v11  ;;  %3620 = verf.f32 %v2093_v41  ;;  %v5431_v62 = vpop.f32.mrb[57].mxu0  ;;  %v5438_v38 = vadd.f32 %v5191_v45, %v4860_v34 }
 0x29c   : > { %v5433_v10 = vpop.f32.mrb[57].mxu1  ;;  %v2585_v43 = vmul.f32 %v2457_v48, %v2073_v30  ;;  %v5442_v63 = vadd.f32 %v5193_v17, %v4864_v5  ;;  %v5444_v19 = vpop.f32.mrb[58].mxu0  ;;  %v1957_v31 = vmul.f32 0.5, %v5369_v37  ;;  %3622 = verf.f32 %v2095_v22 }
 0x29d   : > { %5779 = vst [vmem:[#allocation2_spill] sm:$0xff] %v5444_v19  ;;  %v5446_v49 = vpop.f32.mrb[58].mxu1  ;;  %v3609_v20 = vpop.eup %3608  ;;  %v2587_v28 = vmul.f32 %v2459_v58, %v2075_v3  ;;  %v5451_v42 = vadd.f32 %v5196_v21, %v4954_v40  ;;  %v2100_v11 = vmul.f32 0.70710677, %v5438_v38  ;;  %v5460_v58 = vadd.f32 %v5198_v16, %v4988_v56 }
 0x29e   : > { %5780 = vst [vmem:[#allocation3_spill] sm:$0xff] %v5446_v49  ;;  %v5453_v45 = vpop.f32.mrb[59].mxu0  ;;  %v5455_v30 = vpop.f32.mrb[59].mxu1  ;;  %v3420_v9 = vpack.c.bf16 %v2585_v43, %v2584_v60  ;;  %v2340_v41 = vadd.f32 1.0, %v3609_v20  ;;  %v2102_v21 = vmul.f32 0.70710677, %v5442_v63  ;;  %v5465_v22 = vadd.f32 %v5204_v7, %v4860_v34 }
 0x29f   : > { %5781 = vst [vmem:[#allocation15_spill] sm:$0xff] %v5453_v45  ;;  %5782 = vst [vmem:[#allocation16_spill] sm:$0xff] %v5455_v30  ;;  %v3611_v17 = vpop.eup %3610  ;;  %v3421_v3 = vpack.c.bf16 %v2587_v28, %v2586_v0  ;;  %v1959_v43 = vmul.f32 0.5, %v5373_v39  ;;  %3624 = verf.f32 %v2100_v11  ;;  %v2101_v0 = vmul.f32 0.70710677, %v5451_v42 }
 0x2a0   : > { %v3613_v37 = vpop.eup %3612  ;;  %v2342_v48 = vadd.f32 1.0, %v3611_v17  ;;  %3036 = vst [vmem:[%s4901_s14 + $0x1e0] sm:$0xff] %v3420_v9  ;;  %v2468_v45 = vmul.f32 %v2340_v41, %v1956_v13  ;;  %3626 = verf.f32 %v2102_v21  ;;  %v1964_v17 = vmul.f32 0.5, %v5399_v12 }
 0x2a1   : > { %v3615_v30 = vpop.eup %3614  ;;  %v2341_v60 = vadd.f32 1.0, %v3613_v37  ;;  %3037 = vst [vmem:[%s4901_s14 + $0x1e8] sm:$0xff] %v3421_v3  ;;  %v1966_v49 = vmul.f32 0.5, %v5408_v46  ;;  %v2103_v7 = vmul.f32 0.70710677, %v5460_v58  ;;  %3628 = verf.f32 %v2101_v0  ;;  %v5783_v37 = vld [vmem:[#allocation4_spill] sm:$0xff] }
 0x2a2   : > { %v2470_v20 = vmul.f32 %v2342_v48, %v1958_v14  ;;  %v2343_v16 = vadd.f32 1.0, %v3615_v30  ;;  %v5474_v19 = vpop.f32.mrb[60].mxu0  ;;  %v3617_v9 = vpop.eup %3616  ;;  %v2108_v14 = vmul.f32 0.70710677, %v5465_v22  ;;  %v5481_v30 = vadd.f32 %v5206_v26, %v4864_v5 }
 0x2a3   : > { %v2469_v28 = vmul.f32 %v2341_v60, %v1957_v31  ;;  %v5476_v13 = vpop.f32.mrb[60].mxu1  ;;  %v5483_v31 = vpop.f32.mrb[61].mxu0  ;;  %v2348_v11 = vadd.f32 1.0, %v3617_v9  ;;  %3630 = verf.f32 %v2103_v7  ;;  %v5489_v3 = vadd.f32 %v5783_v37, %v4954_v40 }
 0x2a4   : > { %v2471_v39 = vmul.f32 %v2343_v16, %v1959_v43  ;;  %v5485_v12 = vpop.f32.mrb[61].mxu1  ;;  %v3619_v46 = vpop.eup %3618  ;;  %v1965_v16 = vmul.f32 0.5, %v5412_v18  ;;  %3632 = verf.f32 %v2108_v14  ;;  %v1967_v9 = vmul.f32 0.5, %v5417_v54 }
 0x2a5   : > { %v3362_v41 = vpack.c.bf16 %v2469_v28, %v2468_v45  ;;  %v5491_v48 = vpop.f32.mrb[62].mxu0  ;;  %v5493_v21 = vpop.f32.mrb[62].mxu1  ;;  %v2350_v43 = vadd.f32 1.0, %v3619_v46  ;;  %v2476_v28 = vmul.f32 %v2348_v11, %v1964_v17  ;;  %v2110_v37 = vmul.f32 0.70710677, %v5481_v30 }
 0x2a6   : > { %5784 = vst [vmem:[#allocation4_spill] sm:$0xff] %v5491_v48  ;;  %5785 = vst [vmem:[#allocation17_spill] sm:$0xff] %v5493_v21  ;;  %v3621_v26 = vpop.eup %3620  ;;  %v3363_v60 = vpack.c.bf16 %v2471_v39, %v2470_v20  ;;  %v5496_v0 = vpop.f32.mrb[63].mxu0  ;;  %v2109_v20 = vmul.f32 0.70710677, %v5489_v3  ;;  %v5786_v39 = vld [vmem:[#allocation5_spill] sm:$0xff]  ;;  %v5509_v14 = vadd.f32 %v5233_v57, %v4860_v34  ;;  %v5513_v54 = vadd.f32 %v5235_v47, %v4864_v5 }
 0x2a7   : > { %v5498_v45 = vpop.f32.mrb[63].mxu1  ;;  %2978 = vst [vmem:[%s4901_s14 + $0x10] sm:$0xff] %v3362_v41  ;;  %v2349_v7 = vadd.f32 1.0, %v3621_v26  ;;  %v3623_v48 = vpop.eup %3622  ;;  %v2478_v21 = vmul.f32 %v2350_v43, %v1966_v49  ;;  %v1890_v18 = vadd.f32 %v5786_v39, %v4988_v56  ;;  %3634 = verf.f32 %v2110_v37 }
 0x2a8   : > { %2979 = vst [vmem:[%s4901_s14 + $0x18] sm:$0xff] %v3363_v60  ;;  %v2351_v41 = vadd.f32 1.0, %v3623_v48  ;;  %v1972_v17 = vmul.f32 0.5, %v5438_v38  ;;  %v1974_v49 = vmul.f32 0.5, %v5442_v63  ;;  %3636 = verf.f32 %v2109_v20 }
 0x2a9   : > { %v2477_v46 = vmul.f32 %v2349_v7, %v1965_v16  ;;  %v2111_v11 = vmul.f32 0.70710677, %v1890_v18  ;;  %v3625_v26 = vpop.eup %3624  ;;  %v1973_v57 = vmul.f32 0.5, %v5451_v42  ;;  %v2116_v16 = vmul.f32 0.70710677, %v5509_v14 }
 0x2aa   : > { %v2479_v43 = vmul.f32 %v2351_v41, %v1967_v9  ;;  %v3627_v48 = vpop.eup %3626  ;;  %v2356_v7 = vadd.f32 1.0, %v3625_v26  ;;  %v2118_v47 = vmul.f32 0.70710677, %v5513_v54  ;;  %v1783_v38 = vadd.f32 %v5245_v23, %v4954_v40 }
 0x2ab   : > { %v3366_v60 = vpack.c.bf16 %v2477_v46, %v2476_v28  ;;  %3638 = verf.f32 %v2111_v11  ;;  %v2358_v37 = vadd.f32 1.0, %v3627_v48  ;;  %v1896_v28 = vadd.f32 %v5247_v29, %v4988_v56  ;;  %v3629_v9 = vpop.eup %3628  ;;  %v5788_v29 = vld [vmem:[#allocation7_spill] sm:$0xff] }
 0x2ac   : > { %v3367_v63 = vpack.c.bf16 %v2479_v43, %v2478_v21  ;;  %3640 = verf.f32 %v2116_v16  ;;  %v1975_v42 = vmul.f32 0.5, %v5460_v58  ;;  %v1980_v20 = vmul.f32 0.5, %v5465_v22  ;;  %v5787_v43 = vld [vmem:[#allocation6_spill] sm:$0xff] }
 0x2ad   : > { %2982 = vst [vmem:[%s4901_s14 + $0x30] sm:$0xff] %v3366_v60  ;;  %3642 = verf.f32 %v2118_v47  ;;  %v2117_v39 = vmul.f32 0.70710677, %v1783_v38  ;;  %v3631_v46 = vpop.eup %3630  ;;  %v2484_v41 = vmul.f32 %v2356_v7, %v1972_v17  ;;  %v2486_v11 = vmul.f32 %v2358_v37, %v1974_v49  ;;  %v5789_v47 = vld [vmem:[#allocation8_spill] sm:$0xff] }
 0x2ae   : > { %2983 = vst [vmem:[%s4901_s14 + $0x38] sm:$0xff] %v3367_v63  ;;  %v2357_v26 = vadd.f32 1.0, %v3629_v9  ;;  %v2119_v23 = vmul.f32 0.70710677, %v1896_v28  ;;  %v3633_v60 = vpop.eup %3632  ;;  %v2359_v21 = vadd.f32 1.0, %v3631_v46  ;;  %v1785_v16 = vadd.f32 %v5787_v43, %v4860_v34 }
 0x2af   : > { %3644 = verf.f32 %v2117_v39  ;;  %v5532_v48 = vadd.f32 %v5788_v29, %v4864_v5  ;;  %v2364_v22 = vadd.f32 1.0, %v3633_v60  ;;  %v5536_v17 = vadd.f32 %v5789_v47, %v4954_v40 }
 0x2b0   : > { %v2485_v58 = vmul.f32 %v2357_v26, %v1973_v57  ;;  %3646 = verf.f32 %v2119_v23  ;;  %v2487_v49 = vmul.f32 %v2359_v21, %v1975_v42  ;;  %v1982_v7 = vmul.f32 0.5, %v5481_v30  ;;  %v5790_v30 = vld [vmem:[#allocation9_spill] sm:$0xff] }
 0x2b1   : > { %v1981_v63 = vmul.f32 0.5, %v5489_v3  ;;  %v2124_v37 = vmul.f32 0.70710677, %v1785_v16  ;;  %v3635_v9 = vpop.eup %3634  ;;  %v2492_v46 = vmul.f32 %v2364_v22, %v1980_v20  ;;  %v1983_v43 = vmul.f32 0.5, %v1890_v18 }
 0x2b2   : > { %v3370_v39 = vpack.c.bf16 %v2485_v58, %v2484_v41  ;;  %v2126_v57 = vmul.f32 0.70710677, %v5532_v48  ;;  %v3637_v26 = vpop.eup %3636  ;;  %v3371_v23 = vpack.c.bf16 %v2487_v49, %v2486_v11  ;;  %v2366_v60 = vadd.f32 1.0, %v3635_v9 }
 0x2b3   : > { %3648 = verf.f32 %v2124_v37  ;;  %v2125_v29 = vmul.f32 0.70710677, %v5536_v17  ;;  %v2365_v42 = vadd.f32 1.0, %v3637_v26  ;;  %v1900_v3 = vadd.f32 %v5790_v30, %v4988_v56 }
 0x2b4   : > { %2986 = vst [vmem:[%s4901_s14 + $0x50] sm:$0xff] %v3370_v39  ;;  %3650 = verf.f32 %v2126_v57  ;;  %v1791_v21 = vadd.f32 %v5283_v52, %v4860_v34  ;;  %2987 = vst [vmem:[%s4901_s14 + $0x58] sm:$0xff] %v3371_v23  ;;  %v2494_v18 = vmul.f32 %v2366_v60, %v1982_v7  ;;  %v1988_v20 = vmul.f32 0.5, %v5509_v14 }
 0x2b5   : > { %v3639_v41 = vpop.eup %3638  ;;  %3652 = verf.f32 %v2125_v29  ;;  %v5551_v11 = vadd.f32 %v5285_v59, %v4864_v5  ;;  %v2493_v22 = vmul.f32 %v2365_v42, %v1981_v63  ;;  %v2127_v49 = vmul.f32 0.70710677, %v1900_v3 }
 0x2b6   : > { %v3641_v58 = vpop.eup %3640  ;;  %v2367_v47 = vadd.f32 1.0, %v3639_v41  ;;  %v5555_v37 = vadd.f32 %v5292_v33, %v4954_v40  ;;  %v1990_v7 = vmul.f32 0.5, %v5513_v54  ;;  %v1989_v39 = vmul.f32 0.5, %v1783_v38 }
 0x2b7   : > { %v3643_v52 = vpop.eup %3642  ;;  %v2372_v9 = vadd.f32 1.0, %v3641_v58  ;;  %v2132_v14 = vmul.f32 0.70710677, %v1791_v21  ;;  %v3374_v57 = vpack.c.bf16 %v2493_v22, %v2492_v46  ;;  %3654 = verf.f32 %v2127_v49  ;;  %v5791_v58 = vld [vmem:[#allocation10_spill] sm:$0xff] }
 0x2b8   : > { %v2495_v26 = vmul.f32 %v2367_v47, %v1983_v43  ;;  %v2374_v23 = vadd.f32 1.0, %v3643_v52  ;;  %v1991_v60 = vmul.f32 0.5, %v1896_v28  ;;  %v2134_v29 = vmul.f32 0.70710677, %v5551_v11 }
 0x2b9   : > { %v3645_v59 = vpop.eup %3644  ;;  %v2500_v63 = vmul.f32 %v2372_v9, %v1988_v20  ;;  %3656 = verf.f32 %v2132_v14  ;;  %2990 = vst [vmem:[%s4901_s14 + $0x70] sm:$0xff] %v3374_v57  ;;  %v2133_v54 = vmul.f32 0.70710677, %v5555_v37  ;;  %v1906_v46 = vadd.f32 %v5294_v8, %v4988_v56 }
 0x2ba   : > { %v3647_v33 = vpop.eup %3646  ;;  %v3375_v42 = vpack.c.bf16 %v2495_v26, %v2494_v18  ;;  %v2502_v30 = vmul.f32 %v2374_v23, %v1990_v7  ;;  %v2373_v41 = vadd.f32 1.0, %v3645_v59  ;;  %3658 = verf.f32 %v2134_v29 }
 0x2bb   : > { %v2375_v38 = vadd.f32 1.0, %v3647_v33  ;;  %v1795_v43 = vadd.f32 %v5302_v24, %v4860_v34  ;;  %v1996_v20 = vmul.f32 0.5, %v1785_v16  ;;  %3660 = verf.f32 %v2133_v54 }
 0x2bc   : > { %2991 = vst [vmem:[%s4901_s14 + $0x78] sm:$0xff] %v3375_v42  ;;  %v2501_v28 = vmul.f32 %v2373_v41, %v1989_v39  ;;  %v1908_v22 = vadd.f32 %v5791_v58, %v4864_v5  ;;  %v1998_v49 = vmul.f32 0.5, %v5532_v48  ;;  %v2135_v52 = vmul.f32 0.70710677, %v1906_v46 }
 0x2bd   : > { %v3649_v18 = vpop.eup %3648  ;;  %v2503_v47 = vmul.f32 %v2375_v38, %v1991_v60  ;;  %v1797_v9 = vadd.f32 %v5308_v32, %v4954_v40  ;;  %v1997_v39 = vmul.f32 0.5, %v5536_v17  ;;  %v2140_v16 = vmul.f32 0.70710677, %v1795_v43 }
 0x2be   : > { %v3651_v8 = vpop.eup %3650  ;;  %v3378_v7 = vpack.c.bf16 %v2501_v28, %v2500_v63  ;;  %v2380_v24 = vadd.f32 1.0, %v3649_v18  ;;  %3662 = verf.f32 %v2135_v52  ;;  %v2142_v23 = vmul.f32 0.70710677, %v1908_v22 }
 0x2bf   : > { %v3653_v14 = vpop.eup %3652  ;;  %v3379_v57 = vpack.c.bf16 %v2503_v47, %v2502_v30  ;;  %v2382_v26 = vadd.f32 1.0, %v3651_v8  ;;  %v1999_v48 = vmul.f32 0.5, %v1900_v3  ;;  %3664 = verf.f32 %v2140_v16 }
 0x2c0   : > { %2994 = vst [vmem:[%s4901_s14 + $0x90] sm:$0xff] %v3378_v7  ;;  %v2508_v59 = vmul.f32 %v2380_v24, %v1996_v20  ;;  %v2381_v60 = vadd.f32 1.0, %v3653_v14  ;;  %v2004_v29 = vmul.f32 0.5, %v1791_v21  ;;  %3666 = verf.f32 %v2142_v23 }
 0x2c1   : > { %2995 = vst [vmem:[%s4901_s14 + $0x98] sm:$0xff] %v3379_v57  ;;  %v2141_v32 = vmul.f32 0.70710677, %v1797_v9  ;;  %v1910_v63 = vadd.f32 %v5310_v1, %v4988_v56  ;;  %v3655_v33 = vpop.eup %3654  ;;  %v2510_v17 = vmul.f32 %v2382_v26, %v1998_v49  ;;  %v1801_v30 = vadd.f32 %v5334_v25, %v4860_v34 }
 0x2c2   : > { %v2509_v42 = vmul.f32 %v2381_v60, %v1997_v39  ;;  %v5580_v41 = vadd.f32 %v5336_v51, %v4864_v5  ;;  %v2383_v54 = vadd.f32 1.0, %v3655_v33  ;;  %v5584_v38 = vadd.f32 %v5340_v15, %v4954_v40 }
 0x2c3   : > { %v3657_v3 = vpop.eup %3656  ;;  %3668 = verf.f32 %v2141_v32  ;;  %v2143_v21 = vmul.f32 0.70710677, %v1910_v63  ;;  %v2006_v20 = vmul.f32 0.5, %v5551_v11  ;;  %v2148_v58 = vmul.f32 0.70710677, %v1801_v30 }
 0x2c4   : > { %v3382_v1 = vpack.c.bf16 %v2509_v42, %v2508_v59  ;;  %v2388_v28 = vadd.f32 1.0, %v3657_v3  ;;  %v3659_v18 = vpop.eup %3658  ;;  %v2511_v25 = vmul.f32 %v2383_v54, %v1999_v48  ;;  %v2005_v47 = vmul.f32 0.5, %v5555_v37 }
 0x2c5   : > { %3670 = verf.f32 %v2143_v21  ;;  %v2150_v51 = vmul.f32 0.70710677, %v5580_v41  ;;  %v3661_v49 = vpop.eup %3660  ;;  %v2390_v8 = vadd.f32 1.0, %v3659_v18  ;;  %v2007_v7 = vmul.f32 0.5, %v1906_v46 }
 0x2c6   : > { %2998 = vst [vmem:[%s4901_s14 + $0xb0] sm:$0xff] %v3382_v1  ;;  %v2516_v52 = vmul.f32 %v2388_v28, %v2004_v29  ;;  %3672 = verf.f32 %v2148_v58  ;;  %v3383_v15 = vpack.c.bf16 %v2511_v25, %v2510_v17  ;;  %v2389_v24 = vadd.f32 1.0, %v3661_v49 }
 0x2c7   : > { %3674 = verf.f32 %v2150_v51  ;;  %v2149_v11 = vmul.f32 0.70710677, %v5584_v38  ;;  %v2012_v39 = vmul.f32 0.5, %v1795_v43  ;;  %v1916_v16 = vadd.f32 %v5342_v44, %v4988_v56 }
 0x2c8   : > { %v1805_v37 = vadd.f32 %v5347_v35, %v4860_v34  ;;  %v5597_v14 = vadd.f32 %v5349_v61, %v4864_v5  ;;  %v3663_v57 = vpop.eup %3662  ;;  %2999 = vst [vmem:[%s4901_s14 + $0xb8] sm:$0xff] %v3383_v15  ;;  %v2517_v46 = vmul.f32 %v2389_v24, %v2005_v47  ;;  %v2014_v26 = vmul.f32 0.5, %v1908_v22 }
 0x2c9   : > { %3676 = verf.f32 %v2149_v11  ;;  %v1807_v23 = vadd.f32 %v5354_v50, %v4954_v40  ;;  %v3665_v43 = vpop.eup %3664  ;;  %v2518_v59 = vmul.f32 %v2390_v8, %v2006_v20  ;;  %v2391_v60 = vadd.f32 1.0, %v3663_v57 }
 0x2ca   : > { %v2013_v44 = vmul.f32 0.5, %v1797_v9  ;;  %v2151_v48 = vmul.f32 0.70710677, %v1916_v16  ;;  %v3667_v29 = vpop.eup %3666  ;;  %v3386_v35 = vpack.c.bf16 %v2517_v46, %v2516_v52  ;;  %v2396_v32 = vadd.f32 1.0, %v3665_v43 }
 0x2cb   : > { %v2156_v33 = vmul.f32 0.70710677, %v1805_v37  ;;  %v5604_v61 = vadd.f32 %v5356_v2, %v4988_v56  ;;  %v2519_v17 = vmul.f32 %v2391_v60, %v2007_v7  ;;  %v2398_v22 = vadd.f32 1.0, %v3667_v29  ;;  %v5793_v60 = vld [vmem:[#allocation12_spill] sm:$0xff] }
 0x2cc   : > { %3678 = verf.f32 %v2151_v48  ;;  %v2158_v42 = vmul.f32 0.70710677, %v5597_v14  ;;  %3002 = vst [vmem:[%s4901_s14 + $0xd0] sm:$0xff] %v3386_v35  ;;  %v2015_v3 = vmul.f32 0.5, %v1910_v63  ;;  %v2020_v54 = vmul.f32 0.5, %v1801_v30 }
 0x2cd   : > { %v3669_v50 = vpop.eup %3668  ;;  %3680 = verf.f32 %v2156_v33  ;;  %v2157_v9 = vmul.f32 0.70710677, %v1807_v23  ;;  %v3387_v21 = vpack.c.bf16 %v2519_v17, %v2518_v59  ;;  %v2524_v1 = vmul.f32 %v2396_v32, %v2012_v39 }
 0x2ce   : > { %v2397_v28 = vadd.f32 1.0, %v3669_v50  ;;  %3682 = verf.f32 %v2158_v42  ;;  %v2526_v58 = vmul.f32 %v2398_v22, %v2014_v26  ;;  %v2159_v2 = vmul.f32 0.70710677, %v5604_v61  ;;  %v5794_v22 = vld [vmem:[#allocation13_spill] sm:$0xff] }
 0x2cf   : > { %v3671_v20 = vpop.eup %3670  ;;  %3684 = verf.f32 %v2157_v9  ;;  %v1811_v18 = vadd.f32 %v5381_v27, %v4860_v34  ;;  %3003 = vst [vmem:[%s4901_s14 + $0xd8] sm:$0xff] %v3387_v21  ;;  %v5614_v63 = vadd.f32 %v5383_v4, %v4864_v5  ;;  %v5618_v30 = vadd.f32 %v5386_v6, %v4954_v40  ;;  %v5795_v21 = vld [vmem:[#allocation14_spill] sm:$0xff] }
 0x2d0   : > { %v3673_v25 = vpop.eup %3672  ;;  %v2525_v47 = vmul.f32 %v2397_v28, %v2013_v44  ;;  %v2399_v51 = vadd.f32 1.0, %v3671_v20  ;;  %v2022_v8 = vmul.f32 0.5, %v5580_v41  ;;  %3686 = verf.f32 %v2159_v2 }
 0x2d1   : > { %v3675_v49 = vpop.eup %3674  ;;  %v2404_v52 = vadd.f32 1.0, %v3673_v25  ;;  %v2164_v7 = vmul.f32 0.70710677, %v1811_v18  ;;  %v2021_v24 = vmul.f32 0.5, %v5584_v38  ;;  %v2023_v11 = vmul.f32 0.5, %v1916_v16  ;;  %v5792_v38 = vld [vmem:[#allocation11_spill] sm:$0xff] }
 0x2d2   : > { %v3390_v27 = vpack.c.bf16 %v2525_v47, %v2524_v1  ;;  %v2527_v15 = vmul.f32 %v2399_v51, %v2015_v3  ;;  %v2406_v4 = vadd.f32 1.0, %v3675_v49  ;;  %v2028_v57 = vmul.f32 0.5, %v1805_v37 }
 0x2d3   : > { %v3677_v39 = vpop.eup %3676  ;;  %3688 = verf.f32 %v2164_v7  ;;  %v2166_v46 = vmul.f32 0.70710677, %v5614_v63  ;;  %v2532_v26 = vmul.f32 %v2404_v52, %v2020_v54  ;;  %v2165_v41 = vmul.f32 0.70710677, %v5618_v30 }
 0x2d4   : > { %3006 = vst [vmem:[%s4901_s14 + $0xf0] sm:$0xff] %v3390_v27  ;;  %v3391_v6 = vpack.c.bf16 %v2527_v15, %v2526_v58  ;;  %v2405_v43 = vadd.f32 1.0, %v3677_v39  ;;  %v1926_v59 = vadd.f32 %v5388_v53, %v4988_v56  ;;  %v5629_v16 = vadd.f32 %v5792_v38, %v4860_v34 }
 0x2d5   : > { %3690 = verf.f32 %v2166_v46  ;;  %v5633_v37 = vadd.f32 %v5793_v60, %v4864_v5  ;;  %v2030_v29 = vmul.f32 0.5, %v5597_v14  ;;  %v2029_v35 = vmul.f32 0.5, %v1807_v23 }
 0x2d6   : > { %v3679_v44 = vpop.eup %3678  ;;  %3007 = vst [vmem:[%s4901_s14 + $0xf8] sm:$0xff] %v3391_v6  ;;  %v2533_v48 = vmul.f32 %v2405_v43, %v2021_v24  ;;  %3692 = verf.f32 %v2165_v41  ;;  %v2534_v33 = vmul.f32 %v2406_v4, %v2022_v8  ;;  %v2167_v53 = vmul.f32 0.70710677, %v1926_v59 }
 0x2d7   : > { %v3681_v32 = vpop.eup %3680  ;;  %v2407_v17 = vadd.f32 1.0, %v3679_v44  ;;  %v5639_v42 = vadd.f32 %v5794_v22, %v4954_v40  ;;  %v2172_v9 = vmul.f32 0.70710677, %v5629_v16  ;;  %v5644_v1 = vadd.f32 %v5795_v21, %v4988_v56 }
 0x2d8   : > { %v3683_v50 = vpop.eup %3682  ;;  %v3394_v3 = vpack.c.bf16 %v2533_v48, %v2532_v26  ;;  %v2412_v54 = vadd.f32 1.0, %v3681_v32  ;;  %3694 = verf.f32 %v2167_v53  ;;  %v2174_v20 = vmul.f32 0.70710677, %v5633_v37  ;;  %v5797_v32 = vld [vmem:[#allocation3_spill] sm:$0xff] }
 0x2d9   : > { %v3685_v14 = vpop.eup %3684  ;;  %v2535_v23 = vmul.f32 %v2407_v17, %v2023_v11  ;;  %v2414_v28 = vadd.f32 1.0, %v3683_v50  ;;  %v2031_v25 = vmul.f32 0.5, %v5604_v61  ;;  %3696 = verf.f32 %v2172_v9 }
 0x2da   : > { %3010 = vst [vmem:[%s4901_s14 + $0x110] sm:$0xff] %v3394_v3  ;;  %v2540_v58 = vmul.f32 %v2412_v54, %v2028_v57  ;;  %v2413_v2 = vadd.f32 1.0, %v3685_v14  ;;  %v3687_v47 = vpop.eup %3686  ;;  %v2036_v49 = vmul.f32 0.5, %v1811_v18  ;;  %3698 = verf.f32 %v2174_v20 }
 0x2db   : > { %v3395_v51 = vpack.c.bf16 %v2535_v23, %v2534_v33  ;;  %v2173_v52 = vmul.f32 0.70710677, %v5639_v42  ;;  %v2542_v8 = vmul.f32 %v2414_v28, %v2030_v29  ;;  %v2415_v27 = vadd.f32 1.0, %v3687_v47  ;;  %v5796_v29 = vld [vmem:[#allocation2_spill] sm:$0xff] }
 0x2dc   : > { %v2541_v7 = vmul.f32 %v2413_v2, %v2029_v35  ;;  %v2175_v15 = vmul.f32 0.70710677, %v5644_v1  ;;  %v1821_v11 = vadd.f32 %v5425_v36, %v4860_v34  ;;  %v5656_v61 = vadd.f32 %v5427_v55, %v4864_v5 }
 0x2dd   : > { %v3689_v24 = vpop.eup %3688  ;;  %3011 = vst [vmem:[%s4901_s14 + $0x118] sm:$0xff] %v3395_v51  ;;  %3700 = verf.f32 %v2173_v52  ;;  %v5660_v18 = vadd.f32 %v5431_v62, %v4954_v40  ;;  %v2543_v4 = vmul.f32 %v2415_v27, %v2031_v25  ;;  %v2038_v6 = vmul.f32 0.5, %v5614_v63  ;;  %v5799_v25 = vld [vmem:[#allocation16_spill] sm:$0xff] }
 0x2de   : > { %v3398_v39 = vpack.c.bf16 %v2541_v7, %v2540_v58  ;;  %v2420_v57 = vadd.f32 1.0, %v3689_v24  ;;  %3702 = verf.f32 %v2175_v15  ;;  %v2180_v26 = vmul.f32 0.70710677, %v1821_v11 }
 0x2df   : > { %v3691_v46 = vpop.eup %3690  ;;  %v2182_v43 = vmul.f32 0.70710677, %v5656_v61  ;;  %v3399_v41 = vpack.c.bf16 %v2543_v4, %v2542_v8  ;;  %v2037_v60 = vmul.f32 0.5, %v5618_v30  ;;  %v2181_v44 = vmul.f32 0.70710677, %v5660_v18 }
 0x2e0   : > { %v3693_v36 = vpop.eup %3692  ;;  %3014 = vst [vmem:[%s4901_s14 + $0x130] sm:$0xff] %v3398_v39  ;;  %v2548_v55 = vmul.f32 %v2420_v57, %v2036_v49  ;;  %v2422_v38 = vadd.f32 1.0, %v3691_v46  ;;  %3704 = verf.f32 %v2180_v26  ;;  %v5669_v48 = vadd.f32 %v5433_v10, %v4988_v56 }
 0x2e1   : > { %v2421_v62 = vadd.f32 1.0, %v3693_v36  ;;  %3015 = vst [vmem:[%s4901_s14 + $0x138] sm:$0xff] %v3399_v41  ;;  %v2039_v63 = vmul.f32 0.5, %v1926_v59  ;;  %3706 = verf.f32 %v2182_v43  ;;  %v5674_v35 = vadd.f32 %v5796_v29, %v4860_v34 }
 0x2e2   : > { %v5678_v33 = vadd.f32 %v5797_v32, %v4864_v5  ;;  %v3695_v30 = vpop.eup %3694  ;;  %v2044_v53 = vmul.f32 0.5, %v5629_v16  ;;  %3708 = verf.f32 %v2181_v44  ;;  %v2183_v22 = vmul.f32 0.70710677, %v5669_v48  ;;  %v5798_v16 = vld [vmem:[#allocation15_spill] sm:$0xff] }
 0x2e3   : > { %v2549_v17 = vmul.f32 %v2421_v62, %v2037_v60  ;;  %v3697_v10 = vpop.eup %3696  ;;  %v2550_v50 = vmul.f32 %v2422_v38, %v2038_v6  ;;  %v2423_v59 = vadd.f32 1.0, %v3695_v30  ;;  %v2046_v3 = vmul.f32 0.5, %v5633_v37 }
 0x2e4   : > { %v2188_v54 = vmul.f32 0.70710677, %v5674_v35  ;;  %v3699_v9 = vpop.eup %3698  ;;  %v2428_v14 = vadd.f32 1.0, %v3697_v10  ;;  %3710 = verf.f32 %v2183_v22  ;;  %v2190_v23 = vmul.f32 0.70710677, %v5678_v33  ;;  %v5800_v10 = vld [vmem:[#allocation4_spill] sm:$0xff] }
 0x2e5   : > { %v3402_v21 = vpack.c.bf16 %v2549_v17, %v2548_v55  ;;  %v2551_v28 = vmul.f32 %v2423_v59, %v2039_v63  ;;  %v2430_v20 = vadd.f32 1.0, %v3699_v9  ;;  %v5687_v58 = vadd.f32 %v5798_v16, %v4954_v40  ;;  %v5801_v59 = vld [vmem:[#allocation17_spill] sm:$0xff] }
 0x2e6   : > { %3712 = verf.f32 %v2188_v54  ;;  %v2045_v37 = vmul.f32 0.5, %v5639_v42  ;;  %v5693_v47 = vadd.f32 %v5799_v25, %v4988_v56  ;;  %v5697_v51 = vadd.f32 %v5474_v19, %v4860_v34 }
 0x2e7   : > { %v3701_v2 = vpop.eup %3700  ;;  %3018 = vst [vmem:[%s4901_s14 + $0x150] sm:$0xff] %v3402_v21  ;;  %3714 = verf.f32 %v2190_v23  ;;  %v3403_v52 = vpack.c.bf16 %v2551_v28, %v2550_v50  ;;  %v2556_v8 = vmul.f32 %v2428_v14, %v2044_v53  ;;  %v2047_v27 = vmul.f32 0.5, %v5644_v1 }
 0x2e8   : > { %v3703_v49 = vpop.eup %3702  ;;  %v2429_v7 = vadd.f32 1.0, %v3701_v2  ;;  %v2558_v15 = vmul.f32 %v2430_v20, %v2046_v3  ;;  %v2189_v39 = vmul.f32 0.70710677, %v5687_v58  ;;  %v2191_v42 = vmul.f32 0.70710677, %v5693_v47 }
 0x2e9   : > { %v2431_v24 = vadd.f32 1.0, %v3703_v49  ;;  %3019 = vst [vmem:[%s4901_s14 + $0x158] sm:$0xff] %v3403_v52  ;;  %v2052_v57 = vmul.f32 0.5, %v1821_v11  ;;  %v2196_v46 = vmul.f32 0.70710677, %v5697_v51  ;;  %v5706_v19 = vadd.f32 %v5476_v13, %v4864_v5 }
 0x2ea   : > { %v2557_v4 = vmul.f32 %v2429_v7, %v2045_v37  ;;  %v3705_v6 = vpop.eup %3704  ;;  %3716 = verf.f32 %v2189_v39  ;;  %v5710_v1 = vadd.f32 %v5483_v31, %v4954_v40  ;;  %v5714_v43 = vadd.f32 %v5485_v12, %v4988_v56 }
 0x2eb   : > { %v2559_v26 = vmul.f32 %v2431_v24, %v2047_v27  ;;  %v3707_v36 = vpop.eup %3706  ;;  %v2436_v41 = vadd.f32 1.0, %v3705_v6  ;;  %v2054_v55 = vmul.f32 0.5, %v5656_v61  ;;  %3718 = verf.f32 %v2191_v42 }
 0x2ec   : > { %v3406_v11 = vpack.c.bf16 %v2557_v4, %v2556_v8  ;;  %v3709_v13 = vpop.eup %3708  ;;  %v2438_v60 = vadd.f32 1.0, %v3707_v36  ;;  %3720 = verf.f32 %v2196_v46  ;;  %v2198_v62 = vmul.f32 0.70710677, %v5706_v19 }
 0x2ed   : > { %v3407_v38 = vpack.c.bf16 %v2559_v26, %v2558_v15  ;;  %v2564_v31 = vmul.f32 %v2436_v41, %v2052_v57  ;;  %v2053_v44 = vmul.f32 0.5, %v5660_v18  ;;  %v2437_v63 = vadd.f32 1.0, %v3709_v13 }
 0x2ee   : > { %3022 = vst [vmem:[%s4901_s14 + $0x170] sm:$0xff] %v3406_v11  ;;  %v2197_v12 = vmul.f32 0.70710677, %v5710_v1  ;;  %v3711_v29 = vpop.eup %3710  ;;  %v2566_v32 = vmul.f32 %v2438_v60, %v2054_v55  ;;  %v2055_v30 = vmul.f32 0.5, %v5669_v48  ;;  %3722 = verf.f32 %v2198_v62 }
 0x2ef   : > { %3023 = vst [vmem:[%s4901_s14 + $0x178] sm:$0xff] %v3407_v38  ;;  %v2199_v61 = vmul.f32 0.70710677, %v5714_v43  ;;  %v2565_v53 = vmul.f32 %v2437_v63, %v2053_v44  ;;  %v2439_v22 = vadd.f32 1.0, %v3711_v29  ;;  %v1835_v50 = vadd.f32 %v5800_v10, %v4860_v34 }
 0x2f0   : > { %v3713_v17 = vpop.eup %3712  ;;  %3724 = verf.f32 %v2197_v12  ;;  %v1948_v3 = vadd.f32 %v5801_v59, %v4864_v5  ;;  %v1837_v54 = vadd.f32 %v5496_v0, %v4954_v40  ;;  %v2060_v16 = vmul.f32 0.5, %v5674_v35 }
 0x2f1   : > { %v3715_v18 = vpop.eup %3714  ;;  %3726 = verf.f32 %v2199_v61  ;;  %v3410_v48 = vpack.c.bf16 %v2565_v53, %v2564_v31  ;;  %v2567_v9 = vmul.f32 %v2439_v22, %v2055_v30  ;;  %v2444_v21 = vadd.f32 1.0, %v3713_v17 }
 0x2f2   : > { %v2446_v14 = vadd.f32 1.0, %v3715_v18  ;;  %v2204_v23 = vmul.f32 0.70710677, %v1835_v50  ;;  %v2206_v28 = vmul.f32 0.70710677, %v1948_v3  ;;  %v2062_v37 = vmul.f32 0.5, %v5678_v33 }
 0x2f3   : > { %3026 = vst [vmem:[%s4901_s14 + $0x190] sm:$0xff] %v3410_v48  ;;  %v3411_v20 = vpack.c.bf16 %v2567_v9, %v2566_v32  ;;  %v2205_v34 = vmul.f32 0.70710677, %v1837_v54  ;;  %v2061_v5 = vmul.f32 0.5, %v5687_v58  ;;  %v1950_v40 = vadd.f32 %v5498_v45, %v4988_v56 }
 0x2f4   : > { %v3717_v2 = vpop.eup %3716  ;;  %3728 = verf.f32 %v2204_v23  ;;  %v2572_v25 = vmul.f32 %v2444_v21, %v2060_v16  ;;  %v2063_v52 = vmul.f32 0.5, %v5693_v47  ;;  %v2574_v7 = vmul.f32 %v2446_v14, %v2062_v37 }
 0x2f5   : > { %v3719_v0 = vpop.eup %3718  ;;  %3027 = vst [vmem:[%s4901_s14 + $0x198] sm:$0xff] %v3411_v20  ;;  %v2445_v49 = vadd.f32 1.0, %v3717_v2  ;;  %3730 = verf.f32 %v2206_v28  ;;  %v2207_v27 = vmul.f32 0.70710677, %v1950_v40  ;;  %v2068_v56 = vmul.f32 0.5, %v5697_v51 }
 0x2f6   : > { %v3721_v8 = vpop.eup %3720  ;;  %v2447_v35 = vadd.f32 1.0, %v3719_v0  ;;  %3732 = verf.f32 %v2205_v34  ;;  %v2070_v42 = vmul.f32 0.5, %v5706_v19  ;;  %v2069_v6 = vmul.f32 0.5, %v5710_v1 }
 0x2f7   : > { %v2573_v33 = vmul.f32 %v2445_v49, %v2061_v5  ;;  %v2452_v15 = vadd.f32 1.0, %v3721_v8  ;;  %3734 = verf.f32 %v2207_v27  ;;  %v2071_v11 = vmul.f32 0.5, %v5714_v43 }
 0x2f8   : > { %v3723_v58 = vpop.eup %3722  ;;  %v2575_v24 = vmul.f32 %v2447_v35, %v2063_v52  ;;  %v2076_v62 = vmul.f32 0.5, %v1835_v50  ;;  %v2078_v12 = vmul.f32 0.5, %v1948_v3  ;;  %v2077_v29 = vmul.f32 0.5, %v1837_v54 }
 0x2f9   : > { %v3414_v39 = vpack.c.bf16 %v2573_v33, %v2572_v25  ;;  %v2454_v47 = vadd.f32 1.0, %v3723_v58  ;;  %v2580_v46 = vmul.f32 %v2452_v15, %v2068_v56  ;;  %v2079_v17 = vmul.f32 0.5, %v1950_v40 }
 0x2fa   : > { %v3725_v45 = vpop.eup %3724  ;;  %v3415_v57 = vpack.c.bf16 %v2575_v24, %v2574_v7 }
 0x2fb   : > { %v3727_v4 = vpop.eup %3726  ;;  %v2453_v26 = vadd.f32 1.0, %v3725_v45  ;;  %3030 = vst [vmem:[%s4901_s14 + $0x1b0] sm:$0xff] %v3414_v39  ;;  %v2582_v36 = vmul.f32 %v2454_v47, %v2070_v42 }
 0x2fc   : > { %v2455_v41 = vadd.f32 1.0, %v3727_v4  ;;  %3031 = vst [vmem:[%s4901_s14 + $0x1b8] sm:$0xff] %v3415_v57 }
 0x2fd   : > { %v2581_v51 = vmul.f32 %v2453_v26, %v2069_v6 }
 0x2fe   : > { %v2583_v55 = vmul.f32 %v2455_v41, %v2071_v11  ;;  %v3729_v13 = vpop.eup %3728 }
 0x2ff   : > { %v3418_v38 = vpack.c.bf16 %v2581_v51, %v2580_v46  ;;  %v3731_v19 = vpop.eup %3730  ;;  %v2460_v31 = vadd.f32 1.0, %v3729_v13 }
 0x300   : > { %v3419_v60 = vpack.c.bf16 %v2583_v55, %v2582_v36  ;;  %v3733_v44 = vpop.eup %3732  ;;  %v2462_v1 = vadd.f32 1.0, %v3731_v19 }
 0x301   : > { %3034 = vst [vmem:[%s4901_s14 + $0x1d0] sm:$0xff] %v3418_v38  ;;  %v2588_v63 = vmul.f32 %v2460_v31, %v2076_v62  ;;  %v2461_v43 = vadd.f32 1.0, %v3733_v44  ;;  %v3735_v32 = vpop.eup %3734 }
 0x302   : > { %3035 = vst [vmem:[%s4901_s14 + $0x1d8] sm:$0xff] %v3419_v60  ;;  %v2590_v30 = vmul.f32 %v2462_v1, %v2078_v12  ;;  %v2463_v53 = vadd.f32 1.0, %v3735_v32 }
 0x303   : > { %v2589_v61 = vmul.f32 %v2461_v43, %v2077_v29 }
 0x304   : > { %v2591_v10 = vmul.f32 %v2463_v53, %v2079_v17 }
 0x305   : > { %v3422_v22 = vpack.c.bf16 %v2589_v61, %v2588_v63 }
 0x306   : > { %v3423_v50 = vpack.c.bf16 %v2591_v10, %v2590_v30 }
 0x307   : > { %3038 = vst [vmem:[%s4901_s14 + $0x1f0] sm:$0xff] %v3422_v22 }
 0x308   : > { %3039 = vst [vmem:[%s4901_s14 + $0x1f8] sm:$0xff] %v3423_v50 }
 0x309 PF: > { %s15_s20 = sadd.s32 1, %s3758_s20   ;;  %s5802_s18 = smov %s3754_s19 }
 0x30a   : > { %p12_p5 = scmp.ge.s32.totalorder %s15_s20, 4   ;;  %s5803_s19 = smov %s5805_s21 }
 0x30c   :  { %14 = sbr.rel (!%p12_p5) target bundleno = 2 (0x2), region = 76 }

// kernel: _lambda_.17
= control target key start
LH: loop header
LB: loop body
LE: loop exit
PB: predicated region body
PF: predicated region fallthrough
CT: control target
= control target key end

     0   :  { %s729_s12 = smov 0   ;;  %s1187_s0 = inlined_call_operand.vmem [shape: f32[256,256], index: 0, kind: input, shape index: {}]   ;;  %s1188_s1 = inlined_call_operand.vmem [shape: f32[1,256], index: 1, kind: input, shape index: {}]   ;;  %s1189_s2 = inlined_call_operand.vmem [shape: f32[1,256], index: 2, kind: input, shape index: {}]   ;;  %s1190_s3 = inlined_call_operand.vmem [shape: f32[256,256], index: 3, kind: output, shape index: {}]  }
   0x1 LB: > { %s646_s13 = sadd.s32 4294967295, %s707_s12   ;;  %p650_p0 = scmp.ge.s32.totalorder %s707_s12, 1  ;;  %s707_s12 = sphi %s729_s12, %s13_s12  }
   0x2   : > { %p139_p1 = scmp.lt.s32.totalorder %s707_s12, 3 }
   0x4   : > { %p140_p2 = pnand %p650_p0, %p139_p1 }
   0x5   : > { %s651_s14 = sshll.u32 (!%p140_p2), %s646_s13, 4 }
   0x6   : > { %143 = sbr.rel (%p140_p2) target bundleno = 370 (0x172), region = 32  ;;  %p166_p3 = scmp.lt.s32.totalorder (!%p140_p2), %s651_s14, 31 }
   0xd   : > { %s1192_s14 = smov (!%p166_p3, %s651_s14), 31 }
   0xe   : > { %s659_s15 = sshll.u32 %s1192_s14, 4 }
   0xf   : > { %s745_s18 = scalar_lea.vmem %s1187_s0, %s659_s15  ;;  %s1058_s25 = scalar_lea.vmem %s1190_s3, %s659_s15 }
  0x10   : > { %v748_v0 = vld [vmem:[%s745_s18] sm:$0xff]  ;;  %v751_v1 = vld [vmem:[%s745_s18 + $0x8] sm:$0xff]  ;;  %v762_v5 = vld [vmem:[%s745_s18 + $0x10] sm:$0xff] }
  0x11   : > { %v754_v2 = vld [vmem:[%s745_s18 + $0x20] sm:$0xff]  ;;  %v211_v3 = vadd.f32 %v751_v1, %v748_v0  ;;  %v759_v4 = vld [vmem:[%s745_s18 + $0x28] sm:$0xff]  ;;  %v765_v6 = vld [vmem:[%s745_s18 + $0x18] sm:$0xff] }
  0x12   : > { %v217_v7 = vadd.f32 %v759_v4, %v754_v2  ;;  %v770_v8 = vld [vmem:[%s745_s18 + $0x30] sm:$0xff]  ;;  %v773_v9 = vld [vmem:[%s745_s18 + $0x38] sm:$0xff]  ;;  %v214_v10 = vadd.f32 %v765_v6, %v762_v5  ;;  %v780_v12 = vld [vmem:[%s745_s18 + $0x40] sm:$0xff] }
  0x13   : > { %212 = vadd.xlane.f32.xlu0 %v211_v3  ;;  %v220_v11 = vadd.f32 %v773_v9, %v770_v8  ;;  %v783_v13 = vld [vmem:[%s745_s18 + $0x48] sm:$0xff]  ;;  %v786_v14 = vld [vmem:[%s745_s18 + $0x50] sm:$0xff]  ;;  %v789_v15 = vld [vmem:[%s745_s18 + $0x58] sm:$0xff] }
  0x14   : > { %218 = vadd.xlane.f32.xlu1 %v217_v7  ;;  %v223_v16 = vadd.f32 %v783_v13, %v780_v12  ;;  %v226_v17 = vadd.f32 %v789_v15, %v786_v14  ;;  %v796_v18 = vld [vmem:[%s745_s18 + $0x60] sm:$0xff]  ;;  %v799_v19 = vld [vmem:[%s745_s18 + $0x68] sm:$0xff]  ;;  %v802_v20 = vld [vmem:[%s745_s18 + $0x70] sm:$0xff] }
  0x15   : > { %v805_v21 = vld [vmem:[%s745_s18 + $0x78] sm:$0xff]  ;;  %v229_v22 = vadd.f32 %v799_v19, %v796_v18  ;;  %v812_v24 = vld [vmem:[%s745_s18 + $0x80] sm:$0xff]  ;;  %v815_v25 = vld [vmem:[%s745_s18 + $0x88] sm:$0xff] }
  0x16   : > { %v232_v23 = vadd.f32 %v805_v21, %v802_v20  ;;  %v818_v26 = vld [vmem:[%s745_s18 + $0x90] sm:$0xff]  ;;  %v821_v27 = vld [vmem:[%s745_s18 + $0x98] sm:$0xff]  ;;  %v235_v28 = vadd.f32 %v815_v25, %v812_v24  ;;  %v828_v30 = vld [vmem:[%s745_s18 + $0xa0] sm:$0xff] }
  0x17   : > { %215 = vadd.xlane.f32.xlu0 %v214_v10  ;;  %v238_v29 = vadd.f32 %v821_v27, %v818_v26  ;;  %v831_v31 = vld [vmem:[%s745_s18 + $0xa8] sm:$0xff]  ;;  %v834_v32 = vld [vmem:[%s745_s18 + $0xb0] sm:$0xff]  ;;  %v837_v33 = vld [vmem:[%s745_s18 + $0xb8] sm:$0xff] }
  0x18   : > { %221 = vadd.xlane.f32.xlu1 %v220_v11  ;;  %v241_v34 = vadd.f32 %v831_v31, %v828_v30  ;;  %v244_v35 = vadd.f32 %v837_v33, %v834_v32  ;;  %v844_v36 = vld [vmem:[%s745_s18 + $0xc0] sm:$0xff]  ;;  %v847_v37 = vld [vmem:[%s745_s18 + $0xc8] sm:$0xff]  ;;  %v850_v38 = vld [vmem:[%s745_s18 + $0xd0] sm:$0xff] }
  0x19   : > { %v853_v39 = vld [vmem:[%s745_s18 + $0xd8] sm:$0xff]  ;;  %v247_v40 = vadd.f32 %v847_v37, %v844_v36  ;;  %v860_v42 = vld [vmem:[%s745_s18 + $0xe0] sm:$0xff]  ;;  %v863_v43 = vld [vmem:[%s745_s18 + $0xe8] sm:$0xff] }
  0x1a   : > { %v250_v41 = vadd.f32 %v853_v39, %v850_v38  ;;  %v866_v44 = vld [vmem:[%s745_s18 + $0xf0] sm:$0xff]  ;;  %v869_v45 = vld [vmem:[%s745_s18 + $0xf8] sm:$0xff]  ;;  %v253_v46 = vadd.f32 %v863_v43, %v860_v42 }
  0x1b   : > { %224 = vadd.xlane.f32.xlu0 %v223_v16  ;;  %v256_v47 = vadd.f32 %v869_v45, %v866_v44 }
  0x1c   : > { %227 = vadd.xlane.f32.xlu1 %v226_v17 }
  0x1f   : > { %230 = vadd.xlane.f32.xlu0 %v229_v22 }
  0x20   : > { %233 = vadd.xlane.f32.xlu1 %v232_v23 }
  0x23   : > { %236 = vadd.xlane.f32.xlu0 %v235_v28 }
  0x24   : > { %239 = vadd.xlane.f32.xlu1 %v238_v29 }
  0x27   : > { %242 = vadd.xlane.f32.xlu0 %v241_v34 }
  0x28   : > { %245 = vadd.xlane.f32.xlu1 %v244_v35 }
  0x2b   : > { %248 = vadd.xlane.f32.xlu0 %v247_v40 }
  0x2c   : > { %251 = vadd.xlane.f32.xlu1 %v250_v41 }
  0x2f   : > { %254 = vadd.xlane.f32.xlu0 %v253_v46 }
  0x30   : > { %257 = vadd.xlane.f32.xlu1 %v256_v47 }
  0xa0   : > { %v213_v48 = vpop.xlane.xlu0 %212 }
  0xa1   : > { %v260_v49 = vmul.f32 0.00390625, %v213_v48  ;;  %v219_v50 = vpop.xlane.xlu1 %218 }
  0xa2   : > { %v262_v51 = vmul.f32 0.00390625, %v219_v50 }
  0xa3   : > { %v876_v52 = vsub.f32 %v748_v0, %v260_v49  ;;  %v879_v53 = vsub.f32 %v751_v1, %v260_v49 }
  0xa4   : > { %v882_v54 = vsub.f32 %v754_v2, %v262_v51  ;;  %v885_v55 = vsub.f32 %v759_v4, %v262_v51  ;;  %v216_v56 = vpop.xlane.xlu0 %215 }
  0xa5   : > { %v261_v57 = vmul.f32 0.00390625, %v216_v56  ;;  %v222_v58 = vpop.xlane.xlu1 %221  ;;  %v308_v59 = vmul.f32 %v876_v52, %v876_v52  ;;  %v309_v60 = vmul.f32 %v879_v53, %v879_v53 }
  0xa6   : > { %v263_v61 = vmul.f32 0.00390625, %v222_v58  ;;  %v312_v62 = vmul.f32 %v882_v54, %v882_v54  ;;  %v313_v63 = vmul.f32 %v885_v55, %v885_v55 }
  0xa7   : > { %v896_v0 = vsub.f32 %v762_v5, %v261_v57  ;;  %v899_v1 = vsub.f32 %v765_v6, %v261_v57  ;;  %v340_v2 = vadd.f32 %v309_v60, %v308_v59 }
  0xa8   : > { %v902_v3 = vsub.f32 %v770_v8, %v263_v61  ;;  %v905_v4 = vsub.f32 %v773_v9, %v263_v61  ;;  %v225_v7 = vpop.xlane.xlu0 %224  ;;  %v346_v16 = vadd.f32 %v313_v63, %v312_v62 }
  0xa9   : > { %v264_v10 = vmul.f32 0.00390625, %v225_v7  ;;  %341 = vadd.xlane.f32.xlu0 %v340_v2  ;;  %v228_v11 = vpop.xlane.xlu1 %227  ;;  %v310_v17 = vmul.f32 %v896_v0, %v896_v0  ;;  %v311_v5 = vmul.f32 %v899_v1, %v899_v1 }
  0xaa   : > { %v265_v6 = vmul.f32 0.00390625, %v228_v11  ;;  %v314_v22 = vmul.f32 %v902_v3, %v902_v3  ;;  %v315_v8 = vmul.f32 %v905_v4, %v905_v4 }
  0xab   : > { %v916_v9 = vsub.f32 %v780_v12, %v264_v10  ;;  %v919_v23 = vsub.f32 %v783_v13, %v264_v10  ;;  %v343_v28 = vadd.f32 %v311_v5, %v310_v17 }
  0xac   : > { %v922_v29 = vsub.f32 %v786_v14, %v265_v6  ;;  %v925_v34 = vsub.f32 %v789_v15, %v265_v6  ;;  %v231_v35 = vpop.xlane.xlu0 %230  ;;  %v349_v46 = vadd.f32 %v315_v8, %v314_v22 }
  0xad   : > { %v266_v40 = vmul.f32 0.00390625, %v231_v35  ;;  %347 = vadd.xlane.f32.xlu0 %v346_v16  ;;  %344 = vadd.xlane.f32.xlu1 %v343_v28  ;;  %v234_v41 = vpop.xlane.xlu1 %233  ;;  %v316_v12 = vmul.f32 %v916_v9, %v916_v9  ;;  %v317_v13 = vmul.f32 %v919_v23, %v919_v23 }
  0xae   : > { %v267_v47 = vmul.f32 0.00390625, %v234_v41  ;;  %v318_v14 = vmul.f32 %v922_v29, %v922_v29  ;;  %v319_v15 = vmul.f32 %v925_v34, %v925_v34 }
  0xaf   : > { %v936_v48 = vsub.f32 %v796_v18, %v266_v40  ;;  %v939_v49 = vsub.f32 %v799_v19, %v266_v40  ;;  %v352_v50 = vadd.f32 %v317_v13, %v316_v12 }
  0xb0   : > { %v942_v51 = vsub.f32 %v802_v20, %v267_v47  ;;  %v945_v56 = vsub.f32 %v805_v21, %v267_v47  ;;  %v237_v57 = vpop.xlane.xlu0 %236  ;;  %v355_v60 = vadd.f32 %v319_v15, %v318_v14 }
  0xb1   : > { %v268_v58 = vmul.f32 0.00390625, %v237_v57  ;;  %350 = vadd.xlane.f32.xlu1 %v349_v46  ;;  %353 = vadd.xlane.f32.xlu0 %v352_v50  ;;  %v240_v59 = vpop.xlane.xlu1 %239  ;;  %v320_v18 = vmul.f32 %v936_v48, %v936_v48  ;;  %v321_v19 = vmul.f32 %v939_v49, %v939_v49 }
  0xb2   : > { %v269_v61 = vmul.f32 0.00390625, %v240_v59  ;;  %v322_v20 = vmul.f32 %v942_v51, %v942_v51  ;;  %v323_v21 = vmul.f32 %v945_v56, %v945_v56 }
  0xb3   : > { %v956_v62 = vsub.f32 %v812_v24, %v268_v58  ;;  %v959_v63 = vsub.f32 %v815_v25, %v268_v58  ;;  %v358_v2 = vadd.f32 %v321_v19, %v320_v18 }
  0xb4   : > { %v962_v7 = vsub.f32 %v818_v26, %v269_v61  ;;  %v965_v10 = vsub.f32 %v821_v27, %v269_v61  ;;  %v243_v11 = vpop.xlane.xlu0 %242  ;;  %v361_v5 = vadd.f32 %v323_v21, %v322_v20 }
  0xb5   : > { %v270_v16 = vmul.f32 0.00390625, %v243_v11  ;;  %356 = vadd.xlane.f32.xlu1 %v355_v60  ;;  %359 = vadd.xlane.f32.xlu0 %v358_v2  ;;  %v246_v17 = vpop.xlane.xlu1 %245  ;;  %v324_v24 = vmul.f32 %v956_v62, %v956_v62  ;;  %v325_v25 = vmul.f32 %v959_v63, %v959_v63 }
  0xb6   : > { %v271_v6 = vmul.f32 0.00390625, %v246_v17  ;;  %v326_v26 = vmul.f32 %v962_v7, %v962_v7  ;;  %v327_v27 = vmul.f32 %v965_v10, %v965_v10 }
  0xb7   : > { %v976_v22 = vsub.f32 %v828_v30, %v270_v16  ;;  %v979_v8 = vsub.f32 %v831_v31, %v270_v16  ;;  %v364_v28 = vadd.f32 %v325_v25, %v324_v24 }
  0xb8   : > { %v982_v35 = vsub.f32 %v834_v32, %v271_v6  ;;  %v985_v40 = vsub.f32 %v837_v33, %v271_v6  ;;  %v249_v41 = vpop.xlane.xlu0 %248  ;;  %v367_v13 = vadd.f32 %v327_v27, %v326_v26  ;;  %v470_v26 = vlaneseq }
  0xb9   : > { %v272_v46 = vmul.f32 0.00390625, %v249_v41  ;;  %362 = vadd.xlane.f32.xlu1 %v361_v5  ;;  %365 = vadd.xlane.f32.xlu0 %v364_v28  ;;  %v252_v12 = vpop.xlane.xlu1 %251  ;;  %v328_v30 = vmul.f32 %v976_v22, %v976_v22  ;;  %v329_v31 = vmul.f32 %v979_v8, %v979_v8 }
  0xba   : > { %v273_v47 = vmul.f32 0.00390625, %v252_v12  ;;  %v330_v32 = vmul.f32 %v982_v35, %v982_v35  ;;  %v331_v33 = vmul.f32 %v985_v40, %v985_v40 }
  0xbb   : > { %v996_v14 = vsub.f32 %v844_v36, %v272_v46  ;;  %v999_v15 = vsub.f32 %v847_v37, %v272_v46  ;;  %v370_v50 = vadd.f32 %v329_v31, %v328_v30 }
  0xbc   : > { %v1002_v57 = vsub.f32 %v850_v38, %v273_v47  ;;  %v1005_v58 = vsub.f32 %v853_v39, %v273_v47  ;;  %v255_v59 = vpop.xlane.xlu0 %254  ;;  %v373_v19 = vadd.f32 %v331_v33, %v330_v32 }
  0xbd   : > { %v274_v60 = vmul.f32 0.00390625, %v255_v59  ;;  %368 = vadd.xlane.f32.xlu1 %v367_v13  ;;  %371 = vadd.xlane.f32.xlu0 %v370_v50  ;;  %v258_v18 = vpop.xlane.xlu1 %257  ;;  %v332_v36 = vmul.f32 %v996_v14, %v996_v14  ;;  %v333_v37 = vmul.f32 %v999_v15, %v999_v15  ;;  %v471_v13 = vshrl.u32 %v470_v26, 7 }
  0xbe   : > { %v275_v61 = vmul.f32 0.00390625, %v258_v18  ;;  %v334_v38 = vmul.f32 %v1002_v57, %v1002_v57  ;;  %v335_v39 = vmul.f32 %v1005_v58, %v1005_v58  ;;  %v468_v18 = vld [vmem:[%s1188_s1] sm:$0x3] }
  0xbf   : > { %v1016_v20 = vsub.f32 %v860_v42, %v274_v60  ;;  %v1019_v21 = vsub.f32 %v863_v43, %v274_v60  ;;  %v376_v2 = vadd.f32 %v333_v37, %v332_v36  ;;  %v472_v59 = vsub.s32 0, %v471_v13 }
  0xc0   : > { %v1022_v11 = vsub.f32 %v866_v44, %v275_v61  ;;  %v1025_v16 = vsub.f32 %v869_v45, %v275_v61  ;;  %v379_v17 = vadd.f32 %v335_v39, %v334_v38  ;;  %v476_v60 = vsub.s32 1, %v471_v13  ;;  %v512_v38 = vld [vmem:[%s1189_s2] sm:$0x3] }
  0xc1   : > { %374 = vadd.xlane.f32.xlu1 %v373_v19  ;;  %377 = vadd.xlane.f32.xlu0 %v376_v2  ;;  %v336_v5 = vmul.f32 %v1016_v20, %v1016_v20  ;;  %v337_v42 = vmul.f32 %v1019_v21, %v1019_v21 }
  0xc2   : > { %v338_v43 = vmul.f32 %v1022_v11, %v1022_v11  ;;  %v339_v24 = vmul.f32 %v1025_v16, %v1025_v16 }
  0xc3   : > { %v382_v44 = vadd.f32 %v337_v42, %v336_v5  ;;  %v1043_v5 = vrot.slane %v468_v18, %v476_v60 }
  0xc4   : > { %v385_v45 = vadd.f32 %v339_v24, %v338_v43 }
  0xc5   : > { %380 = vadd.xlane.f32.xlu1 %v379_v17  ;;  %383 = vadd.xlane.f32.xlu0 %v382_v44  ;;  %v1041_v17 = vrot.slane %v468_v18, %v472_v59  ;;  %v1045_v44 = vrot.slane %v512_v38, %v472_v59 }
  0xc9   : > { %386 = vadd.xlane.f32.xlu1 %v385_v45  ;;  %v1047_v45 = vrot.slane %v512_v38, %v476_v60 }
 0x136   : > { %v342_v25 = vpop.xlane.xlu0 %341 }
 0x137   : > { %v388_v6 = vmul.f32 0.00390625, %v342_v25 }
 0x139   : > { %v404_v27 = vadd.f32 1e-05, %v388_v6 }
 0x13a   : > { %v345_v28 = vpop.xlane.xlu1 %344  ;;  %v348_v41 = vpop.xlane.xlu0 %347 }
 0x13b   : > { %669 = vrsqrt.f32 %v404_v27  ;;  %v389_v46 = vmul.f32 0.00390625, %v345_v28  ;;  %v390_v12 = vmul.f32 0.00390625, %v348_v41 }
 0x13d   : > { %v405_v30 = vadd.f32 1e-05, %v389_v46  ;;  %v406_v31 = vadd.f32 1e-05, %v390_v12 }
 0x13e   : > { %v351_v47 = vpop.xlane.xlu1 %350  ;;  %v354_v32 = vpop.xlane.xlu0 %353 }
 0x13f   : > { %671 = vrsqrt.f32 %v405_v30  ;;  %v391_v33 = vmul.f32 0.00390625, %v351_v47  ;;  %v392_v50 = vmul.f32 0.00390625, %v354_v32 }
 0x140   : > { %673 = vrsqrt.f32 %v406_v31 }
 0x141   : > { %v407_v19 = vadd.f32 1e-05, %v391_v33  ;;  %v408_v36 = vadd.f32 1e-05, %v392_v50 }
 0x142   : > { %v357_v37 = vpop.xlane.xlu1 %356  ;;  %v360_v61 = vpop.xlane.xlu0 %359 }
 0x143   : > { %675 = vrsqrt.f32 %v407_v19  ;;  %v393_v39 = vmul.f32 0.00390625, %v357_v37  ;;  %v394_v2 = vmul.f32 0.00390625, %v360_v61 }
 0x144   : > { %677 = vrsqrt.f32 %v408_v36 }
 0x145   : > { %v670_v42 = vpop.eup %669  ;;  %v409_v43 = vadd.f32 1e-05, %v393_v39  ;;  %v410_v24 = vadd.f32 1e-05, %v394_v2 }
 0x146   : > { %v436_v25 = vmul.f32 %v670_v42, %v876_v52  ;;  %v437_v6 = vmul.f32 %v670_v42, %v879_v53  ;;  %v363_v26 = vpop.xlane.xlu1 %362  ;;  %v366_v27 = vpop.xlane.xlu0 %365 }
 0x147   : > { %679 = vrsqrt.f32 %v409_v43  ;;  %v395_v28 = vmul.f32 0.00390625, %v363_v26  ;;  %v396_v41 = vmul.f32 0.00390625, %v366_v27 }
 0x148   : > { %v480_v46 = vmul.f32 %v1041_v17, %v436_v25  ;;  %v481_v12 = vmul.f32 %v1043_v5, %v437_v6  ;;  %681 = vrsqrt.f32 %v410_v24 }
 0x149   : > { %v672_v13 = vpop.eup %671  ;;  %v411_v52 = vadd.f32 1e-05, %v395_v28  ;;  %v412_v53 = vadd.f32 1e-05, %v396_v41 }
 0x14a   : > { %v674_v30 = vpop.eup %673  ;;  %v524_v31 = vadd.f32 %v1045_v44, %v480_v46  ;;  %v525_v47 = vadd.f32 %v1047_v45, %v481_v12  ;;  %v438_v32 = vmul.f32 %v672_v13, %v896_v0  ;;  %v439_v33 = vmul.f32 %v672_v13, %v899_v1  ;;  %v369_v50 = vpop.xlane.xlu1 %368 }
 0x14b   : > { %v372_v59 = vpop.xlane.xlu0 %371  ;;  %v440_v60 = vmul.f32 %v674_v30, %v882_v54  ;;  %v441_v18 = vmul.f32 %v674_v30, %v885_v55  ;;  %683 = vrsqrt.f32 %v411_v52  ;;  %v397_v19 = vmul.f32 0.00390625, %v369_v50 }
 0x14c   : > { %556 = vst [vmem:[%s1058_s25] sm:$0xff] %v524_v31  ;;  %557 = vst [vmem:[%s1058_s25 + $0x8] sm:$0xff] %v525_v47  ;;  %v482_v36 = vmul.f32 %v1041_v17, %v438_v32  ;;  %v483_v37 = vmul.f32 %v1043_v5, %v439_v33  ;;  %685 = vrsqrt.f32 %v412_v53  ;;  %v398_v61 = vmul.f32 0.00390625, %v372_v59 }
 0x14d   : > { %v676_v0 = vpop.eup %675  ;;  %v484_v1 = vmul.f32 %v1041_v17, %v440_v60  ;;  %v485_v38 = vmul.f32 %v1043_v5, %v441_v18  ;;  %v413_v54 = vadd.f32 1e-05, %v397_v19 }
 0x14e   : > { %v678_v39 = vpop.eup %677  ;;  %v526_v55 = vadd.f32 %v1045_v44, %v482_v36  ;;  %v527_v2 = vadd.f32 %v1047_v45, %v483_v37  ;;  %v442_v42 = vmul.f32 %v676_v0, %v902_v3  ;;  %v443_v43 = vmul.f32 %v676_v0, %v905_v4  ;;  %v375_v24 = vpop.xlane.xlu1 %374 }
 0x14f   : > { %v378_v25 = vpop.xlane.xlu0 %377  ;;  %v528_v6 = vadd.f32 %v1045_v44, %v484_v1  ;;  %v529_v26 = vadd.f32 %v1047_v45, %v485_v38  ;;  %v444_v27 = vmul.f32 %v678_v39, %v916_v9  ;;  %v445_v28 = vmul.f32 %v678_v39, %v919_v23 }
 0x150   : > { %558 = vst [vmem:[%s1058_s25 + $0x10] sm:$0xff] %v526_v55  ;;  %559 = vst [vmem:[%s1058_s25 + $0x18] sm:$0xff] %v527_v2  ;;  %v486_v41 = vmul.f32 %v1041_v17, %v442_v42  ;;  %v487_v46 = vmul.f32 %v1043_v5, %v443_v43  ;;  %687 = vrsqrt.f32 %v413_v54  ;;  %v414_v3 = vadd.f32 1e-05, %v398_v61 }
 0x151   : > { %v680_v12 = vpop.eup %679  ;;  %560 = vst [vmem:[%s1058_s25 + $0x20] sm:$0xff] %v528_v6  ;;  %561 = vst [vmem:[%s1058_s25 + $0x28] sm:$0xff] %v529_v26  ;;  %v488_v4 = vmul.f32 %v1041_v17, %v444_v27  ;;  %v489_v13 = vmul.f32 %v1043_v5, %v445_v28  ;;  %v399_v9 = vmul.f32 0.00390625, %v375_v24  ;;  %v400_v52 = vmul.f32 0.00390625, %v378_v25 }
 0x152   : > { %v682_v23 = vpop.eup %681  ;;  %v530_v53 = vadd.f32 %v1045_v44, %v486_v41  ;;  %v531_v30 = vadd.f32 %v1047_v45, %v487_v46  ;;  %v446_v31 = vmul.f32 %v680_v12, %v922_v29  ;;  %v447_v47 = vmul.f32 %v680_v12, %v925_v34  ;;  %v381_v32 = vpop.xlane.xlu1 %380 }
 0x153   : > { %v532_v33 = vadd.f32 %v1045_v44, %v488_v4  ;;  %v533_v50 = vadd.f32 %v1047_v45, %v489_v13  ;;  %v448_v59 = vmul.f32 %v682_v23, %v936_v48  ;;  %v449_v60 = vmul.f32 %v682_v23, %v939_v49  ;;  %v384_v39 = vpop.xlane.xlu0 %383 }
 0x154   : > { %562 = vst [vmem:[%s1058_s25 + $0x30] sm:$0xff] %v530_v53  ;;  %563 = vst [vmem:[%s1058_s25 + $0x38] sm:$0xff] %v531_v30  ;;  %v490_v18 = vmul.f32 %v1041_v17, %v446_v31  ;;  %v491_v19 = vmul.f32 %v1043_v5, %v447_v47  ;;  %689 = vrsqrt.f32 %v414_v3  ;;  %v415_v36 = vadd.f32 1e-05, %v399_v9 }
 0x155   : > { %v684_v29 = vpop.eup %683  ;;  %564 = vst [vmem:[%s1058_s25 + $0x40] sm:$0xff] %v532_v33  ;;  %565 = vst [vmem:[%s1058_s25 + $0x48] sm:$0xff] %v533_v50  ;;  %v492_v34 = vmul.f32 %v1041_v17, %v448_v59  ;;  %v493_v37 = vmul.f32 %v1043_v5, %v449_v60  ;;  %v416_v48 = vadd.f32 1e-05, %v400_v52  ;;  %v401_v61 = vmul.f32 0.00390625, %v381_v32 }
 0x156   : > { %v686_v49 = vpop.eup %685  ;;  %v534_v0 = vadd.f32 %v1045_v44, %v490_v18  ;;  %v535_v1 = vadd.f32 %v1047_v45, %v491_v19  ;;  %v450_v38 = vmul.f32 %v684_v29, %v942_v51  ;;  %v451_v54 = vmul.f32 %v684_v29, %v945_v56  ;;  %v387_v24 = vpop.xlane.xlu1 %386 }
 0x157   : > { %v536_v55 = vadd.f32 %v1045_v44, %v492_v34  ;;  %v537_v2 = vadd.f32 %v1047_v45, %v493_v37  ;;  %v452_v42 = vmul.f32 %v686_v49, %v956_v62  ;;  %v453_v43 = vmul.f32 %v686_v49, %v959_v63 }
 0x158   : > { %566 = vst [vmem:[%s1058_s25 + $0x50] sm:$0xff] %v534_v0  ;;  %567 = vst [vmem:[%s1058_s25 + $0x58] sm:$0xff] %v535_v1  ;;  %v494_v25 = vmul.f32 %v1041_v17, %v450_v38  ;;  %v495_v6 = vmul.f32 %v1043_v5, %v451_v54  ;;  %691 = vrsqrt.f32 %v415_v36  ;;  %v417_v51 = vadd.f32 1e-05, %v401_v61 }
 0x159   : > { %568 = vst [vmem:[%s1058_s25 + $0x60] sm:$0xff] %v536_v55  ;;  %569 = vst [vmem:[%s1058_s25 + $0x68] sm:$0xff] %v537_v2  ;;  %v496_v56 = vmul.f32 %v1041_v17, %v452_v42  ;;  %v497_v26 = vmul.f32 %v1043_v5, %v453_v43  ;;  %693 = vrsqrt.f32 %v416_v48  ;;  %v402_v62 = vmul.f32 0.00390625, %v384_v39 }
 0x15a   : > { %v688_v63 = vpop.eup %687  ;;  %v538_v27 = vadd.f32 %v1045_v44, %v494_v25  ;;  %v539_v28 = vadd.f32 %v1047_v45, %v495_v6  ;;  %695 = vrsqrt.f32 %v417_v51  ;;  %v403_v41 = vmul.f32 0.00390625, %v387_v24 }
 0x15b   : > { %v540_v46 = vadd.f32 %v1045_v44, %v496_v56  ;;  %v541_v3 = vadd.f32 %v1047_v45, %v497_v26  ;;  %v454_v12 = vmul.f32 %v688_v63, %v962_v7  ;;  %v455_v4 = vmul.f32 %v688_v63, %v965_v10 }
 0x15c   : > { %570 = vst [vmem:[%s1058_s25 + $0x70] sm:$0xff] %v538_v27  ;;  %571 = vst [vmem:[%s1058_s25 + $0x78] sm:$0xff] %v539_v28  ;;  %v418_v13 = vadd.f32 1e-05, %v402_v62  ;;  %v419_v9 = vadd.f32 1e-05, %v403_v41 }
 0x15d   : > { %572 = vst [vmem:[%s1058_s25 + $0x80] sm:$0xff] %v540_v46  ;;  %573 = vst [vmem:[%s1058_s25 + $0x88] sm:$0xff] %v541_v3  ;;  %v498_v52 = vmul.f32 %v1041_v17, %v454_v12  ;;  %v499_v23 = vmul.f32 %v1043_v5, %v455_v4 }
 0x15e   : > { %v690_v53 = vpop.eup %689  ;;  %697 = vrsqrt.f32 %v418_v13 }
 0x15f   : > { %v542_v30 = vadd.f32 %v1045_v44, %v498_v52  ;;  %v543_v7 = vadd.f32 %v1047_v45, %v499_v23  ;;  %v456_v10 = vmul.f32 %v690_v53, %v976_v22  ;;  %v457_v31 = vmul.f32 %v690_v53, %v979_v8 }
 0x160   : > { %699 = vrsqrt.f32 %v419_v9 }
 0x161   : > { %574 = vst [vmem:[%s1058_s25 + $0x90] sm:$0xff] %v542_v30  ;;  %575 = vst [vmem:[%s1058_s25 + $0x98] sm:$0xff] %v543_v7  ;;  %v500_v47 = vmul.f32 %v1041_v17, %v456_v10  ;;  %v501_v32 = vmul.f32 %v1043_v5, %v457_v31 }
 0x162   : > { %v692_v33 = vpop.eup %691 }
 0x163   : > { %v694_v50 = vpop.eup %693  ;;  %v544_v59 = vadd.f32 %v1045_v44, %v500_v47  ;;  %v545_v60 = vadd.f32 %v1047_v45, %v501_v32  ;;  %v458_v18 = vmul.f32 %v692_v33, %v982_v35  ;;  %v459_v22 = vmul.f32 %v692_v33, %v985_v40 }
 0x164   : > { %v696_v19 = vpop.eup %695  ;;  %v460_v8 = vmul.f32 %v694_v50, %v996_v14  ;;  %v461_v36 = vmul.f32 %v694_v50, %v999_v15 }
 0x165   : > { %576 = vst [vmem:[%s1058_s25 + $0xa0] sm:$0xff] %v544_v59  ;;  %577 = vst [vmem:[%s1058_s25 + $0xa8] sm:$0xff] %v545_v60  ;;  %v502_v29 = vmul.f32 %v1041_v17, %v458_v18  ;;  %v503_v34 = vmul.f32 %v1043_v5, %v459_v22  ;;  %v462_v37 = vmul.f32 %v696_v19, %v1002_v57 }
 0x166   : > { %v463_v48 = vmul.f32 %v696_v19, %v1005_v58  ;;  %v504_v35 = vmul.f32 %v1041_v17, %v460_v8  ;;  %v505_v40 = vmul.f32 %v1043_v5, %v461_v36 }
 0x167   : > { %v546_v14 = vadd.f32 %v1045_v44, %v502_v29  ;;  %v547_v15 = vadd.f32 %v1047_v45, %v503_v34  ;;  %v506_v61 = vmul.f32 %v1041_v17, %v462_v37 }
 0x168   : > { %v507_v49 = vmul.f32 %v1043_v5, %v463_v48  ;;  %v698_v0 = vpop.eup %697  ;;  %v548_v57 = vadd.f32 %v1045_v44, %v504_v35  ;;  %v549_v58 = vadd.f32 %v1047_v45, %v505_v40 }
 0x169   : > { %578 = vst [vmem:[%s1058_s25 + $0xb0] sm:$0xff] %v546_v14  ;;  %579 = vst [vmem:[%s1058_s25 + $0xb8] sm:$0xff] %v547_v15  ;;  %v550_v1 = vadd.f32 %v1045_v44, %v506_v61  ;;  %v464_v54 = vmul.f32 %v698_v0, %v1016_v20  ;;  %v465_v39 = vmul.f32 %v698_v0, %v1019_v21 }
 0x16a   : > { %v551_v38 = vadd.f32 %v1047_v45, %v507_v49  ;;  %v700_v55 = vpop.eup %699  ;;  %580 = vst [vmem:[%s1058_s25 + $0xc0] sm:$0xff] %v548_v57  ;;  %581 = vst [vmem:[%s1058_s25 + $0xc8] sm:$0xff] %v549_v58 }
 0x16b   : > { %582 = vst [vmem:[%s1058_s25 + $0xd0] sm:$0xff] %v550_v1  ;;  %v508_v2 = vmul.f32 %v1041_v17, %v464_v54  ;;  %v509_v42 = vmul.f32 %v1043_v5, %v465_v39  ;;  %v466_v43 = vmul.f32 %v700_v55, %v1022_v11  ;;  %v467_v24 = vmul.f32 %v700_v55, %v1025_v16 }
 0x16c   : > { %583 = vst [vmem:[%s1058_s25 + $0xd8] sm:$0xff] %v551_v38 }
 0x16d   : > { %v552_v20 = vadd.f32 %v1045_v44, %v508_v2  ;;  %v553_v25 = vadd.f32 %v1047_v45, %v509_v42  ;;  %v510_v21 = vmul.f32 %v1041_v17, %v466_v43  ;;  %v511_v6 = vmul.f32 %v1043_v5, %v467_v24 }
 0x16f   : > { %584 = vst [vmem:[%s1058_s25 + $0xe0] sm:$0xff] %v552_v20  ;;  %585 = vst [vmem:[%s1058_s25 + $0xe8] sm:$0xff] %v553_v25  ;;  %v554_v51 = vadd.f32 %v1045_v44, %v510_v21  ;;  %v555_v56 = vadd.f32 %v1047_v45, %v511_v6 }
 0x171   : > { %586 = vst [vmem:[%s1058_s25 + $0xf0] sm:$0xff] %v554_v51  ;;  %587 = vst [vmem:[%s1058_s25 + $0xf8] sm:$0xff] %v555_v56 }
 0x172 PF: > { %s13_s12 = sadd.s32 1, %s707_s12  }
 0x173   : > { %p10_p4 = scmp.ge.s32.totalorder %s13_s12, 4  }
 0x175   :  { %12 = sbr.rel (!%p10_p4) target bundleno = 1 (0x1), region = 62 }

</bundles_post_ra>
